<compile_context>
chip_gen: v7x
topology: tpu7x:2x2x1
jax: 0.10.0
libtpu: 0.0.40
codegen_flags: <defaults>
</compile_context>

<pallas_src>
import jax
import jax.numpy as jnp
from jax.experimental import pallas as pl
from jax.experimental.pallas import tpu as pltpu

BN_EPS = 1e-5
NORM_EPS = 1e-12  # F.normalize default eps


def _round_up(v, m):
    return (v + m - 1) // m * m


# ----------------------------------------------------------------------------
# Pallas kernels
# ----------------------------------------------------------------------------
def _make_conv3x3_kernel(OH, OW, apply_relu, has_residual):
    """Implicit-GEMM 3x3 stride-1 pad-1 conv, fused BN-shift/residual/ReLU.

    x_ref:     (1, OH+2, OW+2, Cin)  bf16 (spatially pre-padded input)
    w_ref:     (9, Cin, Cout)        bf16 (BN scale folded in)
    shift_ref: (1, Cout)             f32
    res_ref:   (1, OH, OW, Cout)     bf16 (optional residual)
    o_ref:     (1, OH, OW, Cout)     bf16
    """
    def kernel(*refs):
        if has_residual:
            x_ref, w_ref, shift_ref, res_ref, o_ref = refs
        else:
            x_ref, w_ref, shift_ref, o_ref = refs
        cout = w_ref.shape[-1]
        xv = x_ref[0]                                        # (OH+2, OW+2, Cin)
        acc = jnp.zeros((OH * OW, cout), jnp.float32)
        for ky in range(3):                                  # 9 MXU taps, f32 acc
            for kx in range(3):
                xs = xv[ky:ky + OH, kx:kx + OW, :]           # (OH, OW, Cin)
                a2 = xs.reshape(OH * OW, xs.shape[-1])
                acc = acc + jnp.dot(a2, w_ref[ky * 3 + kx],
                                    preferred_element_type=jnp.float32)
        y = acc + shift_ref[...]
        if has_residual:
            y = y + res_ref[0].reshape(OH * OW, cout).astype(jnp.float32)
        if apply_relu:
            y = jnp.maximum(y, 0.0)
        o_ref[0] = y.reshape(OH, OW, cout).astype(o_ref.dtype)
    return kernel


def _make_matmul_kernel(n_cols, relu_cols):
    """im2col matmul: out = (A @ W + shift), ReLU on the first `relu_cols` lanes."""
    def kernel(a_ref, w_ref, shift_ref, o_ref):
        acc = jnp.dot(a_ref[...], w_ref[...], preferred_element_type=jnp.float32)
        y = acc + shift_ref[...]
        if relu_cols >= n_cols:
            y = jnp.maximum(y, 0.0)
        elif relu_cols > 0:
            lane = jax.lax.broadcasted_iota(jnp.int32, y.shape, 1)
            y = jnp.where(lane < relu_cols, jnp.maximum(y, 0.0), y)
        o_ref[...] = y.astype(o_ref.dtype)
    return kernel


def _make_maxpool_kernel(OH, OW):
    """3x3/2 max-pool from 4 even/odd phase views; 9 elementwise VPU maxes."""
    def kernel(ee_ref, eo_ref, oe_ref, oo_ref, o_ref):
        ee = ee_ref[0]
        eo = eo_ref[0]
        oe = oe_ref[0]
        oo = oo_ref[0]
        m = oo[:OH, :OW, :]
        m = jnp.maximum(m, ee[:OH, :OW, :])
        m = jnp.maximum(m, ee[:OH, 1:OW + 1, :])
        m = jnp.maximum(m, ee[1:OH + 1, :OW, :])
        m = jnp.maximum(m, ee[1:OH + 1, 1:OW + 1, :])
        m = jnp.maximum(m, eo[:OH, :OW, :])
        m = jnp.maximum(m, eo[1:OH + 1, :OW, :])
        m = jnp.maximum(m, oe[:OH, :OW, :])
        m = jnp.maximum(m, oe[:OH, 1:OW + 1, :])
        o_ref[0] = m
    return kernel


def _l2norm_kernel(x_ref, o_ref):
    # F.normalize(p=2, dim=channel): x / clamp_min(||x||, eps) == x * rsqrt(max(ss, eps^2))
    x = x_ref[...].astype(jnp.float32)
    ss = jnp.sum(x * x, axis=-1, keepdims=True)
    inv = jax.lax.rsqrt(jnp.maximum(ss, NORM_EPS * NORM_EPS))
    o_ref[...] = x * inv


# ----------------------------------------------------------------------------
# Pallas wrappers
# ----------------------------------------------------------------------------
def conv3x3_s1_fused(x, w9, shift, relu, residual=None):
    """Implicit-GEMM 3x3 stride-1 pad-1 conv on NHWC bf16, per-batch grid."""
    N, H, W, Cin = x.shape
    Cout = w9.shape[-1]
    OH, OW = H, W
    xp = jnp.pad(x, ((0, 0), (1, 1), (1, 1), (0, 0)))
    args = [xp, w9, shift]
    in_specs = [
        pl.BlockSpec((1, H + 2, W + 2, Cin), lambda n: (n, 0, 0, 0)),
        pl.BlockSpec((9, Cin, Cout), lambda n: (0, 0, 0)),
        pl.BlockSpec((1, Cout), lambda n: (0, 0)),
    ]
    if residual is not None:
        args.append(residual)
        in_specs.append(pl.BlockSpec((1, OH, OW, Cout), lambda n: (n, 0, 0, 0)))
    flops = 2 * N * OH * OW * 9 * Cin * Cout
    bytes_accessed = (xp.size * 2 + w9.size * 2 + shift.size * 4
                      + N * OH * OW * Cout * 2 * (2 if residual is not None else 1))
    return pl.pallas_call(
        _make_conv3x3_kernel(OH, OW, relu, residual is not None),
        out_shape=jax.ShapeDtypeStruct((N, OH, OW, Cout), jnp.bfloat16),
        grid=(N,),
        in_specs=in_specs,
        out_specs=pl.BlockSpec((1, OH, OW, Cout), lambda n: (n, 0, 0, 0)),
        compiler_params=pltpu.CompilerParams(dimension_semantics=("parallel",)),
        cost_estimate=pl.CostEstimate(flops=flops, transcendentals=0,
                                      bytes_accessed=bytes_accessed),
    )(*args)


def _matmul_fused(a, w, shift, relu_cols):
    """A:(M,K) bf16 @ W:(K,Cout) bf16 + shift, ReLU on first relu_cols lanes."""
    M, K = a.shape
    Cout = w.shape[1]
    Mp = _round_up(M, 8)
    if Mp <= 512:
        TM = Mp                       # per-layer tile: no padding up to fixed 128
    else:
        TM = 512
        Mp = _round_up(M, TM)
    if Mp != M:
        a = jnp.pad(a, ((0, Mp - M), (0, 0)))
    flops = 2 * Mp * K * Cout
    bytes_accessed = Mp * K * 2 + K * Cout * 2 + Cout * 4 + Mp * Cout * 2
    out = pl.pallas_call(
        _make_matmul_kernel(Cout, relu_cols),
        out_shape=jax.ShapeDtypeStruct((Mp, Cout), jnp.bfloat16),
        grid=(Mp // TM,),
        in_specs=[
            pl.BlockSpec((TM, K), lambda i: (i, 0)),
            pl.BlockSpec((K, Cout), lambda i: (0, 0)),
            pl.BlockSpec((1, Cout), lambda i: (0, 0)),
        ],
        out_specs=pl.BlockSpec((TM, Cout), lambda i: (i, 0)),
        compiler_params=pltpu.CompilerParams(dimension_semantics=("parallel",)),
        cost_estimate=pl.CostEstimate(flops=flops, transcendentals=0,
                                      bytes_accessed=bytes_accessed),
    )(a, w, shift)
    if Mp != M:
        out = out[:M]
    return out


def _im2col(x, kh, kw, stride, padding):
    """x: (N,H,W,C) -> A:(N*OH*OW, kh*kw*C) with (ky,kx,c) ordering."""
    N, H, W, C = x.shape
    OH = (H + 2 * padding - kh) // stride + 1
    OW = (W + 2 * padding - kw) // stride + 1
    xp = jnp.pad(x, ((0, 0), (padding, padding), (padding, padding), (0, 0)))
    pats = []
    for ky in range(kh):
        for kx in range(kw):
            pats.append(xp[:, ky:ky + (OH - 1) * stride + 1:stride,
                           kx:kx + (OW - 1) * stride + 1:stride, :])
    a = jnp.stack(pats, axis=3).reshape(N * OH * OW, kh * kw * C)
    return a, OH, OW


def conv_via_matmul(x, wmat, shift, kh, kw, stride, padding, relu_cols):
    """im2col matmul path (stem 7x7/2 and packed stride-2 block entries)."""
    N = x.shape[0]
    a, OH, OW = _im2col(x, kh, kw, stride, padding)
    y = _matmul_fused(a, wmat, shift, relu_cols)
    return y.reshape(N, OH, OW, wmat.shape[1]), OH, OW


def maxpool_3x3_s2(x):
    """MaxPool2d(kernel=3, stride=2, padding=1) on NHWC via phase-split views."""
    N, H, W, C = x.shape
    OH = (H - 1) // 2 + 1
    OW = (W - 1) // 2 + 1
    ph = 2 * OH - H
    pw = 2 * OW - W
    xp = jnp.pad(x, ((0, 0), (1, 1 + ph), (1, 1 + pw), (0, 0)),
                 constant_values=float("-inf"))
    ee = xp[:, 0:2 * OH + 1:2, 0:2 * OW + 1:2, :]     # even rows / even cols
    eo = xp[:, 0:2 * OH + 1:2, 1:2 * OW + 2:2, :]     # even rows / odd cols
    oe = xp[:, 1:2 * OH + 2:2, 0:2 * OW + 1:2, :]     # odd rows  / even cols
    oo = xp[:, 1:2 * OH + 2:2, 1:2 * OW + 2:2, :]     # odd rows  / odd cols
    phase_spec = pl.BlockSpec((1, OH + 1, OW + 1, C), lambda n: (n, 0, 0, 0))
    return pl.pallas_call(
        _make_maxpool_kernel(OH, OW),
        out_shape=jax.ShapeDtypeStruct((N, OH, OW, C), x.dtype),
        grid=(N,),
        in_specs=[phase_spec, phase_spec, phase_spec, phase_spec],
        out_specs=pl.BlockSpec((1, OH, OW, C), lambda n: (n, 0, 0, 0)),
        compiler_params=pltpu.CompilerParams(dimension_semantics=("parallel",)),
    )(ee, eo, oe, oo)


def l2_normalize_channels(x):
    """F.normalize(x, p=2, dim=channel) on NHWC; row-tiled, f32 output."""
    N, H, W, C = x.shape
    M = N * H * W
    flat = x.reshape(M, C)
    Mp = _round_up(M, 8)
    if Mp <= 1024:
        TR = Mp
    else:
        TR = 512
        Mp = _round_up(M, TR)
    if Mp != M:
        flat = jnp.pad(flat, ((0, Mp - M), (0, 0)))
    out = pl.pallas_call(
        _l2norm_kernel,
        out_shape=jax.ShapeDtypeStruct((Mp, C), jnp.float32),
        grid=(Mp // TR,),
        in_specs=[pl.BlockSpec((TR, C), lambda i: (i, 0))],
        out_specs=pl.BlockSpec((TR, C), lambda i: (i, 0)),
        compiler_params=pltpu.CompilerParams(dimension_semantics=("parallel",)),
    )(flat)
    if Mp != M:
        out = out[:M]
    return out.reshape(N, H, W, C)


# ----------------------------------------------------------------------------
# Parameters: raw (PyTorch layout, BN folded) + preparation (outside jit)
# ----------------------------------------------------------------------------
def _fold_bn(gamma, beta, mean, var):
    scale = gamma / jnp.sqrt(var + BN_EPS)
    shift = beta - mean * scale
    return scale, shift


def _init_conv_bn(key, cin, cout, k):
    kw_, kg, kb, km, kv = jax.random.split(key, 5)
    fan_in = cin * k * k
    w = jax.random.normal(kw_, (cout, cin, k, k), jnp.float32) * jnp.sqrt(2.0 / fan_in)
    gamma = 1.0 + 0.1 * jax.random.normal(kg, (cout,), jnp.float32)
    beta = 0.1 * jax.random.normal(kb, (cout,), jnp.float32)
    mean = 0.1 * jax.random.normal(km, (cout,), jnp.float32)
    var = 1.0 + 0.1 * jnp.abs(jax.random.normal(kv, (cout,), jnp.float32))
    scale, shift = _fold_bn(gamma, beta, mean, var)
    return {"w": w, "scale": scale, "shift": shift}


def init_params(key):
    # TODO(synk): reference loads torchvision pretrained weights; synthetic
    # deterministic init is used here instead (no checkpoint load).
    keys = jax.random.split(key, 20)
    ki = iter(keys)
    p = {}
    p["conv1"] = _init_conv_bn(next(ki), 3, 64, 7)
    p["layer1_0"] = {"conv1": _init_conv_bn(next(ki), 64, 64, 3),
                     "conv2": _init_conv_bn(next(ki), 64, 64, 3)}
    p["layer1_1"] = {"conv1": _init_conv_bn(next(ki), 64, 64, 3),
                     "conv2": _init_conv_bn(next(ki), 64, 64, 3)}
    p["layer2_0"] = {"conv1": _init_conv_bn(next(ki), 64, 128, 3),
                     "conv2": _init_conv_bn(next(ki), 128, 128, 3),
                     "down": _init_conv_bn(next(ki), 64, 128, 1)}
    p["layer2_1"] = {"conv1": _init_conv_bn(next(ki), 128, 128, 3),
                     "conv2": _init_conv_bn(next(ki), 128, 128, 3)}
    p["layer3_0"] = {"conv1": _init_conv_bn(next(ki), 128, 256, 3),
                     "conv2": _init_conv_bn(next(ki), 256, 256, 3),
                     "down": _init_conv_bn(next(ki), 128, 256, 1)}
    p["layer3_1"] = {"conv1": _init_conv_bn(next(ki), 256, 256, 3),
                     "conv2": _init_conv_bn(next(ki), 256, 256, 3)}
    # neck_conv = Conv2d(256, 128, kernel_size=3, padding=1), with bias.
    kw_, kb = jax.random.split(next(ki), 2)
    fan_in = 256 * 9
    p["neck"] = {
        "w": jax.random.normal(kw_, (128, 256, 3, 3), jnp.float32) * jnp.sqrt(2.0 / fan_in),
        "scale": jnp.ones((128,), jnp.float32),
        "shift": 0.1 * jax.random.normal(kb, (128,), jnp.float32),  # bias
    }
    return p


def _fold_scale_into_w(cb):
    return cb["w"] * cb["scale"][:, None, None, None]


def _prep_matmul(cb):
    w = _fold_scale_into_w(cb)
    cout, cin, kh, kw = w.shape
    wmat = jnp.transpose(w, (2, 3, 1, 0)).reshape(kh * kw * cin, cout)
    return {"w": wmat.astype(jnp.bfloat16),
            "shift": cb["shift"].reshape(1, cout).astype(jnp.float32)}


def _prep_conv3(cb):
    w = _fold_scale_into_w(cb)
    cout, cin, _, _ = w.shape
    w9 = jnp.transpose(w, (2, 3, 1, 0)).reshape(9, cin, cout)
    return {"w": w9.astype(jnp.bfloat16),
            "shift": cb["shift"].reshape(1, cout).astype(jnp.float32)}


def _prep_packed(conv1, down):
    """Pack the block's 3x3/s2 conv1 and its 1x1/s2 downsample into one
    (9*Cin, 2*Cout) matmul sharing the same im2col A (1x1 == centre tap)."""
    w1 = _fold_scale_into_w(conv1)                        # (Cout, Cin, 3, 3)
    cout, cin, _, _ = w1.shape
    w1 = jnp.transpose(w1, (2, 3, 1, 0))                  # (3, 3, Cin, Cout)
    wd = _fold_scale_into_w(down)[:, :, 0, 0].T           # (Cin, Cout)
    wd3 = jnp.zeros((3, 3, cin, cout), jnp.float32).at[1, 1].set(wd)
    wcat = jnp.concatenate([w1, wd3], axis=-1).reshape(9 * cin, 2 * cout)
    shift = jnp.concatenate([conv1["shift"], down["shift"]]).reshape(1, 2 * cout)
    return {"w": wcat.astype(jnp.bfloat16), "shift": shift.astype(jnp.float32)}


def prepare_params(raw):
    """BN-scale folding, weight transposes and bf16 casts — done ONCE, outside jit."""
    p = {"conv1": _prep_matmul(raw["conv1"])}
    for name in ("layer1_0", "layer1_1", "layer2_1", "layer3_1"):
        p[name] = {"conv1": _prep_conv3(raw[name]["conv1"]),
                   "conv2": _prep_conv3(raw[name]["conv2"])}
    for name in ("layer2_0", "layer3_0"):
        p[name] = {"packed": _prep_packed(raw[name]["conv1"], raw[name]["down"]),
                   "conv2": _prep_conv3(raw[name]["conv2"])}
    p["neck"] = _prep_conv3(raw["neck"])
    return p


# ----------------------------------------------------------------------------
# Forward pass (ResNet-18 basic blocks up to layer3, then neck + normalize)
# ----------------------------------------------------------------------------
def basic_block_plain(x, bp):
    out = conv3x3_s1_fused(x, bp["conv1"]["w"], bp["conv1"]["shift"], relu=True)
    return conv3x3_s1_fused(out, bp["conv2"]["w"], bp["conv2"]["shift"],
                            relu=True, residual=x)


def basic_block_down(x, bp):
    cout = bp["packed"]["w"].shape[1] // 2
    y, _, _ = conv_via_matmul(x, bp["packed"]["w"], bp["packed"]["shift"],
                              kh=3, kw=3, stride=2, padding=1, relu_cols=cout)
    out = y[..., :cout]          # conv1+bn1+relu branch
    identity = y[..., cout:]     # downsample branch (no relu)
    return conv3x3_s1_fused(out, bp["conv2"]["w"], bp["conv2"]["shift"],
                            relu=True, residual=identity)


@jax.jit
def resnet_forward(params, x_nchw):
    x = jnp.transpose(x_nchw, (0, 2, 3, 1)).astype(jnp.bfloat16)   # NCHW -> NHWC bf16
    # stem: conv1(7x7/2) + bn + relu via im2col matmul, then 3x3/2 maxpool
    x, _, _ = conv_via_matmul(x, params["conv1"]["w"], params["conv1"]["shift"],
                              kh=7, kw=7, stride=2, padding=3,
                              relu_cols=params["conv1"]["w"].shape[1])
    x = maxpool_3x3_s2(x)
    # layer1 .. layer3 (forward breaks after final_layer='layer3')
    x = basic_block_plain(x, params["layer1_0"])
    x = basic_block_plain(x, params["layer1_1"])
    x = basic_block_down(x, params["layer2_0"])
    x = basic_block_plain(x, params["layer2_1"])
    x = basic_block_down(x, params["layer3_0"])
    x = basic_block_plain(x, params["layer3_1"])
    # neck conv (3x3, bias, no activation) then F.normalize over channels
    x = conv3x3_s1_fused(x, params["neck"]["w"], params["neck"]["shift"], relu=False)
    x = l2_normalize_channels(x)                                   # f32 output
    return jnp.transpose(x, (0, 3, 1, 2))                          # NHWC -> NCHW


if __name__ == "__main__":
    key = jax.random.PRNGKey(0)
    pkey, xkey = jax.random.split(key)
    raw_params = init_params(pkey)
    params = prepare_params(raw_params)                            # prep outside jit
    x = jax.random.normal(xkey, (2, 3, 32, 32), jnp.float32)       # NCHW, like PyTorch
    out = resnet_forward(params, x)
    jax.block_until_ready(out)
    assert out.shape == (2, 128, 2, 2), out.shape
    # sanity: per-position channel vectors are unit-norm after F.normalize
    norms = jnp.sqrt(jnp.sum(out.astype(jnp.float32) ** 2, axis=1))
    assert bool(jnp.all(jnp.abs(norms - 1.0) < 1e-3))
    print("KERNEL_OK")
</pallas_src>

<mosaic_0001>
module attributes {stable_mosaic.version = 11 : i64} {
  func.func @kernel(%arg0: i32, %arg1: memref<512x147xbf16, #tpu.memory_space<vmem>>, %arg2: memref<147x64xbf16, #tpu.memory_space<vmem>>, %arg3: memref<1x64xf32, #tpu.memory_space<vmem>>, %arg4: memref<512x64xbf16, #tpu.memory_space<vmem>>) attributes {dimension_semantics = [#tpu.dimension_semantics<parallel>], iteration_bounds = array<i64: 1>, scalar_prefetch = 0 : i64, scratch_operands = 0 : i64, tpu.core_type = #tpu.core_type<tc>, window_params = [{transform_indices = @transform_0, window_bounds = array<i64: 512, 147>}, {pipeline_mode = #tpu.pipeline_mode<synchronous>, transform_indices = @transform_1, window_bounds = array<i64: 147, 64>}, {pipeline_mode = #tpu.pipeline_mode<synchronous>, transform_indices = @transform_2, window_bounds = array<i64: 1, 64>}, {transform_indices = @transform_3, window_bounds = array<i64: 512, 64>}]} {
    %c0 = arith.constant 0 : index
    %c0_0 = arith.constant 0 : index
    %0 = vector.load %arg1[%c0, %c0_0] : memref<512x147xbf16, #tpu.memory_space<vmem>>, vector<512x147xbf16>
    %c0_1 = arith.constant 0 : index
    %c0_2 = arith.constant 0 : index
    %1 = vector.load %arg2[%c0_1, %c0_2] : memref<147x64xbf16, #tpu.memory_space<vmem>>, vector<147x64xbf16>
    %cst = arith.constant dense<0.000000e+00> : vector<512x64xf32>
    %2 = tpu.matmul %0, %1, %cst {dimension_numbers = #tpu.dot_dimension_numbers<[1], [0], [0], [1], [0, 0, 1, 1], [], []>} : vector<512x147xbf16>, vector<147x64xbf16>, vector<512x64xf32> -> vector<512x64xf32>
    %c0_3 = arith.constant 0 : index
    %c0_4 = arith.constant 0 : index
    %3 = vector.load %arg3[%c0_3, %c0_4] : memref<1x64xf32, #tpu.memory_space<vmem>>, vector<1x64xf32>
    %4 = vector.broadcast %3 : vector<1x64xf32> to vector<512x64xf32>
    %5 = arith.addf %2, %4 : vector<512x64xf32>
    %cst_5 = arith.constant 0.000000e+00 : f32
    %6 = vector.broadcast %cst_5 : f32 to vector<512x64xf32>
    %7 = arith.maximumf %5, %6 : vector<512x64xf32>
    %8 = arith.truncf %7 : vector<512x64xf32> to vector<512x64xbf16>
    %c0_6 = arith.constant 0 : index
    %c0_7 = arith.constant 0 : index
    %9 = vector.load %arg4[%c0_6, %c0_7] : memref<512x64xbf16, #tpu.memory_space<vmem>>, vector<512x64xbf16>
    tpu.vector_store %arg4[%c0_6, %c0_7], %8 {strides = array<i32>} : memref<512x64xbf16, #tpu.memory_space<vmem>>, vector<512x64xbf16>,
    return
  }
  func.func @transform_0(%arg0: i32) -> (i32, i32) {
    %c0_i32 = arith.constant 0 : i32
    %c0_i32_0 = arith.constant 0 : i32
    return %arg0, %c0_i32 : i32, i32
  }
  func.func @transform_1(%arg0: i32) -> (i32, i32) {
    %c0_i32 = arith.constant 0 : i32
    %c0_i32_0 = arith.constant 0 : i32
    %c0_i32_1 = arith.constant 0 : i32
    return %c0_i32, %c0_i32_0 : i32, i32
  }
  func.func @transform_2(%arg0: i32) -> (i32, i32) {
    %c0_i32 = arith.constant 0 : i32
    %c0_i32_0 = arith.constant 0 : i32
    %c0_i32_1 = arith.constant 0 : i32
    return %c0_i32, %c0_i32_0 : i32, i32
  }
  func.func @transform_3(%arg0: i32) -> (i32, i32) {
    %c0_i32 = arith.constant 0 : i32
    %c0_i32_0 = arith.constant 0 : i32
    return %arg0, %c0_i32 : i32, i32
  }
}

module attributes {stable_mosaic.version = 11 : i64} {
  func.func @kernel(%arg0: i32, %arg1: memref<1x9x9x64xbf16, #tpu.memory_space<vmem>>, %arg2: memref<1x9x9x64xbf16, #tpu.memory_space<vmem>>, %arg3: memref<1x9x9x64xbf16, #tpu.memory_space<vmem>>, %arg4: memref<1x9x9x64xbf16, #tpu.memory_space<vmem>>, %arg5: memref<1x8x8x64xbf16, #tpu.memory_space<vmem>>) attributes {dimension_semantics = [#tpu.dimension_semantics<parallel>], iteration_bounds = array<i64: 2>, scalar_prefetch = 0 : i64, scratch_operands = 0 : i64, tpu.core_type = #tpu.core_type<tc>, window_params = [{transform_indices = @transform_0, window_bounds = array<i64: 1, 9, 9, 64>}, {transform_indices = @transform_1, window_bounds = array<i64: 1, 9, 9, 64>}, {transform_indices = @transform_2, window_bounds = array<i64: 1, 9, 9, 64>}, {transform_indices = @transform_3, window_bounds = array<i64: 1, 9, 9, 64>}, {transform_indices = @transform_4, window_bounds = array<i64: 1, 8, 8, 64>}]} {
    %c0 = arith.constant 0 : index
    %c0_0 = arith.constant 0 : index
    %c0_1 = arith.constant 0 : index
    %c0_2 = arith.constant 0 : index
    %0 = vector.load %arg1[%c0, %c0_0, %c0_1, %c0_2] : memref<1x9x9x64xbf16, #tpu.memory_space<vmem>>, vector<1x9x9x64xbf16>
    %1 = vector.shape_cast %0 : vector<1x9x9x64xbf16> to vector<9x9x64xbf16>
    %c0_3 = arith.constant 0 : index
    %c0_4 = arith.constant 0 : index
    %c0_5 = arith.constant 0 : index
    %c0_6 = arith.constant 0 : index
    %2 = vector.load %arg2[%c0_3, %c0_4, %c0_5, %c0_6] : memref<1x9x9x64xbf16, #tpu.memory_space<vmem>>, vector<1x9x9x64xbf16>
    %3 = vector.shape_cast %2 : vector<1x9x9x64xbf16> to vector<9x9x64xbf16>
    %c0_7 = arith.constant 0 : index
    %c0_8 = arith.constant 0 : index
    %c0_9 = arith.constant 0 : index
    %c0_10 = arith.constant 0 : index
    %4 = vector.load %arg3[%c0_7, %c0_8, %c0_9, %c0_10] : memref<1x9x9x64xbf16, #tpu.memory_space<vmem>>, vector<1x9x9x64xbf16>
    %5 = vector.shape_cast %4 : vector<1x9x9x64xbf16> to vector<9x9x64xbf16>
    %c0_11 = arith.constant 0 : index
    %c0_12 = arith.constant 0 : index
    %c0_13 = arith.constant 0 : index
    %c0_14 = arith.constant 0 : index
    %6 = vector.load %arg4[%c0_11, %c0_12, %c0_13, %c0_14] : memref<1x9x9x64xbf16, #tpu.memory_space<vmem>>, vector<1x9x9x64xbf16>
    %7 = vector.shape_cast %6 : vector<1x9x9x64xbf16> to vector<9x9x64xbf16>
    %8 = vector.extract_strided_slice %7 {offsets = [0, 0, 0], sizes = [8, 8, 64], strides = [1, 1, 1]} : vector<9x9x64xbf16> to vector<8x8x64xbf16>
    %9 = vector.extract_strided_slice %1 {offsets = [0, 0, 0], sizes = [8, 8, 64], strides = [1, 1, 1]} : vector<9x9x64xbf16> to vector<8x8x64xbf16>
    %10 = arith.maximumf %8, %9 : vector<8x8x64xbf16>
    %11 = vector.extract_strided_slice %1 {offsets = [0, 1, 0], sizes = [8, 8, 64], strides = [1, 1, 1]} : vector<9x9x64xbf16> to vector<8x8x64xbf16>
    %12 = arith.maximumf %10, %11 : vector<8x8x64xbf16>
    %13 = vector.extract_strided_slice %1 {offsets = [1, 0, 0], sizes = [8, 8, 64], strides = [1, 1, 1]} : vector<9x9x64xbf16> to vector<8x8x64xbf16>
    %14 = arith.maximumf %12, %13 : vector<8x8x64xbf16>
    %15 = vector.extract_strided_slice %1 {offsets = [1, 1, 0], sizes = [8, 8, 64], strides = [1, 1, 1]} : vector<9x9x64xbf16> to vector<8x8x64xbf16>
    %16 = arith.maximumf %14, %15 : vector<8x8x64xbf16>
    %17 = vector.extract_strided_slice %3 {offsets = [0, 0, 0], sizes = [8, 8, 64], strides = [1, 1, 1]} : vector<9x9x64xbf16> to vector<8x8x64xbf16>
    %18 = arith.maximumf %16, %17 : vector<8x8x64xbf16>
    %19 = vector.extract_strided_slice %3 {offsets = [1, 0, 0], sizes = [8, 8, 64], strides = [1, 1, 1]} : vector<9x9x64xbf16> to vector<8x8x64xbf16>
    %20 = arith.maximumf %18, %19 : vector<8x8x64xbf16>
    %21 = vector.extract_strided_slice %5 {offsets = [0, 0, 0], sizes = [8, 8, 64], strides = [1, 1, 1]} : vector<9x9x64xbf16> to vector<8x8x64xbf16>
    %22 = arith.maximumf %20, %21 : vector<8x8x64xbf16>
    %23 = vector.extract_strided_slice %5 {offsets = [0, 1, 0], sizes = [8, 8, 64], strides = [1, 1, 1]} : vector<9x9x64xbf16> to vector<8x8x64xbf16>
    %24 = arith.maximumf %22, %23 : vector<8x8x64xbf16>
    %c0_15 = arith.constant 0 : index
    %c0_16 = arith.constant 0 : index
    %c0_17 = arith.constant 0 : index
    %c0_18 = arith.constant 0 : index
    %25 = vector.load %arg5[%c0_15, %c0_16, %c0_17, %c0_18] : memref<1x8x8x64xbf16, #tpu.memory_space<vmem>>, vector<1x8x8x64xbf16>
    %26 = vector.shape_cast %25 : vector<1x8x8x64xbf16> to vector<8x8x64xbf16>
    %27 = vector.shape_cast %24 : vector<8x8x64xbf16> to vector<1x8x8x64xbf16>
    tpu.vector_store %arg5[%c0_15, %c0_16, %c0_17, %c0_18], %27 {strides = array<i32>} : memref<1x8x8x64xbf16, #tpu.memory_space<vmem>>, vector<1x8x8x64xbf16>,
    return
  }
  func.func @transform_0(%arg0: i32) -> (i32, i32, i32, i32) {
    %c0_i32 = arith.constant 0 : i32
    %c0_i32_0 = arith.constant 0 : i32
    %c0_i32_1 = arith.constant 0 : i32
    %c0_i32_2 = arith.constant 0 : i32
    return %arg0, %c0_i32, %c0_i32_0, %c0_i32_1 : i32, i32, i32, i32
  }
  func.func @transform_1(%arg0: i32) -> (i32, i32, i32, i32) {
    %c0_i32 = arith.constant 0 : i32
    %c0_i32_0 = arith.constant 0 : i32
    %c0_i32_1 = arith.constant 0 : i32
    %c0_i32_2 = arith.constant 0 : i32
    return %arg0, %c0_i32, %c0_i32_0, %c0_i32_1 : i32, i32, i32, i32
  }
  func.func @transform_2(%arg0: i32) -> (i32, i32, i32, i32) {
    %c0_i32 = arith.constant 0 : i32
    %c0_i32_0 = arith.constant 0 : i32
    %c0_i32_1 = arith.constant 0 : i32
    %c0_i32_2 = arith.constant 0 : i32
    return %arg0, %c0_i32, %c0_i32_0, %c0_i32_1 : i32, i32, i32, i32
  }
  func.func @transform_3(%arg0: i32) -> (i32, i32, i32, i32) {
    %c0_i32 = arith.constant 0 : i32
    %c0_i32_0 = arith.constant 0 : i32
    %c0_i32_1 = arith.constant 0 : i32
    %c0_i32_2 = arith.constant 0 : i32
    return %arg0, %c0_i32, %c0_i32_0, %c0_i32_1 : i32, i32, i32, i32
  }
  func.func @transform_4(%arg0: i32) -> (i32, i32, i32, i32) {
    %c0_i32 = arith.constant 0 : i32
    %c0_i32_0 = arith.constant 0 : i32
    %c0_i32_1 = arith.constant 0 : i32
    %c0_i32_2 = arith.constant 0 : i32
    return %arg0, %c0_i32, %c0_i32_0, %c0_i32_1 : i32, i32, i32, i32
  }
}

module attributes {stable_mosaic.version = 11 : i64} {
  func.func @kernel(%arg0: i32, %arg1: memref<1x10x10x64xbf16, #tpu.memory_space<vmem>>, %arg2: memref<9x64x64xbf16, #tpu.memory_space<vmem>>, %arg3: memref<1x64xf32, #tpu.memory_space<vmem>>, %arg4: memref<1x8x8x64xbf16, #tpu.memory_space<vmem>>) attributes {dimension_semantics = [#tpu.dimension_semantics<parallel>], iteration_bounds = array<i64: 2>, scalar_prefetch = 0 : i64, scratch_operands = 0 : i64, tpu.core_type = #tpu.core_type<tc>, window_params = [{transform_indices = @transform_0, window_bounds = array<i64: 1, 10, 10, 64>}, {pipeline_mode = #tpu.pipeline_mode<synchronous>, transform_indices = @transform_1, window_bounds = array<i64: 9, 64, 64>}, {pipeline_mode = #tpu.pipeline_mode<synchronous>, transform_indices = @transform_2, window_bounds = array<i64: 1, 64>}, {transform_indices = @transform_3, window_bounds = array<i64: 1, 8, 8, 64>}]} {
    %c0 = arith.constant 0 : index
    %c0_0 = arith.constant 0 : index
    %c0_1 = arith.constant 0 : index
    %c0_2 = arith.constant 0 : index
    %0 = vector.load %arg1[%c0, %c0_0, %c0_1, %c0_2] : memref<1x10x10x64xbf16, #tpu.memory_space<vmem>>, vector<1x10x10x64xbf16>
    %1 = vector.shape_cast %0 : vector<1x10x10x64xbf16> to vector<10x10x64xbf16>
    %cst = arith.constant 0.000000e+00 : f32
    %2 = vector.broadcast %cst : f32 to vector<64x64xf32>
    %3 = vector.extract_strided_slice %1 {offsets = [0, 0, 0], sizes = [8, 8, 64], strides = [1, 1, 1]} : vector<10x10x64xbf16> to vector<8x8x64xbf16>
    %4 = vector.shape_cast %3 : vector<8x8x64xbf16> to vector<64x64xbf16>
    %c0_3 = arith.constant 0 : index
    %c0_4 = arith.constant 0 : index
    %c0_5 = arith.constant 0 : index
    %5 = vector.load %arg2[%c0_3, %c0_4, %c0_5] : memref<9x64x64xbf16, #tpu.memory_space<vmem>>, vector<1x64x64xbf16>
    %6 = vector.shape_cast %5 : vector<1x64x64xbf16> to vector<64x64xbf16>
    %cst_6 = arith.constant dense<0.000000e+00> : vector<64x64xf32>
    %7 = tpu.matmul %4, %6, %cst_6 {dimension_numbers = #tpu.dot_dimension_numbers<[1], [0], [0], [1], [0, 0, 1, 1], [], []>} : vector<64x64xbf16>, vector<64x64xbf16>, vector<64x64xf32> -> vector<64x64xf32>
    %8 = arith.addf %2, %7 : vector<64x64xf32>
    %9 = vector.extract_strided_slice %1 {offsets = [0, 1, 0], sizes = [8, 8, 64], strides = [1, 1, 1]} : vector<10x10x64xbf16> to vector<8x8x64xbf16>
    %10 = vector.shape_cast %9 : vector<8x8x64xbf16> to vector<64x64xbf16>
    %c1 = arith.constant 1 : index
    %c0_7 = arith.constant 0 : index
    %c0_8 = arith.constant 0 : index
    %11 = vector.load %arg2[%c1, %c0_7, %c0_8] : memref<9x64x64xbf16, #tpu.memory_space<vmem>>, vector<1x64x64xbf16>
    %12 = vector.shape_cast %11 : vector<1x64x64xbf16> to vector<64x64xbf16>
    %cst_9 = arith.constant dense<0.000000e+00> : vector<64x64xf32>
    %13 = tpu.matmul %10, %12, %cst_9 {dimension_numbers = #tpu.dot_dimension_numbers<[1], [0], [0], [1], [0, 0, 1, 1], [], []>} : vector<64x64xbf16>, vector<64x64xbf16>, vector<64x64xf32> -> vector<64x64xf32>
    %14 = arith.addf %8, %13 : vector<64x64xf32>
    %15 = vector.extract_strided_slice %1 {offsets = [0, 2, 0], sizes = [8, 8, 64], strides = [1, 1, 1]} : vector<10x10x64xbf16> to vector<8x8x64xbf16>
    %16 = vector.shape_cast %15 : vector<8x8x64xbf16> to vector<64x64xbf16>
    %c2 = arith.constant 2 : index
    %c0_10 = arith.constant 0 : index
    %c0_11 = arith.constant 0 : index
    %17 = vector.load %arg2[%c2, %c0_10, %c0_11] : memref<9x64x64xbf16, #tpu.memory_space<vmem>>, vector<1x64x64xbf16>
    %18 = vector.shape_cast %17 : vector<1x64x64xbf16> to vector<64x64xbf16>
    %cst_12 = arith.constant dense<0.000000e+00> : vector<64x64xf32>
    %19 = tpu.matmul %16, %18, %cst_12 {dimension_numbers = #tpu.dot_dimension_numbers<[1], [0], [0], [1], [0, 0, 1, 1], [], []>} : vector<64x64xbf16>, vector<64x64xbf16>, vector<64x64xf32> -> vector<64x64xf32>
    %20 = arith.addf %14, %19 : vector<64x64xf32>
    %21 = vector.extract_strided_slice %1 {offsets = [1, 0, 0], sizes = [8, 8, 64], strides = [1, 1, 1]} : vector<10x10x64xbf16> to vector<8x8x64xbf16>
    %22 = vector.shape_cast %21 : vector<8x8x64xbf16> to vector<64x64xbf16>
    %c3 = arith.constant 3 : index
    %c0_13 = arith.constant 0 : index
    %c0_14 = arith.constant 0 : index
    %23 = vector.load %arg2[%c3, %c0_13, %c0_14] : memref<9x64x64xbf16, #tpu.memory_space<vmem>>, vector<1x64x64xbf16>
    %24 = vector.shape_cast %23 : vector<1x64x64xbf16> to vector<64x64xbf16>
    %cst_15 = arith.constant dense<0.000000e+00> : vector<64x64xf32>
    %25 = tpu.matmul %22, %24, %cst_15 {dimension_numbers = #tpu.dot_dimension_numbers<[1], [0], [0], [1], [0, 0, 1, 1], [], []>} : vector<64x64xbf16>, vector<64x64xbf16>, vector<64x64xf32> -> vector<64x64xf32>
    %26 = arith.addf %20, %25 : vector<64x64xf32>
    %27 = vector.extract_strided_slice %1 {offsets = [1, 1, 0], sizes = [8, 8, 64], strides = [1, 1, 1]} : vector<10x10x64xbf16> to vector<8x8x64xbf16>
    %28 = vector.shape_cast %27 : vector<8x8x64xbf16> to vector<64x64xbf16>
    %c4 = arith.constant 4 : index
    %c0_16 = arith.constant 0 : index
    %c0_17 = arith.constant 0 : index
    %29 = vector.load %arg2[%c4, %c0_16, %c0_17] : memref<9x64x64xbf16, #tpu.memory_space<vmem>>, vector<1x64x64xbf16>
    %30 = vector.shape_cast %29 : vector<1x64x64xbf16> to vector<64x64xbf16>
    %cst_18 = arith.constant dense<0.000000e+00> : vector<64x64xf32>
    %31 = tpu.matmul %28, %30, %cst_18 {dimension_numbers = #tpu.dot_dimension_numbers<[1], [0], [0], [1], [0, 0, 1, 1], [], []>} : vector<64x64xbf16>, vector<64x64xbf16>, vector<64x64xf32> -> vector<64x64xf32>
    %32 = arith.addf %26, %31 : vector<64x64xf32>
    %33 = vector.extract_strided_slice %1 {offsets = [1, 2, 0], sizes = [8, 8, 64], strides = [1, 1, 1]} : vector<10x10x64xbf16> to vector<8x8x64xbf16>
    %34 = vector.shape_cast %33 : vector<8x8x64xbf16> to vector<64x64xbf16>
    %c5 = arith.constant 5 : index
    %c0_19 = arith.constant 0 : index
    %c0_20 = arith.constant 0 : index
    %35 = vector.load %arg2[%c5, %c0_19, %c0_20] : memref<9x64x64xbf16, #tpu.memory_space<vmem>>, vector<1x64x64xbf16>
    %36 = vector.shape_cast %35 : vector<1x64x64xbf16> to vector<64x64xbf16>
    %cst_21 = arith.constant dense<0.000000e+00> : vector<64x64xf32>
    %37 = tpu.matmul %34, %36, %cst_21 {dimension_numbers = #tpu.dot_dimension_numbers<[1], [0], [0], [1], [0, 0, 1, 1], [], []>} : vector<64x64xbf16>, vector<64x64xbf16>, vector<64x64xf32> -> vector<64x64xf32>
    %38 = arith.addf %32, %37 : vector<64x64xf32>
    %39 = vector.extract_strided_slice %1 {offsets = [2, 0, 0], sizes = [8, 8, 64], strides = [1, 1, 1]} : vector<10x10x64xbf16> to vector<8x8x64xbf16>
    %40 = vector.shape_cast %39 : vector<8x8x64xbf16> to vector<64x64xbf16>
    %c6 = arith.constant 6 : index
    %c0_22 = arith.constant 0 : index
    %c0_23 = arith.constant 0 : index
    %41 = vector.load %arg2[%c6, %c0_22, %c0_23] : memref<9x64x64xbf16, #tpu.memory_space<vmem>>, vector<1x64x64xbf16>
    %42 = vector.shape_cast %41 : vector<1x64x64xbf16> to vector<64x64xbf16>
    %cst_24 = arith.constant dense<0.000000e+00> : vector<64x64xf32>
    %43 = tpu.matmul %40, %42, %cst_24 {dimension_numbers = #tpu.dot_dimension_numbers<[1], [0], [0], [1], [0, 0, 1, 1], [], []>} : vector<64x64xbf16>, vector<64x64xbf16>, vector<64x64xf32> -> vector<64x64xf32>
    %44 = arith.addf %38, %43 : vector<64x64xf32>
    %45 = vector.extract_strided_slice %1 {offsets = [2, 1, 0], sizes = [8, 8, 64], strides = [1, 1, 1]} : vector<10x10x64xbf16> to vector<8x8x64xbf16>
    %46 = vector.shape_cast %45 : vector<8x8x64xbf16> to vector<64x64xbf16>
    %c7 = arith.constant 7 : index
    %c0_25 = arith.constant 0 : index
    %c0_26 = arith.constant 0 : index
    %47 = vector.load %arg2[%c7, %c0_25, %c0_26] : memref<9x64x64xbf16, #tpu.memory_space<vmem>>, vector<1x64x64xbf16>
    %48 = vector.shape_cast %47 : vector<1x64x64xbf16> to vector<64x64xbf16>
    %cst_27 = arith.constant dense<0.000000e+00> : vector<64x64xf32>
    %49 = tpu.matmul %46, %48, %cst_27 {dimension_numbers = #tpu.dot_dimension_numbers<[1], [0], [0], [1], [0, 0, 1, 1], [], []>} : vector<64x64xbf16>, vector<64x64xbf16>, vector<64x64xf32> -> vector<64x64xf32>
    %50 = arith.addf %44, %49 : vector<64x64xf32>
    %51 = vector.extract_strided_slice %1 {offsets = [2, 2, 0], sizes = [8, 8, 64], strides = [1, 1, 1]} : vector<10x10x64xbf16> to vector<8x8x64xbf16>
    %52 = vector.shape_cast %51 : vector<8x8x64xbf16> to vector<64x64xbf16>
    %c8 = arith.constant 8 : index
    %c0_28 = arith.constant 0 : index
    %c0_29 = arith.constant 0 : index
    %53 = vector.load %arg2[%c8, %c0_28, %c0_29] : memref<9x64x64xbf16, #tpu.memory_space<vmem>>, vector<1x64x64xbf16>
    %54 = vector.shape_cast %53 : vector<1x64x64xbf16> to vector<64x64xbf16>
    %cst_30 = arith.constant dense<0.000000e+00> : vector<64x64xf32>
    %55 = tpu.matmul %52, %54, %cst_30 {dimension_numbers = #tpu.dot_dimension_numbers<[1], [0], [0], [1], [0, 0, 1, 1], [], []>} : vector<64x64xbf16>, vector<64x64xbf16>, vector<64x64xf32> -> vector<64x64xf32>
    %56 = arith.addf %50, %55 : vector<64x64xf32>
    %c0_31 = arith.constant 0 : index
    %c0_32 = arith.constant 0 : index
    %57 = vector.load %arg3[%c0_31, %c0_32] : memref<1x64xf32, #tpu.memory_space<vmem>>, vector<1x64xf32>
    %58 = vector.broadcast %57 : vector<1x64xf32> to vector<64x64xf32>
    %59 = arith.addf %56, %58 : vector<64x64xf32>
    %cst_33 = arith.constant 0.000000e+00 : f32
    %60 = vector.broadcast %cst_33 : f32 to vector<64x64xf32>
    %61 = arith.maximumf %59, %60 : vector<64x64xf32>
    %62 = vector.shape_cast %61 : vector<64x64xf32> to vector<8x8x64xf32>
    %63 = arith.truncf %62 : vector<8x8x64xf32> to vector<8x8x64xbf16>
    %c0_34 = arith.constant 0 : index
    %c0_35 = arith.constant 0 : index
    %c0_36 = arith.constant 0 : index
    %c0_37 = arith.constant 0 : index
    %64 = vector.load %arg4[%c0_34, %c0_35, %c0_36, %c0_37] : memref<1x8x8x64xbf16, #tpu.memory_space<vmem>>, vector<1x8x8x64xbf16>
    %65 = vector.shape_cast %64 : vector<1x8x8x64xbf16> to vector<8x8x64xbf16>
    %66 = vector.shape_cast %63 : vector<8x8x64xbf16> to vector<1x8x8x64xbf16>
    tpu.vector_store %arg4[%c0_34, %c0_35, %c0_36, %c0_37], %66 {strides = array<i32>} : memref<1x8x8x64xbf16, #tpu.memory_space<vmem>>, vector<1x8x8x64xbf16>,
    return
  }
  func.func @transform_0(%arg0: i32) -> (i32, i32, i32, i32) {
    %c0_i32 = arith.constant 0 : i32
    %c0_i32_0 = arith.constant 0 : i32
    %c0_i32_1 = arith.constant 0 : i32
    %c0_i32_2 = arith.constant 0 : i32
    return %arg0, %c0_i32, %c0_i32_0, %c0_i32_1 : i32, i32, i32, i32
  }
  func.func @transform_1(%arg0: i32) -> (i32, i32, i32) {
    %c0_i32 = arith.constant 0 : i32
    %c0_i32_0 = arith.constant 0 : i32
    %c0_i32_1 = arith.constant 0 : i32
    %c0_i32_2 = arith.constant 0 : i32
    return %c0_i32, %c0_i32_0, %c0_i32_1 : i32, i32, i32
  }
  func.func @transform_2(%arg0: i32) -> (i32, i32) {
    %c0_i32 = arith.constant 0 : i32
    %c0_i32_0 = arith.constant 0 : i32
    %c0_i32_1 = arith.constant 0 : i32
    return %c0_i32, %c0_i32_0 : i32, i32
  }
  func.func @transform_3(%arg0: i32) -> (i32, i32, i32, i32) {
    %c0_i32 = arith.constant 0 : i32
    %c0_i32_0 = arith.constant 0 : i32
    %c0_i32_1 = arith.constant 0 : i32
    %c0_i32_2 = arith.constant 0 : i32
    return %arg0, %c0_i32, %c0_i32_0, %c0_i32_1 : i32, i32, i32, i32
  }
}

module attributes {stable_mosaic.version = 11 : i64} {
  func.func @kernel(%arg0: i32, %arg1: memref<1x10x10x64xbf16, #tpu.memory_space<vmem>>, %arg2: memref<9x64x64xbf16, #tpu.memory_space<vmem>>, %arg3: memref<1x64xf32, #tpu.memory_space<vmem>>, %arg4: memref<1x8x8x64xbf16, #tpu.memory_space<vmem>>, %arg5: memref<1x8x8x64xbf16, #tpu.memory_space<vmem>>) attributes {dimension_semantics = [#tpu.dimension_semantics<parallel>], iteration_bounds = array<i64: 2>, scalar_prefetch = 0 : i64, scratch_operands = 0 : i64, tpu.core_type = #tpu.core_type<tc>, window_params = [{transform_indices = @transform_0, window_bounds = array<i64: 1, 10, 10, 64>}, {pipeline_mode = #tpu.pipeline_mode<synchronous>, transform_indices = @transform_1, window_bounds = array<i64: 9, 64, 64>}, {pipeline_mode = #tpu.pipeline_mode<synchronous>, transform_indices = @transform_2, window_bounds = array<i64: 1, 64>}, {transform_indices = @transform_3, window_bounds = array<i64: 1, 8, 8, 64>}, {transform_indices = @transform_4, window_bounds = array<i64: 1, 8, 8, 64>}]} {
    %c0 = arith.constant 0 : index
    %c0_0 = arith.constant 0 : index
    %c0_1 = arith.constant 0 : index
    %c0_2 = arith.constant 0 : index
    %0 = vector.load %arg1[%c0, %c0_0, %c0_1, %c0_2] : memref<1x10x10x64xbf16, #tpu.memory_space<vmem>>, vector<1x10x10x64xbf16>
    %1 = vector.shape_cast %0 : vector<1x10x10x64xbf16> to vector<10x10x64xbf16>
    %cst = arith.constant 0.000000e+00 : f32
    %2 = vector.broadcast %cst : f32 to vector<64x64xf32>
    %3 = vector.extract_strided_slice %1 {offsets = [0, 0, 0], sizes = [8, 8, 64], strides = [1, 1, 1]} : vector<10x10x64xbf16> to vector<8x8x64xbf16>
    %4 = vector.shape_cast %3 : vector<8x8x64xbf16> to vector<64x64xbf16>
    %c0_3 = arith.constant 0 : index
    %c0_4 = arith.constant 0 : index
    %c0_5 = arith.constant 0 : index
    %5 = vector.load %arg2[%c0_3, %c0_4, %c0_5] : memref<9x64x64xbf16, #tpu.memory_space<vmem>>, vector<1x64x64xbf16>
    %6 = vector.shape_cast %5 : vector<1x64x64xbf16> to vector<64x64xbf16>
    %cst_6 = arith.constant dense<0.000000e+00> : vector<64x64xf32>
    %7 = tpu.matmul %4, %6, %cst_6 {dimension_numbers = #tpu.dot_dimension_numbers<[1], [0], [0], [1], [0, 0, 1, 1], [], []>} : vector<64x64xbf16>, vector<64x64xbf16>, vector<64x64xf32> -> vector<64x64xf32>
    %8 = arith.addf %2, %7 : vector<64x64xf32>
    %9 = vector.extract_strided_slice %1 {offsets = [0, 1, 0], sizes = [8, 8, 64], strides = [1, 1, 1]} : vector<10x10x64xbf16> to vector<8x8x64xbf16>
    %10 = vector.shape_cast %9 : vector<8x8x64xbf16> to vector<64x64xbf16>
    %c1 = arith.constant 1 : index
    %c0_7 = arith.constant 0 : index
    %c0_8 = arith.constant 0 : index
    %11 = vector.load %arg2[%c1, %c0_7, %c0_8] : memref<9x64x64xbf16, #tpu.memory_space<vmem>>, vector<1x64x64xbf16>
    %12 = vector.shape_cast %11 : vector<1x64x64xbf16> to vector<64x64xbf16>
    %cst_9 = arith.constant dense<0.000000e+00> : vector<64x64xf32>
    %13 = tpu.matmul %10, %12, %cst_9 {dimension_numbers = #tpu.dot_dimension_numbers<[1], [0], [0], [1], [0, 0, 1, 1], [], []>} : vector<64x64xbf16>, vector<64x64xbf16>, vector<64x64xf32> -> vector<64x64xf32>
    %14 = arith.addf %8, %13 : vector<64x64xf32>
    %15 = vector.extract_strided_slice %1 {offsets = [0, 2, 0], sizes = [8, 8, 64], strides = [1, 1, 1]} : vector<10x10x64xbf16> to vector<8x8x64xbf16>
    %16 = vector.shape_cast %15 : vector<8x8x64xbf16> to vector<64x64xbf16>
    %c2 = arith.constant 2 : index
    %c0_10 = arith.constant 0 : index
    %c0_11 = arith.constant 0 : index
    %17 = vector.load %arg2[%c2, %c0_10, %c0_11] : memref<9x64x64xbf16, #tpu.memory_space<vmem>>, vector<1x64x64xbf16>
    %18 = vector.shape_cast %17 : vector<1x64x64xbf16> to vector<64x64xbf16>
    %cst_12 = arith.constant dense<0.000000e+00> : vector<64x64xf32>
    %19 = tpu.matmul %16, %18, %cst_12 {dimension_numbers = #tpu.dot_dimension_numbers<[1], [0], [0], [1], [0, 0, 1, 1], [], []>} : vector<64x64xbf16>, vector<64x64xbf16>, vector<64x64xf32> -> vector<64x64xf32>
    %20 = arith.addf %14, %19 : vector<64x64xf32>
    %21 = vector.extract_strided_slice %1 {offsets = [1, 0, 0], sizes = [8, 8, 64], strides = [1, 1, 1]} : vector<10x10x64xbf16> to vector<8x8x64xbf16>
    %22 = vector.shape_cast %21 : vector<8x8x64xbf16> to vector<64x64xbf16>
    %c3 = arith.constant 3 : index
    %c0_13 = arith.constant 0 : index
    %c0_14 = arith.constant 0 : index
    %23 = vector.load %arg2[%c3, %c0_13, %c0_14] : memref<9x64x64xbf16, #tpu.memory_space<vmem>>, vector<1x64x64xbf16>
    %24 = vector.shape_cast %23 : vector<1x64x64xbf16> to vector<64x64xbf16>
    %cst_15 = arith.constant dense<0.000000e+00> : vector<64x64xf32>
    %25 = tpu.matmul %22, %24, %cst_15 {dimension_numbers = #tpu.dot_dimension_numbers<[1], [0], [0], [1], [0, 0, 1, 1], [], []>} : vector<64x64xbf16>, vector<64x64xbf16>, vector<64x64xf32> -> vector<64x64xf32>
    %26 = arith.addf %20, %25 : vector<64x64xf32>
    %27 = vector.extract_strided_slice %1 {offsets = [1, 1, 0], sizes = [8, 8, 64], strides = [1, 1, 1]} : vector<10x10x64xbf16> to vector<8x8x64xbf16>
    %28 = vector.shape_cast %27 : vector<8x8x64xbf16> to vector<64x64xbf16>
    %c4 = arith.constant 4 : index
    %c0_16 = arith.constant 0 : index
    %c0_17 = arith.constant 0 : index
    %29 = vector.load %arg2[%c4, %c0_16, %c0_17] : memref<9x64x64xbf16, #tpu.memory_space<vmem>>, vector<1x64x64xbf16>
    %30 = vector.shape_cast %29 : vector<1x64x64xbf16> to vector<64x64xbf16>
    %cst_18 = arith.constant dense<0.000000e+00> : vector<64x64xf32>
    %31 = tpu.matmul %28, %30, %cst_18 {dimension_numbers = #tpu.dot_dimension_numbers<[1], [0], [0], [1], [0, 0, 1, 1], [], []>} : vector<64x64xbf16>, vector<64x64xbf16>, vector<64x64xf32> -> vector<64x64xf32>
    %32 = arith.addf %26, %31 : vector<64x64xf32>
    %33 = vector.extract_strided_slice %1 {offsets = [1, 2, 0], sizes = [8, 8, 64], strides = [1, 1, 1]} : vector<10x10x64xbf16> to vector<8x8x64xbf16>
    %34 = vector.shape_cast %33 : vector<8x8x64xbf16> to vector<64x64xbf16>
    %c5 = arith.constant 5 : index
    %c0_19 = arith.constant 0 : index
    %c0_20 = arith.constant 0 : index
    %35 = vector.load %arg2[%c5, %c0_19, %c0_20] : memref<9x64x64xbf16, #tpu.memory_space<vmem>>, vector<1x64x64xbf16>
    %36 = vector.shape_cast %35 : vector<1x64x64xbf16> to vector<64x64xbf16>
    %cst_21 = arith.constant dense<0.000000e+00> : vector<64x64xf32>
    %37 = tpu.matmul %34, %36, %cst_21 {dimension_numbers = #tpu.dot_dimension_numbers<[1], [0], [0], [1], [0, 0, 1, 1], [], []>} : vector<64x64xbf16>, vector<64x64xbf16>, vector<64x64xf32> -> vector<64x64xf32>
    %38 = arith.addf %32, %37 : vector<64x64xf32>
    %39 = vector.extract_strided_slice %1 {offsets = [2, 0, 0], sizes = [8, 8, 64], strides = [1, 1, 1]} : vector<10x10x64xbf16> to vector<8x8x64xbf16>
    %40 = vector.shape_cast %39 : vector<8x8x64xbf16> to vector<64x64xbf16>
    %c6 = arith.constant 6 : index
    %c0_22 = arith.constant 0 : index
    %c0_23 = arith.constant 0 : index
    %41 = vector.load %arg2[%c6, %c0_22, %c0_23] : memref<9x64x64xbf16, #tpu.memory_space<vmem>>, vector<1x64x64xbf16>
    %42 = vector.shape_cast %41 : vector<1x64x64xbf16> to vector<64x64xbf16>
    %cst_24 = arith.constant dense<0.000000e+00> : vector<64x64xf32>
    %43 = tpu.matmul %40, %42, %cst_24 {dimension_numbers = #tpu.dot_dimension_numbers<[1], [0], [0], [1], [0, 0, 1, 1], [], []>} : vector<64x64xbf16>, vector<64x64xbf16>, vector<64x64xf32> -> vector<64x64xf32>
    %44 = arith.addf %38, %43 : vector<64x64xf32>
    %45 = vector.extract_strided_slice %1 {offsets = [2, 1, 0], sizes = [8, 8, 64], strides = [1, 1, 1]} : vector<10x10x64xbf16> to vector<8x8x64xbf16>
    %46 = vector.shape_cast %45 : vector<8x8x64xbf16> to vector<64x64xbf16>
    %c7 = arith.constant 7 : index
    %c0_25 = arith.constant 0 : index
    %c0_26 = arith.constant 0 : index
    %47 = vector.load %arg2[%c7, %c0_25, %c0_26] : memref<9x64x64xbf16, #tpu.memory_space<vmem>>, vector<1x64x64xbf16>
    %48 = vector.shape_cast %47 : vector<1x64x64xbf16> to vector<64x64xbf16>
    %cst_27 = arith.constant dense<0.000000e+00> : vector<64x64xf32>
    %49 = tpu.matmul %46, %48, %cst_27 {dimension_numbers = #tpu.dot_dimension_numbers<[1], [0], [0], [1], [0, 0, 1, 1], [], []>} : vector<64x64xbf16>, vector<64x64xbf16>, vector<64x64xf32> -> vector<64x64xf32>
    %50 = arith.addf %44, %49 : vector<64x64xf32>
    %51 = vector.extract_strided_slice %1 {offsets = [2, 2, 0], sizes = [8, 8, 64], strides = [1, 1, 1]} : vector<10x10x64xbf16> to vector<8x8x64xbf16>
    %52 = vector.shape_cast %51 : vector<8x8x64xbf16> to vector<64x64xbf16>
    %c8 = arith.constant 8 : index
    %c0_28 = arith.constant 0 : index
    %c0_29 = arith.constant 0 : index
    %53 = vector.load %arg2[%c8, %c0_28, %c0_29] : memref<9x64x64xbf16, #tpu.memory_space<vmem>>, vector<1x64x64xbf16>
    %54 = vector.shape_cast %53 : vector<1x64x64xbf16> to vector<64x64xbf16>
    %cst_30 = arith.constant dense<0.000000e+00> : vector<64x64xf32>
    %55 = tpu.matmul %52, %54, %cst_30 {dimension_numbers = #tpu.dot_dimension_numbers<[1], [0], [0], [1], [0, 0, 1, 1], [], []>} : vector<64x64xbf16>, vector<64x64xbf16>, vector<64x64xf32> -> vector<64x64xf32>
    %56 = arith.addf %50, %55 : vector<64x64xf32>
    %c0_31 = arith.constant 0 : index
    %c0_32 = arith.constant 0 : index
    %57 = vector.load %arg3[%c0_31, %c0_32] : memref<1x64xf32, #tpu.memory_space<vmem>>, vector<1x64xf32>
    %58 = vector.broadcast %57 : vector<1x64xf32> to vector<64x64xf32>
    %59 = arith.addf %56, %58 : vector<64x64xf32>
    %c0_33 = arith.constant 0 : index
    %c0_34 = arith.constant 0 : index
    %c0_35 = arith.constant 0 : index
    %c0_36 = arith.constant 0 : index
    %60 = vector.load %arg4[%c0_33, %c0_34, %c0_35, %c0_36] : memref<1x8x8x64xbf16, #tpu.memory_space<vmem>>, vector<1x8x8x64xbf16>
    %61 = vector.shape_cast %60 : vector<1x8x8x64xbf16> to vector<8x8x64xbf16>
    %62 = vector.shape_cast %61 : vector<8x8x64xbf16> to vector<64x64xbf16>
    %63 = arith.extf %62 : vector<64x64xbf16> to vector<64x64xf32>
    %64 = arith.addf %59, %63 : vector<64x64xf32>
    %cst_37 = arith.constant 0.000000e+00 : f32
    %65 = vector.broadcast %cst_37 : f32 to vector<64x64xf32>
    %66 = arith.maximumf %64, %65 : vector<64x64xf32>
    %67 = vector.shape_cast %66 : vector<64x64xf32> to vector<8x8x64xf32>
    %68 = arith.truncf %67 : vector<8x8x64xf32> to vector<8x8x64xbf16>
    %c0_38 = arith.constant 0 : index
    %c0_39 = arith.constant 0 : index
    %c0_40 = arith.constant 0 : index
    %c0_41 = arith.constant 0 : index
    %69 = vector.load %arg5[%c0_38, %c0_39, %c0_40, %c0_41] : memref<1x8x8x64xbf16, #tpu.memory_space<vmem>>, vector<1x8x8x64xbf16>
    %70 = vector.shape_cast %69 : vector<1x8x8x64xbf16> to vector<8x8x64xbf16>
    %71 = vector.shape_cast %68 : vector<8x8x64xbf16> to vector<1x8x8x64xbf16>
    tpu.vector_store %arg5[%c0_38, %c0_39, %c0_40, %c0_41], %71 {strides = array<i32>} : memref<1x8x8x64xbf16, #tpu.memory_space<vmem>>, vector<1x8x8x64xbf16>,
    return
  }
  func.func @transform_0(%arg0: i32) -> (i32, i32, i32, i32) {
    %c0_i32 = arith.constant 0 : i32
    %c0_i32_0 = arith.constant 0 : i32
    %c0_i32_1 = arith.constant 0 : i32
    %c0_i32_2 = arith.constant 0 : i32
    return %arg0, %c0_i32, %c0_i32_0, %c0_i32_1 : i32, i32, i32, i32
  }
  func.func @transform_1(%arg0: i32) -> (i32, i32, i32) {
    %c0_i32 = arith.constant 0 : i32
    %c0_i32_0 = arith.constant 0 : i32
    %c0_i32_1 = arith.constant 0 : i32
    %c0_i32_2 = arith.constant 0 : i32
    return %c0_i32, %c0_i32_0, %c0_i32_1 : i32, i32, i32
  }
  func.func @transform_2(%arg0: i32) -> (i32, i32) {
    %c0_i32 = arith.constant 0 : i32
    %c0_i32_0 = arith.constant 0 : i32
    %c0_i32_1 = arith.constant 0 : i32
    return %c0_i32, %c0_i32_0 : i32, i32
  }
  func.func @transform_3(%arg0: i32) -> (i32, i32, i32, i32) {
    %c0_i32 = arith.constant 0 : i32
    %c0_i32_0 = arith.constant 0 : i32
    %c0_i32_1 = arith.constant 0 : i32
    %c0_i32_2 = arith.constant 0 : i32
    return %arg0, %c0_i32, %c0_i32_0, %c0_i32_1 : i32, i32, i32, i32
  }
  func.func @transform_4(%arg0: i32) -> (i32, i32, i32, i32) {
    %c0_i32 = arith.constant 0 : i32
    %c0_i32_0 = arith.constant 0 : i32
    %c0_i32_1 = arith.constant 0 : i32
    %c0_i32_2 = arith.constant 0 : i32
    return %arg0, %c0_i32, %c0_i32_0, %c0_i32_1 : i32, i32, i32, i32
  }
}

module attributes {stable_mosaic.version = 11 : i64} {
  func.func @kernel(%arg0: i32, %arg1: memref<32x576xbf16, #tpu.memory_space<vmem>>, %arg2: memref<576x256xbf16, #tpu.memory_space<vmem>>, %arg3: memref<1x256xf32, #tpu.memory_space<vmem>>, %arg4: memref<32x256xbf16, #tpu.memory_space<vmem>>) attributes {dimension_semantics = [#tpu.dimension_semantics<parallel>], iteration_bounds = array<i64: 1>, scalar_prefetch = 0 : i64, scratch_operands = 0 : i64, tpu.core_type = #tpu.core_type<tc>, window_params = [{transform_indices = @transform_0, window_bounds = array<i64: 32, 576>}, {pipeline_mode = #tpu.pipeline_mode<synchronous>, transform_indices = @transform_1, window_bounds = array<i64: 576, 256>}, {pipeline_mode = #tpu.pipeline_mode<synchronous>, transform_indices = @transform_2, window_bounds = array<i64: 1, 256>}, {transform_indices = @transform_3, window_bounds = array<i64: 32, 256>}]} {
    %c0 = arith.constant 0 : index
    %c0_0 = arith.constant 0 : index
    %0 = vector.load %arg1[%c0, %c0_0] : memref<32x576xbf16, #tpu.memory_space<vmem>>, vector<32x576xbf16>
    %c0_1 = arith.constant 0 : index
    %c0_2 = arith.constant 0 : index
    %1 = vector.load %arg2[%c0_1, %c0_2] : memref<576x256xbf16, #tpu.memory_space<vmem>>, vector<576x256xbf16>
    %cst = arith.constant dense<0.000000e+00> : vector<32x256xf32>
    %2 = tpu.matmul %0, %1, %cst {dimension_numbers = #tpu.dot_dimension_numbers<[1], [0], [0], [1], [0, 0, 1, 1], [], []>} : vector<32x576xbf16>, vector<576x256xbf16>, vector<32x256xf32> -> vector<32x256xf32>
    %c0_3 = arith.constant 0 : index
    %c0_4 = arith.constant 0 : index
    %3 = vector.load %arg3[%c0_3, %c0_4] : memref<1x256xf32, #tpu.memory_space<vmem>>, vector<1x256xf32>
    %4 = vector.broadcast %3 : vector<1x256xf32> to vector<32x256xf32>
    %5 = arith.addf %2, %4 : vector<32x256xf32>
    %6 = tpu.iota {dimensions = array<i32: 1>} : vector<32x256xi32>
    %c128_i32 = arith.constant 128 : i32
    %7 = vector.broadcast %c128_i32 : i32 to vector<32x256xi32>
    %8 = arith.cmpi slt, %6, %7 : vector<32x256xi32>
    %cst_5 = arith.constant 0.000000e+00 : f32
    %9 = vector.broadcast %cst_5 : f32 to vector<32x256xf32>
    %10 = arith.maximumf %5, %9 : vector<32x256xf32>
    %11 = arith.select %8, %10, %5 : vector<32x256xi1>, vector<32x256xf32>
    %12 = arith.truncf %11 : vector<32x256xf32> to vector<32x256xbf16>
    %c0_6 = arith.constant 0 : index
    %c0_7 = arith.constant 0 : index
    %13 = vector.load %arg4[%c0_6, %c0_7] : memref<32x256xbf16, #tpu.memory_space<vmem>>, vector<32x256xbf16>
    tpu.vector_store %arg4[%c0_6, %c0_7], %12 {strides = array<i32>} : memref<32x256xbf16, #tpu.memory_space<vmem>>, vector<32x256xbf16>,
    return
  }
  func.func @transform_0(%arg0: i32) -> (i32, i32) {
    %c0_i32 = arith.constant 0 : i32
    %c0_i32_0 = arith.constant 0 : i32
    return %arg0, %c0_i32 : i32, i32
  }
  func.func @transform_1(%arg0: i32) -> (i32, i32) {
    %c0_i32 = arith.constant 0 : i32
    %c0_i32_0 = arith.constant 0 : i32
    %c0_i32_1 = arith.constant 0 : i32
    return %c0_i32, %c0_i32_0 : i32, i32
  }
  func.func @transform_2(%arg0: i32) -> (i32, i32) {
    %c0_i32 = arith.constant 0 : i32
    %c0_i32_0 = arith.constant 0 : i32
    %c0_i32_1 = arith.constant 0 : i32
    return %c0_i32, %c0_i32_0 : i32, i32
  }
  func.func @transform_3(%arg0: i32) -> (i32, i32) {
    %c0_i32 = arith.constant 0 : i32
    %c0_i32_0 = arith.constant 0 : i32
    return %arg0, %c0_i32 : i32, i32
  }
}

module attributes {stable_mosaic.version = 11 : i64} {
  func.func @kernel(%arg0: i32, %arg1: memref<1x6x6x128xbf16, #tpu.memory_space<vmem>>, %arg2: memref<9x128x128xbf16, #tpu.memory_space<vmem>>, %arg3: memref<1x128xf32, #tpu.memory_space<vmem>>, %arg4: memref<1x4x4x128xbf16, #tpu.memory_space<vmem>>, %arg5: memref<1x4x4x128xbf16, #tpu.memory_space<vmem>>) attributes {dimension_semantics = [#tpu.dimension_semantics<parallel>], iteration_bounds = array<i64: 2>, scalar_prefetch = 0 : i64, scratch_operands = 0 : i64, tpu.core_type = #tpu.core_type<tc>, window_params = [{transform_indices = @transform_0, window_bounds = array<i64: 1, 6, 6, 128>}, {pipeline_mode = #tpu.pipeline_mode<synchronous>, transform_indices = @transform_1, window_bounds = array<i64: 9, 128, 128>}, {pipeline_mode = #tpu.pipeline_mode<synchronous>, transform_indices = @transform_2, window_bounds = array<i64: 1, 128>}, {transform_indices = @transform_3, window_bounds = array<i64: 1, 4, 4, 128>}, {transform_indices = @transform_4, window_bounds = array<i64: 1, 4, 4, 128>}]} {
    %c0 = arith.constant 0 : index
    %c0_0 = arith.constant 0 : index
    %c0_1 = arith.constant 0 : index
    %c0_2 = arith.constant 0 : index
    %0 = vector.load %arg1[%c0, %c0_0, %c0_1, %c0_2] : memref<1x6x6x128xbf16, #tpu.memory_space<vmem>>, vector<1x6x6x128xbf16>
    %1 = vector.shape_cast %0 : vector<1x6x6x128xbf16> to vector<6x6x128xbf16>
    %cst = arith.constant 0.000000e+00 : f32
    %2 = vector.broadcast %cst : f32 to vector<16x128xf32>
    %3 = vector.extract_strided_slice %1 {offsets = [0, 0, 0], sizes = [4, 4, 128], strides = [1, 1, 1]} : vector<6x6x128xbf16> to vector<4x4x128xbf16>
    %4 = vector.shape_cast %3 : vector<4x4x128xbf16> to vector<16x128xbf16>
    %c0_3 = arith.constant 0 : index
    %c0_4 = arith.constant 0 : index
    %c0_5 = arith.constant 0 : index
    %5 = vector.load %arg2[%c0_3, %c0_4, %c0_5] : memref<9x128x128xbf16, #tpu.memory_space<vmem>>, vector<1x128x128xbf16>
    %6 = vector.shape_cast %5 : vector<1x128x128xbf16> to vector<128x128xbf16>
    %cst_6 = arith.constant dense<0.000000e+00> : vector<16x128xf32>
    %7 = tpu.matmul %4, %6, %cst_6 {dimension_numbers = #tpu.dot_dimension_numbers<[1], [0], [0], [1], [0, 0, 1, 1], [], []>} : vector<16x128xbf16>, vector<128x128xbf16>, vector<16x128xf32> -> vector<16x128xf32>
    %8 = arith.addf %2, %7 : vector<16x128xf32>
    %9 = vector.extract_strided_slice %1 {offsets = [0, 1, 0], sizes = [4, 4, 128], strides = [1, 1, 1]} : vector<6x6x128xbf16> to vector<4x4x128xbf16>
    %10 = vector.shape_cast %9 : vector<4x4x128xbf16> to vector<16x128xbf16>
    %c1 = arith.constant 1 : index
    %c0_7 = arith.constant 0 : index
    %c0_8 = arith.constant 0 : index
    %11 = vector.load %arg2[%c1, %c0_7, %c0_8] : memref<9x128x128xbf16, #tpu.memory_space<vmem>>, vector<1x128x128xbf16>
    %12 = vector.shape_cast %11 : vector<1x128x128xbf16> to vector<128x128xbf16>
    %cst_9 = arith.constant dense<0.000000e+00> : vector<16x128xf32>
    %13 = tpu.matmul %10, %12, %cst_9 {dimension_numbers = #tpu.dot_dimension_numbers<[1], [0], [0], [1], [0, 0, 1, 1], [], []>} : vector<16x128xbf16>, vector<128x128xbf16>, vector<16x128xf32> -> vector<16x128xf32>
    %14 = arith.addf %8, %13 : vector<16x128xf32>
    %15 = vector.extract_strided_slice %1 {offsets = [0, 2, 0], sizes = [4, 4, 128], strides = [1, 1, 1]} : vector<6x6x128xbf16> to vector<4x4x128xbf16>
    %16 = vector.shape_cast %15 : vector<4x4x128xbf16> to vector<16x128xbf16>
    %c2 = arith.constant 2 : index
    %c0_10 = arith.constant 0 : index
    %c0_11 = arith.constant 0 : index
    %17 = vector.load %arg2[%c2, %c0_10, %c0_11] : memref<9x128x128xbf16, #tpu.memory_space<vmem>>, vector<1x128x128xbf16>
    %18 = vector.shape_cast %17 : vector<1x128x128xbf16> to vector<128x128xbf16>
    %cst_12 = arith.constant dense<0.000000e+00> : vector<16x128xf32>
    %19 = tpu.matmul %16, %18, %cst_12 {dimension_numbers = #tpu.dot_dimension_numbers<[1], [0], [0], [1], [0, 0, 1, 1], [], []>} : vector<16x128xbf16>, vector<128x128xbf16>, vector<16x128xf32> -> vector<16x128xf32>
    %20 = arith.addf %14, %19 : vector<16x128xf32>
    %21 = vector.extract_strided_slice %1 {offsets = [1, 0, 0], sizes = [4, 4, 128], strides = [1, 1, 1]} : vector<6x6x128xbf16> to vector<4x4x128xbf16>
    %22 = vector.shape_cast %21 : vector<4x4x128xbf16> to vector<16x128xbf16>
    %c3 = arith.constant 3 : index
    %c0_13 = arith.constant 0 : index
    %c0_14 = arith.constant 0 : index
    %23 = vector.load %arg2[%c3, %c0_13, %c0_14] : memref<9x128x128xbf16, #tpu.memory_space<vmem>>, vector<1x128x128xbf16>
    %24 = vector.shape_cast %23 : vector<1x128x128xbf16> to vector<128x128xbf16>
    %cst_15 = arith.constant dense<0.000000e+00> : vector<16x128xf32>
    %25 = tpu.matmul %22, %24, %cst_15 {dimension_numbers = #tpu.dot_dimension_numbers<[1], [0], [0], [1], [0, 0, 1, 1], [], []>} : vector<16x128xbf16>, vector<128x128xbf16>, vector<16x128xf32> -> vector<16x128xf32>
    %26 = arith.addf %20, %25 : vector<16x128xf32>
    %27 = vector.extract_strided_slice %1 {offsets = [1, 1, 0], sizes = [4, 4, 128], strides = [1, 1, 1]} : vector<6x6x128xbf16> to vector<4x4x128xbf16>
    %28 = vector.shape_cast %27 : vector<4x4x128xbf16> to vector<16x128xbf16>
    %c4 = arith.constant 4 : index
    %c0_16 = arith.constant 0 : index
    %c0_17 = arith.constant 0 : index
    %29 = vector.load %arg2[%c4, %c0_16, %c0_17] : memref<9x128x128xbf16, #tpu.memory_space<vmem>>, vector<1x128x128xbf16>
    %30 = vector.shape_cast %29 : vector<1x128x128xbf16> to vector<128x128xbf16>
    %cst_18 = arith.constant dense<0.000000e+00> : vector<16x128xf32>
    %31 = tpu.matmul %28, %30, %cst_18 {dimension_numbers = #tpu.dot_dimension_numbers<[1], [0], [0], [1], [0, 0, 1, 1], [], []>} : vector<16x128xbf16>, vector<128x128xbf16>, vector<16x128xf32> -> vector<16x128xf32>
    %32 = arith.addf %26, %31 : vector<16x128xf32>
    %33 = vector.extract_strided_slice %1 {offsets = [1, 2, 0], sizes = [4, 4, 128], strides = [1, 1, 1]} : vector<6x6x128xbf16> to vector<4x4x128xbf16>
    %34 = vector.shape_cast %33 : vector<4x4x128xbf16> to vector<16x128xbf16>
    %c5 = arith.constant 5 : index
    %c0_19 = arith.constant 0 : index
    %c0_20 = arith.constant 0 : index
    %35 = vector.load %arg2[%c5, %c0_19, %c0_20] : memref<9x128x128xbf16, #tpu.memory_space<vmem>>, vector<1x128x128xbf16>
    %36 = vector.shape_cast %35 : vector<1x128x128xbf16> to vector<128x128xbf16>
    %cst_21 = arith.constant dense<0.000000e+00> : vector<16x128xf32>
    %37 = tpu.matmul %34, %36, %cst_21 {dimension_numbers = #tpu.dot_dimension_numbers<[1], [0], [0], [1], [0, 0, 1, 1], [], []>} : vector<16x128xbf16>, vector<128x128xbf16>, vector<16x128xf32> -> vector<16x128xf32>
    %38 = arith.addf %32, %37 : vector<16x128xf32>
    %39 = vector.extract_strided_slice %1 {offsets = [2, 0, 0], sizes = [4, 4, 128], strides = [1, 1, 1]} : vector<6x6x128xbf16> to vector<4x4x128xbf16>
    %40 = vector.shape_cast %39 : vector<4x4x128xbf16> to vector<16x128xbf16>
    %c6 = arith.constant 6 : index
    %c0_22 = arith.constant 0 : index
    %c0_23 = arith.constant 0 : index
    %41 = vector.load %arg2[%c6, %c0_22, %c0_23] : memref<9x128x128xbf16, #tpu.memory_space<vmem>>, vector<1x128x128xbf16>
    %42 = vector.shape_cast %41 : vector<1x128x128xbf16> to vector<128x128xbf16>
    %cst_24 = arith.constant dense<0.000000e+00> : vector<16x128xf32>
    %43 = tpu.matmul %40, %42, %cst_24 {dimension_numbers = #tpu.dot_dimension_numbers<[1], [0], [0], [1], [0, 0, 1, 1], [], []>} : vector<16x128xbf16>, vector<128x128xbf16>, vector<16x128xf32> -> vector<16x128xf32>
    %44 = arith.addf %38, %43 : vector<16x128xf32>
    %45 = vector.extract_strided_slice %1 {offsets = [2, 1, 0], sizes = [4, 4, 128], strides = [1, 1, 1]} : vector<6x6x128xbf16> to vector<4x4x128xbf16>
    %46 = vector.shape_cast %45 : vector<4x4x128xbf16> to vector<16x128xbf16>
    %c7 = arith.constant 7 : index
    %c0_25 = arith.constant 0 : index
    %c0_26 = arith.constant 0 : index
    %47 = vector.load %arg2[%c7, %c0_25, %c0_26] : memref<9x128x128xbf16, #tpu.memory_space<vmem>>, vector<1x128x128xbf16>
    %48 = vector.shape_cast %47 : vector<1x128x128xbf16> to vector<128x128xbf16>
    %cst_27 = arith.constant dense<0.000000e+00> : vector<16x128xf32>
    %49 = tpu.matmul %46, %48, %cst_27 {dimension_numbers = #tpu.dot_dimension_numbers<[1], [0], [0], [1], [0, 0, 1, 1], [], []>} : vector<16x128xbf16>, vector<128x128xbf16>, vector<16x128xf32> -> vector<16x128xf32>
    %50 = arith.addf %44, %49 : vector<16x128xf32>
    %51 = vector.extract_strided_slice %1 {offsets = [2, 2, 0], sizes = [4, 4, 128], strides = [1, 1, 1]} : vector<6x6x128xbf16> to vector<4x4x128xbf16>
    %52 = vector.shape_cast %51 : vector<4x4x128xbf16> to vector<16x128xbf16>
    %c8 = arith.constant 8 : index
    %c0_28 = arith.constant 0 : index
    %c0_29 = arith.constant 0 : index
    %53 = vector.load %arg2[%c8, %c0_28, %c0_29] : memref<9x128x128xbf16, #tpu.memory_space<vmem>>, vector<1x128x128xbf16>
    %54 = vector.shape_cast %53 : vector<1x128x128xbf16> to vector<128x128xbf16>
    %cst_30 = arith.constant dense<0.000000e+00> : vector<16x128xf32>
    %55 = tpu.matmul %52, %54, %cst_30 {dimension_numbers = #tpu.dot_dimension_numbers<[1], [0], [0], [1], [0, 0, 1, 1], [], []>} : vector<16x128xbf16>, vector<128x128xbf16>, vector<16x128xf32> -> vector<16x128xf32>
    %56 = arith.addf %50, %55 : vector<16x128xf32>
    %c0_31 = arith.constant 0 : index
    %c0_32 = arith.constant 0 : index
    %57 = vector.load %arg3[%c0_31, %c0_32] : memref<1x128xf32, #tpu.memory_space<vmem>>, vector<1x128xf32>
    %58 = vector.broadcast %57 : vector<1x128xf32> to vector<16x128xf32>
    %59 = arith.addf %56, %58 : vector<16x128xf32>
    %c0_33 = arith.constant 0 : index
    %c0_34 = arith.constant 0 : index
    %c0_35 = arith.constant 0 : index
    %c0_36 = arith.constant 0 : index
    %60 = vector.load %arg4[%c0_33, %c0_34, %c0_35, %c0_36] : memref<1x4x4x128xbf16, #tpu.memory_space<vmem>>, vector<1x4x4x128xbf16>
    %61 = vector.shape_cast %60 : vector<1x4x4x128xbf16> to vector<4x4x128xbf16>
    %62 = vector.shape_cast %61 : vector<4x4x128xbf16> to vector<16x128xbf16>
    %63 = arith.extf %62 : vector<16x128xbf16> to vector<16x128xf32>
    %64 = arith.addf %59, %63 : vector<16x128xf32>
    %cst_37 = arith.constant 0.000000e+00 : f32
    %65 = vector.broadcast %cst_37 : f32 to vector<16x128xf32>
    %66 = arith.maximumf %64, %65 : vector<16x128xf32>
    %67 = vector.shape_cast %66 : vector<16x128xf32> to vector<4x4x128xf32>
    %68 = arith.truncf %67 : vector<4x4x128xf32> to vector<4x4x128xbf16>
    %c0_38 = arith.constant 0 : index
    %c0_39 = arith.constant 0 : index
    %c0_40 = arith.constant 0 : index
    %c0_41 = arith.constant 0 : index
    %69 = vector.load %arg5[%c0_38, %c0_39, %c0_40, %c0_41] : memref<1x4x4x128xbf16, #tpu.memory_space<vmem>>, vector<1x4x4x128xbf16>
    %70 = vector.shape_cast %69 : vector<1x4x4x128xbf16> to vector<4x4x128xbf16>
    %71 = vector.shape_cast %68 : vector<4x4x128xbf16> to vector<1x4x4x128xbf16>
    tpu.vector_store %arg5[%c0_38, %c0_39, %c0_40, %c0_41], %71 {strides = array<i32>} : memref<1x4x4x128xbf16, #tpu.memory_space<vmem>>, vector<1x4x4x128xbf16>,
    return
  }
  func.func @transform_0(%arg0: i32) -> (i32, i32, i32, i32) {
    %c0_i32 = arith.constant 0 : i32
    %c0_i32_0 = arith.constant 0 : i32
    %c0_i32_1 = arith.constant 0 : i32
    %c0_i32_2 = arith.constant 0 : i32
    return %arg0, %c0_i32, %c0_i32_0, %c0_i32_1 : i32, i32, i32, i32
  }
  func.func @transform_1(%arg0: i32) -> (i32, i32, i32) {
    %c0_i32 = arith.constant 0 : i32
    %c0_i32_0 = arith.constant 0 : i32
    %c0_i32_1 = arith.constant 0 : i32
    %c0_i32_2 = arith.constant 0 : i32
    return %c0_i32, %c0_i32_0, %c0_i32_1 : i32, i32, i32
  }
  func.func @transform_2(%arg0: i32) -> (i32, i32) {
    %c0_i32 = arith.constant 0 : i32
    %c0_i32_0 = arith.constant 0 : i32
    %c0_i32_1 = arith.constant 0 : i32
    return %c0_i32, %c0_i32_0 : i32, i32
  }
  func.func @transform_3(%arg0: i32) -> (i32, i32, i32, i32) {
    %c0_i32 = arith.constant 0 : i32
    %c0_i32_0 = arith.constant 0 : i32
    %c0_i32_1 = arith.constant 0 : i32
    %c0_i32_2 = arith.constant 0 : i32
    return %arg0, %c0_i32, %c0_i32_0, %c0_i32_1 : i32, i32, i32, i32
  }
  func.func @transform_4(%arg0: i32) -> (i32, i32, i32, i32) {
    %c0_i32 = arith.constant 0 : i32
    %c0_i32_0 = arith.constant 0 : i32
    %c0_i32_1 = arith.constant 0 : i32
    %c0_i32_2 = arith.constant 0 : i32
    return %arg0, %c0_i32, %c0_i32_0, %c0_i32_1 : i32, i32, i32, i32
  }
}

module attributes {stable_mosaic.version = 11 : i64} {
  func.func @kernel(%arg0: i32, %arg1: memref<1x6x6x128xbf16, #tpu.memory_space<vmem>>, %arg2: memref<9x128x128xbf16, #tpu.memory_space<vmem>>, %arg3: memref<1x128xf32, #tpu.memory_space<vmem>>, %arg4: memref<1x4x4x128xbf16, #tpu.memory_space<vmem>>) attributes {dimension_semantics = [#tpu.dimension_semantics<parallel>], iteration_bounds = array<i64: 2>, scalar_prefetch = 0 : i64, scratch_operands = 0 : i64, tpu.core_type = #tpu.core_type<tc>, window_params = [{transform_indices = @transform_0, window_bounds = array<i64: 1, 6, 6, 128>}, {pipeline_mode = #tpu.pipeline_mode<synchronous>, transform_indices = @transform_1, window_bounds = array<i64: 9, 128, 128>}, {pipeline_mode = #tpu.pipeline_mode<synchronous>, transform_indices = @transform_2, window_bounds = array<i64: 1, 128>}, {transform_indices = @transform_3, window_bounds = array<i64: 1, 4, 4, 128>}]} {
    %c0 = arith.constant 0 : index
    %c0_0 = arith.constant 0 : index
    %c0_1 = arith.constant 0 : index
    %c0_2 = arith.constant 0 : index
    %0 = vector.load %arg1[%c0, %c0_0, %c0_1, %c0_2] : memref<1x6x6x128xbf16, #tpu.memory_space<vmem>>, vector<1x6x6x128xbf16>
    %1 = vector.shape_cast %0 : vector<1x6x6x128xbf16> to vector<6x6x128xbf16>
    %cst = arith.constant 0.000000e+00 : f32
    %2 = vector.broadcast %cst : f32 to vector<16x128xf32>
    %3 = vector.extract_strided_slice %1 {offsets = [0, 0, 0], sizes = [4, 4, 128], strides = [1, 1, 1]} : vector<6x6x128xbf16> to vector<4x4x128xbf16>
    %4 = vector.shape_cast %3 : vector<4x4x128xbf16> to vector<16x128xbf16>
    %c0_3 = arith.constant 0 : index
    %c0_4 = arith.constant 0 : index
    %c0_5 = arith.constant 0 : index
    %5 = vector.load %arg2[%c0_3, %c0_4, %c0_5] : memref<9x128x128xbf16, #tpu.memory_space<vmem>>, vector<1x128x128xbf16>
    %6 = vector.shape_cast %5 : vector<1x128x128xbf16> to vector<128x128xbf16>
    %cst_6 = arith.constant dense<0.000000e+00> : vector<16x128xf32>
    %7 = tpu.matmul %4, %6, %cst_6 {dimension_numbers = #tpu.dot_dimension_numbers<[1], [0], [0], [1], [0, 0, 1, 1], [], []>} : vector<16x128xbf16>, vector<128x128xbf16>, vector<16x128xf32> -> vector<16x128xf32>
    %8 = arith.addf %2, %7 : vector<16x128xf32>
    %9 = vector.extract_strided_slice %1 {offsets = [0, 1, 0], sizes = [4, 4, 128], strides = [1, 1, 1]} : vector<6x6x128xbf16> to vector<4x4x128xbf16>
    %10 = vector.shape_cast %9 : vector<4x4x128xbf16> to vector<16x128xbf16>
    %c1 = arith.constant 1 : index
    %c0_7 = arith.constant 0 : index
    %c0_8 = arith.constant 0 : index
    %11 = vector.load %arg2[%c1, %c0_7, %c0_8] : memref<9x128x128xbf16, #tpu.memory_space<vmem>>, vector<1x128x128xbf16>
    %12 = vector.shape_cast %11 : vector<1x128x128xbf16> to vector<128x128xbf16>
    %cst_9 = arith.constant dense<0.000000e+00> : vector<16x128xf32>
    %13 = tpu.matmul %10, %12, %cst_9 {dimension_numbers = #tpu.dot_dimension_numbers<[1], [0], [0], [1], [0, 0, 1, 1], [], []>} : vector<16x128xbf16>, vector<128x128xbf16>, vector<16x128xf32> -> vector<16x128xf32>
    %14 = arith.addf %8, %13 : vector<16x128xf32>
    %15 = vector.extract_strided_slice %1 {offsets = [0, 2, 0], sizes = [4, 4, 128], strides = [1, 1, 1]} : vector<6x6x128xbf16> to vector<4x4x128xbf16>
    %16 = vector.shape_cast %15 : vector<4x4x128xbf16> to vector<16x128xbf16>
    %c2 = arith.constant 2 : index
    %c0_10 = arith.constant 0 : index
    %c0_11 = arith.constant 0 : index
    %17 = vector.load %arg2[%c2, %c0_10, %c0_11] : memref<9x128x128xbf16, #tpu.memory_space<vmem>>, vector<1x128x128xbf16>
    %18 = vector.shape_cast %17 : vector<1x128x128xbf16> to vector<128x128xbf16>
    %cst_12 = arith.constant dense<0.000000e+00> : vector<16x128xf32>
    %19 = tpu.matmul %16, %18, %cst_12 {dimension_numbers = #tpu.dot_dimension_numbers<[1], [0], [0], [1], [0, 0, 1, 1], [], []>} : vector<16x128xbf16>, vector<128x128xbf16>, vector<16x128xf32> -> vector<16x128xf32>
    %20 = arith.addf %14, %19 : vector<16x128xf32>
    %21 = vector.extract_strided_slice %1 {offsets = [1, 0, 0], sizes = [4, 4, 128], strides = [1, 1, 1]} : vector<6x6x128xbf16> to vector<4x4x128xbf16>
    %22 = vector.shape_cast %21 : vector<4x4x128xbf16> to vector<16x128xbf16>
    %c3 = arith.constant 3 : index
    %c0_13 = arith.constant 0 : index
    %c0_14 = arith.constant 0 : index
    %23 = vector.load %arg2[%c3, %c0_13, %c0_14] : memref<9x128x128xbf16, #tpu.memory_space<vmem>>, vector<1x128x128xbf16>
    %24 = vector.shape_cast %23 : vector<1x128x128xbf16> to vector<128x128xbf16>
    %cst_15 = arith.constant dense<0.000000e+00> : vector<16x128xf32>
    %25 = tpu.matmul %22, %24, %cst_15 {dimension_numbers = #tpu.dot_dimension_numbers<[1], [0], [0], [1], [0, 0, 1, 1], [], []>} : vector<16x128xbf16>, vector<128x128xbf16>, vector<16x128xf32> -> vector<16x128xf32>
    %26 = arith.addf %20, %25 : vector<16x128xf32>
    %27 = vector.extract_strided_slice %1 {offsets = [1, 1, 0], sizes = [4, 4, 128], strides = [1, 1, 1]} : vector<6x6x128xbf16> to vector<4x4x128xbf16>
    %28 = vector.shape_cast %27 : vector<4x4x128xbf16> to vector<16x128xbf16>
    %c4 = arith.constant 4 : index
    %c0_16 = arith.constant 0 : index
    %c0_17 = arith.constant 0 : index
    %29 = vector.load %arg2[%c4, %c0_16, %c0_17] : memref<9x128x128xbf16, #tpu.memory_space<vmem>>, vector<1x128x128xbf16>
    %30 = vector.shape_cast %29 : vector<1x128x128xbf16> to vector<128x128xbf16>
    %cst_18 = arith.constant dense<0.000000e+00> : vector<16x128xf32>
    %31 = tpu.matmul %28, %30, %cst_18 {dimension_numbers = #tpu.dot_dimension_numbers<[1], [0], [0], [1], [0, 0, 1, 1], [], []>} : vector<16x128xbf16>, vector<128x128xbf16>, vector<16x128xf32> -> vector<16x128xf32>
    %32 = arith.addf %26, %31 : vector<16x128xf32>
    %33 = vector.extract_strided_slice %1 {offsets = [1, 2, 0], sizes = [4, 4, 128], strides = [1, 1, 1]} : vector<6x6x128xbf16> to vector<4x4x128xbf16>
    %34 = vector.shape_cast %33 : vector<4x4x128xbf16> to vector<16x128xbf16>
    %c5 = arith.constant 5 : index
    %c0_19 = arith.constant 0 : index
    %c0_20 = arith.constant 0 : index
    %35 = vector.load %arg2[%c5, %c0_19, %c0_20] : memref<9x128x128xbf16, #tpu.memory_space<vmem>>, vector<1x128x128xbf16>
    %36 = vector.shape_cast %35 : vector<1x128x128xbf16> to vector<128x128xbf16>
    %cst_21 = arith.constant dense<0.000000e+00> : vector<16x128xf32>
    %37 = tpu.matmul %34, %36, %cst_21 {dimension_numbers = #tpu.dot_dimension_numbers<[1], [0], [0], [1], [0, 0, 1, 1], [], []>} : vector<16x128xbf16>, vector<128x128xbf16>, vector<16x128xf32> -> vector<16x128xf32>
    %38 = arith.addf %32, %37 : vector<16x128xf32>
    %39 = vector.extract_strided_slice %1 {offsets = [2, 0, 0], sizes = [4, 4, 128], strides = [1, 1, 1]} : vector<6x6x128xbf16> to vector<4x4x128xbf16>
    %40 = vector.shape_cast %39 : vector<4x4x128xbf16> to vector<16x128xbf16>
    %c6 = arith.constant 6 : index
    %c0_22 = arith.constant 0 : index
    %c0_23 = arith.constant 0 : index
    %41 = vector.load %arg2[%c6, %c0_22, %c0_23] : memref<9x128x128xbf16, #tpu.memory_space<vmem>>, vector<1x128x128xbf16>
    %42 = vector.shape_cast %41 : vector<1x128x128xbf16> to vector<128x128xbf16>
    %cst_24 = arith.constant dense<0.000000e+00> : vector<16x128xf32>
    %43 = tpu.matmul %40, %42, %cst_24 {dimension_numbers = #tpu.dot_dimension_numbers<[1], [0], [0], [1], [0, 0, 1, 1], [], []>} : vector<16x128xbf16>, vector<128x128xbf16>, vector<16x128xf32> -> vector<16x128xf32>
    %44 = arith.addf %38, %43 : vector<16x128xf32>
    %45 = vector.extract_strided_slice %1 {offsets = [2, 1, 0], sizes = [4, 4, 128], strides = [1, 1, 1]} : vector<6x6x128xbf16> to vector<4x4x128xbf16>
    %46 = vector.shape_cast %45 : vector<4x4x128xbf16> to vector<16x128xbf16>
    %c7 = arith.constant 7 : index
    %c0_25 = arith.constant 0 : index
    %c0_26 = arith.constant 0 : index
    %47 = vector.load %arg2[%c7, %c0_25, %c0_26] : memref<9x128x128xbf16, #tpu.memory_space<vmem>>, vector<1x128x128xbf16>
    %48 = vector.shape_cast %47 : vector<1x128x128xbf16> to vector<128x128xbf16>
    %cst_27 = arith.constant dense<0.000000e+00> : vector<16x128xf32>
    %49 = tpu.matmul %46, %48, %cst_27 {dimension_numbers = #tpu.dot_dimension_numbers<[1], [0], [0], [1], [0, 0, 1, 1], [], []>} : vector<16x128xbf16>, vector<128x128xbf16>, vector<16x128xf32> -> vector<16x128xf32>
    %50 = arith.addf %44, %49 : vector<16x128xf32>
    %51 = vector.extract_strided_slice %1 {offsets = [2, 2, 0], sizes = [4, 4, 128], strides = [1, 1, 1]} : vector<6x6x128xbf16> to vector<4x4x128xbf16>
    %52 = vector.shape_cast %51 : vector<4x4x128xbf16> to vector<16x128xbf16>
    %c8 = arith.constant 8 : index
    %c0_28 = arith.constant 0 : index
    %c0_29 = arith.constant 0 : index
    %53 = vector.load %arg2[%c8, %c0_28, %c0_29] : memref<9x128x128xbf16, #tpu.memory_space<vmem>>, vector<1x128x128xbf16>
    %54 = vector.shape_cast %53 : vector<1x128x128xbf16> to vector<128x128xbf16>
    %cst_30 = arith.constant dense<0.000000e+00> : vector<16x128xf32>
    %55 = tpu.matmul %52, %54, %cst_30 {dimension_numbers = #tpu.dot_dimension_numbers<[1], [0], [0], [1], [0, 0, 1, 1], [], []>} : vector<16x128xbf16>, vector<128x128xbf16>, vector<16x128xf32> -> vector<16x128xf32>
    %56 = arith.addf %50, %55 : vector<16x128xf32>
    %c0_31 = arith.constant 0 : index
    %c0_32 = arith.constant 0 : index
    %57 = vector.load %arg3[%c0_31, %c0_32] : memref<1x128xf32, #tpu.memory_space<vmem>>, vector<1x128xf32>
    %58 = vector.broadcast %57 : vector<1x128xf32> to vector<16x128xf32>
    %59 = arith.addf %56, %58 : vector<16x128xf32>
    %cst_33 = arith.constant 0.000000e+00 : f32
    %60 = vector.broadcast %cst_33 : f32 to vector<16x128xf32>
    %61 = arith.maximumf %59, %60 : vector<16x128xf32>
    %62 = vector.shape_cast %61 : vector<16x128xf32> to vector<4x4x128xf32>
    %63 = arith.truncf %62 : vector<4x4x128xf32> to vector<4x4x128xbf16>
    %c0_34 = arith.constant 0 : index
    %c0_35 = arith.constant 0 : index
    %c0_36 = arith.constant 0 : index
    %c0_37 = arith.constant 0 : index
    %64 = vector.load %arg4[%c0_34, %c0_35, %c0_36, %c0_37] : memref<1x4x4x128xbf16, #tpu.memory_space<vmem>>, vector<1x4x4x128xbf16>
    %65 = vector.shape_cast %64 : vector<1x4x4x128xbf16> to vector<4x4x128xbf16>
    %66 = vector.shape_cast %63 : vector<4x4x128xbf16> to vector<1x4x4x128xbf16>
    tpu.vector_store %arg4[%c0_34, %c0_35, %c0_36, %c0_37], %66 {strides = array<i32>} : memref<1x4x4x128xbf16, #tpu.memory_space<vmem>>, vector<1x4x4x128xbf16>,
    return
  }
  func.func @transform_0(%arg0: i32) -> (i32, i32, i32, i32) {
    %c0_i32 = arith.constant 0 : i32
    %c0_i32_0 = arith.constant 0 : i32
    %c0_i32_1 = arith.constant 0 : i32
    %c0_i32_2 = arith.constant 0 : i32
    return %arg0, %c0_i32, %c0_i32_0, %c0_i32_1 : i32, i32, i32, i32
  }
  func.func @transform_1(%arg0: i32) -> (i32, i32, i32) {
    %c0_i32 = arith.constant 0 : i32
    %c0_i32_0 = arith.constant 0 : i32
    %c0_i32_1 = arith.constant 0 : i32
    %c0_i32_2 = arith.constant 0 : i32
    return %c0_i32, %c0_i32_0, %c0_i32_1 : i32, i32, i32
  }
  func.func @transform_2(%arg0: i32) -> (i32, i32) {
    %c0_i32 = arith.constant 0 : i32
    %c0_i32_0 = arith.constant 0 : i32
    %c0_i32_1 = arith.constant 0 : i32
    return %c0_i32, %c0_i32_0 : i32, i32
  }
  func.func @transform_3(%arg0: i32) -> (i32, i32, i32, i32) {
    %c0_i32 = arith.constant 0 : i32
    %c0_i32_0 = arith.constant 0 : i32
    %c0_i32_1 = arith.constant 0 : i32
    %c0_i32_2 = arith.constant 0 : i32
    return %arg0, %c0_i32, %c0_i32_0, %c0_i32_1 : i32, i32, i32, i32
  }
}

module attributes {stable_mosaic.version = 11 : i64} {
  func.func @kernel(%arg0: i32, %arg1: memref<8x1152xbf16, #tpu.memory_space<vmem>>, %arg2: memref<1152x512xbf16, #tpu.memory_space<vmem>>, %arg3: memref<1x512xf32, #tpu.memory_space<vmem>>, %arg4: memref<8x512xbf16, #tpu.memory_space<vmem>>) attributes {dimension_semantics = [#tpu.dimension_semantics<parallel>], iteration_bounds = array<i64: 1>, scalar_prefetch = 0 : i64, scratch_operands = 0 : i64, tpu.core_type = #tpu.core_type<tc>, window_params = [{transform_indices = @transform_0, window_bounds = array<i64: 8, 1152>}, {pipeline_mode = #tpu.pipeline_mode<synchronous>, transform_indices = @transform_1, window_bounds = array<i64: 1152, 512>}, {pipeline_mode = #tpu.pipeline_mode<synchronous>, transform_indices = @transform_2, window_bounds = array<i64: 1, 512>}, {transform_indices = @transform_3, window_bounds = array<i64: 8, 512>}]} {
    %c0 = arith.constant 0 : index
    %c0_0 = arith.constant 0 : index
    %0 = vector.load %arg1[%c0, %c0_0] : memref<8x1152xbf16, #tpu.memory_space<vmem>>, vector<8x1152xbf16>
    %c0_1 = arith.constant 0 : index
    %c0_2 = arith.constant 0 : index
    %1 = vector.load %arg2[%c0_1, %c0_2] : memref<1152x512xbf16, #tpu.memory_space<vmem>>, vector<1152x512xbf16>
    %cst = arith.constant dense<0.000000e+00> : vector<8x512xf32>
    %2 = tpu.matmul %0, %1, %cst {dimension_numbers = #tpu.dot_dimension_numbers<[1], [0], [0], [1], [0, 0, 1, 1], [], []>} : vector<8x1152xbf16>, vector<1152x512xbf16>, vector<8x512xf32> -> vector<8x512xf32>
    %c0_3 = arith.constant 0 : index
    %c0_4 = arith.constant 0 : index
    %3 = vector.load %arg3[%c0_3, %c0_4] : memref<1x512xf32, #tpu.memory_space<vmem>>, vector<1x512xf32>
    %4 = vector.broadcast %3 : vector<1x512xf32> to vector<8x512xf32>
    %5 = arith.addf %2, %4 : vector<8x512xf32>
    %6 = tpu.iota {dimensions = array<i32: 1>} : vector<8x512xi32>
    %c256_i32 = arith.constant 256 : i32
    %7 = vector.broadcast %c256_i32 : i32 to vector<8x512xi32>
    %8 = arith.cmpi slt, %6, %7 : vector<8x512xi32>
    %cst_5 = arith.constant 0.000000e+00 : f32
    %9 = vector.broadcast %cst_5 : f32 to vector<8x512xf32>
    %10 = arith.maximumf %5, %9 : vector<8x512xf32>
    %11 = arith.select %8, %10, %5 : vector<8x512xi1>, vector<8x512xf32>
    %12 = arith.truncf %11 : vector<8x512xf32> to vector<8x512xbf16>
    %c0_6 = arith.constant 0 : index
    %c0_7 = arith.constant 0 : index
    %13 = vector.load %arg4[%c0_6, %c0_7] : memref<8x512xbf16, #tpu.memory_space<vmem>>, vector<8x512xbf16>
    tpu.vector_store %arg4[%c0_6, %c0_7], %12 {strides = array<i32>} : memref<8x512xbf16, #tpu.memory_space<vmem>>, vector<8x512xbf16>,
    return
  }
  func.func @transform_0(%arg0: i32) -> (i32, i32) {
    %c0_i32 = arith.constant 0 : i32
    %c0_i32_0 = arith.constant 0 : i32
    return %arg0, %c0_i32 : i32, i32
  }
  func.func @transform_1(%arg0: i32) -> (i32, i32) {
    %c0_i32 = arith.constant 0 : i32
    %c0_i32_0 = arith.constant 0 : i32
    %c0_i32_1 = arith.constant 0 : i32
    return %c0_i32, %c0_i32_0 : i32, i32
  }
  func.func @transform_2(%arg0: i32) -> (i32, i32) {
    %c0_i32 = arith.constant 0 : i32
    %c0_i32_0 = arith.constant 0 : i32
    %c0_i32_1 = arith.constant 0 : i32
    return %c0_i32, %c0_i32_0 : i32, i32
  }
  func.func @transform_3(%arg0: i32) -> (i32, i32) {
    %c0_i32 = arith.constant 0 : i32
    %c0_i32_0 = arith.constant 0 : i32
    return %arg0, %c0_i32 : i32, i32
  }
}

module attributes {stable_mosaic.version = 11 : i64} {
  func.func @kernel(%arg0: i32, %arg1: memref<1x4x4x256xbf16, #tpu.memory_space<vmem>>, %arg2: memref<9x256x256xbf16, #tpu.memory_space<vmem>>, %arg3: memref<1x256xf32, #tpu.memory_space<vmem>>, %arg4: memref<1x2x2x256xbf16, #tpu.memory_space<vmem>>, %arg5: memref<1x2x2x256xbf16, #tpu.memory_space<vmem>>) attributes {dimension_semantics = [#tpu.dimension_semantics<parallel>], iteration_bounds = array<i64: 2>, scalar_prefetch = 0 : i64, scratch_operands = 0 : i64, tpu.core_type = #tpu.core_type<tc>, window_params = [{transform_indices = @transform_0, window_bounds = array<i64: 1, 4, 4, 256>}, {pipeline_mode = #tpu.pipeline_mode<synchronous>, transform_indices = @transform_1, window_bounds = array<i64: 9, 256, 256>}, {pipeline_mode = #tpu.pipeline_mode<synchronous>, transform_indices = @transform_2, window_bounds = array<i64: 1, 256>}, {transform_indices = @transform_3, window_bounds = array<i64: 1, 2, 2, 256>}, {transform_indices = @transform_4, window_bounds = array<i64: 1, 2, 2, 256>}]} {
    %c0 = arith.constant 0 : index
    %c0_0 = arith.constant 0 : index
    %c0_1 = arith.constant 0 : index
    %c0_2 = arith.constant 0 : index
    %0 = vector.load %arg1[%c0, %c0_0, %c0_1, %c0_2] : memref<1x4x4x256xbf16, #tpu.memory_space<vmem>>, vector<1x4x4x256xbf16>
    %1 = vector.shape_cast %0 : vector<1x4x4x256xbf16> to vector<4x4x256xbf16>
    %cst = arith.constant 0.000000e+00 : f32
    %2 = vector.broadcast %cst : f32 to vector<4x256xf32>
    %3 = vector.extract_strided_slice %1 {offsets = [0, 0, 0], sizes = [2, 2, 256], strides = [1, 1, 1]} : vector<4x4x256xbf16> to vector<2x2x256xbf16>
    %4 = vector.shape_cast %3 : vector<2x2x256xbf16> to vector<4x256xbf16>
    %c0_3 = arith.constant 0 : index
    %c0_4 = arith.constant 0 : index
    %c0_5 = arith.constant 0 : index
    %5 = vector.load %arg2[%c0_3, %c0_4, %c0_5] : memref<9x256x256xbf16, #tpu.memory_space<vmem>>, vector<1x256x256xbf16>
    %6 = vector.shape_cast %5 : vector<1x256x256xbf16> to vector<256x256xbf16>
    %cst_6 = arith.constant dense<0.000000e+00> : vector<4x256xf32>
    %7 = tpu.matmul %4, %6, %cst_6 {dimension_numbers = #tpu.dot_dimension_numbers<[1], [0], [0], [1], [0, 0, 1, 1], [], []>} : vector<4x256xbf16>, vector<256x256xbf16>, vector<4x256xf32> -> vector<4x256xf32>
    %8 = arith.addf %2, %7 : vector<4x256xf32>
    %9 = vector.extract_strided_slice %1 {offsets = [0, 1, 0], sizes = [2, 2, 256], strides = [1, 1, 1]} : vector<4x4x256xbf16> to vector<2x2x256xbf16>
    %10 = vector.shape_cast %9 : vector<2x2x256xbf16> to vector<4x256xbf16>
    %c1 = arith.constant 1 : index
    %c0_7 = arith.constant 0 : index
    %c0_8 = arith.constant 0 : index
    %11 = vector.load %arg2[%c1, %c0_7, %c0_8] : memref<9x256x256xbf16, #tpu.memory_space<vmem>>, vector<1x256x256xbf16>
    %12 = vector.shape_cast %11 : vector<1x256x256xbf16> to vector<256x256xbf16>
    %cst_9 = arith.constant dense<0.000000e+00> : vector<4x256xf32>
    %13 = tpu.matmul %10, %12, %cst_9 {dimension_numbers = #tpu.dot_dimension_numbers<[1], [0], [0], [1], [0, 0, 1, 1], [], []>} : vector<4x256xbf16>, vector<256x256xbf16>, vector<4x256xf32> -> vector<4x256xf32>
    %14 = arith.addf %8, %13 : vector<4x256xf32>
    %15 = vector.extract_strided_slice %1 {offsets = [0, 2, 0], sizes = [2, 2, 256], strides = [1, 1, 1]} : vector<4x4x256xbf16> to vector<2x2x256xbf16>
    %16 = vector.shape_cast %15 : vector<2x2x256xbf16> to vector<4x256xbf16>
    %c2 = arith.constant 2 : index
    %c0_10 = arith.constant 0 : index
    %c0_11 = arith.constant 0 : index
    %17 = vector.load %arg2[%c2, %c0_10, %c0_11] : memref<9x256x256xbf16, #tpu.memory_space<vmem>>, vector<1x256x256xbf16>
    %18 = vector.shape_cast %17 : vector<1x256x256xbf16> to vector<256x256xbf16>
    %cst_12 = arith.constant dense<0.000000e+00> : vector<4x256xf32>
    %19 = tpu.matmul %16, %18, %cst_12 {dimension_numbers = #tpu.dot_dimension_numbers<[1], [0], [0], [1], [0, 0, 1, 1], [], []>} : vector<4x256xbf16>, vector<256x256xbf16>, vector<4x256xf32> -> vector<4x256xf32>
    %20 = arith.addf %14, %19 : vector<4x256xf32>
    %21 = vector.extract_strided_slice %1 {offsets = [1, 0, 0], sizes = [2, 2, 256], strides = [1, 1, 1]} : vector<4x4x256xbf16> to vector<2x2x256xbf16>
    %22 = vector.shape_cast %21 : vector<2x2x256xbf16> to vector<4x256xbf16>
    %c3 = arith.constant 3 : index
    %c0_13 = arith.constant 0 : index
    %c0_14 = arith.constant 0 : index
    %23 = vector.load %arg2[%c3, %c0_13, %c0_14] : memref<9x256x256xbf16, #tpu.memory_space<vmem>>, vector<1x256x256xbf16>
    %24 = vector.shape_cast %23 : vector<1x256x256xbf16> to vector<256x256xbf16>
    %cst_15 = arith.constant dense<0.000000e+00> : vector<4x256xf32>
    %25 = tpu.matmul %22, %24, %cst_15 {dimension_numbers = #tpu.dot_dimension_numbers<[1], [0], [0], [1], [0, 0, 1, 1], [], []>} : vector<4x256xbf16>, vector<256x256xbf16>, vector<4x256xf32> -> vector<4x256xf32>
    %26 = arith.addf %20, %25 : vector<4x256xf32>
    %27 = vector.extract_strided_slice %1 {offsets = [1, 1, 0], sizes = [2, 2, 256], strides = [1, 1, 1]} : vector<4x4x256xbf16> to vector<2x2x256xbf16>
    %28 = vector.shape_cast %27 : vector<2x2x256xbf16> to vector<4x256xbf16>
    %c4 = arith.constant 4 : index
    %c0_16 = arith.constant 0 : index
    %c0_17 = arith.constant 0 : index
    %29 = vector.load %arg2[%c4, %c0_16, %c0_17] : memref<9x256x256xbf16, #tpu.memory_space<vmem>>, vector<1x256x256xbf16>
    %30 = vector.shape_cast %29 : vector<1x256x256xbf16> to vector<256x256xbf16>
    %cst_18 = arith.constant dense<0.000000e+00> : vector<4x256xf32>
    %31 = tpu.matmul %28, %30, %cst_18 {dimension_numbers = #tpu.dot_dimension_numbers<[1], [0], [0], [1], [0, 0, 1, 1], [], []>} : vector<4x256xbf16>, vector<256x256xbf16>, vector<4x256xf32> -> vector<4x256xf32>
    %32 = arith.addf %26, %31 : vector<4x256xf32>
    %33 = vector.extract_strided_slice %1 {offsets = [1, 2, 0], sizes = [2, 2, 256], strides = [1, 1, 1]} : vector<4x4x256xbf16> to vector<2x2x256xbf16>
    %34 = vector.shape_cast %33 : vector<2x2x256xbf16> to vector<4x256xbf16>
    %c5 = arith.constant 5 : index
    %c0_19 = arith.constant 0 : index
    %c0_20 = arith.constant 0 : index
    %35 = vector.load %arg2[%c5, %c0_19, %c0_20] : memref<9x256x256xbf16, #tpu.memory_space<vmem>>, vector<1x256x256xbf16>
    %36 = vector.shape_cast %35 : vector<1x256x256xbf16> to vector<256x256xbf16>
    %cst_21 = arith.constant dense<0.000000e+00> : vector<4x256xf32>
    %37 = tpu.matmul %34, %36, %cst_21 {dimension_numbers = #tpu.dot_dimension_numbers<[1], [0], [0], [1], [0, 0, 1, 1], [], []>} : vector<4x256xbf16>, vector<256x256xbf16>, vector<4x256xf32> -> vector<4x256xf32>
    %38 = arith.addf %32, %37 : vector<4x256xf32>
    %39 = vector.extract_strided_slice %1 {offsets = [2, 0, 0], sizes = [2, 2, 256], strides = [1, 1, 1]} : vector<4x4x256xbf16> to vector<2x2x256xbf16>
    %40 = vector.shape_cast %39 : vector<2x2x256xbf16> to vector<4x256xbf16>
    %c6 = arith.constant 6 : index
    %c0_22 = arith.constant 0 : index
    %c0_23 = arith.constant 0 : index
    %41 = vector.load %arg2[%c6, %c0_22, %c0_23] : memref<9x256x256xbf16, #tpu.memory_space<vmem>>, vector<1x256x256xbf16>
    %42 = vector.shape_cast %41 : vector<1x256x256xbf16> to vector<256x256xbf16>
    %cst_24 = arith.constant dense<0.000000e+00> : vector<4x256xf32>
    %43 = tpu.matmul %40, %42, %cst_24 {dimension_numbers = #tpu.dot_dimension_numbers<[1], [0], [0], [1], [0, 0, 1, 1], [], []>} : vector<4x256xbf16>, vector<256x256xbf16>, vector<4x256xf32> -> vector<4x256xf32>
    %44 = arith.addf %38, %43 : vector<4x256xf32>
    %45 = vector.extract_strided_slice %1 {offsets = [2, 1, 0], sizes = [2, 2, 256], strides = [1, 1, 1]} : vector<4x4x256xbf16> to vector<2x2x256xbf16>
    %46 = vector.shape_cast %45 : vector<2x2x256xbf16> to vector<4x256xbf16>
    %c7 = arith.constant 7 : index
    %c0_25 = arith.constant 0 : index
    %c0_26 = arith.constant 0 : index
    %47 = vector.load %arg2[%c7, %c0_25, %c0_26] : memref<9x256x256xbf16, #tpu.memory_space<vmem>>, vector<1x256x256xbf16>
    %48 = vector.shape_cast %47 : vector<1x256x256xbf16> to vector<256x256xbf16>
    %cst_27 = arith.constant dense<0.000000e+00> : vector<4x256xf32>
    %49 = tpu.matmul %46, %48, %cst_27 {dimension_numbers = #tpu.dot_dimension_numbers<[1], [0], [0], [1], [0, 0, 1, 1], [], []>} : vector<4x256xbf16>, vector<256x256xbf16>, vector<4x256xf32> -> vector<4x256xf32>
    %50 = arith.addf %44, %49 : vector<4x256xf32>
    %51 = vector.extract_strided_slice %1 {offsets = [2, 2, 0], sizes = [2, 2, 256], strides = [1, 1, 1]} : vector<4x4x256xbf16> to vector<2x2x256xbf16>
    %52 = vector.shape_cast %51 : vector<2x2x256xbf16> to vector<4x256xbf16>
    %c8 = arith.constant 8 : index
    %c0_28 = arith.constant 0 : index
    %c0_29 = arith.constant 0 : index
    %53 = vector.load %arg2[%c8, %c0_28, %c0_29] : memref<9x256x256xbf16, #tpu.memory_space<vmem>>, vector<1x256x256xbf16>
    %54 = vector.shape_cast %53 : vector<1x256x256xbf16> to vector<256x256xbf16>
    %cst_30 = arith.constant dense<0.000000e+00> : vector<4x256xf32>
    %55 = tpu.matmul %52, %54, %cst_30 {dimension_numbers = #tpu.dot_dimension_numbers<[1], [0], [0], [1], [0, 0, 1, 1], [], []>} : vector<4x256xbf16>, vector<256x256xbf16>, vector<4x256xf32> -> vector<4x256xf32>
    %56 = arith.addf %50, %55 : vector<4x256xf32>
    %c0_31 = arith.constant 0 : index
    %c0_32 = arith.constant 0 : index
    %57 = vector.load %arg3[%c0_31, %c0_32] : memref<1x256xf32, #tpu.memory_space<vmem>>, vector<1x256xf32>
    %58 = vector.broadcast %57 : vector<1x256xf32> to vector<4x256xf32>
    %59 = arith.addf %56, %58 : vector<4x256xf32>
    %c0_33 = arith.constant 0 : index
    %c0_34 = arith.constant 0 : index
    %c0_35 = arith.constant 0 : index
    %c0_36 = arith.constant 0 : index
    %60 = vector.load %arg4[%c0_33, %c0_34, %c0_35, %c0_36] : memref<1x2x2x256xbf16, #tpu.memory_space<vmem>>, vector<1x2x2x256xbf16>
    %61 = vector.shape_cast %60 : vector<1x2x2x256xbf16> to vector<2x2x256xbf16>
    %62 = vector.shape_cast %61 : vector<2x2x256xbf16> to vector<4x256xbf16>
    %63 = arith.extf %62 : vector<4x256xbf16> to vector<4x256xf32>
    %64 = arith.addf %59, %63 : vector<4x256xf32>
    %cst_37 = arith.constant 0.000000e+00 : f32
    %65 = vector.broadcast %cst_37 : f32 to vector<4x256xf32>
    %66 = arith.maximumf %64, %65 : vector<4x256xf32>
    %67 = vector.shape_cast %66 : vector<4x256xf32> to vector<2x2x256xf32>
    %68 = arith.truncf %67 : vector<2x2x256xf32> to vector<2x2x256xbf16>
    %c0_38 = arith.constant 0 : index
    %c0_39 = arith.constant 0 : index
    %c0_40 = arith.constant 0 : index
    %c0_41 = arith.constant 0 : index
    %69 = vector.load %arg5[%c0_38, %c0_39, %c0_40, %c0_41] : memref<1x2x2x256xbf16, #tpu.memory_space<vmem>>, vector<1x2x2x256xbf16>
    %70 = vector.shape_cast %69 : vector<1x2x2x256xbf16> to vector<2x2x256xbf16>
    %71 = vector.shape_cast %68 : vector<2x2x256xbf16> to vector<1x2x2x256xbf16>
    tpu.vector_store %arg5[%c0_38, %c0_39, %c0_40, %c0_41], %71 {strides = array<i32>} : memref<1x2x2x256xbf16, #tpu.memory_space<vmem>>, vector<1x2x2x256xbf16>,
    return
  }
  func.func @transform_0(%arg0: i32) -> (i32, i32, i32, i32) {
    %c0_i32 = arith.constant 0 : i32
    %c0_i32_0 = arith.constant 0 : i32
    %c0_i32_1 = arith.constant 0 : i32
    %c0_i32_2 = arith.constant 0 : i32
    return %arg0, %c0_i32, %c0_i32_0, %c0_i32_1 : i32, i32, i32, i32
  }
  func.func @transform_1(%arg0: i32) -> (i32, i32, i32) {
    %c0_i32 = arith.constant 0 : i32
    %c0_i32_0 = arith.constant 0 : i32
    %c0_i32_1 = arith.constant 0 : i32
    %c0_i32_2 = arith.constant 0 : i32
    return %c0_i32, %c0_i32_0, %c0_i32_1 : i32, i32, i32
  }
  func.func @transform_2(%arg0: i32) -> (i32, i32) {
    %c0_i32 = arith.constant 0 : i32
    %c0_i32_0 = arith.constant 0 : i32
    %c0_i32_1 = arith.constant 0 : i32
    return %c0_i32, %c0_i32_0 : i32, i32
  }
  func.func @transform_3(%arg0: i32) -> (i32, i32, i32, i32) {
    %c0_i32 = arith.constant 0 : i32
    %c0_i32_0 = arith.constant 0 : i32
    %c0_i32_1 = arith.constant 0 : i32
    %c0_i32_2 = arith.constant 0 : i32
    return %arg0, %c0_i32, %c0_i32_0, %c0_i32_1 : i32, i32, i32, i32
  }
  func.func @transform_4(%arg0: i32) -> (i32, i32, i32, i32) {
    %c0_i32 = arith.constant 0 : i32
    %c0_i32_0 = arith.constant 0 : i32
    %c0_i32_1 = arith.constant 0 : i32
    %c0_i32_2 = arith.constant 0 : i32
    return %arg0, %c0_i32, %c0_i32_0, %c0_i32_1 : i32, i32, i32, i32
  }
}

module attributes {stable_mosaic.version = 11 : i64} {
  func.func @kernel(%arg0: i32, %arg1: memref<1x4x4x256xbf16, #tpu.memory_space<vmem>>, %arg2: memref<9x256x256xbf16, #tpu.memory_space<vmem>>, %arg3: memref<1x256xf32, #tpu.memory_space<vmem>>, %arg4: memref<1x2x2x256xbf16, #tpu.memory_space<vmem>>) attributes {dimension_semantics = [#tpu.dimension_semantics<parallel>], iteration_bounds = array<i64: 2>, scalar_prefetch = 0 : i64, scratch_operands = 0 : i64, tpu.core_type = #tpu.core_type<tc>, window_params = [{transform_indices = @transform_0, window_bounds = array<i64: 1, 4, 4, 256>}, {pipeline_mode = #tpu.pipeline_mode<synchronous>, transform_indices = @transform_1, window_bounds = array<i64: 9, 256, 256>}, {pipeline_mode = #tpu.pipeline_mode<synchronous>, transform_indices = @transform_2, window_bounds = array<i64: 1, 256>}, {transform_indices = @transform_3, window_bounds = array<i64: 1, 2, 2, 256>}]} {
    %c0 = arith.constant 0 : index
    %c0_0 = arith.constant 0 : index
    %c0_1 = arith.constant 0 : index
    %c0_2 = arith.constant 0 : index
    %0 = vector.load %arg1[%c0, %c0_0, %c0_1, %c0_2] : memref<1x4x4x256xbf16, #tpu.memory_space<vmem>>, vector<1x4x4x256xbf16>
    %1 = vector.shape_cast %0 : vector<1x4x4x256xbf16> to vector<4x4x256xbf16>
    %cst = arith.constant 0.000000e+00 : f32
    %2 = vector.broadcast %cst : f32 to vector<4x256xf32>
    %3 = vector.extract_strided_slice %1 {offsets = [0, 0, 0], sizes = [2, 2, 256], strides = [1, 1, 1]} : vector<4x4x256xbf16> to vector<2x2x256xbf16>
    %4 = vector.shape_cast %3 : vector<2x2x256xbf16> to vector<4x256xbf16>
    %c0_3 = arith.constant 0 : index
    %c0_4 = arith.constant 0 : index
    %c0_5 = arith.constant 0 : index
    %5 = vector.load %arg2[%c0_3, %c0_4, %c0_5] : memref<9x256x256xbf16, #tpu.memory_space<vmem>>, vector<1x256x256xbf16>
    %6 = vector.shape_cast %5 : vector<1x256x256xbf16> to vector<256x256xbf16>
    %cst_6 = arith.constant dense<0.000000e+00> : vector<4x256xf32>
    %7 = tpu.matmul %4, %6, %cst_6 {dimension_numbers = #tpu.dot_dimension_numbers<[1], [0], [0], [1], [0, 0, 1, 1], [], []>} : vector<4x256xbf16>, vector<256x256xbf16>, vector<4x256xf32> -> vector<4x256xf32>
    %8 = arith.addf %2, %7 : vector<4x256xf32>
    %9 = vector.extract_strided_slice %1 {offsets = [0, 1, 0], sizes = [2, 2, 256], strides = [1, 1, 1]} : vector<4x4x256xbf16> to vector<2x2x256xbf16>
    %10 = vector.shape_cast %9 : vector<2x2x256xbf16> to vector<4x256xbf16>
    %c1 = arith.constant 1 : index
    %c0_7 = arith.constant 0 : index
    %c0_8 = arith.constant 0 : index
    %11 = vector.load %arg2[%c1, %c0_7, %c0_8] : memref<9x256x256xbf16, #tpu.memory_space<vmem>>, vector<1x256x256xbf16>
    %12 = vector.shape_cast %11 : vector<1x256x256xbf16> to vector<256x256xbf16>
    %cst_9 = arith.constant dense<0.000000e+00> : vector<4x256xf32>
    %13 = tpu.matmul %10, %12, %cst_9 {dimension_numbers = #tpu.dot_dimension_numbers<[1], [0], [0], [1], [0, 0, 1, 1], [], []>} : vector<4x256xbf16>, vector<256x256xbf16>, vector<4x256xf32> -> vector<4x256xf32>
    %14 = arith.addf %8, %13 : vector<4x256xf32>
    %15 = vector.extract_strided_slice %1 {offsets = [0, 2, 0], sizes = [2, 2, 256], strides = [1, 1, 1]} : vector<4x4x256xbf16> to vector<2x2x256xbf16>
    %16 = vector.shape_cast %15 : vector<2x2x256xbf16> to vector<4x256xbf16>
    %c2 = arith.constant 2 : index
    %c0_10 = arith.constant 0 : index
    %c0_11 = arith.constant 0 : index
    %17 = vector.load %arg2[%c2, %c0_10, %c0_11] : memref<9x256x256xbf16, #tpu.memory_space<vmem>>, vector<1x256x256xbf16>
    %18 = vector.shape_cast %17 : vector<1x256x256xbf16> to vector<256x256xbf16>
    %cst_12 = arith.constant dense<0.000000e+00> : vector<4x256xf32>
    %19 = tpu.matmul %16, %18, %cst_12 {dimension_numbers = #tpu.dot_dimension_numbers<[1], [0], [0], [1], [0, 0, 1, 1], [], []>} : vector<4x256xbf16>, vector<256x256xbf16>, vector<4x256xf32> -> vector<4x256xf32>
    %20 = arith.addf %14, %19 : vector<4x256xf32>
    %21 = vector.extract_strided_slice %1 {offsets = [1, 0, 0], sizes = [2, 2, 256], strides = [1, 1, 1]} : vector<4x4x256xbf16> to vector<2x2x256xbf16>
    %22 = vector.shape_cast %21 : vector<2x2x256xbf16> to vector<4x256xbf16>
    %c3 = arith.constant 3 : index
    %c0_13 = arith.constant 0 : index
    %c0_14 = arith.constant 0 : index
    %23 = vector.load %arg2[%c3, %c0_13, %c0_14] : memref<9x256x256xbf16, #tpu.memory_space<vmem>>, vector<1x256x256xbf16>
    %24 = vector.shape_cast %23 : vector<1x256x256xbf16> to vector<256x256xbf16>
    %cst_15 = arith.constant dense<0.000000e+00> : vector<4x256xf32>
    %25 = tpu.matmul %22, %24, %cst_15 {dimension_numbers = #tpu.dot_dimension_numbers<[1], [0], [0], [1], [0, 0, 1, 1], [], []>} : vector<4x256xbf16>, vector<256x256xbf16>, vector<4x256xf32> -> vector<4x256xf32>
    %26 = arith.addf %20, %25 : vector<4x256xf32>
    %27 = vector.extract_strided_slice %1 {offsets = [1, 1, 0], sizes = [2, 2, 256], strides = [1, 1, 1]} : vector<4x4x256xbf16> to vector<2x2x256xbf16>
    %28 = vector.shape_cast %27 : vector<2x2x256xbf16> to vector<4x256xbf16>
    %c4 = arith.constant 4 : index
    %c0_16 = arith.constant 0 : index
    %c0_17 = arith.constant 0 : index
    %29 = vector.load %arg2[%c4, %c0_16, %c0_17] : memref<9x256x256xbf16, #tpu.memory_space<vmem>>, vector<1x256x256xbf16>
    %30 = vector.shape_cast %29 : vector<1x256x256xbf16> to vector<256x256xbf16>
    %cst_18 = arith.constant dense<0.000000e+00> : vector<4x256xf32>
    %31 = tpu.matmul %28, %30, %cst_18 {dimension_numbers = #tpu.dot_dimension_numbers<[1], [0], [0], [1], [0, 0, 1, 1], [], []>} : vector<4x256xbf16>, vector<256x256xbf16>, vector<4x256xf32> -> vector<4x256xf32>
    %32 = arith.addf %26, %31 : vector<4x256xf32>
    %33 = vector.extract_strided_slice %1 {offsets = [1, 2, 0], sizes = [2, 2, 256], strides = [1, 1, 1]} : vector<4x4x256xbf16> to vector<2x2x256xbf16>
    %34 = vector.shape_cast %33 : vector<2x2x256xbf16> to vector<4x256xbf16>
    %c5 = arith.constant 5 : index
    %c0_19 = arith.constant 0 : index
    %c0_20 = arith.constant 0 : index
    %35 = vector.load %arg2[%c5, %c0_19, %c0_20] : memref<9x256x256xbf16, #tpu.memory_space<vmem>>, vector<1x256x256xbf16>
    %36 = vector.shape_cast %35 : vector<1x256x256xbf16> to vector<256x256xbf16>
    %cst_21 = arith.constant dense<0.000000e+00> : vector<4x256xf32>
    %37 = tpu.matmul %34, %36, %cst_21 {dimension_numbers = #tpu.dot_dimension_numbers<[1], [0], [0], [1], [0, 0, 1, 1], [], []>} : vector<4x256xbf16>, vector<256x256xbf16>, vector<4x256xf32> -> vector<4x256xf32>
    %38 = arith.addf %32, %37 : vector<4x256xf32>
    %39 = vector.extract_strided_slice %1 {offsets = [2, 0, 0], sizes = [2, 2, 256], strides = [1, 1, 1]} : vector<4x4x256xbf16> to vector<2x2x256xbf16>
    %40 = vector.shape_cast %39 : vector<2x2x256xbf16> to vector<4x256xbf16>
    %c6 = arith.constant 6 : index
    %c0_22 = arith.constant 0 : index
    %c0_23 = arith.constant 0 : index
    %41 = vector.load %arg2[%c6, %c0_22, %c0_23] : memref<9x256x256xbf16, #tpu.memory_space<vmem>>, vector<1x256x256xbf16>
    %42 = vector.shape_cast %41 : vector<1x256x256xbf16> to vector<256x256xbf16>
    %cst_24 = arith.constant dense<0.000000e+00> : vector<4x256xf32>
    %43 = tpu.matmul %40, %42, %cst_24 {dimension_numbers = #tpu.dot_dimension_numbers<[1], [0], [0], [1], [0, 0, 1, 1], [], []>} : vector<4x256xbf16>, vector<256x256xbf16>, vector<4x256xf32> -> vector<4x256xf32>
    %44 = arith.addf %38, %43 : vector<4x256xf32>
    %45 = vector.extract_strided_slice %1 {offsets = [2, 1, 0], sizes = [2, 2, 256], strides = [1, 1, 1]} : vector<4x4x256xbf16> to vector<2x2x256xbf16>
    %46 = vector.shape_cast %45 : vector<2x2x256xbf16> to vector<4x256xbf16>
    %c7 = arith.constant 7 : index
    %c0_25 = arith.constant 0 : index
    %c0_26 = arith.constant 0 : index
    %47 = vector.load %arg2[%c7, %c0_25, %c0_26] : memref<9x256x256xbf16, #tpu.memory_space<vmem>>, vector<1x256x256xbf16>
    %48 = vector.shape_cast %47 : vector<1x256x256xbf16> to vector<256x256xbf16>
    %cst_27 = arith.constant dense<0.000000e+00> : vector<4x256xf32>
    %49 = tpu.matmul %46, %48, %cst_27 {dimension_numbers = #tpu.dot_dimension_numbers<[1], [0], [0], [1], [0, 0, 1, 1], [], []>} : vector<4x256xbf16>, vector<256x256xbf16>, vector<4x256xf32> -> vector<4x256xf32>
    %50 = arith.addf %44, %49 : vector<4x256xf32>
    %51 = vector.extract_strided_slice %1 {offsets = [2, 2, 0], sizes = [2, 2, 256], strides = [1, 1, 1]} : vector<4x4x256xbf16> to vector<2x2x256xbf16>
    %52 = vector.shape_cast %51 : vector<2x2x256xbf16> to vector<4x256xbf16>
    %c8 = arith.constant 8 : index
    %c0_28 = arith.constant 0 : index
    %c0_29 = arith.constant 0 : index
    %53 = vector.load %arg2[%c8, %c0_28, %c0_29] : memref<9x256x256xbf16, #tpu.memory_space<vmem>>, vector<1x256x256xbf16>
    %54 = vector.shape_cast %53 : vector<1x256x256xbf16> to vector<256x256xbf16>
    %cst_30 = arith.constant dense<0.000000e+00> : vector<4x256xf32>
    %55 = tpu.matmul %52, %54, %cst_30 {dimension_numbers = #tpu.dot_dimension_numbers<[1], [0], [0], [1], [0, 0, 1, 1], [], []>} : vector<4x256xbf16>, vector<256x256xbf16>, vector<4x256xf32> -> vector<4x256xf32>
    %56 = arith.addf %50, %55 : vector<4x256xf32>
    %c0_31 = arith.constant 0 : index
    %c0_32 = arith.constant 0 : index
    %57 = vector.load %arg3[%c0_31, %c0_32] : memref<1x256xf32, #tpu.memory_space<vmem>>, vector<1x256xf32>
    %58 = vector.broadcast %57 : vector<1x256xf32> to vector<4x256xf32>
    %59 = arith.addf %56, %58 : vector<4x256xf32>
    %cst_33 = arith.constant 0.000000e+00 : f32
    %60 = vector.broadcast %cst_33 : f32 to vector<4x256xf32>
    %61 = arith.maximumf %59, %60 : vector<4x256xf32>
    %62 = vector.shape_cast %61 : vector<4x256xf32> to vector<2x2x256xf32>
    %63 = arith.truncf %62 : vector<2x2x256xf32> to vector<2x2x256xbf16>
    %c0_34 = arith.constant 0 : index
    %c0_35 = arith.constant 0 : index
    %c0_36 = arith.constant 0 : index
    %c0_37 = arith.constant 0 : index
    %64 = vector.load %arg4[%c0_34, %c0_35, %c0_36, %c0_37] : memref<1x2x2x256xbf16, #tpu.memory_space<vmem>>, vector<1x2x2x256xbf16>
    %65 = vector.shape_cast %64 : vector<1x2x2x256xbf16> to vector<2x2x256xbf16>
    %66 = vector.shape_cast %63 : vector<2x2x256xbf16> to vector<1x2x2x256xbf16>
    tpu.vector_store %arg4[%c0_34, %c0_35, %c0_36, %c0_37], %66 {strides = array<i32>} : memref<1x2x2x256xbf16, #tpu.memory_space<vmem>>, vector<1x2x2x256xbf16>,
    return
  }
  func.func @transform_0(%arg0: i32) -> (i32, i32, i32, i32) {
    %c0_i32 = arith.constant 0 : i32
    %c0_i32_0 = arith.constant 0 : i32
    %c0_i32_1 = arith.constant 0 : i32
    %c0_i32_2 = arith.constant 0 : i32
    return %arg0, %c0_i32, %c0_i32_0, %c0_i32_1 : i32, i32, i32, i32
  }
  func.func @transform_1(%arg0: i32) -> (i32, i32, i32) {
    %c0_i32 = arith.constant 0 : i32
    %c0_i32_0 = arith.constant 0 : i32
    %c0_i32_1 = arith.constant 0 : i32
    %c0_i32_2 = arith.constant 0 : i32
    return %c0_i32, %c0_i32_0, %c0_i32_1 : i32, i32, i32
  }
  func.func @transform_2(%arg0: i32) -> (i32, i32) {
    %c0_i32 = arith.constant 0 : i32
    %c0_i32_0 = arith.constant 0 : i32
    %c0_i32_1 = arith.constant 0 : i32
    return %c0_i32, %c0_i32_0 : i32, i32
  }
  func.func @transform_3(%arg0: i32) -> (i32, i32, i32, i32) {
    %c0_i32 = arith.constant 0 : i32
    %c0_i32_0 = arith.constant 0 : i32
    %c0_i32_1 = arith.constant 0 : i32
    %c0_i32_2 = arith.constant 0 : i32
    return %arg0, %c0_i32, %c0_i32_0, %c0_i32_1 : i32, i32, i32, i32
  }
}

module attributes {stable_mosaic.version = 11 : i64} {
  func.func @kernel(%arg0: i32, %arg1: memref<1x4x4x256xbf16, #tpu.memory_space<vmem>>, %arg2: memref<9x256x128xbf16, #tpu.memory_space<vmem>>, %arg3: memref<1x128xf32, #tpu.memory_space<vmem>>, %arg4: memref<1x2x2x128xbf16, #tpu.memory_space<vmem>>) attributes {dimension_semantics = [#tpu.dimension_semantics<parallel>], iteration_bounds = array<i64: 2>, scalar_prefetch = 0 : i64, scratch_operands = 0 : i64, tpu.core_type = #tpu.core_type<tc>, window_params = [{transform_indices = @transform_0, window_bounds = array<i64: 1, 4, 4, 256>}, {pipeline_mode = #tpu.pipeline_mode<synchronous>, transform_indices = @transform_1, window_bounds = array<i64: 9, 256, 128>}, {pipeline_mode = #tpu.pipeline_mode<synchronous>, transform_indices = @transform_2, window_bounds = array<i64: 1, 128>}, {transform_indices = @transform_3, window_bounds = array<i64: 1, 2, 2, 128>}]} {
    %c0 = arith.constant 0 : index
    %c0_0 = arith.constant 0 : index
    %c0_1 = arith.constant 0 : index
    %c0_2 = arith.constant 0 : index
    %0 = vector.load %arg1[%c0, %c0_0, %c0_1, %c0_2] : memref<1x4x4x256xbf16, #tpu.memory_space<vmem>>, vector<1x4x4x256xbf16>
    %1 = vector.shape_cast %0 : vector<1x4x4x256xbf16> to vector<4x4x256xbf16>
    %cst = arith.constant 0.000000e+00 : f32
    %2 = vector.broadcast %cst : f32 to vector<4x128xf32>
    %3 = vector.extract_strided_slice %1 {offsets = [0, 0, 0], sizes = [2, 2, 256], strides = [1, 1, 1]} : vector<4x4x256xbf16> to vector<2x2x256xbf16>
    %4 = vector.shape_cast %3 : vector<2x2x256xbf16> to vector<4x256xbf16>
    %c0_3 = arith.constant 0 : index
    %c0_4 = arith.constant 0 : index
    %c0_5 = arith.constant 0 : index
    %5 = vector.load %arg2[%c0_3, %c0_4, %c0_5] : memref<9x256x128xbf16, #tpu.memory_space<vmem>>, vector<1x256x128xbf16>
    %6 = vector.shape_cast %5 : vector<1x256x128xbf16> to vector<256x128xbf16>
    %cst_6 = arith.constant dense<0.000000e+00> : vector<4x128xf32>
    %7 = tpu.matmul %4, %6, %cst_6 {dimension_numbers = #tpu.dot_dimension_numbers<[1], [0], [0], [1], [0, 0, 1, 1], [], []>} : vector<4x256xbf16>, vector<256x128xbf16>, vector<4x128xf32> -> vector<4x128xf32>
    %8 = arith.addf %2, %7 : vector<4x128xf32>
    %9 = vector.extract_strided_slice %1 {offsets = [0, 1, 0], sizes = [2, 2, 256], strides = [1, 1, 1]} : vector<4x4x256xbf16> to vector<2x2x256xbf16>
    %10 = vector.shape_cast %9 : vector<2x2x256xbf16> to vector<4x256xbf16>
    %c1 = arith.constant 1 : index
    %c0_7 = arith.constant 0 : index
    %c0_8 = arith.constant 0 : index
    %11 = vector.load %arg2[%c1, %c0_7, %c0_8] : memref<9x256x128xbf16, #tpu.memory_space<vmem>>, vector<1x256x128xbf16>
    %12 = vector.shape_cast %11 : vector<1x256x128xbf16> to vector<256x128xbf16>
    %cst_9 = arith.constant dense<0.000000e+00> : vector<4x128xf32>
    %13 = tpu.matmul %10, %12, %cst_9 {dimension_numbers = #tpu.dot_dimension_numbers<[1], [0], [0], [1], [0, 0, 1, 1], [], []>} : vector<4x256xbf16>, vector<256x128xbf16>, vector<4x128xf32> -> vector<4x128xf32>
    %14 = arith.addf %8, %13 : vector<4x128xf32>
    %15 = vector.extract_strided_slice %1 {offsets = [0, 2, 0], sizes = [2, 2, 256], strides = [1, 1, 1]} : vector<4x4x256xbf16> to vector<2x2x256xbf16>
    %16 = vector.shape_cast %15 : vector<2x2x256xbf16> to vector<4x256xbf16>
    %c2 = arith.constant 2 : index
    %c0_10 = arith.constant 0 : index
    %c0_11 = arith.constant 0 : index
    %17 = vector.load %arg2[%c2, %c0_10, %c0_11] : memref<9x256x128xbf16, #tpu.memory_space<vmem>>, vector<1x256x128xbf16>
    %18 = vector.shape_cast %17 : vector<1x256x128xbf16> to vector<256x128xbf16>
    %cst_12 = arith.constant dense<0.000000e+00> : vector<4x128xf32>
    %19 = tpu.matmul %16, %18, %cst_12 {dimension_numbers = #tpu.dot_dimension_numbers<[1], [0], [0], [1], [0, 0, 1, 1], [], []>} : vector<4x256xbf16>, vector<256x128xbf16>, vector<4x128xf32> -> vector<4x128xf32>
    %20 = arith.addf %14, %19 : vector<4x128xf32>
    %21 = vector.extract_strided_slice %1 {offsets = [1, 0, 0], sizes = [2, 2, 256], strides = [1, 1, 1]} : vector<4x4x256xbf16> to vector<2x2x256xbf16>
    %22 = vector.shape_cast %21 : vector<2x2x256xbf16> to vector<4x256xbf16>
    %c3 = arith.constant 3 : index
    %c0_13 = arith.constant 0 : index
    %c0_14 = arith.constant 0 : index
    %23 = vector.load %arg2[%c3, %c0_13, %c0_14] : memref<9x256x128xbf16, #tpu.memory_space<vmem>>, vector<1x256x128xbf16>
    %24 = vector.shape_cast %23 : vector<1x256x128xbf16> to vector<256x128xbf16>
    %cst_15 = arith.constant dense<0.000000e+00> : vector<4x128xf32>
    %25 = tpu.matmul %22, %24, %cst_15 {dimension_numbers = #tpu.dot_dimension_numbers<[1], [0], [0], [1], [0, 0, 1, 1], [], []>} : vector<4x256xbf16>, vector<256x128xbf16>, vector<4x128xf32> -> vector<4x128xf32>
    %26 = arith.addf %20, %25 : vector<4x128xf32>
    %27 = vector.extract_strided_slice %1 {offsets = [1, 1, 0], sizes = [2, 2, 256], strides = [1, 1, 1]} : vector<4x4x256xbf16> to vector<2x2x256xbf16>
    %28 = vector.shape_cast %27 : vector<2x2x256xbf16> to vector<4x256xbf16>
    %c4 = arith.constant 4 : index
    %c0_16 = arith.constant 0 : index
    %c0_17 = arith.constant 0 : index
    %29 = vector.load %arg2[%c4, %c0_16, %c0_17] : memref<9x256x128xbf16, #tpu.memory_space<vmem>>, vector<1x256x128xbf16>
    %30 = vector.shape_cast %29 : vector<1x256x128xbf16> to vector<256x128xbf16>
    %cst_18 = arith.constant dense<0.000000e+00> : vector<4x128xf32>
    %31 = tpu.matmul %28, %30, %cst_18 {dimension_numbers = #tpu.dot_dimension_numbers<[1], [0], [0], [1], [0, 0, 1, 1], [], []>} : vector<4x256xbf16>, vector<256x128xbf16>, vector<4x128xf32> -> vector<4x128xf32>
    %32 = arith.addf %26, %31 : vector<4x128xf32>
    %33 = vector.extract_strided_slice %1 {offsets = [1, 2, 0], sizes = [2, 2, 256], strides = [1, 1, 1]} : vector<4x4x256xbf16> to vector<2x2x256xbf16>
    %34 = vector.shape_cast %33 : vector<2x2x256xbf16> to vector<4x256xbf16>
    %c5 = arith.constant 5 : index
    %c0_19 = arith.constant 0 : index
    %c0_20 = arith.constant 0 : index
    %35 = vector.load %arg2[%c5, %c0_19, %c0_20] : memref<9x256x128xbf16, #tpu.memory_space<vmem>>, vector<1x256x128xbf16>
    %36 = vector.shape_cast %35 : vector<1x256x128xbf16> to vector<256x128xbf16>
    %cst_21 = arith.constant dense<0.000000e+00> : vector<4x128xf32>
    %37 = tpu.matmul %34, %36, %cst_21 {dimension_numbers = #tpu.dot_dimension_numbers<[1], [0], [0], [1], [0, 0, 1, 1], [], []>} : vector<4x256xbf16>, vector<256x128xbf16>, vector<4x128xf32> -> vector<4x128xf32>
    %38 = arith.addf %32, %37 : vector<4x128xf32>
    %39 = vector.extract_strided_slice %1 {offsets = [2, 0, 0], sizes = [2, 2, 256], strides = [1, 1, 1]} : vector<4x4x256xbf16> to vector<2x2x256xbf16>
    %40 = vector.shape_cast %39 : vector<2x2x256xbf16> to vector<4x256xbf16>
    %c6 = arith.constant 6 : index
    %c0_22 = arith.constant 0 : index
    %c0_23 = arith.constant 0 : index
    %41 = vector.load %arg2[%c6, %c0_22, %c0_23] : memref<9x256x128xbf16, #tpu.memory_space<vmem>>, vector<1x256x128xbf16>
    %42 = vector.shape_cast %41 : vector<1x256x128xbf16> to vector<256x128xbf16>
    %cst_24 = arith.constant dense<0.000000e+00> : vector<4x128xf32>
    %43 = tpu.matmul %40, %42, %cst_24 {dimension_numbers = #tpu.dot_dimension_numbers<[1], [0], [0], [1], [0, 0, 1, 1], [], []>} : vector<4x256xbf16>, vector<256x128xbf16>, vector<4x128xf32> -> vector<4x128xf32>
    %44 = arith.addf %38, %43 : vector<4x128xf32>
    %45 = vector.extract_strided_slice %1 {offsets = [2, 1, 0], sizes = [2, 2, 256], strides = [1, 1, 1]} : vector<4x4x256xbf16> to vector<2x2x256xbf16>
    %46 = vector.shape_cast %45 : vector<2x2x256xbf16> to vector<4x256xbf16>
    %c7 = arith.constant 7 : index
    %c0_25 = arith.constant 0 : index
    %c0_26 = arith.constant 0 : index
    %47 = vector.load %arg2[%c7, %c0_25, %c0_26] : memref<9x256x128xbf16, #tpu.memory_space<vmem>>, vector<1x256x128xbf16>
    %48 = vector.shape_cast %47 : vector<1x256x128xbf16> to vector<256x128xbf16>
    %cst_27 = arith.constant dense<0.000000e+00> : vector<4x128xf32>
    %49 = tpu.matmul %46, %48, %cst_27 {dimension_numbers = #tpu.dot_dimension_numbers<[1], [0], [0], [1], [0, 0, 1, 1], [], []>} : vector<4x256xbf16>, vector<256x128xbf16>, vector<4x128xf32> -> vector<4x128xf32>
    %50 = arith.addf %44, %49 : vector<4x128xf32>
    %51 = vector.extract_strided_slice %1 {offsets = [2, 2, 0], sizes = [2, 2, 256], strides = [1, 1, 1]} : vector<4x4x256xbf16> to vector<2x2x256xbf16>
    %52 = vector.shape_cast %51 : vector<2x2x256xbf16> to vector<4x256xbf16>
    %c8 = arith.constant 8 : index
    %c0_28 = arith.constant 0 : index
    %c0_29 = arith.constant 0 : index
    %53 = vector.load %arg2[%c8, %c0_28, %c0_29] : memref<9x256x128xbf16, #tpu.memory_space<vmem>>, vector<1x256x128xbf16>
    %54 = vector.shape_cast %53 : vector<1x256x128xbf16> to vector<256x128xbf16>
    %cst_30 = arith.constant dense<0.000000e+00> : vector<4x128xf32>
    %55 = tpu.matmul %52, %54, %cst_30 {dimension_numbers = #tpu.dot_dimension_numbers<[1], [0], [0], [1], [0, 0, 1, 1], [], []>} : vector<4x256xbf16>, vector<256x128xbf16>, vector<4x128xf32> -> vector<4x128xf32>
    %56 = arith.addf %50, %55 : vector<4x128xf32>
    %c0_31 = arith.constant 0 : index
    %c0_32 = arith.constant 0 : index
    %57 = vector.load %arg3[%c0_31, %c0_32] : memref<1x128xf32, #tpu.memory_space<vmem>>, vector<1x128xf32>
    %58 = vector.broadcast %57 : vector<1x128xf32> to vector<4x128xf32>
    %59 = arith.addf %56, %58 : vector<4x128xf32>
    %60 = vector.shape_cast %59 : vector<4x128xf32> to vector<2x2x128xf32>
    %61 = arith.truncf %60 : vector<2x2x128xf32> to vector<2x2x128xbf16>
    %c0_33 = arith.constant 0 : index
    %c0_34 = arith.constant 0 : index
    %c0_35 = arith.constant 0 : index
    %c0_36 = arith.constant 0 : index
    %62 = vector.load %arg4[%c0_33, %c0_34, %c0_35, %c0_36] : memref<1x2x2x128xbf16, #tpu.memory_space<vmem>>, vector<1x2x2x128xbf16>
    %63 = vector.shape_cast %62 : vector<1x2x2x128xbf16> to vector<2x2x128xbf16>
    %64 = vector.shape_cast %61 : vector<2x2x128xbf16> to vector<1x2x2x128xbf16>
    tpu.vector_store %arg4[%c0_33, %c0_34, %c0_35, %c0_36], %64 {strides = array<i32>} : memref<1x2x2x128xbf16, #tpu.memory_space<vmem>>, vector<1x2x2x128xbf16>,
    return
  }
  func.func @transform_0(%arg0: i32) -> (i32, i32, i32, i32) {
    %c0_i32 = arith.constant 0 : i32
    %c0_i32_0 = arith.constant 0 : i32
    %c0_i32_1 = arith.constant 0 : i32
    %c0_i32_2 = arith.constant 0 : i32
    return %arg0, %c0_i32, %c0_i32_0, %c0_i32_1 : i32, i32, i32, i32
  }
  func.func @transform_1(%arg0: i32) -> (i32, i32, i32) {
    %c0_i32 = arith.constant 0 : i32
    %c0_i32_0 = arith.constant 0 : i32
    %c0_i32_1 = arith.constant 0 : i32
    %c0_i32_2 = arith.constant 0 : i32
    return %c0_i32, %c0_i32_0, %c0_i32_1 : i32, i32, i32
  }
  func.func @transform_2(%arg0: i32) -> (i32, i32) {
    %c0_i32 = arith.constant 0 : i32
    %c0_i32_0 = arith.constant 0 : i32
    %c0_i32_1 = arith.constant 0 : i32
    return %c0_i32, %c0_i32_0 : i32, i32
  }
  func.func @transform_3(%arg0: i32) -> (i32, i32, i32, i32) {
    %c0_i32 = arith.constant 0 : i32
    %c0_i32_0 = arith.constant 0 : i32
    %c0_i32_1 = arith.constant 0 : i32
    %c0_i32_2 = arith.constant 0 : i32
    return %arg0, %c0_i32, %c0_i32_0, %c0_i32_1 : i32, i32, i32, i32
  }
}

module attributes {stable_mosaic.version = 11 : i64} {
  func.func @_l2norm_kernel(%arg0: i32, %arg1: memref<8x128xbf16, #tpu.memory_space<vmem>>, %arg2: memref<8x128xf32, #tpu.memory_space<vmem>>) attributes {dimension_semantics = [#tpu.dimension_semantics<parallel>], iteration_bounds = array<i64: 1>, scalar_prefetch = 0 : i64, scratch_operands = 0 : i64, tpu.core_type = #tpu.core_type<tc>, window_params = [{transform_indices = @transform_0, window_bounds = array<i64: 8, 128>}, {transform_indices = @transform_1, window_bounds = array<i64: 8, 128>}]} {
    %c0 = arith.constant 0 : index
    %c0_0 = arith.constant 0 : index
    %0 = vector.load %arg1[%c0, %c0_0] : memref<8x128xbf16, #tpu.memory_space<vmem>>, vector<8x128xbf16>
    %1 = arith.extf %0 : vector<8x128xbf16> to vector<8x128xf32>
    %2 = arith.mulf %1, %1 : vector<8x128xf32>
    %cst = arith.constant dense<0.000000e+00> : vector<8xf32>
    %3 = vector.multi_reduction <add>, %2, %cst [1] : vector<8x128xf32> to vector<8xf32>
    %4 = vector.shape_cast %3 : vector<8xf32> to vector<8x1xf32>
    %cst_1 = arith.constant 1.000000e-24 : f32
    %5 = vector.broadcast %cst_1 : f32 to vector<8x1xf32>
    %6 = arith.maximumf %4, %5 : vector<8x1xf32>
    %7 = math.rsqrt %6 : vector<8x1xf32>
    %8 = vector.broadcast %7 : vector<8x1xf32> to vector<8x128xf32>
    %9 = arith.mulf %1, %8 : vector<8x128xf32>
    %c0_2 = arith.constant 0 : index
    %c0_3 = arith.constant 0 : index
    %10 = vector.load %arg2[%c0_2, %c0_3] : memref<8x128xf32, #tpu.memory_space<vmem>>, vector<8x128xf32>
    tpu.vector_store %arg2[%c0_2, %c0_3], %9 {strides = array<i32>} : memref<8x128xf32, #tpu.memory_space<vmem>>, vector<8x128xf32>,
    return
  }
  func.func @transform_0(%arg0: i32) -> (i32, i32) {
    %c0_i32 = arith.constant 0 : i32
    %c0_i32_0 = arith.constant 0 : i32
    return %arg0, %c0_i32 : i32, i32
  }
  func.func @transform_1(%arg0: i32) -> (i32, i32) {
    %c0_i32 = arith.constant 0 : i32
    %c0_i32_0 = arith.constant 0 : i32
    return %arg0, %c0_i32 : i32, i32
  }
}

</mosaic_0001>

<bundles_post_ra>
// kernel: resnet_forward.16
= control target key start
LH: loop header
LB: loop body
LE: loop exit
PB: predicated region body
PF: predicated region fallthrough
CT: control target
= control target key end

     0   :  { %v1595_v0 = vmov 0   ;;  %vm450_vm0 = vcmask 154624   ;;  %vm547_vm1 = vcmask 1040384   ;;  %vm548_vm2 = vcmask 1041408   ;;  %s2196_s1 = inlined_call_operand.vmem [shape: bf16[147,64], index: 1, kind: input, shape index: {}]   ;;  %s2197_s0 = inlined_call_operand.vmem [shape: bf16[512,147], index: 0, kind: input, shape index: {}]   ;;  %s2198_s2 = inlined_call_operand.vmem [shape: f32[1,64], index: 2, kind: input, shape index: {}]   ;;  %s2199_s3 = inlined_call_operand.vmem [shape: bf16[512,64], index: 3, kind: output, shape index: {}]  }
   0x1   :  { %554 = vmatprep.subr.bf16.mxu0 %v1595_v0  ;;  %1467 = vmatprep.subr.bf16.mxu1 %v1595_v0  ;;  %v1489_v1 = vld [vmem:[%s2196_s1] sm:$0xff]   ;;  %v1490_v2 = vld [vmem:[%s2196_s1 + $0x8] sm:$0xff]   ;;  %v1491_v3 = vld [vmem:[%s2196_s1 + $0x10] sm:$0xff]   ;;  %v1596_v11 = vmov 65535   ;;  %vm1163_vm3 = vcmask 519168  }
   0x2   :  { %555 = vmatpush1.bf16.msra.mxu0 %v1489_v1  ;;  %1477 = vmatpush1.bf16.msra.mxu1 %v1489_v1  ;;  %v1492_v4 = vld [vmem:[%s2196_s1 + $0x18] sm:$0xff]   ;;  %v1501_v5 = vld [vmem:[%s2197_s0 + $0x4] ss:$8 sps:$4 sm:$0xff]   ;;  %v1495_v9 = vld [vmem:[%s2196_s1 + $0x30] sm:$0xff]   ;;  %v549_v12 = vsel %vm547_vm1, 4294967295, %v1596_v11 }
   0x3   :  { %556 = vmatprep.subr.bf16.mxu0 %v1595_v0  ;;  %1468 = vmatprep.subr.bf16.mxu1 %v1595_v0  ;;  %v1504_v6 = vld [vmem:[%s2197_s0 + $0x104] ss:$8 sps:$4 sm:$0xff]   ;;  %v1496_v10 = vld [vmem:[%s2196_s1 + $0x38] sm:$0xff]   ;;  %v1498_v14 = vld [vmem:[%s2196_s1 + $0x48] ss:$0 sps:$4 sm:$0x33]  }
   0x4   :  { %1307 = vmatprep.mubr.msk.bf16.mxu0 %vm450_vm0, %v1501_v5  ;;  %v1493_v7 = vld [vmem:[%s2196_s1 + $0x20] sm:$0xff]   ;;  %1323 = vmatprep.mubr.msk.bf16.mxu1 %vm450_vm0, %v1504_v6  ;;  %v1494_v8 = vld [vmem:[%s2196_s1 + $0x28] sm:$0xff]   ;;  %v550_v15 = vsel %vm548_vm2, %v549_v12, 0  ;;  %v1505_v19 = vld [vmem:[%s2197_s0 + $0x14] ss:$8 sps:$4 sm:$0xff]  }
   0x5   :  { %v1497_v13 = vld [vmem:[%s2196_s1 + $0x40] sm:$0xff]   ;;  %v552_v16 = vand.u32 %v1498_v14, %v550_v15  ;;  %v1507_v20 = vld [vmem:[%s2197_s0 + $0x114] ss:$8 sps:$4 sm:$0xff]   ;;  %v1509_v21 = vld [vmem:[%s2197_s0 + $0x10] ss:$8 sps:$4 sm:$0xff]  }
   0x6   :  { %557 = vmatpush1.bf16.msra.mxu0 %v1490_v2  ;;  %1478 = vmatpush1.bf16.msra.mxu1 %v1490_v2  ;;  %v1499_v17 = vld [vmem:[%s2197_s0] ss:$8 sps:$4 sm:$0xff]   ;;  %v1510_v22 = vld [vmem:[%s2197_s0 + $0x110] ss:$8 sps:$4 sm:$0xff]   ;;  %v1511_v23 = vld [vmem:[%s2197_s0 + $0x24] ss:$8 sps:$4 sm:$0xff]  }
   0x7   :  { %558 = vmatprep.subr.bf16.mxu0 %v1595_v0  ;;  %1469 = vmatprep.subr.bf16.mxu1 %v1595_v0  ;;  %v1502_v18 = vld [vmem:[%s2197_s0 + $0x100] ss:$8 sps:$4 sm:$0xff]   ;;  %v1513_v24 = vld [vmem:[%s2197_s0 + $0x124] ss:$8 sps:$4 sm:$0xff]   ;;  %v1517_v27 = vld [vmem:[%s2197_s0 + $0x34] ss:$8 sps:$4 sm:$0xff]  }
   0x8   :  { %v1515_v25 = vld [vmem:[%s2197_s0 + $0x20] ss:$8 sps:$4 sm:$0xff]   ;;  %v1519_v28 = vld [vmem:[%s2197_s0 + $0x134] ss:$8 sps:$4 sm:$0xff]   ;;  %v1521_v29 = vld [vmem:[%s2197_s0 + $0x30] ss:$8 sps:$4 sm:$0xff]  }
   0x9   :  { %v1516_v26 = vld [vmem:[%s2197_s0 + $0x120] ss:$8 sps:$4 sm:$0xff]   ;;  %v1522_v30 = vld [vmem:[%s2197_s0 + $0x130] ss:$8 sps:$4 sm:$0xff]   ;;  %v1523_v31 = vld [vmem:[%s2197_s0 + $0x44] ss:$8 sps:$4 sm:$0xff]  }
   0xa   :  { %559 = vmatpush1.bf16.msra.mxu0 %v1491_v3  ;;  %1479 = vmatpush1.bf16.msra.mxu1 %v1491_v3  ;;  %v1525_v32 = vld [vmem:[%s2197_s0 + $0x144] ss:$8 sps:$4 sm:$0xff]   ;;  %v1527_v33 = vld [vmem:[%s2197_s0 + $0x40] ss:$8 sps:$4 sm:$0xff]   ;;  %v1529_v35 = vld [vmem:[%s2197_s0 + $0x54] ss:$8 sps:$4 sm:$0xff]  }
   0xb   :  { %560 = vmatprep.subr.bf16.mxu0 %v1595_v0  ;;  %1470 = vmatprep.subr.bf16.mxu1 %v1595_v0  ;;  %v1528_v34 = vld [vmem:[%s2197_s0 + $0x140] ss:$8 sps:$4 sm:$0xff]   ;;  %v1531_v36 = vld [vmem:[%s2197_s0 + $0x154] ss:$8 sps:$4 sm:$0xff]   ;;  %v1533_v37 = vld [vmem:[%s2197_s0 + $0x50] ss:$8 sps:$4 sm:$0xff]  }
   0xc   :  { %v1534_v38 = vld [vmem:[%s2197_s0 + $0x150] ss:$8 sps:$4 sm:$0xff]   ;;  %v1535_v39 = vld [vmem:[%s2197_s0 + $0x64] ss:$8 sps:$4 sm:$0xff]   ;;  %v1539_v41 = vld [vmem:[%s2197_s0 + $0x60] ss:$8 sps:$4 sm:$0xff]  }
   0xd   :  { %v1537_v40 = vld [vmem:[%s2197_s0 + $0x164] ss:$8 sps:$4 sm:$0xff]   ;;  %v1540_v42 = vld [vmem:[%s2197_s0 + $0x160] ss:$8 sps:$4 sm:$0xff]   ;;  %v1541_v43 = vld [vmem:[%s2197_s0 + $0x74] ss:$8 sps:$4 sm:$0xff]  }
   0xe   :  { %561 = vmatpush1.bf16.msra.mxu0 %v1492_v4  ;;  %1480 = vmatpush1.bf16.msra.mxu1 %v1492_v4  ;;  %v1543_v44 = vld [vmem:[%s2197_s0 + $0x174] ss:$8 sps:$4 sm:$0xff]   ;;  %v1545_v45 = vld [vmem:[%s2197_s0 + $0x70] ss:$8 sps:$4 sm:$0xff]   ;;  %v1547_v47 = vld [vmem:[%s2197_s0 + $0x84] ss:$8 sps:$4 sm:$0xff]  }
   0xf   :  { %562 = vmatprep.subr.bf16.mxu0 %v1595_v0  ;;  %1471 = vmatprep.subr.bf16.mxu1 %v1595_v0  ;;  %v1546_v46 = vld [vmem:[%s2197_s0 + $0x170] ss:$8 sps:$4 sm:$0xff]   ;;  %v1549_v48 = vld [vmem:[%s2197_s0 + $0x184] ss:$8 sps:$4 sm:$0xff]   ;;  %v1551_v49 = vld [vmem:[%s2197_s0 + $0x80] ss:$8 sps:$4 sm:$0xff]  }
  0x10   :  { %v1552_v50 = vld [vmem:[%s2197_s0 + $0x180] ss:$8 sps:$4 sm:$0xff]   ;;  %v1553_v51 = vld [vmem:[%s2197_s0 + $0x94] ss:$8 sps:$4 sm:$0xff]   ;;  %v1557_v53 = vld [vmem:[%s2197_s0 + $0x90] ss:$8 sps:$4 sm:$0xff]  }
  0x11   :  { %v1555_v52 = vld [vmem:[%s2197_s0 + $0x194] ss:$8 sps:$4 sm:$0xff]   ;;  %v1558_v54 = vld [vmem:[%s2197_s0 + $0x190] ss:$8 sps:$4 sm:$0xff]   ;;  %v1559_v55 = vld [vmem:[%s2197_s0 + $0xa4] ss:$8 sps:$4 sm:$0xff]  }
  0x12   :  { %563 = vmatpush1.bf16.msra.mxu0 %v1493_v7  ;;  %1481 = vmatpush1.bf16.msra.mxu1 %v1493_v7  ;;  %v1561_v56 = vld [vmem:[%s2197_s0 + $0x1a4] ss:$8 sps:$4 sm:$0xff]   ;;  %v1563_v57 = vld [vmem:[%s2197_s0 + $0xa0] ss:$8 sps:$4 sm:$0xff]   ;;  %v1565_v59 = vld [vmem:[%s2197_s0 + $0xb4] ss:$8 sps:$4 sm:$0xff]  }
  0x13   :  { %564 = vmatprep.subr.bf16.mxu0 %v1595_v0  ;;  %1472 = vmatprep.subr.bf16.mxu1 %v1595_v0  ;;  %v1564_v58 = vld [vmem:[%s2197_s0 + $0x1a0] ss:$8 sps:$4 sm:$0xff]   ;;  %v1567_v60 = vld [vmem:[%s2197_s0 + $0x1b4] ss:$8 sps:$4 sm:$0xff]   ;;  %v1569_v61 = vld [vmem:[%s2197_s0 + $0xb0] ss:$8 sps:$4 sm:$0xff]  }
  0x14   :  { %v1570_v62 = vld [vmem:[%s2197_s0 + $0x1b0] ss:$8 sps:$4 sm:$0xff]   ;;  %v1571_v63 = vld [vmem:[%s2197_s0 + $0xc4] ss:$8 sps:$4 sm:$0xff]   ;;  %v1575_v1 = vld [vmem:[%s2197_s0 + $0xc0] ss:$8 sps:$4 sm:$0xff]  }
  0x15   :  { %v1576_v2 = vld [vmem:[%s2197_s0 + $0x1c0] ss:$8 sps:$4 sm:$0xff]   ;;  %v1577_v3 = vld [vmem:[%s2197_s0 + $0xd4] ss:$8 sps:$4 sm:$0xff]   ;;  %v1581_v5 = vld [vmem:[%s2197_s0 + $0xd0] ss:$8 sps:$4 sm:$0xff]  }
  0x16   :  { %565 = vmatpush1.bf16.msra.mxu0 %v1494_v8  ;;  %1482 = vmatpush1.bf16.msra.mxu1 %v1494_v8  ;;  %v1579_v4 = vld [vmem:[%s2197_s0 + $0x1d4] ss:$8 sps:$4 sm:$0xff]   ;;  %v1582_v6 = vld [vmem:[%s2197_s0 + $0x1d0] ss:$8 sps:$4 sm:$0xff]   ;;  %v1583_v7 = vld [vmem:[%s2197_s0 + $0xe4] ss:$8 sps:$4 sm:$0xff]  }
  0x17   :  { %566 = vmatprep.subr.bf16.mxu0 %v1595_v0  ;;  %1473 = vmatprep.subr.bf16.mxu1 %v1595_v0  ;;  %v1585_v8 = vld [vmem:[%s2197_s0 + $0x1e4] ss:$8 sps:$4 sm:$0xff]   ;;  %v1589_v11 = vld [vmem:[%s2197_s0 + $0xf4] ss:$8 sps:$4 sm:$0xff]   ;;  %v1594_v14 = vld [vmem:[%s2197_s0 + $0x1f0] ss:$8 sps:$4 sm:$0xff]  }
  0x18   :  { %v1591_v12 = vld [vmem:[%s2197_s0 + $0x1f4] ss:$8 sps:$4 sm:$0xff]   ;;  %v1874_v15 = vld [vmem:[%s2198_s2] ss:$0 sm:$0xff] }
  0x1a   :  { %567 = vmatpush1.bf16.msra.mxu0 %v1495_v9  ;;  %1483 = vmatpush1.bf16.msra.mxu1 %v1495_v9  ;;  %v1587_v9 = vld [vmem:[%s2197_s0 + $0xe0] ss:$8 sps:$4 sm:$0xff]  }
  0x1b   :  { %568 = vmatprep.subr.bf16.mxu0 %v1595_v0  ;;  %1474 = vmatprep.subr.bf16.mxu1 %v1595_v0 }
  0x1e   :  { %569 = vmatpush1.bf16.msra.mxu0 %v1496_v10  ;;  %1484 = vmatpush1.bf16.msra.mxu1 %v1496_v10  ;;  %v1588_v10 = vld [vmem:[%s2197_s0 + $0x1e0] ss:$8 sps:$4 sm:$0xff]  }
  0x1f   :  { %570 = vmatprep.subr.bf16.mxu0 %v1595_v0  ;;  %1475 = vmatprep.subr.bf16.mxu1 %v1595_v0 }
  0x22   :  { %571 = vmatpush1.bf16.msra.mxu0 %v1497_v13  ;;  %1485 = vmatpush1.bf16.msra.mxu1 %v1497_v13  ;;  %v1593_v13 = vld [vmem:[%s2197_s0 + $0xf0] ss:$8 sps:$4 sm:$0xff]  }
  0x23   :  { %572 = vmatprep.subr.bf16.mxu0 %v1595_v0  ;;  %1476 = vmatprep.subr.bf16.mxu1 %v1595_v0  ;;  %v1573_v0 = vld [vmem:[%s2197_s0 + $0x1c4] ss:$8 sps:$4 sm:$0xff]  }
  0x26   :  { %573 = vmatpush1.bf16.msra.mxu0 %v552_v16  ;;  %1486 = vmatpush1.bf16.msra.mxu1 %v552_v16 }
  0x29   :  { %587 = vmatmul.mubr.bf16.vlgmr.msra.gmra.mrb[0].mxu0 %v1499_v17  ;;  %715 = vmatmul.mubr.bf16.vlgmr.msra.gmra.mrb[0].mxu1 %v1502_v18 }
  0x2a   :  { %1308 = vmatprep.mubr.msk.bf16.mxu0 %vm450_vm0, %v1505_v19  ;;  %1324 = vmatprep.mubr.msk.bf16.mxu1 %vm450_vm0, %v1507_v20 }
  0x31   :  { %595 = vmatmul.mubr.bf16.gmra.mrb[4].mxu0 %v1509_v21  ;;  %723 = vmatmul.mubr.bf16.gmra.mrb[4].mxu1 %v1510_v22 }
  0x32   :  { %1309 = vmatprep.mubr.msk.bf16.mxu0 %vm450_vm0, %v1511_v23  ;;  %1325 = vmatprep.mubr.msk.bf16.mxu1 %vm450_vm0, %v1513_v24 }
  0x39   :  { %603 = vmatmul.mubr.bf16.gmra.mrb[8].mxu0 %v1515_v25  ;;  %731 = vmatmul.mubr.bf16.gmra.mrb[8].mxu1 %v1516_v26 }
  0x3a   :  { %1310 = vmatprep.mubr.msk.bf16.mxu0 %vm450_vm0, %v1517_v27  ;;  %1326 = vmatprep.mubr.msk.bf16.mxu1 %vm450_vm0, %v1519_v28 }
  0x41   :  { %611 = vmatmul.mubr.bf16.gmra.mrb[12].mxu0 %v1521_v29  ;;  %739 = vmatmul.mubr.bf16.gmra.mrb[12].mxu1 %v1522_v30 }
  0x42   :  { %1311 = vmatprep.mubr.msk.bf16.mxu0 %vm450_vm0, %v1523_v31  ;;  %1327 = vmatprep.mubr.msk.bf16.mxu1 %vm450_vm0, %v1525_v32 }
  0x49   :  { %619 = vmatmul.mubr.bf16.gmra.mrb[16].mxu0 %v1527_v33  ;;  %747 = vmatmul.mubr.bf16.gmra.mrb[16].mxu1 %v1528_v34 }
  0x4a   :  { %1312 = vmatprep.mubr.msk.bf16.mxu0 %vm450_vm0, %v1529_v35  ;;  %1328 = vmatprep.mubr.msk.bf16.mxu1 %vm450_vm0, %v1531_v36 }
  0x51   :  { %627 = vmatmul.mubr.bf16.gmra.mrb[20].mxu0 %v1533_v37  ;;  %755 = vmatmul.mubr.bf16.gmra.mrb[20].mxu1 %v1534_v38 }
  0x52   :  { %1313 = vmatprep.mubr.msk.bf16.mxu0 %vm450_vm0, %v1535_v39  ;;  %1329 = vmatprep.mubr.msk.bf16.mxu1 %vm450_vm0, %v1537_v40 }
  0x59   :  { %635 = vmatmul.mubr.bf16.gmra.mrb[24].mxu0 %v1539_v41  ;;  %763 = vmatmul.mubr.bf16.gmra.mrb[24].mxu1 %v1540_v42 }
  0x5a   :  { %1314 = vmatprep.mubr.msk.bf16.mxu0 %vm450_vm0, %v1541_v43  ;;  %1330 = vmatprep.mubr.msk.bf16.mxu1 %vm450_vm0, %v1543_v44 }
  0x61   :  { %643 = vmatmul.mubr.bf16.gmra.mrb[28].mxu0 %v1545_v45  ;;  %771 = vmatmul.mubr.bf16.gmra.mrb[28].mxu1 %v1546_v46 }
  0x62   :  { %1315 = vmatprep.mubr.msk.bf16.mxu0 %vm450_vm0, %v1547_v47  ;;  %1331 = vmatprep.mubr.msk.bf16.mxu1 %vm450_vm0, %v1549_v48 }
  0x69   :  { %651 = vmatmul.mubr.bf16.gmra.mrb[32].mxu0 %v1551_v49  ;;  %779 = vmatmul.mubr.bf16.gmra.mrb[32].mxu1 %v1552_v50 }
  0x6a   :  { %1316 = vmatprep.mubr.msk.bf16.mxu0 %vm450_vm0, %v1553_v51  ;;  %1332 = vmatprep.mubr.msk.bf16.mxu1 %vm450_vm0, %v1555_v52 }
  0x71   :  { %659 = vmatmul.mubr.bf16.gmra.mrb[36].mxu0 %v1557_v53  ;;  %787 = vmatmul.mubr.bf16.gmra.mrb[36].mxu1 %v1558_v54 }
  0x72   :  { %1317 = vmatprep.mubr.msk.bf16.mxu0 %vm450_vm0, %v1559_v55  ;;  %1333 = vmatprep.mubr.msk.bf16.mxu1 %vm450_vm0, %v1561_v56 }
  0x79   :  { %667 = vmatmul.mubr.bf16.gmra.mrb[40].mxu0 %v1563_v57  ;;  %795 = vmatmul.mubr.bf16.gmra.mrb[40].mxu1 %v1564_v58 }
  0x7a   :  { %1318 = vmatprep.mubr.msk.bf16.mxu0 %vm450_vm0, %v1565_v59  ;;  %1334 = vmatprep.mubr.msk.bf16.mxu1 %vm450_vm0, %v1567_v60 }
  0x81   :  { %675 = vmatmul.mubr.bf16.gmra.mrb[44].mxu0 %v1569_v61  ;;  %803 = vmatmul.mubr.bf16.gmra.mrb[44].mxu1 %v1570_v62 }
  0x82   :  { %1319 = vmatprep.mubr.msk.bf16.mxu0 %vm450_vm0, %v1571_v63  ;;  %1335 = vmatprep.mubr.msk.bf16.mxu1 %vm450_vm0, %v1573_v0 }
  0x89   :  { %683 = vmatmul.mubr.bf16.gmra.mrb[48].mxu0 %v1575_v1  ;;  %811 = vmatmul.mubr.bf16.gmra.mrb[48].mxu1 %v1576_v2 }
  0x8a   :  { %1320 = vmatprep.mubr.msk.bf16.mxu0 %vm450_vm0, %v1577_v3  ;;  %1336 = vmatprep.mubr.msk.bf16.mxu1 %vm450_vm0, %v1579_v4 }
  0x91   :  { %691 = vmatmul.mubr.bf16.gmra.mrb[52].mxu0 %v1581_v5  ;;  %819 = vmatmul.mubr.bf16.gmra.mrb[52].mxu1 %v1582_v6 }
  0x92   :  { %1321 = vmatprep.mubr.msk.bf16.mxu0 %vm450_vm0, %v1583_v7  ;;  %1337 = vmatprep.mubr.msk.bf16.mxu1 %vm450_vm0, %v1585_v8 }
  0x99   :  { %699 = vmatmul.mubr.bf16.gmra.mrb[56].mxu0 %v1587_v9  ;;  %827 = vmatmul.mubr.bf16.gmra.mrb[56].mxu1 %v1588_v10 }
  0x9a   :  { %1322 = vmatprep.mubr.msk.bf16.mxu0 %vm450_vm0, %v1589_v11  ;;  %1338 = vmatprep.mubr.msk.bf16.mxu1 %vm450_vm0, %v1591_v12 }
  0xa1   :  { %707 = vmatmul.mubr.bf16.gmra.mrb[60].mxu0 %v1593_v13  ;;  %835 = vmatmul.mubr.bf16.gmra.mrb[60].mxu1 %v1594_v14 }
  0xfc   :  { %v588_v16 = vpop.f32.mrb[0].mxu0  ;;  %v716_v17 = vpop.f32.mrb[0].mxu1 }
  0xfd   :  { %v589_v18 = vadd.f32 %v1874_v15, %v588_v16  ;;  %v717_v19 = vadd.f32 %v1874_v15, %v716_v17  ;;  %v590_v20 = vpop.f32.mrb[1].mxu0  ;;  %v718_v21 = vpop.f32.mrb[1].mxu1 }
  0xfe   :  { %v591_v22 = vpop.f32.mrb[2].mxu0  ;;  %v719_v23 = vpop.f32.mrb[2].mxu1 }
  0xff   :  { %v843_v24 = vmax.f32 %v589_v18, 0.0  ;;  %v875_v25 = vmax.f32 %v717_v19, 0.0  ;;  %v592_v26 = vadd.f32 %v1874_v15, %v591_v22  ;;  %v720_v27 = vadd.f32 %v1874_v15, %v719_v23  ;;  %v593_v28 = vpop.f32.mrb[3].mxu0  ;;  %v721_v29 = vpop.f32.mrb[3].mxu1 }
 0x101   :  { %v1403_v30 = vpack.c.bf16 %v843_v24, %v843_v24  ;;  %v1435_v31 = vpack.c.bf16 %v875_v25, %v875_v25  ;;  %v844_v32 = vmax.f32 %v592_v26, 0.0  ;;  %v876_v33 = vmax.f32 %v720_v27, 0.0 }
 0x103   :  { %1164 = vst.msk [vmem:[%s2199_s3] sm:$0xf] %vm1163_vm3, %v1403_v30  ;;  %1196 = vst.msk [vmem:[%s2199_s3 + $0x80] sm:$0xf] %vm1163_vm3, %v1435_v31  ;;  %v1404_v34 = vpack.c.bf16 %v844_v32, %v844_v32  ;;  %v1436_v35 = vpack.c.bf16 %v876_v33, %v876_v33 }
 0x104   :  { %v596_v36 = vpop.f32.mrb[4].mxu0  ;;  %v724_v37 = vpop.f32.mrb[4].mxu1 }
 0x105   :  { %1165 = vst.msk [vmem:[%s2199_s3 + $0x4] sm:$0xf] %vm1163_vm3, %v1404_v34  ;;  %1197 = vst.msk [vmem:[%s2199_s3 + $0x84] sm:$0xf] %vm1163_vm3, %v1436_v35  ;;  %v597_v38 = vadd.f32 %v1874_v15, %v596_v36  ;;  %v725_v39 = vadd.f32 %v1874_v15, %v724_v37  ;;  %v598_v40 = vpop.f32.mrb[5].mxu0  ;;  %v726_v41 = vpop.f32.mrb[5].mxu1 }
 0x106   :  { %v599_v42 = vpop.f32.mrb[6].mxu0  ;;  %v727_v43 = vpop.f32.mrb[6].mxu1 }
 0x107   :  { %v845_v44 = vmax.f32 %v597_v38, 0.0  ;;  %v877_v45 = vmax.f32 %v725_v39, 0.0  ;;  %v600_v46 = vadd.f32 %v1874_v15, %v599_v42  ;;  %v728_v47 = vadd.f32 %v1874_v15, %v727_v43  ;;  %v601_v48 = vpop.f32.mrb[7].mxu0  ;;  %v729_v49 = vpop.f32.mrb[7].mxu1 }
 0x109   :  { %v1405_v50 = vpack.c.bf16 %v845_v44, %v845_v44  ;;  %v1437_v51 = vpack.c.bf16 %v877_v45, %v877_v45  ;;  %v846_v52 = vmax.f32 %v600_v46, 0.0  ;;  %v878_v53 = vmax.f32 %v728_v47, 0.0 }
 0x10b   :  { %1166 = vst.msk [vmem:[%s2199_s3 + $0x8] sm:$0xf] %vm1163_vm3, %v1405_v50  ;;  %1198 = vst.msk [vmem:[%s2199_s3 + $0x88] sm:$0xf] %vm1163_vm3, %v1437_v51  ;;  %v1406_v54 = vpack.c.bf16 %v846_v52, %v846_v52  ;;  %v1438_v55 = vpack.c.bf16 %v878_v53, %v878_v53 }
 0x10c   :  { %v604_v56 = vpop.f32.mrb[8].mxu0  ;;  %v732_v57 = vpop.f32.mrb[8].mxu1 }
 0x10d   :  { %1167 = vst.msk [vmem:[%s2199_s3 + $0xc] sm:$0xf] %vm1163_vm3, %v1406_v54  ;;  %1199 = vst.msk [vmem:[%s2199_s3 + $0x8c] sm:$0xf] %vm1163_vm3, %v1438_v55  ;;  %v605_v58 = vadd.f32 %v1874_v15, %v604_v56  ;;  %v733_v59 = vadd.f32 %v1874_v15, %v732_v57  ;;  %v606_v60 = vpop.f32.mrb[9].mxu0  ;;  %v734_v61 = vpop.f32.mrb[9].mxu1 }
 0x10e   :  { %v607_v62 = vpop.f32.mrb[10].mxu0  ;;  %v735_v63 = vpop.f32.mrb[10].mxu1 }
 0x10f   :  { %v847_v0 = vmax.f32 %v605_v58, 0.0  ;;  %v879_v1 = vmax.f32 %v733_v59, 0.0  ;;  %v608_v2 = vadd.f32 %v1874_v15, %v607_v62  ;;  %v736_v3 = vadd.f32 %v1874_v15, %v735_v63  ;;  %v609_v4 = vpop.f32.mrb[11].mxu0  ;;  %v737_v5 = vpop.f32.mrb[11].mxu1 }
 0x111   :  { %v1407_v6 = vpack.c.bf16 %v847_v0, %v847_v0  ;;  %v1439_v7 = vpack.c.bf16 %v879_v1, %v879_v1  ;;  %v848_v8 = vmax.f32 %v608_v2, 0.0  ;;  %v880_v9 = vmax.f32 %v736_v3, 0.0 }
 0x113   :  { %1168 = vst.msk [vmem:[%s2199_s3 + $0x10] sm:$0xf] %vm1163_vm3, %v1407_v6  ;;  %1200 = vst.msk [vmem:[%s2199_s3 + $0x90] sm:$0xf] %vm1163_vm3, %v1439_v7  ;;  %v1408_v10 = vpack.c.bf16 %v848_v8, %v848_v8  ;;  %v1440_v11 = vpack.c.bf16 %v880_v9, %v880_v9 }
 0x114   :  { %v612_v12 = vpop.f32.mrb[12].mxu0  ;;  %v740_v13 = vpop.f32.mrb[12].mxu1 }
 0x115   :  { %1169 = vst.msk [vmem:[%s2199_s3 + $0x14] sm:$0xf] %vm1163_vm3, %v1408_v10  ;;  %1201 = vst.msk [vmem:[%s2199_s3 + $0x94] sm:$0xf] %vm1163_vm3, %v1440_v11  ;;  %v613_v14 = vadd.f32 %v1874_v15, %v612_v12  ;;  %v741_v16 = vadd.f32 %v1874_v15, %v740_v13  ;;  %v614_v17 = vpop.f32.mrb[13].mxu0  ;;  %v742_v18 = vpop.f32.mrb[13].mxu1 }
 0x116   :  { %v615_v19 = vpop.f32.mrb[14].mxu0  ;;  %v743_v20 = vpop.f32.mrb[14].mxu1 }
 0x117   :  { %v849_v21 = vmax.f32 %v613_v14, 0.0  ;;  %v881_v22 = vmax.f32 %v741_v16, 0.0  ;;  %v616_v23 = vadd.f32 %v1874_v15, %v615_v19  ;;  %v744_v24 = vadd.f32 %v1874_v15, %v743_v20  ;;  %v617_v25 = vpop.f32.mrb[15].mxu0  ;;  %v745_v26 = vpop.f32.mrb[15].mxu1 }
 0x119   :  { %v1409_v27 = vpack.c.bf16 %v849_v21, %v849_v21  ;;  %v1441_v28 = vpack.c.bf16 %v881_v22, %v881_v22  ;;  %v850_v29 = vmax.f32 %v616_v23, 0.0  ;;  %v882_v30 = vmax.f32 %v744_v24, 0.0 }
 0x11b   :  { %1170 = vst.msk [vmem:[%s2199_s3 + $0x18] sm:$0xf] %vm1163_vm3, %v1409_v27  ;;  %1202 = vst.msk [vmem:[%s2199_s3 + $0x98] sm:$0xf] %vm1163_vm3, %v1441_v28  ;;  %v1410_v31 = vpack.c.bf16 %v850_v29, %v850_v29  ;;  %v1442_v32 = vpack.c.bf16 %v882_v30, %v882_v30 }
 0x11c   :  { %v620_v33 = vpop.f32.mrb[16].mxu0  ;;  %v748_v34 = vpop.f32.mrb[16].mxu1 }
 0x11d   :  { %1171 = vst.msk [vmem:[%s2199_s3 + $0x1c] sm:$0xf] %vm1163_vm3, %v1410_v31  ;;  %1203 = vst.msk [vmem:[%s2199_s3 + $0x9c] sm:$0xf] %vm1163_vm3, %v1442_v32  ;;  %v621_v35 = vadd.f32 %v1874_v15, %v620_v33  ;;  %v749_v36 = vadd.f32 %v1874_v15, %v748_v34  ;;  %v622_v37 = vpop.f32.mrb[17].mxu0  ;;  %v750_v38 = vpop.f32.mrb[17].mxu1 }
 0x11e   :  { %v623_v39 = vpop.f32.mrb[18].mxu0  ;;  %v751_v40 = vpop.f32.mrb[18].mxu1 }
 0x11f   :  { %v851_v41 = vmax.f32 %v621_v35, 0.0  ;;  %v883_v42 = vmax.f32 %v749_v36, 0.0  ;;  %v624_v43 = vadd.f32 %v1874_v15, %v623_v39  ;;  %v752_v44 = vadd.f32 %v1874_v15, %v751_v40  ;;  %v625_v45 = vpop.f32.mrb[19].mxu0  ;;  %v753_v46 = vpop.f32.mrb[19].mxu1 }
 0x121   :  { %v1411_v47 = vpack.c.bf16 %v851_v41, %v851_v41  ;;  %v1443_v48 = vpack.c.bf16 %v883_v42, %v883_v42  ;;  %v852_v49 = vmax.f32 %v624_v43, 0.0  ;;  %v884_v50 = vmax.f32 %v752_v44, 0.0 }
 0x123   :  { %1172 = vst.msk [vmem:[%s2199_s3 + $0x20] sm:$0xf] %vm1163_vm3, %v1411_v47  ;;  %1204 = vst.msk [vmem:[%s2199_s3 + $0xa0] sm:$0xf] %vm1163_vm3, %v1443_v48  ;;  %v1412_v51 = vpack.c.bf16 %v852_v49, %v852_v49  ;;  %v1444_v52 = vpack.c.bf16 %v884_v50, %v884_v50 }
 0x124   :  { %v628_v53 = vpop.f32.mrb[20].mxu0  ;;  %v756_v54 = vpop.f32.mrb[20].mxu1 }
 0x125   :  { %1173 = vst.msk [vmem:[%s2199_s3 + $0x24] sm:$0xf] %vm1163_vm3, %v1412_v51  ;;  %1205 = vst.msk [vmem:[%s2199_s3 + $0xa4] sm:$0xf] %vm1163_vm3, %v1444_v52  ;;  %v629_v55 = vadd.f32 %v1874_v15, %v628_v53  ;;  %v757_v56 = vadd.f32 %v1874_v15, %v756_v54  ;;  %v630_v57 = vpop.f32.mrb[21].mxu0  ;;  %v758_v58 = vpop.f32.mrb[21].mxu1 }
 0x126   :  { %v631_v59 = vpop.f32.mrb[22].mxu0  ;;  %v759_v60 = vpop.f32.mrb[22].mxu1 }
 0x127   :  { %v853_v61 = vmax.f32 %v629_v55, 0.0  ;;  %v885_v62 = vmax.f32 %v757_v56, 0.0  ;;  %v632_v63 = vadd.f32 %v1874_v15, %v631_v59  ;;  %v760_v0 = vadd.f32 %v1874_v15, %v759_v60  ;;  %v633_v1 = vpop.f32.mrb[23].mxu0  ;;  %v761_v2 = vpop.f32.mrb[23].mxu1 }
 0x129   :  { %v1413_v3 = vpack.c.bf16 %v853_v61, %v853_v61  ;;  %v1445_v4 = vpack.c.bf16 %v885_v62, %v885_v62  ;;  %v854_v5 = vmax.f32 %v632_v63, 0.0  ;;  %v886_v6 = vmax.f32 %v760_v0, 0.0 }
 0x12b   :  { %1174 = vst.msk [vmem:[%s2199_s3 + $0x28] sm:$0xf] %vm1163_vm3, %v1413_v3  ;;  %1206 = vst.msk [vmem:[%s2199_s3 + $0xa8] sm:$0xf] %vm1163_vm3, %v1445_v4  ;;  %v1414_v7 = vpack.c.bf16 %v854_v5, %v854_v5  ;;  %v1446_v8 = vpack.c.bf16 %v886_v6, %v886_v6 }
 0x12c   :  { %v636_v9 = vpop.f32.mrb[24].mxu0  ;;  %v764_v10 = vpop.f32.mrb[24].mxu1 }
 0x12d   :  { %1175 = vst.msk [vmem:[%s2199_s3 + $0x2c] sm:$0xf] %vm1163_vm3, %v1414_v7  ;;  %1207 = vst.msk [vmem:[%s2199_s3 + $0xac] sm:$0xf] %vm1163_vm3, %v1446_v8  ;;  %v637_v11 = vadd.f32 %v1874_v15, %v636_v9  ;;  %v765_v12 = vadd.f32 %v1874_v15, %v764_v10  ;;  %v638_v13 = vpop.f32.mrb[25].mxu0  ;;  %v766_v14 = vpop.f32.mrb[25].mxu1 }
 0x12e   :  { %v639_v16 = vpop.f32.mrb[26].mxu0  ;;  %v767_v17 = vpop.f32.mrb[26].mxu1 }
 0x12f   :  { %v855_v18 = vmax.f32 %v637_v11, 0.0  ;;  %v887_v19 = vmax.f32 %v765_v12, 0.0  ;;  %v640_v20 = vadd.f32 %v1874_v15, %v639_v16  ;;  %v768_v21 = vadd.f32 %v1874_v15, %v767_v17  ;;  %v641_v22 = vpop.f32.mrb[27].mxu0  ;;  %v769_v23 = vpop.f32.mrb[27].mxu1 }
 0x131   :  { %v1415_v24 = vpack.c.bf16 %v855_v18, %v855_v18  ;;  %v1447_v25 = vpack.c.bf16 %v887_v19, %v887_v19  ;;  %v856_v26 = vmax.f32 %v640_v20, 0.0  ;;  %v888_v27 = vmax.f32 %v768_v21, 0.0 }
 0x133   :  { %1176 = vst.msk [vmem:[%s2199_s3 + $0x30] sm:$0xf] %vm1163_vm3, %v1415_v24  ;;  %1208 = vst.msk [vmem:[%s2199_s3 + $0xb0] sm:$0xf] %vm1163_vm3, %v1447_v25  ;;  %v1416_v28 = vpack.c.bf16 %v856_v26, %v856_v26  ;;  %v1448_v29 = vpack.c.bf16 %v888_v27, %v888_v27 }
 0x134   :  { %v644_v30 = vpop.f32.mrb[28].mxu0  ;;  %v772_v31 = vpop.f32.mrb[28].mxu1 }
 0x135   :  { %1177 = vst.msk [vmem:[%s2199_s3 + $0x34] sm:$0xf] %vm1163_vm3, %v1416_v28  ;;  %1209 = vst.msk [vmem:[%s2199_s3 + $0xb4] sm:$0xf] %vm1163_vm3, %v1448_v29  ;;  %v645_v32 = vadd.f32 %v1874_v15, %v644_v30  ;;  %v773_v33 = vadd.f32 %v1874_v15, %v772_v31  ;;  %v646_v34 = vpop.f32.mrb[29].mxu0  ;;  %v774_v35 = vpop.f32.mrb[29].mxu1 }
 0x136   :  { %v647_v36 = vpop.f32.mrb[30].mxu0  ;;  %v775_v37 = vpop.f32.mrb[30].mxu1 }
 0x137   :  { %v857_v38 = vmax.f32 %v645_v32, 0.0  ;;  %v889_v39 = vmax.f32 %v773_v33, 0.0  ;;  %v648_v40 = vadd.f32 %v1874_v15, %v647_v36  ;;  %v776_v41 = vadd.f32 %v1874_v15, %v775_v37  ;;  %v649_v42 = vpop.f32.mrb[31].mxu0  ;;  %v777_v43 = vpop.f32.mrb[31].mxu1 }
 0x139   :  { %v1417_v44 = vpack.c.bf16 %v857_v38, %v857_v38  ;;  %v1449_v45 = vpack.c.bf16 %v889_v39, %v889_v39  ;;  %v858_v46 = vmax.f32 %v648_v40, 0.0  ;;  %v890_v47 = vmax.f32 %v776_v41, 0.0 }
 0x13b   :  { %1178 = vst.msk [vmem:[%s2199_s3 + $0x38] sm:$0xf] %vm1163_vm3, %v1417_v44  ;;  %1210 = vst.msk [vmem:[%s2199_s3 + $0xb8] sm:$0xf] %vm1163_vm3, %v1449_v45  ;;  %v1418_v48 = vpack.c.bf16 %v858_v46, %v858_v46  ;;  %v1450_v49 = vpack.c.bf16 %v890_v47, %v890_v47 }
 0x13c   :  { %v652_v50 = vpop.f32.mrb[32].mxu0  ;;  %v780_v51 = vpop.f32.mrb[32].mxu1 }
 0x13d   :  { %1179 = vst.msk [vmem:[%s2199_s3 + $0x3c] sm:$0xf] %vm1163_vm3, %v1418_v48  ;;  %1211 = vst.msk [vmem:[%s2199_s3 + $0xbc] sm:$0xf] %vm1163_vm3, %v1450_v49  ;;  %v653_v52 = vadd.f32 %v1874_v15, %v652_v50  ;;  %v781_v53 = vadd.f32 %v1874_v15, %v780_v51  ;;  %v654_v54 = vpop.f32.mrb[33].mxu0  ;;  %v782_v55 = vpop.f32.mrb[33].mxu1 }
 0x13e   :  { %v655_v56 = vpop.f32.mrb[34].mxu0  ;;  %v783_v57 = vpop.f32.mrb[34].mxu1 }
 0x13f   :  { %v859_v58 = vmax.f32 %v653_v52, 0.0  ;;  %v891_v59 = vmax.f32 %v781_v53, 0.0  ;;  %v656_v60 = vadd.f32 %v1874_v15, %v655_v56  ;;  %v784_v61 = vadd.f32 %v1874_v15, %v783_v57  ;;  %v657_v62 = vpop.f32.mrb[35].mxu0  ;;  %v785_v63 = vpop.f32.mrb[35].mxu1 }
 0x141   :  { %v1419_v0 = vpack.c.bf16 %v859_v58, %v859_v58  ;;  %v1451_v1 = vpack.c.bf16 %v891_v59, %v891_v59  ;;  %v860_v2 = vmax.f32 %v656_v60, 0.0  ;;  %v892_v3 = vmax.f32 %v784_v61, 0.0 }
 0x143   :  { %1180 = vst.msk [vmem:[%s2199_s3 + $0x40] sm:$0xf] %vm1163_vm3, %v1419_v0  ;;  %1212 = vst.msk [vmem:[%s2199_s3 + $0xc0] sm:$0xf] %vm1163_vm3, %v1451_v1  ;;  %v1420_v4 = vpack.c.bf16 %v860_v2, %v860_v2  ;;  %v1452_v5 = vpack.c.bf16 %v892_v3, %v892_v3 }
 0x144   :  { %v660_v6 = vpop.f32.mrb[36].mxu0  ;;  %v788_v7 = vpop.f32.mrb[36].mxu1 }
 0x145   :  { %1181 = vst.msk [vmem:[%s2199_s3 + $0x44] sm:$0xf] %vm1163_vm3, %v1420_v4  ;;  %1213 = vst.msk [vmem:[%s2199_s3 + $0xc4] sm:$0xf] %vm1163_vm3, %v1452_v5  ;;  %v661_v8 = vadd.f32 %v1874_v15, %v660_v6  ;;  %v789_v9 = vadd.f32 %v1874_v15, %v788_v7  ;;  %v662_v10 = vpop.f32.mrb[37].mxu0  ;;  %v790_v11 = vpop.f32.mrb[37].mxu1 }
 0x146   :  { %v663_v12 = vpop.f32.mrb[38].mxu0  ;;  %v791_v13 = vpop.f32.mrb[38].mxu1 }
 0x147   :  { %v861_v14 = vmax.f32 %v661_v8, 0.0  ;;  %v893_v16 = vmax.f32 %v789_v9, 0.0  ;;  %v664_v17 = vadd.f32 %v1874_v15, %v663_v12  ;;  %v792_v18 = vadd.f32 %v1874_v15, %v791_v13  ;;  %v665_v19 = vpop.f32.mrb[39].mxu0  ;;  %v793_v20 = vpop.f32.mrb[39].mxu1 }
 0x149   :  { %v1421_v21 = vpack.c.bf16 %v861_v14, %v861_v14  ;;  %v1453_v22 = vpack.c.bf16 %v893_v16, %v893_v16  ;;  %v862_v23 = vmax.f32 %v664_v17, 0.0  ;;  %v894_v24 = vmax.f32 %v792_v18, 0.0 }
 0x14b   :  { %1182 = vst.msk [vmem:[%s2199_s3 + $0x48] sm:$0xf] %vm1163_vm3, %v1421_v21  ;;  %1214 = vst.msk [vmem:[%s2199_s3 + $0xc8] sm:$0xf] %vm1163_vm3, %v1453_v22  ;;  %v1422_v25 = vpack.c.bf16 %v862_v23, %v862_v23  ;;  %v1454_v26 = vpack.c.bf16 %v894_v24, %v894_v24 }
 0x14c   :  { %v668_v27 = vpop.f32.mrb[40].mxu0  ;;  %v796_v28 = vpop.f32.mrb[40].mxu1 }
 0x14d   :  { %1183 = vst.msk [vmem:[%s2199_s3 + $0x4c] sm:$0xf] %vm1163_vm3, %v1422_v25  ;;  %1215 = vst.msk [vmem:[%s2199_s3 + $0xcc] sm:$0xf] %vm1163_vm3, %v1454_v26  ;;  %v669_v29 = vadd.f32 %v1874_v15, %v668_v27  ;;  %v797_v30 = vadd.f32 %v1874_v15, %v796_v28  ;;  %v670_v31 = vpop.f32.mrb[41].mxu0  ;;  %v798_v32 = vpop.f32.mrb[41].mxu1 }
 0x14e   :  { %v671_v33 = vpop.f32.mrb[42].mxu0  ;;  %v799_v34 = vpop.f32.mrb[42].mxu1 }
 0x14f   :  { %v863_v35 = vmax.f32 %v669_v29, 0.0  ;;  %v895_v36 = vmax.f32 %v797_v30, 0.0  ;;  %v672_v37 = vadd.f32 %v1874_v15, %v671_v33  ;;  %v800_v38 = vadd.f32 %v1874_v15, %v799_v34  ;;  %v673_v39 = vpop.f32.mrb[43].mxu0  ;;  %v801_v40 = vpop.f32.mrb[43].mxu1 }
 0x151   :  { %v1423_v41 = vpack.c.bf16 %v863_v35, %v863_v35  ;;  %v1455_v42 = vpack.c.bf16 %v895_v36, %v895_v36  ;;  %v864_v43 = vmax.f32 %v672_v37, 0.0  ;;  %v896_v44 = vmax.f32 %v800_v38, 0.0 }
 0x153   :  { %1184 = vst.msk [vmem:[%s2199_s3 + $0x50] sm:$0xf] %vm1163_vm3, %v1423_v41  ;;  %1216 = vst.msk [vmem:[%s2199_s3 + $0xd0] sm:$0xf] %vm1163_vm3, %v1455_v42  ;;  %v1424_v45 = vpack.c.bf16 %v864_v43, %v864_v43  ;;  %v1456_v46 = vpack.c.bf16 %v896_v44, %v896_v44 }
 0x154   :  { %v676_v47 = vpop.f32.mrb[44].mxu0  ;;  %v804_v48 = vpop.f32.mrb[44].mxu1 }
 0x155   :  { %1185 = vst.msk [vmem:[%s2199_s3 + $0x54] sm:$0xf] %vm1163_vm3, %v1424_v45  ;;  %1217 = vst.msk [vmem:[%s2199_s3 + $0xd4] sm:$0xf] %vm1163_vm3, %v1456_v46  ;;  %v677_v49 = vadd.f32 %v1874_v15, %v676_v47  ;;  %v805_v50 = vadd.f32 %v1874_v15, %v804_v48  ;;  %v678_v51 = vpop.f32.mrb[45].mxu0  ;;  %v806_v52 = vpop.f32.mrb[45].mxu1 }
 0x156   :  { %v679_v53 = vpop.f32.mrb[46].mxu0  ;;  %v807_v54 = vpop.f32.mrb[46].mxu1 }
 0x157   :  { %v865_v55 = vmax.f32 %v677_v49, 0.0  ;;  %v897_v56 = vmax.f32 %v805_v50, 0.0  ;;  %v680_v57 = vadd.f32 %v1874_v15, %v679_v53  ;;  %v808_v58 = vadd.f32 %v1874_v15, %v807_v54  ;;  %v681_v59 = vpop.f32.mrb[47].mxu0  ;;  %v809_v60 = vpop.f32.mrb[47].mxu1 }
 0x159   :  { %v1425_v61 = vpack.c.bf16 %v865_v55, %v865_v55  ;;  %v1457_v62 = vpack.c.bf16 %v897_v56, %v897_v56  ;;  %v866_v63 = vmax.f32 %v680_v57, 0.0  ;;  %v898_v0 = vmax.f32 %v808_v58, 0.0 }
 0x15b   :  { %1186 = vst.msk [vmem:[%s2199_s3 + $0x58] sm:$0xf] %vm1163_vm3, %v1425_v61  ;;  %1218 = vst.msk [vmem:[%s2199_s3 + $0xd8] sm:$0xf] %vm1163_vm3, %v1457_v62  ;;  %v1426_v1 = vpack.c.bf16 %v866_v63, %v866_v63  ;;  %v1458_v2 = vpack.c.bf16 %v898_v0, %v898_v0 }
 0x15c   :  { %v684_v3 = vpop.f32.mrb[48].mxu0  ;;  %v812_v4 = vpop.f32.mrb[48].mxu1 }
 0x15d   :  { %1187 = vst.msk [vmem:[%s2199_s3 + $0x5c] sm:$0xf] %vm1163_vm3, %v1426_v1  ;;  %1219 = vst.msk [vmem:[%s2199_s3 + $0xdc] sm:$0xf] %vm1163_vm3, %v1458_v2  ;;  %v685_v5 = vadd.f32 %v1874_v15, %v684_v3  ;;  %v813_v6 = vadd.f32 %v1874_v15, %v812_v4  ;;  %v686_v7 = vpop.f32.mrb[49].mxu0  ;;  %v814_v8 = vpop.f32.mrb[49].mxu1 }
 0x15e   :  { %v687_v9 = vpop.f32.mrb[50].mxu0  ;;  %v815_v10 = vpop.f32.mrb[50].mxu1 }
 0x15f   :  { %v867_v11 = vmax.f32 %v685_v5, 0.0  ;;  %v899_v12 = vmax.f32 %v813_v6, 0.0  ;;  %v688_v13 = vadd.f32 %v1874_v15, %v687_v9  ;;  %v816_v14 = vadd.f32 %v1874_v15, %v815_v10  ;;  %v689_v16 = vpop.f32.mrb[51].mxu0  ;;  %v817_v17 = vpop.f32.mrb[51].mxu1 }
 0x161   :  { %v1427_v18 = vpack.c.bf16 %v867_v11, %v867_v11  ;;  %v1459_v19 = vpack.c.bf16 %v899_v12, %v899_v12  ;;  %v868_v20 = vmax.f32 %v688_v13, 0.0  ;;  %v900_v21 = vmax.f32 %v816_v14, 0.0 }
 0x163   :  { %1188 = vst.msk [vmem:[%s2199_s3 + $0x60] sm:$0xf] %vm1163_vm3, %v1427_v18  ;;  %1220 = vst.msk [vmem:[%s2199_s3 + $0xe0] sm:$0xf] %vm1163_vm3, %v1459_v19  ;;  %v1428_v22 = vpack.c.bf16 %v868_v20, %v868_v20  ;;  %v1460_v23 = vpack.c.bf16 %v900_v21, %v900_v21 }
 0x164   :  { %v692_v24 = vpop.f32.mrb[52].mxu0  ;;  %v820_v25 = vpop.f32.mrb[52].mxu1 }
 0x165   :  { %1189 = vst.msk [vmem:[%s2199_s3 + $0x64] sm:$0xf] %vm1163_vm3, %v1428_v22  ;;  %1221 = vst.msk [vmem:[%s2199_s3 + $0xe4] sm:$0xf] %vm1163_vm3, %v1460_v23  ;;  %v693_v26 = vadd.f32 %v1874_v15, %v692_v24  ;;  %v821_v27 = vadd.f32 %v1874_v15, %v820_v25  ;;  %v694_v28 = vpop.f32.mrb[53].mxu0  ;;  %v822_v29 = vpop.f32.mrb[53].mxu1 }
 0x166   :  { %v695_v30 = vpop.f32.mrb[54].mxu0  ;;  %v823_v31 = vpop.f32.mrb[54].mxu1 }
 0x167   :  { %v869_v32 = vmax.f32 %v693_v26, 0.0  ;;  %v901_v33 = vmax.f32 %v821_v27, 0.0  ;;  %v696_v34 = vadd.f32 %v1874_v15, %v695_v30  ;;  %v824_v35 = vadd.f32 %v1874_v15, %v823_v31  ;;  %v697_v36 = vpop.f32.mrb[55].mxu0  ;;  %v825_v37 = vpop.f32.mrb[55].mxu1 }
 0x169   :  { %v1429_v38 = vpack.c.bf16 %v869_v32, %v869_v32  ;;  %v1461_v39 = vpack.c.bf16 %v901_v33, %v901_v33  ;;  %v870_v40 = vmax.f32 %v696_v34, 0.0  ;;  %v902_v41 = vmax.f32 %v824_v35, 0.0 }
 0x16b   :  { %1190 = vst.msk [vmem:[%s2199_s3 + $0x68] sm:$0xf] %vm1163_vm3, %v1429_v38  ;;  %1222 = vst.msk [vmem:[%s2199_s3 + $0xe8] sm:$0xf] %vm1163_vm3, %v1461_v39  ;;  %v1430_v42 = vpack.c.bf16 %v870_v40, %v870_v40  ;;  %v1462_v43 = vpack.c.bf16 %v902_v41, %v902_v41 }
 0x16c   :  { %v700_v44 = vpop.f32.mrb[56].mxu0  ;;  %v828_v45 = vpop.f32.mrb[56].mxu1 }
 0x16d   :  { %1191 = vst.msk [vmem:[%s2199_s3 + $0x6c] sm:$0xf] %vm1163_vm3, %v1430_v42  ;;  %1223 = vst.msk [vmem:[%s2199_s3 + $0xec] sm:$0xf] %vm1163_vm3, %v1462_v43  ;;  %v701_v46 = vadd.f32 %v1874_v15, %v700_v44  ;;  %v829_v47 = vadd.f32 %v1874_v15, %v828_v45  ;;  %v702_v48 = vpop.f32.mrb[57].mxu0  ;;  %v830_v49 = vpop.f32.mrb[57].mxu1 }
 0x16e   :  { %v703_v50 = vpop.f32.mrb[58].mxu0  ;;  %v831_v51 = vpop.f32.mrb[58].mxu1 }
 0x16f   :  { %v871_v52 = vmax.f32 %v701_v46, 0.0  ;;  %v903_v53 = vmax.f32 %v829_v47, 0.0  ;;  %v704_v54 = vadd.f32 %v1874_v15, %v703_v50  ;;  %v832_v55 = vadd.f32 %v1874_v15, %v831_v51  ;;  %v705_v56 = vpop.f32.mrb[59].mxu0  ;;  %v833_v57 = vpop.f32.mrb[59].mxu1 }
 0x171   :  { %v1431_v58 = vpack.c.bf16 %v871_v52, %v871_v52  ;;  %v1463_v59 = vpack.c.bf16 %v903_v53, %v903_v53  ;;  %v872_v60 = vmax.f32 %v704_v54, 0.0  ;;  %v904_v61 = vmax.f32 %v832_v55, 0.0 }
 0x173   :  { %1192 = vst.msk [vmem:[%s2199_s3 + $0x70] sm:$0xf] %vm1163_vm3, %v1431_v58  ;;  %1224 = vst.msk [vmem:[%s2199_s3 + $0xf0] sm:$0xf] %vm1163_vm3, %v1463_v59  ;;  %v1432_v62 = vpack.c.bf16 %v872_v60, %v872_v60  ;;  %v1464_v63 = vpack.c.bf16 %v904_v61, %v904_v61 }
 0x174   :  { %v708_v0 = vpop.f32.mrb[60].mxu0  ;;  %v836_v1 = vpop.f32.mrb[60].mxu1 }
 0x175   :  { %1193 = vst.msk [vmem:[%s2199_s3 + $0x74] sm:$0xf] %vm1163_vm3, %v1432_v62  ;;  %1225 = vst.msk [vmem:[%s2199_s3 + $0xf4] sm:$0xf] %vm1163_vm3, %v1464_v63  ;;  %v709_v2 = vadd.f32 %v1874_v15, %v708_v0  ;;  %v837_v3 = vadd.f32 %v1874_v15, %v836_v1  ;;  %v710_v4 = vpop.f32.mrb[61].mxu0  ;;  %v838_v5 = vpop.f32.mrb[61].mxu1 }
 0x176   :  { %v711_v6 = vpop.f32.mrb[62].mxu0  ;;  %v839_v7 = vpop.f32.mrb[62].mxu1 }
 0x177   :  { %v873_v8 = vmax.f32 %v709_v2, 0.0  ;;  %v905_v9 = vmax.f32 %v837_v3, 0.0  ;;  %v712_v10 = vadd.f32 %v1874_v15, %v711_v6  ;;  %v840_v11 = vadd.f32 %v1874_v15, %v839_v7  ;;  %v713_v12 = vpop.f32.mrb[63].mxu0  ;;  %v841_v13 = vpop.f32.mrb[63].mxu1 }
 0x179   :  { %v1433_v14 = vpack.c.bf16 %v873_v8, %v873_v8  ;;  %v1465_v16 = vpack.c.bf16 %v905_v9, %v905_v9  ;;  %v874_v17 = vmax.f32 %v712_v10, 0.0  ;;  %v906_v18 = vmax.f32 %v840_v11, 0.0 }
 0x17b   :  { %1194 = vst.msk [vmem:[%s2199_s3 + $0x78] sm:$0xf] %vm1163_vm3, %v1433_v14  ;;  %1226 = vst.msk [vmem:[%s2199_s3 + $0xf8] sm:$0xf] %vm1163_vm3, %v1465_v16  ;;  %v1434_v19 = vpack.c.bf16 %v874_v17, %v874_v17  ;;  %v1466_v20 = vpack.c.bf16 %v906_v18, %v906_v18 }
 0x17d   :  { %1195 = vst.msk [vmem:[%s2199_s3 + $0x7c] sm:$0xf] %vm1163_vm3, %v1434_v19  ;;  %1227 = vst.msk [vmem:[%s2199_s3 + $0xfc] sm:$0xf] %vm1163_vm3, %v1466_v20 }

// kernel: resnet_forward.17
= control target key start
LH: loop header
LB: loop body
LE: loop exit
PB: predicated region body
PF: predicated region fallthrough
CT: control target
= control target key end

     0   :  { %s787_s15 = smov 0   ;;  %s1002_s0 = inlined_call_operand.vmem [shape: bf16[2,9,9,64], index: 0, kind: input, shape index: {}]   ;;  %s1003_s1 = inlined_call_operand.vmem [shape: bf16[2,9,9,64], index: 1, kind: input, shape index: {}]   ;;  %s1004_s2 = inlined_call_operand.vmem [shape: bf16[2,9,9,64], index: 2, kind: input, shape index: {}]   ;;  %s1005_s3 = inlined_call_operand.vmem [shape: bf16[2,9,9,64], index: 3, kind: input, shape index: {}]   ;;  %s1006_s4 = inlined_call_operand.vmem [shape: bf16[2,8,8,64], index: 4, kind: output, shape index: {}]  }
   0x1 LB: > { %s731_s16 = sadd.s32 4294967295, %s760_s15   ;;  %p735_p0 = scmp.ge.s32.totalorder %s760_s15, 1  ;;  %s760_s15 = sphi %s787_s15, %s14_s15  }
   0x2   : > { %p192_p1 = scmp.lt.s32.totalorder %s760_s15, 3 }
   0x4   : > { %p193_p2 = pnand %p735_p0, %p192_p1 }
   0x5   : > { %p233_p3 = scmp.lt.s32.totalorder (!%p193_p2), %s731_s16, 1  ;;  %vm317_vm0 = vsmask.f32 (!%p193_p2), 3328  ;;  %vm318_vm1 = vsmask.f32 (!%p193_p2), 7440  ;;  %vm631_vm3 = vcmask (!%p193_p2), 519168  }
   0x6   : > { %196 = sbr.rel (%p193_p2) target bundleno = 83 (0x53), region = 36  ;;  %vm842_vm2 = vmor (!%p193_p2), %vm317_vm0, %vm318_vm1 }
   0xd   : > { %s1010_s16 = smov (!%p233_p3, %s731_s16), 1 }
   0xe   : > { %s798_s17 = smul.u32 72, %s1010_s16  ;;  %s744_s30 = sshll.u32 %s1010_s16, 5 }
   0xf   : > { %s902_s7 = scalar_lea.vmem %s1006_s4, %s744_s30 }
  0x10   : > { %s804_s20 = scalar_lea.vmem %s1002_s0, %s798_s17  ;;  %s810_s23 = scalar_lea.vmem %s1004_s2, %s798_s17 }
  0x11   : > { %s816_s26 = scalar_lea.vmem %s1005_s3, %s798_s17  ;;  %v258_v0 = vld [vmem:[%s804_s20] sm:$0xf]  ;;  %v259_v1 = vld [vmem:[%s804_s20 + $0x4] sm:$0x1]  ;;  %v821_v2 = vld [vmem:[%s804_s20 + $0x8] sm:$0xf]  ;;  %s854_s29 = scalar_lea.vmem %s1003_s1, %s798_s17 }
  0x12   : > { %v261_v3 = vld [vmem:[%s804_s20 + $0xc] sm:$0x1]  ;;  %v825_v4 = vld [vmem:[%s810_s23] sm:$0xf]  ;;  %v302_v6 = vld [vmem:[%s816_s26 + $0x8] sm:$0xf] }
  0x13   : > { %v301_v5 = vld [vmem:[%s816_s26] sm:$0xf]  ;;  %v321_v7 = vshrl.u32 %v258_v0, 16  ;;  %v324_v8 = vshll.u32 %v258_v0, 16  ;;  %v330_v9 = vshll.u32 %v259_v1, 16  ;;  %v335_v12 = vshrl.u32 %v821_v2, 16 }
  0x14   : > { %v286_v10 = vld [vmem:[%s810_s23 + $0x4] sm:$0x1]  ;;  %v309_v11 = vmax.bf16 %v301_v5, %v258_v0  ;;  %v338_v13 = vshll.u32 %v821_v2, 16  ;;  %v344_v14 = vshll.u32 %v261_v3, 16  ;;  %v310_v15 = vmax.bf16 %v302_v6, %v821_v2  ;;  %v262_v19 = vld [vmem:[%s804_s20 + $0x10] sm:$0xf] }
  0x15   : > { %v323_v16 = vrot.slane %v321_v7, 4  ;;  %v326_v17 = vrot.slane %v324_v8, 5  ;;  %v504_v18 = vshrl.u32 %v825_v4, 16  ;;  %v332_v20 = vrot.slane %v330_v9, 5  ;;  %v263_v24 = vld [vmem:[%s804_s20 + $0x14] sm:$0x1] }
  0x16   : > { %v337_v21 = vrot.slane %v335_v12, 4  ;;  %v340_v22 = vrot.slane %v338_v13, 5  ;;  %v507_v23 = vshll.u32 %v825_v4, 16  ;;  %v346_v26 = vrot.slane %v344_v14, 5  ;;  %v838_v29 = vld [vmem:[%s810_s23 + $0x8] sm:$0xf] }
  0x17   : > { %v327_v25 = vor.u32 %v326_v17, %v323_v16  ;;  %v506_v27 = vrot.slane %v504_v18, 4  ;;  %v513_v28 = vshll.u32 %v286_v10, 16  ;;  %v303_v33 = vld [vmem:[%s816_s26 + $0x10] sm:$0xf]  ;;  %v349_v34 = vshrl.u32 %v262_v19, 16 }
  0x18   : > { %v341_v31 = vor.u32 %v340_v22, %v337_v21  ;;  %v509_v32 = vrot.slane %v507_v23, 5  ;;  %v352_v35 = vshll.u32 %v262_v19, 16  ;;  %v311_v38 = vmax.bf16 %v303_v33, %v262_v19  ;;  %v288_v42 = vld [vmem:[%s810_s23 + $0xc] sm:$0x1]  ;;  %v863_v53 = vld [vmem:[%s804_s20 + $0x18] sm:$0xf] }
  0x19   : > { %v328_v36 = vrot.slane %v327_v25, 4  ;;  %v847_v37 = vrot.slane %v513_v28, 5  ;;  %v358_v39 = vshll.u32 %v263_v24, 16  ;;  %v351_v43 = vrot.slane %v349_v34, 4  ;;  %v265_v58 = vld [vmem:[%s804_s20 + $0x1c] sm:$0x1] }
  0x1a   : > { %v342_v40 = vrot.slane %v341_v31, 4  ;;  %v510_v41 = vor.u32 %v509_v32, %v506_v27  ;;  %v354_v44 = vrot.slane %v352_v35, 5  ;;  %v518_v47 = vshrl.u32 %v838_v29, 16  ;;  %v276_v59 = vld [vmem:[%s854_s29] sm:$0xf] }
  0x1b   : > { %v333_v45 = vsel %vm842_vm2, %v328_v36, %v332_v20  ;;  %v360_v46 = vrot.slane %v358_v39, 5  ;;  %v521_v48 = vshll.u32 %v838_v29, 16  ;;  %v527_v57 = vshll.u32 %v288_v42, 16  ;;  %v872_v3 = vld [vmem:[%s810_s23 + $0x10] sm:$0xf] }
  0x1c   : > { %v347_v49 = vsel %vm842_vm2, %v342_v40, %v346_v26  ;;  %v440_v50 = vmax.bf16 %v333_v45, %v309_v11  ;;  %v511_v51 = vrot.slane %v510_v41, 4  ;;  %v355_v52 = vor.u32 %v354_v44, %v351_v43  ;;  %v304_v5 = vld [vmem:[%s816_s26 + $0x18] sm:$0xf]  ;;  %v277_v7 = vld [vmem:[%s854_s29 + $0x8] sm:$0xf] }
  0x1d   : > { %v441_v54 = vmax.bf16 %v347_v49, %v310_v15  ;;  %v520_v55 = vrot.slane %v518_v47, 4  ;;  %v523_v56 = vrot.slane %v521_v48, 5  ;;  %v529_v1 = vrot.slane %v527_v57, 5  ;;  %v290_v14 = vld [vmem:[%s810_s23 + $0x14] sm:$0x1] }
  0x1e   : > { %v448_v60 = vmax.bf16 %v440_v50, %v821_v2  ;;  %v516_v61 = vsel %vm842_vm2, %v511_v51, %v847_v37  ;;  %v356_v62 = vrot.slane %v355_v52, 4  ;;  %v363_v6 = vshrl.u32 %v863_v53, 16  ;;  %v884_v20 = vld [vmem:[%s804_s20 + $0x20] sm:$0xf]  ;;  %v278_v26 = vld [vmem:[%s854_s29 + $0x10] sm:$0xf] }
  0x1f   : > { %v449_v63 = vmax.bf16 %v441_v54, %v262_v19  ;;  %v524_v0 = vor.u32 %v523_v56, %v520_v55  ;;  %v366_v9 = vshll.u32 %v863_v53, 16  ;;  %v372_v10 = vshll.u32 %v265_v58, 16  ;;  %v267_v32 = vld [vmem:[%s804_s20 + $0x24] sm:$0x1]  ;;  %v894_v36 = vld [vmem:[%s810_s23 + $0x18] sm:$0xf] }
  0x20   : > { %v471_v8 = vmax.bf16 %v448_v60, %v347_v49  ;;  %v361_v2 = vsel %vm842_vm2, %v356_v62, %v360_v46  ;;  %v365_v15 = vrot.slane %v363_v6, 4  ;;  %v312_v17 = vmax.bf16 %v304_v5, %v863_v53  ;;  %v292_v47 = vld [vmem:[%s810_s23 + $0x1c] sm:$0x1]  ;;  %v305_v48 = vld [vmem:[%s816_s26 + $0x20] sm:$0xf] }
  0x21   : > { %v442_v11 = vmax.bf16 %v361_v2, %v311_v38  ;;  %v472_v12 = vmax.bf16 %v449_v63, %v361_v2  ;;  %v525_v13 = vrot.slane %v524_v0, 4  ;;  %v368_v18 = vrot.slane %v366_v9, 5  ;;  %v911_v54 = vld [vmem:[%s804_s20 + $0x28] sm:$0xf]  ;;  %v922_v0 = vld [vmem:[%s810_s23 + $0x20] sm:$0xf] }
  0x22   : > { %v479_v16 = vmax.bf16 %v471_v8, %v276_v59  ;;  %v532_v19 = vshrl.u32 %v872_v3, 16  ;;  %v374_v23 = vrot.slane %v372_v10, 5  ;;  %v535_v24 = vshll.u32 %v872_v3, 16  ;;  %v269_v59 = vld [vmem:[%s804_s20 + $0x2c] sm:$0x1] }
  0x23   : > { %v480_v21 = vmax.bf16 %v472_v12, %v277_v7  ;;  %v530_v22 = vsel %vm842_vm2, %v525_v13, %v529_v1  ;;  %v369_v27 = vor.u32 %v368_v18, %v365_v15  ;;  %v541_v31 = vshll.u32 %v290_v14, 16  ;;  %v279_v1 = vld [vmem:[%s854_s29 + $0x18] sm:$0xf]  ;;  %v306_v10 = vld [vmem:[%s816_s26 + $0x28] sm:$0xf] }
  0x24   : > { %v487_v25 = vmax.bf16 %v479_v16, %v277_v7  ;;  %v534_v28 = vrot.slane %v532_v19, 4  ;;  %v450_v34 = vmax.bf16 %v442_v11, %v863_v53  ;;  %v537_v35 = vrot.slane %v535_v24, 5 }
  0x25   : > { %v488_v33 = vmax.bf16 %v480_v21, %v278_v26  ;;  %v377_v37 = vshrl.u32 %v884_v20, 16  ;;  %v370_v39 = vrot.slane %v369_v27, 4  ;;  %v543_v40 = vrot.slane %v541_v31, 5 }
  0x26   : > { %v495_v38 = vmax.bf16 %v487_v25, %v825_v4  ;;  %v380_v41 = vshll.u32 %v884_v20, 16  ;;  %v538_v43 = vor.u32 %v537_v35, %v534_v28  ;;  %v386_v45 = vshll.u32 %v267_v32, 16 }
  0x27   : > { %v496_v42 = vmax.bf16 %v488_v33, %v838_v29  ;;  %v379_v44 = vrot.slane %v377_v37, 4  ;;  %v375_v4 = vsel %vm842_vm2, %v370_v39, %v374_v23  ;;  %v546_v50 = vshrl.u32 %v894_v36, 16  ;;  %v271_v33 = vld [vmem:[%s804_s20 + $0x34] sm:$0x1] }
  0x28   : > { %v623_v46 = vmax.bf16 %v516_v61, %v495_v38  ;;  %v382_v49 = vrot.slane %v380_v41, 5  ;;  %v443_v52 = vmax.bf16 %v375_v4, %v312_v17  ;;  %v473_v53 = vmax.bf16 %v450_v34, %v375_v4  ;;  %v940_v34 = vld [vmem:[%s810_s23 + $0x28] sm:$0xf] }
  0x29   : > { %v624_v51 = vmax.bf16 %v530_v22, %v496_v42  ;;  %v539_v29 = vrot.slane %v538_v43, 4  ;;  %v388_v56 = vrot.slane %v386_v45, 5  ;;  %v548_v57 = vrot.slane %v546_v50, 4 }
  0x2a   : > { %632 = vst.msk [vmem:[%s902_s7] sm:$0xf] %vm631_vm3, %v623_v46  ;;  %v383_v55 = vor.u32 %v382_v49, %v379_v44  ;;  %v549_v58 = vshll.u32 %v894_v36, 16  ;;  %v481_v60 = vmax.bf16 %v473_v53, %v278_v26  ;;  %v313_v61 = vmax.bf16 %v305_v48, %v884_v20  ;;  %v270_v26 = vld [vmem:[%s804_s20 + $0x30] sm:$0xf] }
  0x2b   : > { %633 = vst.msk [vmem:[%s902_s7 + $0x4] sm:$0xf] %vm631_vm3, %v624_v51  ;;  %v451_v62 = vmax.bf16 %v443_v52, %v884_v20  ;;  %v555_v63 = vshll.u32 %v292_v47, 16  ;;  %v544_v5 = vsel %vm842_vm2, %v539_v29, %v543_v40  ;;  %v391_v8 = vshrl.u32 %v911_v54, 16  ;;  %v294_v20 = vld [vmem:[%s810_s23 + $0x24] sm:$0x1] }
  0x2c   : > { %v384_v6 = vrot.slane %v383_v55, 4  ;;  %v551_v7 = vrot.slane %v549_v58, 5  ;;  %v489_v2 = vmax.bf16 %v481_v60, %v279_v1  ;;  %v394_v11 = vshll.u32 %v911_v54, 16  ;;  %v307_v49 = vld [vmem:[%s816_s26 + $0x30] sm:$0xf] }
  0x2d   : > { %v557_v9 = vrot.slane %v555_v63, 5  ;;  %v400_v12 = vshll.u32 %v269_v59, 16  ;;  %v393_v15 = vrot.slane %v391_v8, 4  ;;  %v560_v16 = vshrl.u32 %v922_v0, 16  ;;  %v273_v60 = vld [vmem:[%s804_s20 + $0x3c] sm:$0x1] }
  0x2e   : > { %v389_v13 = vsel %vm842_vm2, %v384_v6, %v388_v56  ;;  %v552_v14 = vor.u32 %v551_v7, %v548_v57  ;;  %v497_v17 = vmax.bf16 %v489_v2, %v872_v3  ;;  %v396_v21 = vrot.slane %v394_v11, 5  ;;  %v280_v3 = vld [vmem:[%s854_s29 + $0x20] sm:$0xf]  ;;  %v272_v56 = vld [vmem:[%s804_s20 + $0x38] sm:$0xf] }
  0x2f   : > { %v444_v18 = vmax.bf16 %v389_v13, %v313_v61  ;;  %v474_v19 = vmax.bf16 %v451_v62, %v389_v13  ;;  %v314_v23 = vmax.bf16 %v306_v10, %v911_v54  ;;  %v562_v24 = vrot.slane %v560_v16, 4  ;;  %v308_v61 = vld [vmem:[%s816_s26 + $0x38] sm:$0xf]  ;;  %v961_v6 = vld [vmem:[%s810_s23 + $0x30] sm:$0xf] }
  0x30   : > { %v553_v22 = vrot.slane %v552_v14, 4  ;;  %v563_v25 = vshll.u32 %v922_v0, 16  ;;  %v625_v27 = vmax.bf16 %v544_v5, %v497_v17  ;;  %v397_v31 = vor.u32 %v396_v21, %v393_v15  ;;  %v281_v7 = vld [vmem:[%s854_s29 + $0x28] sm:$0xf] }
  0x31   : > { %v482_v28 = vmax.bf16 %v474_v19, %v279_v1  ;;  %v402_v32 = vrot.slane %v400_v12, 5  ;;  %v452_v37 = vmax.bf16 %v444_v18, %v911_v54  ;;  %v569_v39 = vshll.u32 %v294_v20, 16  ;;  %v296_v54 = vld [vmem:[%s810_s23 + $0x2c] sm:$0x1] }
  0x32   : > { %v558_v35 = vsel %vm842_vm2, %v553_v22, %v557_v9  ;;  %v565_v38 = vrot.slane %v563_v25, 5  ;;  %634 = vst.msk [vmem:[%s902_s7 + $0x8] sm:$0xf] %vm631_vm3, %v625_v27  ;;  %v398_v41 = vrot.slane %v397_v31, 4  ;;  %v405_v42 = vshrl.u32 %v270_v26, 16 }
  0x33   : > { %v490_v40 = vmax.bf16 %v482_v28, %v280_v3  ;;  %v408_v43 = vshll.u32 %v270_v26, 16  ;;  %v571_v45 = vrot.slane %v569_v39, 5  ;;  %v414_v46 = vshll.u32 %v271_v33, 16  ;;  %v298_v22 = vld [vmem:[%s810_s23 + $0x34] sm:$0x1] }
  0x34   : > { %v566_v44 = vor.u32 %v565_v38, %v562_v24  ;;  %v574_v4 = vshrl.u32 %v940_v34, 16  ;;  %v403_v48 = vsel %vm842_vm2, %v398_v41, %v402_v32  ;;  %v407_v50 = vrot.slane %v405_v42, 4  ;;  %v274_v24 = vld [vmem:[%s804_s20 + $0x40] sm:$0xf]  ;;  %v275_v31 = vld [vmem:[%s804_s20 + $0x44] sm:$0x1] }
  0x35   : > { %v498_v47 = vmax.bf16 %v490_v40, %v894_v36  ;;  %v410_v51 = vrot.slane %v408_v43, 5  ;;  %v445_v52 = vmax.bf16 %v403_v48, %v314_v23  ;;  %v475_v53 = vmax.bf16 %v452_v37, %v403_v48  ;;  %v299_v37 = vld [vmem:[%s810_s23 + $0x38] sm:$0xf]  ;;  %v282_v38 = vld [vmem:[%s854_s29 + $0x30] sm:$0xf] }
  0x36   : > { %v567_v29 = vrot.slane %v566_v44, 4  ;;  %v416_v55 = vrot.slane %v414_v46, 5  ;;  %v576_v59 = vrot.slane %v574_v4, 4  ;;  %v577_v36 = vshll.u32 %v940_v34, 16 }
  0x37   : > { %v626_v57 = vmax.bf16 %v558_v35, %v498_v47  ;;  %v411_v58 = vor.u32 %v410_v51, %v407_v50  ;;  %v483_v62 = vmax.bf16 %v475_v53, %v280_v3  ;;  %v315_v1 = vmax.bf16 %v307_v49, %v270_v26 }
  0x38   : > { %v572_v63 = vsel %vm842_vm2, %v567_v29, %v571_v45  ;;  %v453_v5 = vmax.bf16 %v445_v52, %v270_v26  ;;  %v579_v2 = vrot.slane %v577_v36, 5  ;;  %v583_v9 = vshll.u32 %v296_v54, 16 }
  0x39   : > { %635 = vst.msk [vmem:[%s902_s7 + $0xc] sm:$0xf] %vm631_vm3, %v626_v57  ;;  %v412_v8 = vrot.slane %v411_v58, 4  ;;  %v419_v10 = vshrl.u32 %v272_v56, 16  ;;  %v491_v11 = vmax.bf16 %v483_v62, %v281_v7  ;;  %v316_v12 = vmax.bf16 %v308_v61, %v272_v56 }
  0x3a   : > { %v422_v13 = vshll.u32 %v272_v56, 16  ;;  %v428_v14 = vshll.u32 %v273_v60, 16  ;;  %v580_v16 = vor.u32 %v579_v2, %v576_v59  ;;  %v588_v18 = vshrl.u32 %v961_v6, 16 }
  0x3b   : > { %v417_v15 = vsel %vm842_vm2, %v412_v8, %v416_v55  ;;  %v421_v17 = vrot.slane %v419_v10, 4  ;;  %v499_v19 = vmax.bf16 %v491_v11, %v922_v0  ;;  %v585_v26 = vrot.slane %v583_v9, 5  ;;  %v300_v55 = vld [vmem:[%s810_s23 + $0x3c] sm:$0x1]  ;;  %v284_v11 = vld [vmem:[%s854_s29 + $0x40] sm:$0xf] }
  0x3c   : > { %v446_v20 = vmax.bf16 %v417_v15, %v315_v1  ;;  %v476_v21 = vmax.bf16 %v453_v5, %v417_v15  ;;  %v424_v23 = vrot.slane %v422_v13, 5  ;;  %v581_v25 = vrot.slane %v580_v16, 4 }
  0x3d   : > { %v590_v27 = vrot.slane %v588_v18, 4  ;;  %v591_v28 = vshll.u32 %v961_v6, 16  ;;  %v627_v32 = vmax.bf16 %v572_v63, %v499_v19  ;;  %v430_v35 = vrot.slane %v428_v14, 5 }
  0x3e   : > { %v484_v33 = vmax.bf16 %v476_v21, %v281_v7  ;;  %v425_v3 = vor.u32 %v424_v23, %v421_v17  ;;  %v454_v0 = vmax.bf16 %v446_v20, %v272_v56  ;;  %v597_v40 = vshll.u32 %v298_v22, 16 }
  0x3f   : > { %v593_v39 = vrot.slane %v591_v28, 5  ;;  %v457_v41 = vshrl.u32 %v274_v24, 16  ;;  %636 = vst.msk [vmem:[%s902_s7 + $0x10] sm:$0xf] %vm631_vm3, %v627_v32  ;;  %v460_v44 = vshll.u32 %v274_v24, 16  ;;  %v466_v45 = vshll.u32 %v275_v31, 16 }
  0x40   : > { %v492_v42 = vmax.bf16 %v484_v33, %v282_v38  ;;  %v426_v43 = vrot.slane %v425_v3, 4  ;;  %v586_v46 = vsel %vm842_vm2, %v581_v25, %v585_v26  ;;  %v602_v48 = vshrl.u32 %v299_v37, 16 }
  0x41   : > { %v594_v4 = vor.u32 %v593_v39, %v590_v27  ;;  %v459_v47 = vrot.slane %v457_v41, 4  ;;  %v599_v51 = vrot.slane %v597_v40, 5  ;;  %v462_v52 = vrot.slane %v460_v44, 5 }
  0x42   : > { %v500_v49 = vmax.bf16 %v492_v42, %v940_v34  ;;  %v431_v50 = vsel %vm842_vm2, %v426_v43, %v430_v35  ;;  %v468_v56 = vrot.slane %v466_v45, 5  ;;  %v604_v59 = vrot.slane %v602_v48, 4  ;;  %v283_v34 = vld [vmem:[%s854_s29 + $0x38] sm:$0xf] }
  0x43   : > { %v447_v53 = vmax.bf16 %v431_v50, %v316_v12  ;;  %v477_v29 = vmax.bf16 %v454_v0, %v431_v50  ;;  %v595_v54 = vrot.slane %v594_v4, 4  ;;  %v463_v58 = vor.u32 %v462_v52, %v459_v47 }
  0x44   : > { %v628_v57 = vmax.bf16 %v586_v46, %v500_v49  ;;  %v605_v36 = vshll.u32 %v299_v37, 16  ;;  %v611_v1 = vshll.u32 %v300_v55, 16 }
  0x45   : > { %v485_v60 = vmax.bf16 %v477_v29, %v282_v38  ;;  %v455_v61 = vmax.bf16 %v447_v53, %v274_v24  ;;  %v464_v62 = vrot.slane %v463_v58, 4  ;;  %v600_v7 = vsel %vm842_vm2, %v595_v54, %v599_v51 }
  0x46   : > { %637 = vst.msk [vmem:[%s902_s7 + $0x14] sm:$0xf] %vm631_vm3, %v628_v57  ;;  %v607_v63 = vrot.slane %v605_v36, 5  ;;  %v613_v13 = vrot.slane %v611_v1, 5 }
  0x47   : > { %v493_v5 = vmax.bf16 %v485_v60, %v283_v34  ;;  %v469_v8 = vsel %vm842_vm2, %v464_v62, %v468_v56 }
  0x48   : > { %v608_v2 = vor.u32 %v607_v63, %v604_v59  ;;  %v478_v10 = vmax.bf16 %v469_v8, %v455_v61 }
  0x49   : > { %v501_v9 = vmax.bf16 %v493_v5, %v961_v6 }
  0x4a   : > { %v609_v12 = vrot.slane %v608_v2, 4  ;;  %v486_v15 = vmax.bf16 %v478_v10, %v283_v34 }
  0x4b   : > { %v629_v14 = vmax.bf16 %v600_v7, %v501_v9 }
  0x4c   : > { %v494_v16 = vmax.bf16 %v486_v15, %v284_v11  ;;  %v614_v17 = vsel %vm842_vm2, %v609_v12, %v613_v13 }
  0x4d   : > { %638 = vst.msk [vmem:[%s902_s7 + $0x18] sm:$0xf] %vm631_vm3, %v629_v14 }
  0x4e   : > { %v502_v18 = vmax.bf16 %v494_v16, %v299_v37 }
  0x50   : > { %v630_v19 = vmax.bf16 %v614_v17, %v502_v18 }
  0x52   : > { %639 = vst.msk [vmem:[%s902_s7 + $0x1c] sm:$0xf] %vm631_vm3, %v630_v19 }
  0x53 PF: > { %s14_s15 = sadd.s32 1, %s760_s15  }
  0x54   : > { %p11_p4 = scmp.ge.s32.totalorder %s14_s15, 4  }
  0x56   :  { %13 = sbr.rel (!%p11_p4) target bundleno = 1 (0x1), region = 75 }

// kernel: resnet_forward.18
= control target key start
LH: loop header
LB: loop body
LE: loop exit
PB: predicated region body
PF: predicated region fallthrough
CT: control target
= control target key end

     0   :  { %s2124_s12 = smov 0   ;;  %s2553_s0 = inlined_call_operand.vmem [shape: bf16[2,10,10,64], index: 0, kind: input, shape index: {}]   ;;  %s2554_s1 = inlined_call_operand.vmem [shape: bf16[9,64,64], index: 1, kind: input, shape index: {}]   ;;  %s2555_s2 = inlined_call_operand.vmem [shape: f32[1,64], index: 2, kind: input, shape index: {}]   ;;  %s2556_s3 = inlined_call_operand.vmem [shape: bf16[2,8,8,64], index: 3, kind: output, shape index: {}]  }
   0x1 LB: > { %s1569_s13 = sadd.s32 4294967295, %s2102_s12   ;;  %p1573_p0 = scmp.ge.s32.totalorder %s2102_s12, 1  ;;  %s2102_s12 = sphi %s2124_s12, %s13_s12  }
   0x2   : > { %p137_p1 = scmp.lt.s32.totalorder %s2102_s12, 3 }
   0x4   : > { %p138_p2 = pnand %p1573_p0, %p137_p1 }
   0x5   : > { %v2051_v0 = vld [vmem:[%s2554_s1 + $0x20] sm:$0xff] (!%p138_p2)   ;;  %p161_p3 = scmp.lt.s32.totalorder (!%p138_p2), %s1569_s13, 1  ;;  %v2053_v2 = vld [vmem:[%s2554_s1 + $0x28] sm:$0xff] (!%p138_p2)   ;;  %v2055_v4 = vld [vmem:[%s2554_s1 + $0x30] sm:$0xff] (!%p138_p2)   ;;  %vm200_vm0 = vsmask.f32 (!%p138_p2), 3328 }
   0x6   : > { %141 = sbr.rel (%p138_p2) target bundleno = 327 (0x147), region = 32  ;;  %v2052_v1 = vld [vmem:[%s2554_s1 + $0x80] sm:$0xff] (!%p138_p2)   ;;  %1826 = vmatprep.subr.bf16.mxu1 (!%p138_p2), %v2051_v0  ;;  %v2054_v3 = vld [vmem:[%s2554_s1 + $0x88] sm:$0xff] (!%p138_p2)   ;;  %v2056_v5 = vld [vmem:[%s2554_s1 + $0x90] sm:$0xff] (!%p138_p2)   ;;  %vm201_vm1 = vsmask.f32 (!%p138_p2), 7440 }
   0x7   : > { %1890 = vmatprep.subr.bf16.mxu0 (!%p138_p2), %v2052_v1  ;;  %1827 = vmatpush3.bf16.msra.mxu1 (!%p138_p2), %v2051_v0  ;;  %v2057_v6 = vld [vmem:[%s2554_s1 + $0x38] sm:$0xff] (!%p138_p2)   ;;  %v2185_v22 = vld [vmem:[%s2554_s1] sm:$0xff] (!%p138_p2)   ;;  %vm2209_vm2 = vmor (!%p138_p2), %vm200_vm0, %vm201_vm1  ;;  %vm360_vm3 = vcmask (!%p138_p2), 523264   ;;  %vm567_vm4 = vcmask (!%p138_p2), 1042432   ;;  %vm568_vm5 = vcmask (!%p138_p2), 1046532   ;;  %vm1505_vm7 = vcmask (!%p138_p2), 519168  }
   0x8   : > { %1891 = vmatpush3.bf16.msra.mxu0 (!%p138_p2), %v2052_v1  ;;  %1828 = vmatprep.subr.bf16.mxu1 (!%p138_p2), %v2053_v2  ;;  %v2058_v10 = vld [vmem:[%s2554_s1 + $0x98] sm:$0xff] (!%p138_p2)   ;;  %v2190_v23 = vld [vmem:[%s2554_s1 + $0xa0] sm:$0xff] (!%p138_p2)   ;;  %vm2306_vm6 = vmor (!%p138_p2), %vm567_vm4, %vm568_vm5 }
   0x9   : > { %1892 = vmatprep.subr.bf16.mxu0 (!%p138_p2), %v2054_v3 }
   0xb   : > { %1829 = vmatpush3.bf16.msra.mxu1 (!%p138_p2), %v2053_v2 }
   0xc   : > { %1893 = vmatpush3.bf16.msra.mxu0 (!%p138_p2), %v2054_v3  ;;  %1830 = vmatprep.subr.bf16.mxu1 (!%p138_p2), %v2055_v4 }
   0xd   : > { %s2562_s13 = smov (!%p161_p3, %s1569_s13), 1  ;;  %1894 = vmatprep.subr.bf16.mxu0 %v2056_v5 }
   0xe   : > { %s2042_s24 = smul.u32 80, %s2562_s13  ;;  %s1753_s17 = sshll.u32 %s2562_s13, 5 }
   0xf   : > { %1831 = vmatpush3.bf16.msra.mxu1 %v2055_v4  ;;  %s170_s20 = scalar_lea.vmem %s2556_s3, %s1753_s17 }
  0x10   : > { %s2156_s29 = scalar_lea.vmem %s2553_s0, %s2042_s24  ;;  %1895 = vmatpush3.bf16.msra.mxu0 %v2056_v5  ;;  %1832 = vmatprep.subr.bf16.mxu1 %v2057_v6 }
  0x11   : > { %v2162_v7 = vld [vmem:[%s2156_s29] sm:$0xf]  ;;  %v2165_v8 = vld [vmem:[%s2156_s29 + $0x4] sm:$0x1]  ;;  %v2168_v9 = vld [vmem:[%s2156_s29 + $0x8] sm:$0xf]  ;;  %1896 = vmatprep.subr.bf16.mxu0 %v2058_v10 }
  0x12   : > { %v2174_v11 = vld [vmem:[%s2156_s29 + $0xc] sm:$0x1]  ;;  %v204_v12 = vshrl.u32 %v2162_v7, 16  ;;  %v207_v13 = vshll.u32 %v2162_v7, 16  ;;  %v213_v14 = vshll.u32 %v2165_v8, 16  ;;  %v218_v15 = vshrl.u32 %v2168_v9, 16 }
  0x13   : > { %v221_v16 = vshll.u32 %v2168_v9, 16  ;;  %v227_v17 = vshll.u32 %v2174_v11, 16  ;;  %v2193_v26 = vld [vmem:[%s2156_s29 + $0x10] sm:$0xf]  ;;  %v2196_v27 = vld [vmem:[%s2156_s29 + $0x14] sm:$0x1]  ;;  %1833 = vmatpush3.bf16.msra.mxu1 %v2057_v6 }
  0x14   : > { %v206_v18 = vrot.slane %v204_v12, 4  ;;  %v209_v19 = vrot.slane %v207_v13, 5  ;;  %v215_v20 = vrot.slane %v213_v14, 5  ;;  %v220_v21 = vrot.slane %v218_v15, 4  ;;  %v2199_v29 = vld [vmem:[%s2156_s29 + $0x18] sm:$0xf]  ;;  %1897 = vmatpush3.bf16.msra.mxu0 %v2058_v10  ;;  %1842 = vmatprep.subr.bf16.mxu1 %v2185_v22 }
  0x15   : > { %v223_v24 = vrot.slane %v221_v16, 5  ;;  %v229_v25 = vrot.slane %v227_v17, 5  ;;  %v2202_v30 = vld [vmem:[%s2156_s29 + $0x1c] sm:$0x1]  ;;  %v2205_v31 = vld [vmem:[%s2156_s29 + $0x20] sm:$0xf]  ;;  %1906 = vmatprep.subr.bf16.mxu0 %v2190_v23 }
  0x16   : > { %v210_v28 = vor.u32 %v209_v19, %v206_v18  ;;  %v2214_v34 = vld [vmem:[%s2156_s29 + $0x24] sm:$0x1]  ;;  %v232_v35 = vshrl.u32 %v2193_v26, 16  ;;  %v235_v36 = vshll.u32 %v2193_v26, 16  ;;  %v241_v37 = vshll.u32 %v2196_v27, 16  ;;  %v2061_v18 = vld [vmem:[%s2554_s1 + $0x8] sm:$0xff]  }
  0x17   : > { %v224_v33 = vor.u32 %v223_v24, %v220_v21  ;;  %v246_v39 = vshrl.u32 %v2199_v29, 16  ;;  %v249_v40 = vshll.u32 %v2199_v29, 16  ;;  %v255_v41 = vshll.u32 %v2202_v30, 16  ;;  %v2232_v57 = vld [vmem:[%s2156_s29 + $0x28] sm:$0xf] }
  0x18   : > { %v211_v38 = vrot.slane %v210_v28, 4  ;;  %v234_v43 = vrot.slane %v232_v35, 4  ;;  %v237_v44 = vrot.slane %v235_v36, 5  ;;  %v243_v46 = vrot.slane %v241_v37, 5  ;;  %v2235_v61 = vld [vmem:[%s2156_s29 + $0x2c] sm:$0x1] }
  0x19   : > { %v225_v42 = vrot.slane %v224_v33, 4  ;;  %v248_v47 = vrot.slane %v246_v39, 4  ;;  %v251_v48 = vrot.slane %v249_v40, 5  ;;  %v260_v51 = vshrl.u32 %v2205_v31, 16  ;;  %v2247_v13 = vld [vmem:[%s2156_s29 + $0x30] sm:$0xf] }
  0x1a   : > { %v216_v45 = vsel %vm2209_vm2, %v211_v38, %v215_v20  ;;  %v238_v50 = vor.u32 %v237_v44, %v234_v43  ;;  %v263_v52 = vshll.u32 %v2205_v31, 16  ;;  %v257_v55 = vrot.slane %v255_v41, 5  ;;  %v2250_v14 = vld [vmem:[%s2156_s29 + $0x34] sm:$0x1]  ;;  %v2062_v20 = vld [vmem:[%s2554_s1 + $0xa8] sm:$0xff]  }
  0x1b   : > { %v230_v49 = vsel %vm2209_vm2, %v225_v42, %v229_v25  ;;  %v252_v54 = vor.u32 %v251_v48, %v248_v47  ;;  %v269_v56 = vshll.u32 %v2214_v34, 16  ;;  %v262_v59 = vrot.slane %v260_v51, 4  ;;  %v2270_v36 = vld [vmem:[%s2156_s29 + $0x38] sm:$0xf]  ;;  %v2273_v37 = vld [vmem:[%s2156_s29 + $0x3c] sm:$0x1] }
  0x1c   : > { %v1585_v53 = vcombine.low %v216_v45, %v230_v49  ;;  %v239_v58 = vrot.slane %v238_v50, 4  ;;  %v265_v60 = vrot.slane %v263_v52, 5  ;;  %v274_v0 = vshrl.u32 %v2232_v57, 16  ;;  %v2276_v38 = vld [vmem:[%s2156_s29 + $0x40] sm:$0xf]  ;;  %v2063_v40 = vld [vmem:[%s2554_s1 + $0x10] sm:$0xff]  }
  0x1d   : > { %v253_v62 = vrot.slane %v252_v54, 4  ;;  %v271_v63 = vrot.slane %v269_v56, 5  ;;  %v277_v3 = vshll.u32 %v2232_v57, 16  ;;  %v283_v4 = vshll.u32 %v2235_v61, 16  ;;  %v2283_v44 = vld [vmem:[%s2156_s29 + $0x44] sm:$0x1] }
  0x1e   : > { %1834 = vmatprep.mubr.msk.bf16.mxu1 %vm360_vm3, %v1585_v53  ;;  %v244_v1 = vsel %vm2209_vm2, %v239_v58, %v243_v46  ;;  %v266_v2 = vor.u32 %v265_v60, %v262_v59  ;;  %v576_v5 = vrot.slane %v2174_v11, 5  ;;  %v276_v12 = vrot.slane %v274_v0, 4  ;;  %v2064_v54 = vld [vmem:[%s2554_s1 + $0xb0] sm:$0xff]  }
  0x1f   : > { %v258_v6 = vsel %vm2209_vm2, %v253_v62, %v257_v55  ;;  %v1665_v10 = vcombine.low %v230_v49, %v244_v1  ;;  %v580_v17 = vrot.slane %v2196_v27, 5  ;;  %v279_v19 = vrot.slane %v277_v3, 5 }
  0x20   : > { %v267_v15 = vrot.slane %v266_v2, 4  ;;  %v2252_v16 = vcombine.low %v244_v1, %v258_v6  ;;  %v285_v21 = vrot.slane %v283_v4, 5  ;;  %v288_v24 = vshrl.u32 %v2247_v13, 16 }
  0x21   : > { %1898 = vmatprep.mubr.msk.bf16.mxu0 %vm360_vm3, %v1665_v10  ;;  %v291_v25 = vshll.u32 %v2247_v13, 16  ;;  %v297_v28 = vshll.u32 %v2250_v14, 16  ;;  %v280_v35 = vor.u32 %v279_v19, %v276_v12  ;;  %v302_v46 = vshrl.u32 %v2270_v36, 16 }
  0x22   : > { %v272_v33 = vsel %vm2209_vm2, %v267_v15, %v271_v63  ;;  %1835 = vmatmul.mubr.msk.bf16.vlgmr.msra.gmra.mrb[0].mxu1 %vm360_vm3, %v2252_v16  ;;  %v290_v41 = vrot.slane %v288_v24, 4  ;;  %v305_v47 = vshll.u32 %v2270_v36, 16  ;;  %v311_v48 = vshll.u32 %v2273_v37, 16  ;;  %v2066_v15 = vld [vmem:[%s2554_s1 + $0xb8] sm:$0xff]  }
  0x23   : > { %v1666_v39 = vcombine.low %v258_v6, %v272_v33  ;;  %1843 = vmatpush3.bf16.msra.mxu1 %v2185_v22  ;;  %v293_v42 = vrot.slane %v291_v25, 5  ;;  %v299_v43 = vrot.slane %v297_v28, 5  ;;  %v281_v45 = vrot.slane %v280_v35, 4 }
  0x24   : > { %1844 = vmatprep.subr.bf16.mxu1 %v2061_v18  ;;  %v857_v49 = vshrl.u32 %v2276_v38, 16  ;;  %v860_v50 = vshll.u32 %v2276_v38, 16  ;;  %v866_v51 = vshll.u32 %v2283_v44, 16  ;;  %v584_v52 = vrot.slane %v2202_v30, 5 }
  0x25   : > { %1899 = vmatmul.mubr.msk.bf16.vlgmr.msra.gmra.mrb[0].mxu0 %vm360_vm3, %v1666_v39  ;;  %v294_v22 = vor.u32 %v293_v42, %v290_v41  ;;  %v286_v53 = vsel %vm2209_vm2, %v281_v45, %v285_v21  ;;  %v304_v55 = vrot.slane %v302_v46, 4  ;;  %v307_v56 = vrot.slane %v305_v47, 5  ;;  %v2372_v46 = vld [vmem:[%s2156_s29 + $0x48] sm:$0xf] }
  0x26   : > { %1907 = vmatpush3.bf16.msra.mxu0 %v2190_v23  ;;  %v2299_v58 = vcombine.low %v272_v33, %v286_v53  ;;  %v859_v60 = vrot.slane %v857_v49, 4  ;;  %v862_v62 = vrot.slane %v860_v50, 5  ;;  %v2065_v23 = vld [vmem:[%s2554_s1 + $0x18] sm:$0xff]   ;;  %v313_v63 = vrot.slane %v311_v48, 5 }
  0x27   : > { %1908 = vmatprep.subr.bf16.mxu0 %v2062_v20  ;;  %1845 = vmatpush3.bf16.msra.mxu1 %v2061_v18  ;;  %v295_v59 = vrot.slane %v294_v22, 4  ;;  %v308_v30 = vor.u32 %v307_v56, %v304_v55  ;;  %v1610_v1 = vrot.slane %v2168_v9, 9  ;;  %v868_v4 = vrot.slane %v866_v51, 5  ;;  %v2072_v56 = vld [vmem:[%s2554_s1 + $0xc8] sm:$0xff]  }
  0x28   : > { %1846 = vmatprep.subr.bf16.mxu1 %v2063_v40  ;;  %1838 = vmatprep.mubr.msk.bf16.mxu1 %vm360_vm3, %v2299_v58  ;;  %v863_v3 = vor.u32 %v862_v62, %v859_v60  ;;  %v1611_v6 = vrot.slane %v2193_v26, 9  ;;  %v1612_v21 = vrot.slane %v2199_v29, 9  ;;  %v588_v24 = vrot.slane %v2214_v34, 5  ;;  %v2068_v34 = vld [vmem:[%s2554_s1 + $0x40] sm:$0xff]  }
  0x29   : > { %v300_v2 = vsel %vm2209_vm2, %v295_v59, %v299_v43  ;;  %v309_v12 = vrot.slane %v308_v30, 4  ;;  %v2323_v19 = vsel %vm2306_vm6, %v1610_v1, %v576_v5  ;;  %v1613_v11 = vrot.slane %v2205_v31, 9  ;;  %v2074_v30 = vld [vmem:[%s2554_s1 + $0x50] sm:$0xff]  }
  0x2a   : > { %1909 = vmatpush3.bf16.msra.mxu0 %v2062_v20  ;;  %v1667_v10 = vcombine.low %v286_v53, %v300_v2  ;;  %v864_v18 = vrot.slane %v863_v3, 4  ;;  %v2329_v20 = vsel %vm2306_vm6, %v1611_v6, %v580_v17  ;;  %v1597_v17 = vcombine.low %v2162_v7, %v2168_v9 }
  0x2b   : > { %1910 = vmatprep.subr.bf16.mxu0 %v2064_v54  ;;  %1847 = vmatpush3.bf16.msra.mxu1 %v2063_v40  ;;  %v314_v25 = vsel %vm2209_vm2, %v309_v12, %v313_v63  ;;  %v1686_v33 = vcombine.low %v2323_v19, %v2329_v20  ;;  %v572_v35 = vrot.slane %v2165_v8, 5  ;;  %v2356_v39 = vsel %vm2306_vm6, %v1612_v21, %v584_v52  ;;  %v2069_v40 = vld [vmem:[%s2554_s1 + $0xc0] sm:$0xff]   ;;  %v2078_v21 = vld [vmem:[%s2554_s1 + $0xd8] sm:$0xff]  }
  0x2c   : > { %1902 = vmatprep.mubr.msk.bf16.mxu0 %vm360_vm3, %v1667_v10  ;;  %1848 = vmatprep.subr.bf16.mxu1 %v2065_v23  ;;  %v2337_v5 = vcombine.low %v300_v2, %v314_v25  ;;  %v2341_v27 = vsel %vm2209_vm2, %v864_v18, %v868_v4  ;;  %v1614_v41 = vrot.slane %v2232_v57, 9  ;;  %v2365_v8 = vsel %vm2306_vm6, %v1613_v11, %v588_v24  ;;  %v2075_v2 = vld [vmem:[%s2554_s1 + $0xd0] sm:$0xff]   ;;  %v2080_v11 = vld [vmem:[%s2554_s1 + $0xe0] sm:$0xff]  }
  0x2d   : > { %v1668_v28 = vcombine.low %v314_v25, %v2341_v27  ;;  %v592_v42 = vrot.slane %v2235_v61, 5  ;;  %v1615_v43 = vrot.slane %v2247_v13, 9  ;;  %v596_v45 = vrot.slane %v2250_v14, 5  ;;  %v2071_v61 = vld [vmem:[%s2554_s1 + $0x48] sm:$0xff]   ;;  %v2079_v25 = vld [vmem:[%s2554_s1 + $0x60] sm:$0xff]  }
  0x2e   : > { %1911 = vmatpush3.bf16.msra.mxu0 %v2064_v54  ;;  %1839 = vmatmul.mubr.msk.bf16.gmra.mrb[4].mxu1 %vm360_vm3, %v2337_v5  ;;  %v1687_v47 = vcombine.low %v2356_v39, %v2365_v8  ;;  %v1598_v48 = vcombine.low %v2193_v26, %v2199_v29  ;;  %v2383_v14 = vld [vmem:[%s2156_s29 + $0x4c] sm:$0x1]  ;;  %v1616_v22 = vrot.slane %v2270_v36, 9  ;;  %v600_v49 = vrot.slane %v2273_v37, 5 }
  0x2f   : > { %1912 = vmatprep.subr.bf16.mxu0 %v2066_v15  ;;  %1903 = vmatmul.mubr.msk.bf16.gmra.mrb[4].mxu0 %vm360_vm3, %v1668_v28  ;;  %v593_v50 = vsel %vm2306_vm6, %v1614_v41, %v592_v42  ;;  %v2391_v51 = vsel %vm2306_vm6, %v1615_v43, %v596_v45  ;;  %v1677_v52 = vrot.slane %v2276_v38, 9  ;;  %v1234_v53 = vshrl.u32 %v2372_v46, 16  ;;  %v2087_v41 = vld [vmem:[%s2554_s1 + $0xf8] sm:$0xff]   ;;  %v2089_v42 = vld [vmem:[%s2554_s1 + $0x100] sm:$0xff]  }
  0x30   : > { %1849 = vmatpush3.bf16.msra.mxu1 %v2065_v23  ;;  %1850 = vmatprep.mubr.msk.bf16.mxu1 %vm360_vm3, %v1597_v17  ;;  %v996_v54 = vrot.slane %v2283_v44, 5  ;;  %v1237_v55 = vshll.u32 %v2372_v46, 16  ;;  %v1599_v37 = vcombine.low %v2205_v31, %v2232_v57  ;;  %v1688_v60 = vcombine.low %v593_v50, %v2391_v51  ;;  %v2081_v17 = vld [vmem:[%s2554_s1 + $0x68] sm:$0xff]  }
  0x31   : > { %1858 = vmatprep.subr.bf16.mxu1 %v2068_v34  ;;  %1914 = vmatprep.mubr.msk.bf16.mxu0 %vm360_vm3, %v1686_v33  ;;  %v1236_v59 = vrot.slane %v1234_v53, 4  ;;  %v1609_v62 = vrot.slane %v2162_v7, 9  ;;  %v1243_v44 = vshll.u32 %v2383_v14, 16  ;;  %v601_v63 = vsel %vm2306_vm6, %v1616_v22, %v600_v49  ;;  %v2084_v33 = vld [vmem:[%s2554_s1 + $0xf0] sm:$0xff]  }
  0x32   : > { %1913 = vmatpush3.bf16.msra.mxu0 %v2066_v15  ;;  %v1239_v23 = vrot.slane %v1237_v55, 5  ;;  %v2414_v1 = vsel %vm2306_vm6, %v1677_v52, %v996_v54  ;;  %v1600_v4 = vcombine.low %v2247_v13, %v2270_v36  ;;  %v2077_v15 = vld [vmem:[%s2554_s1 + $0x58] sm:$0xff]   ;;  %v2462_v28 = vcombine.low %v2365_v8, %v593_v50  ;;  %v1750_v54 = vld [vmem:[%s2555_s2] ss:$0 sm:$0xff] }
  0x33   : > { %1922 = vmatprep.subr.bf16.mxu0 %v2069_v40  ;;  %v2420_v3 = vrot.slane %v1243_v44, 5  ;;  %v573_v6 = vsel %vm2306_vm6, %v1609_v62, %v572_v35  ;;  %v1689_v12 = vcombine.low %v601_v63, %v2414_v1  ;;  %v1628_v35 = vcombine.low %v2391_v51, %v601_v63 }
  0x34   : > { %v1240_v7 = vor.u32 %v1239_v23, %v1236_v59  ;;  %v1625_v24 = vcombine.low %v573_v6, %v2323_v19  ;;  %v2452_v19 = vcombine.low %v2329_v20, %v2356_v39  ;;  %v2083_v20 = vld [vmem:[%s2554_s1 + $0x70] sm:$0xff]   ;;  %v1706_v39 = vcombine.low %v2276_v38, %v2372_v46 }
  0x35   : > { %v1645_v8 = vcombine.low %v2168_v9, %v2193_v26  ;;  %v1646_v9 = vcombine.low %v2199_v29, %v2205_v31  ;;  %v2091_v26 = vld [vmem:[%s2554_s1 + $0x108] sm:$0xff]   ;;  %v1647_v43 = vcombine.low %v2232_v57, %v2247_v13  ;;  %v2093_v29 = vld [vmem:[%s2554_s1 + $0x110] sm:$0xff]   ;;  %v1648_v31 = vcombine.low %v2270_v36, %v2276_v38 }
  0x36   : > { %1851 = vmatmul.mubr.msk.bf16.vlgmr.msra.gmra.mrb[0].mxu1 %vm360_vm3, %v1598_v48  ;;  %v2427_v10 = vrot.slane %v1240_v7, 4  ;;  %v1732_v57 = vrot.slane %v2372_v46, 9  ;;  %v1361_v13 = vrot.slane %v2383_v14, 5 }
  0x37   : > { %1859 = vmatpush3.bf16.msra.mxu1 %v2068_v34  ;;  %1915 = vmatmul.mubr.msk.bf16.vlgmr.msra.gmra.mrb[0].mxu0 %vm360_vm3, %v1687_v47  ;;  %v2082_v34 = vld [vmem:[%s2554_s1 + $0xe8] sm:$0xff]  }
  0x38   : > { %1923 = vmatpush3.bf16.msra.mxu0 %v2069_v40  ;;  %1860 = vmatprep.subr.bf16.mxu1 %v2071_v61  ;;  %v1246_v18 = vsel %vm2209_vm2, %v2427_v10, %v2420_v3  ;;  %v2086_v40 = vld [vmem:[%s2554_s1 + $0x78] sm:$0xff]   ;;  %v1362_v36 = vsel %vm2306_vm6, %v1732_v57, %v1361_v13 }
  0x39   : > { %1924 = vmatprep.subr.bf16.mxu0 %v2072_v56  ;;  %1854 = vmatprep.mubr.msk.bf16.mxu1 %vm360_vm3, %v1599_v37  ;;  %v1741_v32 = vcombine.low %v2414_v1, %v1362_v36 }
  0x3a   : > { %1918 = vmatprep.mubr.msk.bf16.mxu0 %vm360_vm3, %v1688_v60 }
  0x3b   : > { %1861 = vmatpush3.bf16.msra.mxu1 %v2071_v61 }
  0x3c   : > { %1925 = vmatpush3.bf16.msra.mxu0 %v2072_v56  ;;  %1862 = vmatprep.subr.bf16.mxu1 %v2074_v30 }
  0x3d   : > { %1926 = vmatprep.subr.bf16.mxu0 %v2075_v2 }
  0x3e   : > { %1855 = vmatmul.mubr.msk.bf16.gmra.mrb[4].mxu1 %vm360_vm3, %v1600_v4 }
  0x3f   : > { %1863 = vmatpush3.bf16.msra.mxu1 %v2074_v30  ;;  %1919 = vmatmul.mubr.msk.bf16.gmra.mrb[4].mxu0 %vm360_vm3, %v1689_v12 }
  0x40   : > { %1927 = vmatpush3.bf16.msra.mxu0 %v2075_v2  ;;  %1864 = vmatprep.subr.bf16.mxu1 %v2077_v15 }
  0x41   : > { %1928 = vmatprep.subr.bf16.mxu0 %v2078_v21  ;;  %1866 = vmatprep.mubr.msk.bf16.mxu1 %vm360_vm3, %v1625_v24 }
  0x42   : > { %1930 = vmatprep.mubr.msk.bf16.mxu0 %vm360_vm3, %v1598_v48 }
  0x43   : > { %1865 = vmatpush3.bf16.msra.mxu1 %v2077_v15 }
  0x44   : > { %1929 = vmatpush3.bf16.msra.mxu0 %v2078_v21  ;;  %1874 = vmatprep.subr.bf16.mxu1 %v2079_v25 }
  0x45   : > { %1938 = vmatprep.subr.bf16.mxu0 %v2080_v11 }
  0x46   : > { %1867 = vmatmul.mubr.msk.bf16.vlgmr.msra.gmra.mrb[0].mxu1 %vm360_vm3, %v2452_v19 }
  0x47   : > { %1875 = vmatpush3.bf16.msra.mxu1 %v2079_v25  ;;  %1931 = vmatmul.mubr.msk.bf16.vlgmr.msra.gmra.mrb[0].mxu0 %vm360_vm3, %v1599_v37 }
  0x48   : > { %1939 = vmatpush3.bf16.msra.mxu0 %v2080_v11  ;;  %1876 = vmatprep.subr.bf16.mxu1 %v2081_v17 }
  0x49   : > { %1940 = vmatprep.subr.bf16.mxu0 %v2082_v34  ;;  %1870 = vmatprep.mubr.msk.bf16.mxu1 %vm360_vm3, %v2462_v28 }
  0x4a   : > { %1934 = vmatprep.mubr.msk.bf16.mxu0 %vm360_vm3, %v1600_v4 }
  0x4b   : > { %1877 = vmatpush3.bf16.msra.mxu1 %v2081_v17 }
  0x4c   : > { %1941 = vmatpush3.bf16.msra.mxu0 %v2082_v34  ;;  %1878 = vmatprep.subr.bf16.mxu1 %v2083_v20 }
  0x4d   : > { %1942 = vmatprep.subr.bf16.mxu0 %v2084_v33 }
  0x4e   : > { %1871 = vmatmul.mubr.msk.bf16.gmra.mrb[4].mxu1 %vm360_vm3, %v1628_v35 }
  0x4f   : > { %1879 = vmatpush3.bf16.msra.mxu1 %v2083_v20  ;;  %1935 = vmatmul.mubr.msk.bf16.gmra.mrb[4].mxu0 %vm360_vm3, %v1706_v39 }
  0x50   : > { %1943 = vmatpush3.bf16.msra.mxu0 %v2084_v33  ;;  %1880 = vmatprep.subr.bf16.mxu1 %v2086_v40 }
  0x51   : > { %1944 = vmatprep.subr.bf16.mxu0 %v2087_v41  ;;  %1882 = vmatprep.mubr.msk.bf16.mxu1 %vm360_vm3, %v1645_v8 }
  0x52   : > { %1946 = vmatprep.mubr.msk.bf16.mxu0 %vm360_vm3, %v2252_v16  ;;  %v1723_v16 = vcombine.low %v2341_v27, %v1246_v18 }
  0x53   : > { %1881 = vmatpush3.bf16.msra.mxu1 %v2086_v40 }
  0x54   : > { %1945 = vmatpush3.bf16.msra.mxu0 %v2087_v41  ;;  %1970 = vmatprep.subr.bf16.mxu1 %v2089_v42 }
  0x55   : > { %1954 = vmatprep.subr.bf16.mxu0 %v2089_v42 }
  0x56   : > { %1883 = vmatmul.mubr.msk.bf16.vlgmr.msra.gmra.mrb[0].mxu1 %vm360_vm3, %v1646_v9 }
  0x57   : > { %1947 = vmatmul.mubr.msk.bf16.vlgmr.msra.gmra.mrb[0].mxu0 %vm360_vm3, %v2299_v58  ;;  %1974 = vmatpush3.bf16.msra.mxu1 %v2089_v42  ;;  %v2095_v58 = vld [vmem:[%s2554_s1 + $0x118] sm:$0xff]  }
  0x58   : > { %1955 = vmatpush3.bf16.msra.mxu0 %v2089_v42  ;;  %1971 = vmatprep.subr.bf16.mxu1 %v2091_v26 }
  0x59   : > { %1956 = vmatprep.subr.bf16.mxu0 %v2091_v26  ;;  %1886 = vmatprep.mubr.msk.bf16.mxu1 %vm360_vm3, %v1647_v43 }
  0x5a   : > { %1950 = vmatprep.mubr.msk.bf16.mxu0 %vm360_vm3, %v2337_v5 }
  0x5b   : > { %1975 = vmatpush3.bf16.msra.mxu1 %v2091_v26 }
  0x5c   : > { %1957 = vmatpush3.bf16.msra.mxu0 %v2091_v26  ;;  %1972 = vmatprep.subr.bf16.mxu1 %v2093_v29 }
  0x5d   : > { %1958 = vmatprep.subr.bf16.mxu0 %v2093_v29 }
  0x5e   : > { %1887 = vmatmul.mubr.msk.bf16.gmra.mrb[4].mxu1 %vm360_vm3, %v1648_v31 }
  0x5f   : > { %1951 = vmatmul.mubr.msk.bf16.gmra.mrb[4].mxu0 %vm360_vm3, %v1723_v16  ;;  %1976 = vmatpush3.bf16.msra.mxu1 %v2093_v29 }
  0x60   : > { %1959 = vmatpush3.bf16.msra.mxu0 %v2093_v29  ;;  %1973 = vmatprep.subr.bf16.mxu1 %v2095_v58 }
  0x61   : > { %1960 = vmatprep.subr.bf16.mxu0 %v2095_v58  ;;  %1962 = vmatprep.mubr.msk.bf16.mxu0 %vm360_vm3, %v2452_v19 }
  0x62   : > { %1966 = vmatprep.mubr.msk.bf16.mxu1 %vm360_vm3, %v1628_v35 }
  0x63   : > { %1977 = vmatpush3.bf16.msra.mxu1 %v2095_v58 }
  0x64   : > { %1961 = vmatpush3.bf16.msra.mxu0 %v2095_v58 }
  0x66   : > { %1967 = vmatmul.mubr.msk.bf16.vlgmr.msra.gmra.mrb[8].mxu1 %vm360_vm3, %v1741_v32 }
  0x67   : > { %1963 = vmatmul.mubr.msk.bf16.vlgmr.msra.gmra.mrb[0].mxu0 %vm360_vm3, %v2462_v28 }
 0x129   : > { %v1884_v38 = vpop.f32.mrb[0].mxu1 }
 0x12a   : > { %v817_v0 = vpop.f32.mrb[1].mxu1 }
 0x12b   : > { %v1885_v5 = vpop.f32.mrb[2].mxu1 }
 0x12c   : > { %v820_v27 = vpop.f32.mrb[3].mxu1 }
 0x131   : > { %v1888_v45 = vpop.f32.mrb[4].mxu1 }
 0x132   : > { %v1952_v46 = vpop.f32.mrb[4].mxu0  ;;  %v833_v47 = vpop.f32.mrb[5].mxu1 }
 0x133   : > { %v1982_v48 = vadd.f32 %v1952_v46, %v1888_v45  ;;  %v1335_v61 = vpop.f32.mrb[5].mxu0  ;;  %v1889_v14 = vpop.f32.mrb[6].mxu1 }
 0x134   : > { %v1984_v22 = vadd.f32 %v1335_v61, %v833_v47  ;;  %v1953_v49 = vpop.f32.mrb[6].mxu0  ;;  %v836_v50 = vpop.f32.mrb[7].mxu1 }
 0x135   : > { %v1986_v51 = vadd.f32 %v1953_v49, %v1889_v14  ;;  %v1338_v52 = vpop.f32.mrb[7].mxu0 }
 0x136   : > { %v1988_v53 = vadd.f32 %v1338_v52, %v836_v50 }
 0x139   : > { %v1968_v55 = vpop.f32.mrb[8].mxu1 }
 0x13a   : > { %v1964_v56 = vpop.f32.mrb[0].mxu0  ;;  %v1983_v37 = vadd.f32 %v1982_v48, %v1968_v55  ;;  %v1451_v59 = vpop.f32.mrb[9].mxu1 }
 0x13b   : > { %v1978_v60 = vadd.f32 %v1964_v56, %v1884_v38  ;;  %v1435_v62 = vpop.f32.mrb[1].mxu0  ;;  %v1985_v23 = vadd.f32 %v1984_v22, %v1451_v59  ;;  %v1969_v44 = vpop.f32.mrb[10].mxu1 }
 0x13c   : > { %v1487_v30 = vadd.f32 %v1983_v37, %v1750_v54  ;;  %v1979_v63 = vadd.f32 %v1435_v62, %v817_v0  ;;  %v1965_v1 = vpop.f32.mrb[2].mxu0  ;;  %v1987_v7 = vadd.f32 %v1986_v51, %v1969_v44  ;;  %v1454_v2 = vpop.f32.mrb[11].mxu1 }
 0x13d   : > { %v1483_v3 = vadd.f32 %v1978_v60, %v1750_v54  ;;  %v1485_v4 = vadd.f32 %v1985_v23, %v1750_v54  ;;  %v1980_v6 = vadd.f32 %v1965_v1, %v1885_v5  ;;  %v1438_v10 = vpop.f32.mrb[3].mxu0  ;;  %v1989_v12 = vadd.f32 %v1988_v53, %v1454_v2 }
 0x13e   : > { %v1495_v15 = vmax.f32 %v1487_v30, 0.0  ;;  %v1481_v18 = vadd.f32 %v1979_v63, %v1750_v54  ;;  %v1488_v21 = vadd.f32 %v1987_v7, %v1750_v54  ;;  %v1981_v24 = vadd.f32 %v1438_v10, %v820_v27 }
 0x13f   : > { %v1491_v25 = vmax.f32 %v1483_v3, 0.0  ;;  %v1493_v11 = vmax.f32 %v1485_v4, 0.0  ;;  %v1484_v19 = vadd.f32 %v1980_v6, %v1750_v54  ;;  %v1486_v17 = vadd.f32 %v1989_v12, %v1750_v54 }
 0x140   : > { %v1503_v34 = vpack.c.bf16 %v1495_v15, %v1495_v15  ;;  %v1489_v28 = vmax.f32 %v1481_v18, 0.0  ;;  %v1496_v20 = vmax.f32 %v1488_v21, 0.0  ;;  %v1482_v33 = vadd.f32 %v1981_v24, %v1750_v54 }
 0x141   : > { %v1499_v35 = vpack.c.bf16 %v1491_v25, %v1491_v25  ;;  %v1501_v39 = vpack.c.bf16 %v1493_v11, %v1493_v11  ;;  %v1492_v40 = vmax.f32 %v1484_v19, 0.0  ;;  %v1494_v41 = vmax.f32 %v1486_v17, 0.0 }
 0x142   : > { %1512 = vst.msk [vmem:[%s170_s20 + $0x18] sm:$0xf] %vm1505_vm7, %v1503_v34  ;;  %v1497_v8 = vpack.c.bf16 %v1489_v28, %v1489_v28  ;;  %v1504_v42 = vpack.c.bf16 %v1496_v20, %v1496_v20  ;;  %v1490_v9 = vmax.f32 %v1482_v33, 0.0 }
 0x143   : > { %1508 = vst.msk [vmem:[%s170_s20 + $0x8] sm:$0xf] %vm1505_vm7, %v1499_v35  ;;  %1510 = vst.msk [vmem:[%s170_s20 + $0x10] sm:$0xf] %vm1505_vm7, %v1501_v39  ;;  %v1500_v26 = vpack.c.bf16 %v1492_v40, %v1492_v40  ;;  %v1502_v43 = vpack.c.bf16 %v1494_v41, %v1494_v41 }
 0x144   : > { %1506 = vst.msk [vmem:[%s170_s20] sm:$0xf] %vm1505_vm7, %v1497_v8  ;;  %1513 = vst.msk [vmem:[%s170_s20 + $0x1c] sm:$0xf] %vm1505_vm7, %v1504_v42  ;;  %v1498_v29 = vpack.c.bf16 %v1490_v9, %v1490_v9 }
 0x145   : > { %1509 = vst.msk [vmem:[%s170_s20 + $0xc] sm:$0xf] %vm1505_vm7, %v1500_v26  ;;  %1511 = vst.msk [vmem:[%s170_s20 + $0x14] sm:$0xf] %vm1505_vm7, %v1502_v43 }
 0x146   : > { %1507 = vst.msk [vmem:[%s170_s20 + $0x4] sm:$0xf] %vm1505_vm7, %v1498_v29 }
 0x147 PF: > { %s13_s12 = sadd.s32 1, %s2102_s12  }
 0x148   : > { %p10_p4 = scmp.ge.s32.totalorder %s13_s12, 4  }
 0x14a   :  { %12 = sbr.rel (!%p10_p4) target bundleno = 1 (0x1), region = 70 }

// kernel: resnet_forward.19
= control target key start
LH: loop header
LB: loop body
LE: loop exit
PB: predicated region body
PF: predicated region fallthrough
CT: control target
= control target key end

     0   :  { %s2234_s15 = smov 0   ;;  %s2670_s0 = inlined_call_operand.vmem [shape: bf16[2,10,10,64], index: 0, kind: input, shape index: {}]   ;;  %s2671_s1 = inlined_call_operand.vmem [shape: bf16[9,64,64], index: 1, kind: input, shape index: {}]   ;;  %s2672_s2 = inlined_call_operand.vmem [shape: f32[1,64], index: 2, kind: input, shape index: {}]   ;;  %s2673_s3 = inlined_call_operand.vmem [shape: bf16[2,8,8,64], index: 3, kind: input, shape index: {}]   ;;  %s2674_s4 = inlined_call_operand.vmem [shape: bf16[2,8,8,64], index: 4, kind: output, shape index: {}]  }
   0x1 LB: > { %s1652_s16 = sadd.s32 4294967295, %s2207_s15   ;;  %p1656_p0 = scmp.ge.s32.totalorder %s2207_s15, 1  ;;  %s2207_s15 = sphi %s2234_s15, %s14_s15  }
   0x2   : > { %p172_p1 = scmp.lt.s32.totalorder %s2207_s15, 3 }
   0x4   : > { %p173_p2 = pnand %p1656_p0, %p172_p1 }
   0x5   : > { %v2156_v0 = vld [vmem:[%s2671_s1 + $0x20] sm:$0xff] (!%p173_p2)   ;;  %p203_p3 = scmp.lt.s32.totalorder (!%p173_p2), %s1652_s16, 1  ;;  %v2158_v2 = vld [vmem:[%s2671_s1 + $0x28] sm:$0xff] (!%p173_p2)   ;;  %v2160_v4 = vld [vmem:[%s2671_s1 + $0x30] sm:$0xff] (!%p173_p2)   ;;  %vm247_vm0 = vsmask.f32 (!%p173_p2), 3328 }
   0x6   : > { %176 = sbr.rel (%p173_p2) target bundleno = 329 (0x149), region = 36  ;;  %v2157_v1 = vld [vmem:[%s2671_s1 + $0x80] sm:$0xff] (!%p173_p2)   ;;  %1931 = vmatprep.subr.bf16.mxu1 (!%p173_p2), %v2156_v0  ;;  %v2159_v3 = vld [vmem:[%s2671_s1 + $0x88] sm:$0xff] (!%p173_p2)   ;;  %v2161_v5 = vld [vmem:[%s2671_s1 + $0x90] sm:$0xff] (!%p173_p2)   ;;  %vm248_vm1 = vsmask.f32 (!%p173_p2), 7440 }
   0x7   : > { %1995 = vmatprep.subr.bf16.mxu0 (!%p173_p2), %v2157_v1  ;;  %1932 = vmatpush3.bf16.msra.mxu1 (!%p173_p2), %v2156_v0  ;;  %v2162_v6 = vld [vmem:[%s2671_s1 + $0x38] sm:$0xff] (!%p173_p2)   ;;  %v2295_v22 = vld [vmem:[%s2671_s1] sm:$0xff] (!%p173_p2)   ;;  %vm2319_vm2 = vmor (!%p173_p2), %vm247_vm0, %vm248_vm1  ;;  %vm407_vm3 = vcmask (!%p173_p2), 523264   ;;  %vm614_vm4 = vcmask (!%p173_p2), 1042432   ;;  %vm615_vm5 = vcmask (!%p173_p2), 1046532   ;;  %vm1576_vm7 = vcmask (!%p173_p2), 519168  }
   0x8   : > { %1996 = vmatpush3.bf16.msra.mxu0 (!%p173_p2), %v2157_v1  ;;  %1933 = vmatprep.subr.bf16.mxu1 (!%p173_p2), %v2158_v2  ;;  %v2163_v10 = vld [vmem:[%s2671_s1 + $0x98] sm:$0xff] (!%p173_p2)   ;;  %v2300_v23 = vld [vmem:[%s2671_s1 + $0xa0] sm:$0xff] (!%p173_p2)   ;;  %vm2416_vm6 = vmor (!%p173_p2), %vm614_vm4, %vm615_vm5 }
   0x9   : > { %1997 = vmatprep.subr.bf16.mxu0 (!%p173_p2), %v2159_v3 }
   0xb   : > { %1934 = vmatpush3.bf16.msra.mxu1 (!%p173_p2), %v2158_v2 }
   0xc   : > { %1998 = vmatpush3.bf16.msra.mxu0 (!%p173_p2), %v2159_v3  ;;  %1935 = vmatprep.subr.bf16.mxu1 (!%p173_p2), %v2160_v4 }
   0xd   : > { %s2680_s16 = smov (!%p203_p3, %s1652_s16), 1  ;;  %1999 = vmatprep.subr.bf16.mxu0 %v2161_v5 }
   0xe   : > { %s2147_s27 = smul.u32 80, %s2680_s16  ;;  %s1838_s21 = sshll.u32 %s2680_s16, 5 }
   0xf   : > { %1936 = vmatpush3.bf16.msra.mxu1 %v2160_v4  ;;  %s212_s24 = scalar_lea.vmem %s2673_s3, %s1838_s21  ;;  %s217_s29 = scalar_lea.vmem %s2674_s4, %s1838_s21 }
  0x10   : > { %s2266_s6 = scalar_lea.vmem %s2670_s0, %s2147_s27  ;;  %2000 = vmatpush3.bf16.msra.mxu0 %v2161_v5  ;;  %1937 = vmatprep.subr.bf16.mxu1 %v2162_v6 }
  0x11   : > { %v2272_v7 = vld [vmem:[%s2266_s6] sm:$0xf]  ;;  %v2275_v8 = vld [vmem:[%s2266_s6 + $0x4] sm:$0x1]  ;;  %v2278_v9 = vld [vmem:[%s2266_s6 + $0x8] sm:$0xf]  ;;  %2001 = vmatprep.subr.bf16.mxu0 %v2163_v10 }
  0x12   : > { %v2284_v11 = vld [vmem:[%s2266_s6 + $0xc] sm:$0x1]  ;;  %v251_v12 = vshrl.u32 %v2272_v7, 16  ;;  %v254_v13 = vshll.u32 %v2272_v7, 16  ;;  %v260_v14 = vshll.u32 %v2275_v8, 16  ;;  %v265_v15 = vshrl.u32 %v2278_v9, 16 }
  0x13   : > { %v268_v16 = vshll.u32 %v2278_v9, 16  ;;  %v274_v17 = vshll.u32 %v2284_v11, 16  ;;  %v2303_v26 = vld [vmem:[%s2266_s6 + $0x10] sm:$0xf]  ;;  %v2306_v27 = vld [vmem:[%s2266_s6 + $0x14] sm:$0x1]  ;;  %1938 = vmatpush3.bf16.msra.mxu1 %v2162_v6 }
  0x14   : > { %v253_v18 = vrot.slane %v251_v12, 4  ;;  %v256_v19 = vrot.slane %v254_v13, 5  ;;  %v262_v20 = vrot.slane %v260_v14, 5  ;;  %v267_v21 = vrot.slane %v265_v15, 4  ;;  %v2309_v29 = vld [vmem:[%s2266_s6 + $0x18] sm:$0xf]  ;;  %2002 = vmatpush3.bf16.msra.mxu0 %v2163_v10  ;;  %1947 = vmatprep.subr.bf16.mxu1 %v2295_v22 }
  0x15   : > { %v270_v24 = vrot.slane %v268_v16, 5  ;;  %v276_v25 = vrot.slane %v274_v17, 5  ;;  %v2312_v30 = vld [vmem:[%s2266_s6 + $0x1c] sm:$0x1]  ;;  %v2315_v31 = vld [vmem:[%s2266_s6 + $0x20] sm:$0xf]  ;;  %2011 = vmatprep.subr.bf16.mxu0 %v2300_v23 }
  0x16   : > { %v257_v28 = vor.u32 %v256_v19, %v253_v18  ;;  %v2324_v34 = vld [vmem:[%s2266_s6 + $0x24] sm:$0x1]  ;;  %v279_v35 = vshrl.u32 %v2303_v26, 16  ;;  %v282_v36 = vshll.u32 %v2303_v26, 16  ;;  %v288_v37 = vshll.u32 %v2306_v27, 16  ;;  %v2166_v18 = vld [vmem:[%s2671_s1 + $0x8] sm:$0xff]  }
  0x17   : > { %v271_v33 = vor.u32 %v270_v24, %v267_v21  ;;  %v293_v39 = vshrl.u32 %v2309_v29, 16  ;;  %v296_v40 = vshll.u32 %v2309_v29, 16  ;;  %v302_v41 = vshll.u32 %v2312_v30, 16  ;;  %v2342_v57 = vld [vmem:[%s2266_s6 + $0x28] sm:$0xf] }
  0x18   : > { %v258_v38 = vrot.slane %v257_v28, 4  ;;  %v281_v43 = vrot.slane %v279_v35, 4  ;;  %v284_v44 = vrot.slane %v282_v36, 5  ;;  %v290_v46 = vrot.slane %v288_v37, 5  ;;  %v2345_v61 = vld [vmem:[%s2266_s6 + $0x2c] sm:$0x1] }
  0x19   : > { %v272_v42 = vrot.slane %v271_v33, 4  ;;  %v295_v47 = vrot.slane %v293_v39, 4  ;;  %v298_v48 = vrot.slane %v296_v40, 5  ;;  %v307_v51 = vshrl.u32 %v2315_v31, 16  ;;  %v2357_v13 = vld [vmem:[%s2266_s6 + $0x30] sm:$0xf] }
  0x1a   : > { %v263_v45 = vsel %vm2319_vm2, %v258_v38, %v262_v20  ;;  %v285_v50 = vor.u32 %v284_v44, %v281_v43  ;;  %v310_v52 = vshll.u32 %v2315_v31, 16  ;;  %v304_v55 = vrot.slane %v302_v41, 5  ;;  %v2360_v14 = vld [vmem:[%s2266_s6 + $0x34] sm:$0x1]  ;;  %v2167_v20 = vld [vmem:[%s2671_s1 + $0xa8] sm:$0xff]  }
  0x1b   : > { %v277_v49 = vsel %vm2319_vm2, %v272_v42, %v276_v25  ;;  %v299_v54 = vor.u32 %v298_v48, %v295_v47  ;;  %v316_v56 = vshll.u32 %v2324_v34, 16  ;;  %v309_v59 = vrot.slane %v307_v51, 4  ;;  %v2380_v36 = vld [vmem:[%s2266_s6 + $0x38] sm:$0xf]  ;;  %v2383_v37 = vld [vmem:[%s2266_s6 + $0x3c] sm:$0x1] }
  0x1c   : > { %v1670_v53 = vcombine.low %v263_v45, %v277_v49  ;;  %v286_v58 = vrot.slane %v285_v50, 4  ;;  %v312_v60 = vrot.slane %v310_v52, 5  ;;  %v321_v0 = vshrl.u32 %v2342_v57, 16  ;;  %v2386_v38 = vld [vmem:[%s2266_s6 + $0x40] sm:$0xf]  ;;  %v2168_v40 = vld [vmem:[%s2671_s1 + $0x10] sm:$0xff]  }
  0x1d   : > { %v300_v62 = vrot.slane %v299_v54, 4  ;;  %v318_v63 = vrot.slane %v316_v56, 5  ;;  %v324_v3 = vshll.u32 %v2342_v57, 16  ;;  %v330_v4 = vshll.u32 %v2345_v61, 16  ;;  %v2393_v44 = vld [vmem:[%s2266_s6 + $0x44] sm:$0x1] }
  0x1e   : > { %1939 = vmatprep.mubr.msk.bf16.mxu1 %vm407_vm3, %v1670_v53  ;;  %v291_v1 = vsel %vm2319_vm2, %v286_v58, %v290_v46  ;;  %v313_v2 = vor.u32 %v312_v60, %v309_v59  ;;  %v623_v5 = vrot.slane %v2284_v11, 5  ;;  %v323_v12 = vrot.slane %v321_v0, 4  ;;  %v2169_v54 = vld [vmem:[%s2671_s1 + $0xb0] sm:$0xff]  }
  0x1f   : > { %v305_v6 = vsel %vm2319_vm2, %v300_v62, %v304_v55  ;;  %v1750_v10 = vcombine.low %v277_v49, %v291_v1  ;;  %v627_v17 = vrot.slane %v2306_v27, 5  ;;  %v326_v19 = vrot.slane %v324_v3, 5 }
  0x20   : > { %v314_v15 = vrot.slane %v313_v2, 4  ;;  %v2362_v16 = vcombine.low %v291_v1, %v305_v6  ;;  %v332_v21 = vrot.slane %v330_v4, 5  ;;  %v335_v24 = vshrl.u32 %v2357_v13, 16 }
  0x21   : > { %2003 = vmatprep.mubr.msk.bf16.mxu0 %vm407_vm3, %v1750_v10  ;;  %v338_v25 = vshll.u32 %v2357_v13, 16  ;;  %v344_v28 = vshll.u32 %v2360_v14, 16  ;;  %v327_v35 = vor.u32 %v326_v19, %v323_v12  ;;  %v349_v46 = vshrl.u32 %v2380_v36, 16 }
  0x22   : > { %v319_v33 = vsel %vm2319_vm2, %v314_v15, %v318_v63  ;;  %1940 = vmatmul.mubr.msk.bf16.vlgmr.msra.gmra.mrb[0].mxu1 %vm407_vm3, %v2362_v16  ;;  %v337_v41 = vrot.slane %v335_v24, 4  ;;  %v352_v47 = vshll.u32 %v2380_v36, 16  ;;  %v358_v48 = vshll.u32 %v2383_v37, 16  ;;  %v2171_v15 = vld [vmem:[%s2671_s1 + $0xb8] sm:$0xff]  }
  0x23   : > { %v1751_v39 = vcombine.low %v305_v6, %v319_v33  ;;  %1948 = vmatpush3.bf16.msra.mxu1 %v2295_v22  ;;  %v340_v42 = vrot.slane %v338_v25, 5  ;;  %v346_v43 = vrot.slane %v344_v28, 5  ;;  %v328_v45 = vrot.slane %v327_v35, 4 }
  0x24   : > { %1949 = vmatprep.subr.bf16.mxu1 %v2166_v18  ;;  %v904_v49 = vshrl.u32 %v2386_v38, 16  ;;  %v907_v50 = vshll.u32 %v2386_v38, 16  ;;  %v913_v51 = vshll.u32 %v2393_v44, 16  ;;  %v631_v52 = vrot.slane %v2312_v30, 5 }
  0x25   : > { %2004 = vmatmul.mubr.msk.bf16.vlgmr.msra.gmra.mrb[0].mxu0 %vm407_vm3, %v1751_v39  ;;  %v341_v22 = vor.u32 %v340_v42, %v337_v41  ;;  %v333_v53 = vsel %vm2319_vm2, %v328_v45, %v332_v21  ;;  %v351_v55 = vrot.slane %v349_v46, 4  ;;  %v354_v56 = vrot.slane %v352_v47, 5  ;;  %v2482_v46 = vld [vmem:[%s2266_s6 + $0x48] sm:$0xf] }
  0x26   : > { %2012 = vmatpush3.bf16.msra.mxu0 %v2300_v23  ;;  %v2409_v58 = vcombine.low %v319_v33, %v333_v53  ;;  %v906_v60 = vrot.slane %v904_v49, 4  ;;  %v909_v62 = vrot.slane %v907_v50, 5  ;;  %v2170_v23 = vld [vmem:[%s2671_s1 + $0x18] sm:$0xff]   ;;  %v360_v63 = vrot.slane %v358_v48, 5 }
  0x27   : > { %2013 = vmatprep.subr.bf16.mxu0 %v2167_v20  ;;  %1950 = vmatpush3.bf16.msra.mxu1 %v2166_v18  ;;  %v342_v59 = vrot.slane %v341_v22, 4  ;;  %v355_v30 = vor.u32 %v354_v56, %v351_v55  ;;  %v1695_v1 = vrot.slane %v2278_v9, 9  ;;  %v915_v4 = vrot.slane %v913_v51, 5  ;;  %v2177_v56 = vld [vmem:[%s2671_s1 + $0xc8] sm:$0xff]  }
  0x28   : > { %1951 = vmatprep.subr.bf16.mxu1 %v2168_v40  ;;  %1943 = vmatprep.mubr.msk.bf16.mxu1 %vm407_vm3, %v2409_v58  ;;  %v910_v3 = vor.u32 %v909_v62, %v906_v60  ;;  %v1696_v6 = vrot.slane %v2303_v26, 9  ;;  %v1697_v21 = vrot.slane %v2309_v29, 9  ;;  %v635_v24 = vrot.slane %v2324_v34, 5  ;;  %v2173_v34 = vld [vmem:[%s2671_s1 + $0x40] sm:$0xff]  }
  0x29   : > { %v347_v2 = vsel %vm2319_vm2, %v342_v59, %v346_v43  ;;  %v356_v12 = vrot.slane %v355_v30, 4  ;;  %v2433_v19 = vsel %vm2416_vm6, %v1695_v1, %v623_v5  ;;  %v1698_v11 = vrot.slane %v2315_v31, 9  ;;  %v2179_v30 = vld [vmem:[%s2671_s1 + $0x50] sm:$0xff]  }
  0x2a   : > { %2014 = vmatpush3.bf16.msra.mxu0 %v2167_v20  ;;  %v1752_v10 = vcombine.low %v333_v53, %v347_v2  ;;  %v911_v18 = vrot.slane %v910_v3, 4  ;;  %v2439_v20 = vsel %vm2416_vm6, %v1696_v6, %v627_v17  ;;  %v1682_v17 = vcombine.low %v2272_v7, %v2278_v9 }
  0x2b   : > { %2015 = vmatprep.subr.bf16.mxu0 %v2169_v54  ;;  %1952 = vmatpush3.bf16.msra.mxu1 %v2168_v40  ;;  %v361_v25 = vsel %vm2319_vm2, %v356_v12, %v360_v63  ;;  %v1771_v33 = vcombine.low %v2433_v19, %v2439_v20  ;;  %v619_v35 = vrot.slane %v2275_v8, 5  ;;  %v2466_v39 = vsel %vm2416_vm6, %v1697_v21, %v631_v52  ;;  %v2174_v40 = vld [vmem:[%s2671_s1 + $0xc0] sm:$0xff]   ;;  %v2183_v21 = vld [vmem:[%s2671_s1 + $0xd8] sm:$0xff]  }
  0x2c   : > { %2007 = vmatprep.mubr.msk.bf16.mxu0 %vm407_vm3, %v1752_v10  ;;  %1953 = vmatprep.subr.bf16.mxu1 %v2170_v23  ;;  %v2447_v5 = vcombine.low %v347_v2, %v361_v25  ;;  %v2451_v27 = vsel %vm2319_vm2, %v911_v18, %v915_v4  ;;  %v1699_v41 = vrot.slane %v2342_v57, 9  ;;  %v2475_v8 = vsel %vm2416_vm6, %v1698_v11, %v635_v24  ;;  %v2180_v2 = vld [vmem:[%s2671_s1 + $0xd0] sm:$0xff]   ;;  %v2185_v11 = vld [vmem:[%s2671_s1 + $0xe0] sm:$0xff]  }
  0x2d   : > { %v1753_v28 = vcombine.low %v361_v25, %v2451_v27  ;;  %v639_v42 = vrot.slane %v2345_v61, 5  ;;  %v1700_v43 = vrot.slane %v2357_v13, 9  ;;  %v643_v45 = vrot.slane %v2360_v14, 5  ;;  %v2176_v61 = vld [vmem:[%s2671_s1 + $0x48] sm:$0xff]   ;;  %v2184_v25 = vld [vmem:[%s2671_s1 + $0x60] sm:$0xff]  }
  0x2e   : > { %2016 = vmatpush3.bf16.msra.mxu0 %v2169_v54  ;;  %1944 = vmatmul.mubr.msk.bf16.gmra.mrb[4].mxu1 %vm407_vm3, %v2447_v5  ;;  %v1772_v47 = vcombine.low %v2466_v39, %v2475_v8  ;;  %v1683_v48 = vcombine.low %v2303_v26, %v2309_v29  ;;  %v2493_v14 = vld [vmem:[%s2266_s6 + $0x4c] sm:$0x1]  ;;  %v1701_v22 = vrot.slane %v2380_v36, 9  ;;  %v647_v49 = vrot.slane %v2383_v37, 5 }
  0x2f   : > { %2017 = vmatprep.subr.bf16.mxu0 %v2171_v15  ;;  %2008 = vmatmul.mubr.msk.bf16.gmra.mrb[4].mxu0 %vm407_vm3, %v1753_v28  ;;  %v640_v50 = vsel %vm2416_vm6, %v1699_v41, %v639_v42  ;;  %v2501_v51 = vsel %vm2416_vm6, %v1700_v43, %v643_v45  ;;  %v1762_v52 = vrot.slane %v2386_v38, 9  ;;  %v1281_v53 = vshrl.u32 %v2482_v46, 16  ;;  %v2192_v41 = vld [vmem:[%s2671_s1 + $0xf8] sm:$0xff]   ;;  %v2194_v42 = vld [vmem:[%s2671_s1 + $0x100] sm:$0xff]  }
  0x30   : > { %1954 = vmatpush3.bf16.msra.mxu1 %v2170_v23  ;;  %1955 = vmatprep.mubr.msk.bf16.mxu1 %vm407_vm3, %v1682_v17  ;;  %v1043_v54 = vrot.slane %v2393_v44, 5  ;;  %v1284_v55 = vshll.u32 %v2482_v46, 16  ;;  %v1684_v37 = vcombine.low %v2315_v31, %v2342_v57  ;;  %v1773_v60 = vcombine.low %v640_v50, %v2501_v51  ;;  %v2186_v17 = vld [vmem:[%s2671_s1 + $0x68] sm:$0xff]  }
  0x31   : > { %1963 = vmatprep.subr.bf16.mxu1 %v2173_v34  ;;  %2019 = vmatprep.mubr.msk.bf16.mxu0 %vm407_vm3, %v1771_v33  ;;  %v1283_v59 = vrot.slane %v1281_v53, 4  ;;  %v1694_v62 = vrot.slane %v2272_v7, 9  ;;  %v1290_v44 = vshll.u32 %v2493_v14, 16  ;;  %v648_v63 = vsel %vm2416_vm6, %v1701_v22, %v647_v49  ;;  %v2189_v33 = vld [vmem:[%s2671_s1 + $0xf0] sm:$0xff]  }
  0x32   : > { %2018 = vmatpush3.bf16.msra.mxu0 %v2171_v15  ;;  %v1286_v23 = vrot.slane %v1284_v55, 5  ;;  %v2524_v1 = vsel %vm2416_vm6, %v1762_v52, %v1043_v54  ;;  %v1685_v4 = vcombine.low %v2357_v13, %v2380_v36  ;;  %v2182_v15 = vld [vmem:[%s2671_s1 + $0x58] sm:$0xff]   ;;  %v2572_v28 = vcombine.low %v2475_v8, %v640_v50  ;;  %v1856_v54 = vld [vmem:[%s212_s24 + $0x8] sm:$0xff]  }
  0x33   : > { %2027 = vmatprep.subr.bf16.mxu0 %v2174_v40  ;;  %v2530_v3 = vrot.slane %v1290_v44, 5  ;;  %v620_v6 = vsel %vm2416_vm6, %v1694_v62, %v619_v35  ;;  %v1774_v12 = vcombine.low %v648_v63, %v2524_v1  ;;  %v1713_v35 = vcombine.low %v2501_v51, %v648_v63  ;;  %v1858_v55 = vld [vmem:[%s212_s24 + $0x18] sm:$0xff]  }
  0x34   : > { %v1287_v7 = vor.u32 %v1286_v23, %v1283_v59  ;;  %v1710_v24 = vcombine.low %v620_v6, %v2433_v19  ;;  %v2562_v19 = vcombine.low %v2439_v20, %v2466_v39  ;;  %v2188_v20 = vld [vmem:[%s2671_s1 + $0x70] sm:$0xff]   ;;  %v1791_v39 = vcombine.low %v2386_v38, %v2482_v46  ;;  %v1835_v59 = vld [vmem:[%s2672_s2] ss:$0 sm:$0xff] }
  0x35   : > { %v1730_v8 = vcombine.low %v2278_v9, %v2303_v26  ;;  %v1731_v9 = vcombine.low %v2309_v29, %v2315_v31  ;;  %v2196_v26 = vld [vmem:[%s2671_s1 + $0x108] sm:$0xff]   ;;  %v1732_v43 = vcombine.low %v2342_v57, %v2357_v13  ;;  %v2198_v29 = vld [vmem:[%s2671_s1 + $0x110] sm:$0xff]   ;;  %v1733_v31 = vcombine.low %v2380_v36, %v2386_v38 }
  0x36   : > { %1956 = vmatmul.mubr.msk.bf16.vlgmr.msra.gmra.mrb[0].mxu1 %vm407_vm3, %v1683_v48  ;;  %v2537_v10 = vrot.slane %v1287_v7, 4  ;;  %v1817_v57 = vrot.slane %v2482_v46, 9  ;;  %v1408_v13 = vrot.slane %v2493_v14, 5  ;;  %v1854_v23 = vunpack.c.l.bf16 %v1858_v55 }
  0x37   : > { %1964 = vmatpush3.bf16.msra.mxu1 %v2173_v34  ;;  %2020 = vmatmul.mubr.msk.bf16.vlgmr.msra.gmra.mrb[0].mxu0 %vm407_vm3, %v1772_v47  ;;  %v2187_v34 = vld [vmem:[%s2671_s1 + $0xe8] sm:$0xff]  }
  0x38   : > { %2028 = vmatpush3.bf16.msra.mxu0 %v2174_v40  ;;  %1965 = vmatprep.subr.bf16.mxu1 %v2176_v61  ;;  %v1293_v18 = vsel %vm2319_vm2, %v2537_v10, %v2530_v3  ;;  %v2191_v40 = vld [vmem:[%s2671_s1 + $0x78] sm:$0xff]   ;;  %v1409_v36 = vsel %vm2416_vm6, %v1817_v57, %v1408_v13  ;;  %v1855_v3 = vunpack.c.h.bf16 %v1858_v55 }
  0x39   : > { %2029 = vmatprep.subr.bf16.mxu0 %v2177_v56  ;;  %1959 = vmatprep.mubr.msk.bf16.mxu1 %vm407_vm3, %v1684_v37  ;;  %v1826_v32 = vcombine.low %v2524_v1, %v1409_v36 }
  0x3a   : > { %2023 = vmatprep.mubr.msk.bf16.mxu0 %vm407_vm3, %v1773_v60  ;;  %v1846_v60 = vunpack.c.l.bf16 %v1856_v54 }
  0x3b   : > { %1966 = vmatpush3.bf16.msra.mxu1 %v2176_v61 }
  0x3c   : > { %2030 = vmatpush3.bf16.msra.mxu0 %v2177_v56  ;;  %1967 = vmatprep.subr.bf16.mxu1 %v2179_v30  ;;  %v1841_v56 = vld [vmem:[%s212_s24] sm:$0xff]  }
  0x3d   : > { %2031 = vmatprep.subr.bf16.mxu0 %v2180_v2  ;;  %v1842_v44 = vunpack.c.l.bf16 %v1841_v56 }
  0x3e   : > { %1960 = vmatmul.mubr.msk.bf16.gmra.mrb[4].mxu1 %vm407_vm3, %v1685_v4 }
  0x3f   : > { %1968 = vmatpush3.bf16.msra.mxu1 %v2179_v30  ;;  %2024 = vmatmul.mubr.msk.bf16.gmra.mrb[4].mxu0 %vm407_vm3, %v1774_v12 }
  0x40   : > { %2032 = vmatpush3.bf16.msra.mxu0 %v2180_v2  ;;  %1969 = vmatprep.subr.bf16.mxu1 %v2182_v15  ;;  %v1847_v2 = vunpack.c.h.bf16 %v1856_v54 }
  0x41   : > { %2033 = vmatprep.subr.bf16.mxu0 %v2183_v21  ;;  %1971 = vmatprep.mubr.msk.bf16.mxu1 %vm407_vm3, %v1710_v24 }
  0x42   : > { %2035 = vmatprep.mubr.msk.bf16.mxu0 %vm407_vm3, %v1683_v48 }
  0x43   : > { %1970 = vmatpush3.bf16.msra.mxu1 %v2182_v15  ;;  %v1843_v15 = vunpack.c.h.bf16 %v1841_v56 }
  0x44   : > { %2034 = vmatpush3.bf16.msra.mxu0 %v2183_v21  ;;  %1979 = vmatprep.subr.bf16.mxu1 %v2184_v25 }
  0x45   : > { %2043 = vmatprep.subr.bf16.mxu0 %v2185_v11 }
  0x46   : > { %1972 = vmatmul.mubr.msk.bf16.vlgmr.msra.gmra.mrb[0].mxu1 %vm407_vm3, %v2562_v19 }
  0x47   : > { %1980 = vmatpush3.bf16.msra.mxu1 %v2184_v25  ;;  %2036 = vmatmul.mubr.msk.bf16.vlgmr.msra.gmra.mrb[0].mxu0 %vm407_vm3, %v1684_v37  ;;  %v1857_v37 = vld [vmem:[%s212_s24 + $0x10] sm:$0xff]  }
  0x48   : > { %2044 = vmatpush3.bf16.msra.mxu0 %v2185_v11  ;;  %1981 = vmatprep.subr.bf16.mxu1 %v2186_v17  ;;  %v1850_v7 = vunpack.c.l.bf16 %v1857_v37 }
  0x49   : > { %2045 = vmatprep.subr.bf16.mxu0 %v2187_v34  ;;  %1975 = vmatprep.mubr.msk.bf16.mxu1 %vm407_vm3, %v2572_v28 }
  0x4a   : > { %2039 = vmatprep.mubr.msk.bf16.mxu0 %vm407_vm3, %v1685_v4 }
  0x4b   : > { %1982 = vmatpush3.bf16.msra.mxu1 %v2186_v17 }
  0x4c   : > { %2046 = vmatpush3.bf16.msra.mxu0 %v2187_v34  ;;  %1983 = vmatprep.subr.bf16.mxu1 %v2188_v20 }
  0x4d   : > { %2047 = vmatprep.subr.bf16.mxu0 %v2189_v33 }
  0x4e   : > { %1976 = vmatmul.mubr.msk.bf16.gmra.mrb[4].mxu1 %vm407_vm3, %v1713_v35 }
  0x4f   : > { %1984 = vmatpush3.bf16.msra.mxu1 %v2188_v20  ;;  %2040 = vmatmul.mubr.msk.bf16.gmra.mrb[4].mxu0 %vm407_vm3, %v1791_v39 }
  0x50   : > { %2048 = vmatpush3.bf16.msra.mxu0 %v2189_v33  ;;  %1985 = vmatprep.subr.bf16.mxu1 %v2191_v40 }
  0x51   : > { %2049 = vmatprep.subr.bf16.mxu0 %v2192_v41  ;;  %1987 = vmatprep.mubr.msk.bf16.mxu1 %vm407_vm3, %v1730_v8 }
  0x52   : > { %2051 = vmatprep.mubr.msk.bf16.mxu0 %vm407_vm3, %v2362_v16  ;;  %v1808_v16 = vcombine.low %v2451_v27, %v1293_v18  ;;  %v1851_v18 = vunpack.c.h.bf16 %v1857_v37 }
  0x53   : > { %1986 = vmatpush3.bf16.msra.mxu1 %v2191_v40 }
  0x54   : > { %2050 = vmatpush3.bf16.msra.mxu0 %v2192_v41  ;;  %2075 = vmatprep.subr.bf16.mxu1 %v2194_v42 }
  0x55   : > { %2059 = vmatprep.subr.bf16.mxu0 %v2194_v42 }
  0x56   : > { %1988 = vmatmul.mubr.msk.bf16.vlgmr.msra.gmra.mrb[0].mxu1 %vm407_vm3, %v1731_v9 }
  0x57   : > { %2052 = vmatmul.mubr.msk.bf16.vlgmr.msra.gmra.mrb[0].mxu0 %vm407_vm3, %v2409_v58  ;;  %2079 = vmatpush3.bf16.msra.mxu1 %v2194_v42  ;;  %v2200_v58 = vld [vmem:[%s2671_s1 + $0x118] sm:$0xff]  }
  0x58   : > { %2060 = vmatpush3.bf16.msra.mxu0 %v2194_v42  ;;  %2076 = vmatprep.subr.bf16.mxu1 %v2196_v26 }
  0x59   : > { %2061 = vmatprep.subr.bf16.mxu0 %v2196_v26  ;;  %1991 = vmatprep.mubr.msk.bf16.mxu1 %vm407_vm3, %v1732_v43 }
  0x5a   : > { %2055 = vmatprep.mubr.msk.bf16.mxu0 %vm407_vm3, %v2447_v5 }
  0x5b   : > { %2080 = vmatpush3.bf16.msra.mxu1 %v2196_v26 }
  0x5c   : > { %2062 = vmatpush3.bf16.msra.mxu0 %v2196_v26  ;;  %2077 = vmatprep.subr.bf16.mxu1 %v2198_v29 }
  0x5d   : > { %2063 = vmatprep.subr.bf16.mxu0 %v2198_v29 }
  0x5e   : > { %1992 = vmatmul.mubr.msk.bf16.gmra.mrb[4].mxu1 %vm407_vm3, %v1733_v31 }
  0x5f   : > { %2056 = vmatmul.mubr.msk.bf16.gmra.mrb[4].mxu0 %vm407_vm3, %v1808_v16  ;;  %2081 = vmatpush3.bf16.msra.mxu1 %v2198_v29 }
  0x60   : > { %2064 = vmatpush3.bf16.msra.mxu0 %v2198_v29  ;;  %2078 = vmatprep.subr.bf16.mxu1 %v2200_v58 }
  0x61   : > { %2065 = vmatprep.subr.bf16.mxu0 %v2200_v58  ;;  %2067 = vmatprep.mubr.msk.bf16.mxu0 %vm407_vm3, %v2562_v19 }
  0x62   : > { %2071 = vmatprep.mubr.msk.bf16.mxu1 %vm407_vm3, %v1713_v35 }
  0x63   : > { %2082 = vmatpush3.bf16.msra.mxu1 %v2200_v58 }
  0x64   : > { %2066 = vmatpush3.bf16.msra.mxu0 %v2200_v58 }
  0x66   : > { %2072 = vmatmul.mubr.msk.bf16.vlgmr.msra.gmra.mrb[8].mxu1 %vm407_vm3, %v1826_v32 }
  0x67   : > { %2068 = vmatmul.mubr.msk.bf16.vlgmr.msra.gmra.mrb[0].mxu0 %vm407_vm3, %v2572_v28 }
 0x129   : > { %v1989_v38 = vpop.f32.mrb[0].mxu1 }
 0x12a   : > { %v864_v0 = vpop.f32.mrb[1].mxu1 }
 0x12b   : > { %v1990_v5 = vpop.f32.mrb[2].mxu1 }
 0x12c   : > { %v867_v27 = vpop.f32.mrb[3].mxu1 }
 0x131   : > { %v1993_v45 = vpop.f32.mrb[4].mxu1 }
 0x132   : > { %v2057_v46 = vpop.f32.mrb[4].mxu0  ;;  %v880_v47 = vpop.f32.mrb[5].mxu1 }
 0x133   : > { %v2087_v48 = vadd.f32 %v2057_v46, %v1993_v45  ;;  %v1382_v61 = vpop.f32.mrb[5].mxu0  ;;  %v1994_v14 = vpop.f32.mrb[6].mxu1 }
 0x134   : > { %v2089_v22 = vadd.f32 %v1382_v61, %v880_v47  ;;  %v2058_v49 = vpop.f32.mrb[6].mxu0  ;;  %v883_v50 = vpop.f32.mrb[7].mxu1 }
 0x135   : > { %v2091_v51 = vadd.f32 %v2058_v49, %v1994_v14  ;;  %v1385_v52 = vpop.f32.mrb[7].mxu0 }
 0x136   : > { %v2093_v53 = vadd.f32 %v1385_v52, %v883_v50 }
 0x139   : > { %v2073_v62 = vpop.f32.mrb[8].mxu1 }
 0x13a   : > { %v2069_v30 = vpop.f32.mrb[0].mxu0  ;;  %v2088_v63 = vadd.f32 %v2087_v48, %v2073_v62  ;;  %v1498_v1 = vpop.f32.mrb[9].mxu1 }
 0x13b   : > { %v2083_v4 = vadd.f32 %v2069_v30, %v1989_v38  ;;  %v1482_v6 = vpop.f32.mrb[1].mxu0  ;;  %v2090_v10 = vadd.f32 %v2089_v22, %v1498_v1  ;;  %v2074_v12 = vpop.f32.mrb[10].mxu1 }
 0x13c   : > { %v1534_v21 = vadd.f32 %v2088_v63, %v1835_v59  ;;  %v2084_v24 = vadd.f32 %v1482_v6, %v864_v0  ;;  %v2070_v25 = vpop.f32.mrb[2].mxu0  ;;  %v2092_v11 = vadd.f32 %v2091_v51, %v2074_v12  ;;  %v1501_v19 = vpop.f32.mrb[11].mxu1 }
 0x13d   : > { %v1530_v17 = vadd.f32 %v2083_v4, %v1835_v59  ;;  %v1532_v34 = vadd.f32 %v2090_v10, %v1835_v59  ;;  %v2085_v28 = vadd.f32 %v2070_v25, %v1990_v5  ;;  %v1485_v20 = vpop.f32.mrb[3].mxu0  ;;  %v2094_v33 = vadd.f32 %v2093_v53, %v1501_v19 }
 0x13e   : > { %v1558_v35 = vadd.f32 %v1854_v23, %v1534_v21  ;;  %v1528_v39 = vadd.f32 %v2084_v24, %v1835_v59  ;;  %v1535_v40 = vadd.f32 %v2092_v11, %v1835_v59  ;;  %v2086_v41 = vadd.f32 %v1485_v20, %v867_v27 }
 0x13f   : > { %v1554_v8 = vadd.f32 %v1846_v60, %v1530_v17  ;;  %v1556_v42 = vadd.f32 %v1850_v7, %v1532_v34  ;;  %v1531_v9 = vadd.f32 %v2085_v28, %v1835_v59  ;;  %v1533_v26 = vadd.f32 %v2094_v33, %v1835_v59 }
 0x140   : > { %v1566_v43 = vmax.f32 %v1558_v35, 0.0  ;;  %v1552_v29 = vadd.f32 %v1842_v44, %v1528_v39  ;;  %v1559_v31 = vadd.f32 %v1855_v3, %v1535_v40  ;;  %v1529_v57 = vadd.f32 %v2086_v41, %v1835_v59 }
 0x141   : > { %v1562_v13 = vmax.f32 %v1554_v8, 0.0  ;;  %v1564_v16 = vmax.f32 %v1556_v42, 0.0  ;;  %v1555_v58 = vadd.f32 %v1847_v2, %v1531_v9  ;;  %v1557_v36 = vadd.f32 %v1851_v18, %v1533_v26 }
 0x142   : > { %v1574_v32 = vpack.c.bf16 %v1566_v43, %v1566_v43  ;;  %v1560_v38 = vmax.f32 %v1552_v29, 0.0  ;;  %v1567_v0 = vmax.f32 %v1559_v31, 0.0  ;;  %v1553_v5 = vadd.f32 %v1843_v15, %v1529_v57 }
 0x143   : > { %v1570_v27 = vpack.c.bf16 %v1562_v13, %v1562_v13  ;;  %v1572_v45 = vpack.c.bf16 %v1564_v16, %v1564_v16  ;;  %v1563_v46 = vmax.f32 %v1555_v58, 0.0  ;;  %v1565_v47 = vmax.f32 %v1557_v36, 0.0 }
 0x144   : > { %1583 = vst.msk [vmem:[%s217_s29 + $0x18] sm:$0xf] %vm1576_vm7, %v1574_v32  ;;  %v1568_v48 = vpack.c.bf16 %v1560_v38, %v1560_v38  ;;  %v1575_v61 = vpack.c.bf16 %v1567_v0, %v1567_v0  ;;  %v1561_v14 = vmax.f32 %v1553_v5, 0.0 }
 0x145   : > { %1579 = vst.msk [vmem:[%s217_s29 + $0x8] sm:$0xf] %vm1576_vm7, %v1570_v27  ;;  %1581 = vst.msk [vmem:[%s217_s29 + $0x10] sm:$0xf] %vm1576_vm7, %v1572_v45  ;;  %v1571_v22 = vpack.c.bf16 %v1563_v46, %v1563_v46  ;;  %v1573_v49 = vpack.c.bf16 %v1565_v47, %v1565_v47 }
 0x146   : > { %1577 = vst.msk [vmem:[%s217_s29] sm:$0xf] %vm1576_vm7, %v1568_v48  ;;  %1584 = vst.msk [vmem:[%s217_s29 + $0x1c] sm:$0xf] %vm1576_vm7, %v1575_v61  ;;  %v1569_v50 = vpack.c.bf16 %v1561_v14, %v1561_v14 }
 0x147   : > { %1580 = vst.msk [vmem:[%s217_s29 + $0xc] sm:$0xf] %vm1576_vm7, %v1571_v22  ;;  %1582 = vst.msk [vmem:[%s217_s29 + $0x14] sm:$0xf] %vm1576_vm7, %v1573_v49 }
 0x148   : > { %1578 = vst.msk [vmem:[%s217_s29 + $0x4] sm:$0xf] %vm1576_vm7, %v1569_v50 }
 0x149 PF: > { %s14_s15 = sadd.s32 1, %s2207_s15  }
 0x14a   : > { %p11_p4 = scmp.ge.s32.totalorder %s14_s15, 4  }
 0x14c   :  { %13 = sbr.rel (!%p11_p4) target bundleno = 1 (0x1), region = 77 }

// kernel: resnet_forward.22
= control target key start
LH: loop header
LB: loop body
LE: loop exit
PB: predicated region body
PF: predicated region fallthrough
CT: control target
= control target key end

     0   :  { %vm521_vm0 = vcmask 523264   ;;  %s1269_s1 = inlined_call_operand.vmem [shape: bf16[576,256], index: 1, kind: input, shape index: {}]   ;;  %s1270_s0 = inlined_call_operand.vmem [shape: bf16[32,576], index: 0, kind: input, shape index: {}]   ;;  %s1271_s2 = inlined_call_operand.vmem [shape: f32[1,256], index: 2, kind: input, shape index: {}]   ;;  %s1272_s3 = inlined_call_operand.vmem [shape: bf16[32,256], index: 3, kind: output, shape index: {}]  }
   0x1   :  { %v865_v0 = vld [vmem:[%s1269_s1 + $0x4] ss:$8 sps:$4 sm:$0xff]   ;;  %v869_v2 = vld [vmem:[%s1269_s1] ss:$8 sps:$4 sm:$0xff]   ;;  %v871_v4 = vld [vmem:[%s1269_s1 + $0x14] ss:$8 sps:$4 sm:$0xff]  }
   0x2   :  { %v867_v1 = vld [vmem:[%s1269_s1 + $0x104] ss:$8 sps:$4 sm:$0xff]   ;;  %528 = vmatprep.subr.bf16.mxu1 %v865_v0  ;;  %v870_v3 = vld [vmem:[%s1269_s1 + $0x100] ss:$8 sps:$4 sm:$0xff]   ;;  %v873_v5 = vld [vmem:[%s1269_s1 + $0x114] ss:$8 sps:$4 sm:$0xff]  }
   0x3   :  { %581 = vmatprep.subr.bf16.mxu0 %v867_v1  ;;  %529 = vmatpush1.bf16.msra.mxu1 %v869_v2  ;;  %v875_v6 = vld [vmem:[%s1269_s1 + $0x10] ss:$8 sps:$4 sm:$0xff]   ;;  %v877_v8 = vld [vmem:[%s1269_s1 + $0x24] ss:$8 sps:$4 sm:$0xff]   ;;  %v881_v10 = vld [vmem:[%s1269_s1 + $0x20] ss:$8 sps:$4 sm:$0xff]  }
   0x4   :  { %582 = vmatpush1.bf16.msra.mxu0 %v870_v3  ;;  %530 = vmatprep.subr.bf16.mxu1 %v871_v4  ;;  %v876_v7 = vld [vmem:[%s1269_s1 + $0x110] ss:$8 sps:$4 sm:$0xff]   ;;  %v879_v9 = vld [vmem:[%s1269_s1 + $0x124] ss:$8 sps:$4 sm:$0xff]   ;;  %v882_v11 = vld [vmem:[%s1269_s1 + $0x120] ss:$8 sps:$4 sm:$0xff]  }
   0x5   :  { %583 = vmatprep.subr.bf16.mxu0 %v873_v5  ;;  %v883_v12 = vld [vmem:[%s1269_s1 + $0x34] ss:$8 sps:$4 sm:$0xff]   ;;  %v887_v14 = vld [vmem:[%s1269_s1 + $0x30] ss:$8 sps:$4 sm:$0xff]   ;;  %v889_v16 = vld [vmem:[%s1269_s1 + $0x44] ss:$8 sps:$4 sm:$0xff]  }
   0x6   :  { %v885_v13 = vld [vmem:[%s1269_s1 + $0x134] ss:$8 sps:$4 sm:$0xff]   ;;  %v888_v15 = vld [vmem:[%s1269_s1 + $0x130] ss:$8 sps:$4 sm:$0xff]   ;;  %v891_v17 = vld [vmem:[%s1269_s1 + $0x144] ss:$8 sps:$4 sm:$0xff]  }
   0x7   :  { %531 = vmatpush1.bf16.msra.mxu1 %v875_v6  ;;  %v893_v18 = vld [vmem:[%s1269_s1 + $0x40] ss:$8 sps:$4 sm:$0xff]   ;;  %v895_v20 = vld [vmem:[%s1269_s1 + $0x54] ss:$8 sps:$4 sm:$0xff]   ;;  %v899_v22 = vld [vmem:[%s1269_s1 + $0x50] ss:$8 sps:$4 sm:$0xff]  }
   0x8   :  { %584 = vmatpush1.bf16.msra.mxu0 %v876_v7  ;;  %532 = vmatprep.subr.bf16.mxu1 %v877_v8  ;;  %v894_v19 = vld [vmem:[%s1269_s1 + $0x140] ss:$8 sps:$4 sm:$0xff]   ;;  %v897_v21 = vld [vmem:[%s1269_s1 + $0x154] ss:$8 sps:$4 sm:$0xff]   ;;  %v900_v23 = vld [vmem:[%s1269_s1 + $0x150] ss:$8 sps:$4 sm:$0xff]  }
   0x9   :  { %585 = vmatprep.subr.bf16.mxu0 %v879_v9  ;;  %v901_v24 = vld [vmem:[%s1269_s1 + $0x64] ss:$8 sps:$4 sm:$0xff]   ;;  %v905_v26 = vld [vmem:[%s1269_s1 + $0x60] ss:$8 sps:$4 sm:$0xff]   ;;  %v907_v28 = vld [vmem:[%s1269_s1 + $0x74] ss:$8 sps:$4 sm:$0xff]  }
   0xa   :  { %v903_v25 = vld [vmem:[%s1269_s1 + $0x164] ss:$8 sps:$4 sm:$0xff]   ;;  %v906_v27 = vld [vmem:[%s1269_s1 + $0x160] ss:$8 sps:$4 sm:$0xff]   ;;  %v909_v29 = vld [vmem:[%s1269_s1 + $0x174] ss:$8 sps:$4 sm:$0xff]  }
   0xb   :  { %533 = vmatpush1.bf16.msra.mxu1 %v881_v10  ;;  %v911_v30 = vld [vmem:[%s1269_s1 + $0x70] ss:$8 sps:$4 sm:$0xff]   ;;  %v913_v32 = vld [vmem:[%s1269_s1 + $0x84] ss:$8 sps:$4 sm:$0xff]   ;;  %v917_v34 = vld [vmem:[%s1269_s1 + $0x80] ss:$8 sps:$4 sm:$0xff]  }
   0xc   :  { %586 = vmatpush1.bf16.msra.mxu0 %v882_v11  ;;  %534 = vmatprep.subr.bf16.mxu1 %v883_v12  ;;  %v912_v31 = vld [vmem:[%s1269_s1 + $0x170] ss:$8 sps:$4 sm:$0xff]   ;;  %v915_v33 = vld [vmem:[%s1269_s1 + $0x184] ss:$8 sps:$4 sm:$0xff]   ;;  %v918_v35 = vld [vmem:[%s1269_s1 + $0x180] ss:$8 sps:$4 sm:$0xff]  }
   0xd   :  { %587 = vmatprep.subr.bf16.mxu0 %v885_v13  ;;  %v919_v36 = vld [vmem:[%s1269_s1 + $0x94] ss:$8 sps:$4 sm:$0xff]   ;;  %v923_v38 = vld [vmem:[%s1269_s1 + $0x90] ss:$8 sps:$4 sm:$0xff]   ;;  %v925_v40 = vld [vmem:[%s1269_s1 + $0xa4] ss:$8 sps:$4 sm:$0xff]  }
   0xe   :  { %v921_v37 = vld [vmem:[%s1269_s1 + $0x194] ss:$8 sps:$4 sm:$0xff]   ;;  %v924_v39 = vld [vmem:[%s1269_s1 + $0x190] ss:$8 sps:$4 sm:$0xff]   ;;  %v927_v41 = vld [vmem:[%s1269_s1 + $0x1a4] ss:$8 sps:$4 sm:$0xff]  }
   0xf   :  { %535 = vmatpush1.bf16.msra.mxu1 %v887_v14  ;;  %v929_v42 = vld [vmem:[%s1269_s1 + $0xa0] ss:$8 sps:$4 sm:$0xff]   ;;  %v931_v44 = vld [vmem:[%s1269_s1 + $0xb4] ss:$8 sps:$4 sm:$0xff]   ;;  %v935_v46 = vld [vmem:[%s1269_s1 + $0xb0] ss:$8 sps:$4 sm:$0xff]  }
  0x10   :  { %588 = vmatpush1.bf16.msra.mxu0 %v888_v15  ;;  %536 = vmatprep.subr.bf16.mxu1 %v889_v16  ;;  %v930_v43 = vld [vmem:[%s1269_s1 + $0x1a0] ss:$8 sps:$4 sm:$0xff]   ;;  %v933_v45 = vld [vmem:[%s1269_s1 + $0x1b4] ss:$8 sps:$4 sm:$0xff]   ;;  %v936_v47 = vld [vmem:[%s1269_s1 + $0x1b0] ss:$8 sps:$4 sm:$0xff]  }
  0x11   :  { %589 = vmatprep.subr.bf16.mxu0 %v891_v17  ;;  %v937_v48 = vld [vmem:[%s1269_s1 + $0xc4] ss:$8 sps:$4 sm:$0xff]   ;;  %v941_v52 = vld [vmem:[%s1269_s1 + $0xc0] ss:$8 sps:$4 sm:$0xff]   ;;  %v943_v54 = vld [vmem:[%s1269_s1 + $0xd4] ss:$8 sps:$4 sm:$0xff]  }
  0x12   :  { %v963_v49 = vld [vmem:[%s1270_s0 + $0x4] ss:$20 sps:$4 sm:$0xff]   ;;  %v966_v51 = vld [vmem:[%s1270_s0 + $0xc] ss:$20 sps:$4 sm:$0xff]   ;;  %v945_v55 = vld [vmem:[%s1269_s1 + $0x1d4] ss:$8 sps:$4 sm:$0xff]  }
  0x13   :  { %537 = vmatpush1.bf16.msra.mxu1 %v893_v18  ;;  %v939_v50 = vld [vmem:[%s1269_s1 + $0x1c4] ss:$8 sps:$4 sm:$0xff]   ;;  %560 = vmatprep.mubr.bf16.mxu1 %v963_v49  ;;  %v942_v53 = vld [vmem:[%s1269_s1 + $0x1c0] ss:$8 sps:$4 sm:$0xff]   ;;  %v947_v56 = vld [vmem:[%s1269_s1 + $0xd0] ss:$8 sps:$4 sm:$0xff]  }
  0x14   :  { %590 = vmatpush1.bf16.msra.mxu0 %v894_v19  ;;  %538 = vmatprep.subr.bf16.mxu1 %v895_v20  ;;  %v948_v57 = vld [vmem:[%s1269_s1 + $0x1d0] ss:$8 sps:$4 sm:$0xff]   ;;  %v949_v58 = vld [vmem:[%s1269_s1 + $0xe4] ss:$8 sps:$4 sm:$0xff]   ;;  %v953_v60 = vld [vmem:[%s1269_s1 + $0xe0] ss:$8 sps:$4 sm:$0xff]   ;;  %v101_v19 = vlaneseq }
  0x15   :  { %591 = vmatprep.subr.bf16.mxu0 %v897_v21  ;;  %613 = vmatprep.mubr.bf16.mxu0 %v966_v51  ;;  %v951_v59 = vld [vmem:[%s1269_s1 + $0x1e4] ss:$8 sps:$4 sm:$0xff]   ;;  %v954_v61 = vld [vmem:[%s1269_s1 + $0x1e0] ss:$8 sps:$4 sm:$0xff]   ;;  %v955_v62 = vld [vmem:[%s1269_s1 + $0xf4] ss:$8 sps:$4 sm:$0xff]  }
  0x16   :  { %v957_v63 = vld [vmem:[%s1269_s1 + $0x1f4] ss:$8 sps:$4 sm:$0xff]   ;;  %v959_v0 = vld [vmem:[%s1269_s1 + $0xf0] ss:$8 sps:$4 sm:$0xff]   ;;  %v969_v2 = vld [vmem:[%s1269_s1 + $0x204] ss:$8 sps:$4 sm:$0xff]  }
  0x17   :  { %539 = vmatpush1.bf16.msra.mxu1 %v899_v22  ;;  %v960_v1 = vld [vmem:[%s1269_s1 + $0x1f0] ss:$8 sps:$4 sm:$0xff]   ;;  %v961_v3 = vld [vmem:[%s1270_s0] ss:$20 sps:$4 sm:$0xff]   ;;  %v964_v4 = vld [vmem:[%s1270_s0 + $0x8] ss:$20 sps:$4 sm:$0xff]  }
  0x18   :  { %592 = vmatpush1.bf16.msra.mxu0 %v900_v23  ;;  %540 = vmatprep.subr.bf16.mxu1 %v901_v24  ;;  %v967_v5 = vld [vmem:[%s1269_s1 + $0x200] ss:$8 sps:$4 sm:$0xff]   ;;  %v972_v6 = vld [vmem:[%s1269_s1 + $0x214] ss:$8 sps:$4 sm:$0xff]   ;;  %v970_v9 = vld [vmem:[%s1269_s1 + $0x210] ss:$8 sps:$4 sm:$0xff]  }
  0x19   :  { %593 = vmatprep.subr.bf16.mxu0 %v903_v25  ;;  %v973_v7 = vld [vmem:[%s1270_s0 + $0x2c] ss:$20 sps:$4 sm:$0xff]   ;;  %v975_v8 = vld [vmem:[%s1270_s0 + $0x34] ss:$20 sps:$4 sm:$0xff]   ;;  %v978_v12 = vld [vmem:[%s1270_s0 + $0x30] ss:$20 sps:$4 sm:$0xff]  }
  0x1a   :  { %v981_v10 = vld [vmem:[%s1269_s1 + $0x224] ss:$8 sps:$4 sm:$0xff]   ;;  %v977_v11 = vld [vmem:[%s1270_s0 + $0x28] ss:$20 sps:$4 sm:$0xff]   ;;  %v982_v15 = vld [vmem:[%s1269_s1 + $0x230] ss:$8 sps:$4 sm:$0xff]  }
  0x1b   :  { %541 = vmatpush1.bf16.msra.mxu1 %v905_v26  ;;  %v979_v13 = vld [vmem:[%s1269_s1 + $0x220] ss:$8 sps:$4 sm:$0xff]   ;;  %v984_v14 = vld [vmem:[%s1269_s1 + $0x234] ss:$8 sps:$4 sm:$0xff]   ;;  %v987_v16 = vmov 0   ;;  %v102_v20 = vshrl.u32 %v101_v19, 7 }
  0x1c   :  { %594 = vmatpush1.bf16.msra.mxu0 %v906_v27  ;;  %542 = vmatprep.subr.bf16.mxu1 %v907_v28  ;;  %v985_v17 = vld [vmem:[%s1270_s0 + $0x10] ss:$20 sps:$4 sm:$0xff]   ;;  %v986_v18 = vld [vmem:[%s1270_s0 + $0x38] ss:$20 sps:$4 sm:$0xff]   ;;  %v99_v26 = vld [vmem:[%s1271_s2] sm:$0x3] }
  0x1d   :  { %595 = vmatprep.subr.bf16.mxu0 %v909_v29  ;;  %v103_v24 = vsub.s32 0, %v102_v20  ;;  %v107_v27 = vsub.s32 1, %v102_v20 }
  0x1f   :  { %543 = vmatpush1.bf16.msra.mxu1 %v911_v30  ;;  %v104_v28 = vrot.slane %v99_v26, %v103_v24  ;;  %v108_v29 = vrot.slane %v99_v26, %v107_v27 }
  0x20   :  { %596 = vmatpush1.bf16.msra.mxu0 %v912_v31  ;;  %544 = vmatprep.subr.bf16.mxu1 %v913_v32 }
  0x21   :  { %597 = vmatprep.subr.bf16.mxu0 %v915_v33 }
  0x23   :  { %545 = vmatpush1.bf16.msra.mxu1 %v917_v34 }
  0x24   :  { %598 = vmatpush1.bf16.msra.mxu0 %v918_v35  ;;  %546 = vmatprep.subr.bf16.mxu1 %v919_v36 }
  0x25   :  { %599 = vmatprep.subr.bf16.mxu0 %v921_v37 }
  0x27   :  { %547 = vmatpush1.bf16.msra.mxu1 %v923_v38 }
  0x28   :  { %600 = vmatpush1.bf16.msra.mxu0 %v924_v39  ;;  %548 = vmatprep.subr.bf16.mxu1 %v925_v40 }
  0x29   :  { %601 = vmatprep.subr.bf16.mxu0 %v927_v41 }
  0x2b   :  { %549 = vmatpush1.bf16.msra.mxu1 %v929_v42 }
  0x2c   :  { %602 = vmatpush1.bf16.msra.mxu0 %v930_v43  ;;  %550 = vmatprep.subr.bf16.mxu1 %v931_v44 }
  0x2d   :  { %603 = vmatprep.subr.bf16.mxu0 %v933_v45 }
  0x2f   :  { %551 = vmatpush1.bf16.msra.mxu1 %v935_v46 }
  0x30   :  { %604 = vmatpush1.bf16.msra.mxu0 %v936_v47  ;;  %552 = vmatprep.subr.bf16.mxu1 %v937_v48 }
  0x31   :  { %605 = vmatprep.subr.bf16.mxu0 %v939_v50 }
  0x33   :  { %553 = vmatpush1.bf16.msra.mxu1 %v941_v52 }
  0x34   :  { %606 = vmatpush1.bf16.msra.mxu0 %v942_v53  ;;  %554 = vmatprep.subr.bf16.mxu1 %v943_v54 }
  0x35   :  { %607 = vmatprep.subr.bf16.mxu0 %v945_v55 }
  0x37   :  { %555 = vmatpush1.bf16.msra.mxu1 %v947_v56 }
  0x38   :  { %608 = vmatpush1.bf16.msra.mxu0 %v948_v57  ;;  %556 = vmatprep.subr.bf16.mxu1 %v949_v58 }
  0x39   :  { %609 = vmatprep.subr.bf16.mxu0 %v951_v59 }
  0x3b   :  { %557 = vmatpush1.bf16.msra.mxu1 %v953_v60 }
  0x3c   :  { %610 = vmatpush1.bf16.msra.mxu0 %v954_v61  ;;  %558 = vmatprep.subr.bf16.mxu1 %v955_v62 }
  0x3d   :  { %611 = vmatprep.subr.bf16.mxu0 %v957_v63 }
  0x3f   :  { %559 = vmatpush1.bf16.msra.mxu1 %v959_v0 }
  0x40   :  { %612 = vmatpush1.bf16.msra.mxu0 %v960_v1  ;;  %832 = vmatprep.subr.bf16.mxu1 %v969_v2 }
  0x41   :  { %634 = vmatprep.subr.bf16.mxu0 %v969_v2 }
  0x42   :  { %561 = vmatmul.mubr.bf16.vlgmr.msra.gmra.mrb[0].mxu1 %v961_v3 }
  0x43   :  { %614 = vmatmul.mubr.bf16.vlgmr.msra.gmra.mrb[0].mxu0 %v964_v4  ;;  %836 = vmatpush1.bf16.msra.mxu1 %v967_v5 }
  0x44   :  { %635 = vmatpush1.bf16.msra.mxu0 %v967_v5  ;;  %833 = vmatprep.subr.bf16.mxu1 %v972_v6 }
  0x45   :  { %636 = vmatprep.subr.bf16.mxu0 %v972_v6  ;;  %570 = vmatprep.mubr.bf16.mxu1 %v973_v7 }
  0x46   :  { %623 = vmatprep.mubr.bf16.mxu0 %v975_v8 }
  0x47   :  { %837 = vmatpush1.bf16.msra.mxu1 %v970_v9 }
  0x48   :  { %637 = vmatpush1.bf16.msra.mxu0 %v970_v9  ;;  %834 = vmatprep.subr.bf16.mxu1 %v981_v10 }
  0x49   :  { %638 = vmatprep.subr.bf16.mxu0 %v981_v10 }
  0x4a   :  { %571 = vmatmul.mubr.bf16.gmra.mrb[4].mxu1 %v977_v11 }
  0x4b   :  { %624 = vmatmul.mubr.bf16.gmra.mrb[4].mxu0 %v978_v12  ;;  %838 = vmatpush1.bf16.msra.mxu1 %v979_v13 }
  0x4c   :  { %639 = vmatpush1.bf16.msra.mxu0 %v979_v13  ;;  %835 = vmatprep.subr.bf16.mxu1 %v984_v14 }
  0x4d   :  { %640 = vmatprep.subr.bf16.mxu0 %v984_v14  ;;  %666 = vmatprep.mubr.bf16.mxu0 %v987_v16 }
  0x4e   :  { %676 = vmatprep.mubr.bf16.mxu1 %v987_v16 }
  0x4f   :  { %839 = vmatpush1.bf16.msra.mxu1 %v982_v15 }
  0x50   :  { %641 = vmatpush1.bf16.msra.mxu0 %v982_v15 }
  0x52   :  { %823 = vmatmul.mubr.msk.bf16.vlgmr.msra.gmra.mrb[8].mxu1 %vm521_vm0, %v986_v18 }
  0x53   :  { %822 = vmatmul.mubr.msk.bf16.vlgmr.msra.gmra.mrb[0].mxu0 %vm521_vm0, %v985_v17 }
 0x115   :  { %v562_v21 = vpop.f32.mrb[0].mxu1 }
 0x116   :  { %v564_v22 = vpop.f32.mrb[1].mxu1  ;;  %v563_v46 = vadd.f32 %v562_v21, %v104_v28 }
 0x117   :  { %v566_v23 = vpop.f32.mrb[2].mxu1  ;;  %v565_v47 = vadd.f32 %v564_v22, %v108_v29 }
 0x118   :  { %v568_v25 = vpop.f32.mrb[3].mxu1  ;;  %v567_v50 = vadd.f32 %v566_v23, %v104_v28 }
 0x119   :  { %v569_v55 = vadd.f32 %v568_v25, %v108_v29 }
 0x11d   :  { %v572_v30 = vpop.f32.mrb[4].mxu1 }
 0x11e   :  { %v625_v31 = vpop.f32.mrb[4].mxu0  ;;  %v573_v32 = vadd.f32 %v572_v30, %v104_v28  ;;  %v574_v33 = vpop.f32.mrb[5].mxu1 }
 0x11f   :  { %v627_v34 = vpop.f32.mrb[5].mxu0  ;;  %v575_v35 = vadd.f32 %v574_v33, %v108_v29  ;;  %v576_v36 = vpop.f32.mrb[6].mxu1 }
 0x120   :  { %v629_v37 = vpop.f32.mrb[6].mxu0  ;;  %v626_v38 = vadd.f32 %v625_v31, %v573_v32  ;;  %v577_v39 = vadd.f32 %v576_v36, %v104_v28  ;;  %v578_v40 = vpop.f32.mrb[7].mxu1 }
 0x121   :  { %v631_v41 = vpop.f32.mrb[7].mxu0  ;;  %v628_v42 = vadd.f32 %v627_v34, %v575_v35  ;;  %v579_v43 = vadd.f32 %v578_v40, %v108_v29 }
 0x122   :  { %v630_v44 = vadd.f32 %v629_v37, %v577_v39 }
 0x123   :  { %v632_v45 = vadd.f32 %v631_v41, %v579_v43 }
 0x125   :  { %v678_v49 = vpop.f32.mrb[8].mxu1 }
 0x126   :  { %v668_v48 = vpop.f32.mrb[0].mxu0  ;;  %v679_v52 = vadd.f32 %v678_v49, %v626_v38  ;;  %v680_v54 = vpop.f32.mrb[9].mxu1 }
 0x127   :  { %v841_v51 = vadd.f32 %v668_v48, %v563_v46  ;;  %v670_v53 = vpop.f32.mrb[1].mxu0  ;;  %v681_v57 = vadd.f32 %v680_v54, %v628_v42  ;;  %v682_v59 = vpop.f32.mrb[10].mxu1 }
 0x128   :  { %v843_v56 = vadd.f32 %v670_v53, %v565_v47  ;;  %v672_v58 = vpop.f32.mrb[2].mxu0  ;;  %v696_v61 = vmax.f32 %v679_v52, 0.0  ;;  %v683_v63 = vadd.f32 %v682_v59, %v630_v44  ;;  %v684_v1 = vpop.f32.mrb[11].mxu1 }
 0x129   :  { %v692_v60 = vmax.f32 %v841_v51, 0.0  ;;  %v845_v62 = vadd.f32 %v672_v58, %v567_v50  ;;  %v674_v0 = vpop.f32.mrb[3].mxu0  ;;  %v685_v3 = vadd.f32 %v684_v1, %v632_v45 }
 0x12a   :  { %v847_v2 = vadd.f32 %v674_v0, %v569_v55  ;;  %v830_v5 = vpack.c.bf16 %v681_v57, %v696_v61  ;;  %v698_v7 = vmax.f32 %v683_v63, 0.0 }
 0x12b   :  { %v828_v4 = vpack.c.bf16 %v843_v56, %v692_v60  ;;  %v694_v6 = vmax.f32 %v845_v62, 0.0 }
 0x12c   :  { %734 = vst [vmem:[%s1272_s3 + $0x10] sm:$0xff] %v830_v5  ;;  %v831_v9 = vpack.c.bf16 %v685_v3, %v698_v7 }
 0x12d   :  { %732 = vst [vmem:[%s1272_s3] sm:$0xff] %v828_v4  ;;  %v829_v8 = vpack.c.bf16 %v847_v2, %v694_v6 }
 0x12e   :  { %735 = vst [vmem:[%s1272_s3 + $0x18] sm:$0xff] %v831_v9 }
 0x12f   :  { %733 = vst [vmem:[%s1272_s3 + $0x8] sm:$0xff] %v829_v8 }

// kernel: resnet_forward.23
= control target key start
LH: loop header
LB: loop body
LE: loop exit
PB: predicated region body
PF: predicated region fallthrough
CT: control target
= control target key end

     0   :  { %s2223_s15 = smov 0   ;;  %s2760_s0 = inlined_call_operand.vmem [shape: bf16[2,6,6,128], index: 0, kind: input, shape index: {}]   ;;  %s2761_s1 = inlined_call_operand.vmem [shape: bf16[9,128,128], index: 1, kind: input, shape index: {}]   ;;  %s2762_s2 = inlined_call_operand.vmem [shape: f32[1,128], index: 2, kind: input, shape index: {}]   ;;  %s2763_s3 = inlined_call_operand.vmem [shape: bf16[2,4,4,128], index: 3, kind: input, shape index: {}]   ;;  %s2764_s4 = inlined_call_operand.vmem [shape: bf16[2,4,4,128], index: 4, kind: output, shape index: {}]  }
   0x1 LB: > { %s1616_s16 = sadd.s32 4294967295, %s2193_s15   ;;  %p1620_p0 = scmp.ge.s32.totalorder %s2193_s15, 1  ;;  %s2193_s15 = sphi %s2223_s15, %s14_s15  }
   0x2   : > { %p172_p1 = scmp.lt.s32.totalorder %s2193_s15, 3 }
   0x4   : > { %p173_p2 = pnand %p1620_p0, %p172_p1 }
   0x5   : > { %v2110_v0 = vld [vmem:[%s2761_s1 + $0x40] sm:$0xff] (!%p173_p2)   ;;  %v2195_v1 = vmov (!%p173_p2), 0.0   ;;  %v2112_v3 = vld [vmem:[%s2761_s1 + $0x48] sm:$0xff] (!%p173_p2)   ;;  %vm2196_vm0 = vmmov (!%p173_p2), 0   ;;  %p203_p3 = scmp.lt.s32.totalorder (!%p173_p2), %s1616_s16, 1  ;;  %v2114_v5 = vld [vmem:[%s2761_s1 + $0x50] sm:$0xff] (!%p173_p2)   ;;  %v248_v10 = vlaneseq (!%p173_p2) }
   0x6   : > { %176 = sbr.rel (%p173_p2) target bundleno = 400 (0x190), region = 36  ;;  %1918 = vmatprep.subr.bf16.mxu0 (!%p173_p2), %v2195_v1  ;;  %1938 = vmatprep.subr.bf16.mxu1 (!%p173_p2), %v2195_v1  ;;  %v2111_v2 = vld [vmem:[%s2761_s1] sm:$0xff] (!%p173_p2)   ;;  %v2113_v4 = vld [vmem:[%s2761_s1 + $0x8] sm:$0xff] (!%p173_p2)   ;;  %v2115_v6 = vld [vmem:[%s2761_s1 + $0x10] sm:$0xff] (!%p173_p2)   ;;  %v2197_v15 = vmov (!%p173_p2), 1983009808  }
   0x7   : > { %1919 = vmatpush3.bf16.msra.mxu0 (!%p173_p2), %v2110_v0  ;;  %1934 = vmatprep.mubr.msk.bf16.mxu0 (!%p173_p2), %vm2196_vm0, %v2195_v1  ;;  %v2116_v7 = vld [vmem:[%s2761_s1 + $0x58] sm:$0xff] (!%p173_p2)   ;;  %v2118_v9 = vld [vmem:[%s2761_s1 + $0x60] sm:$0xff] (!%p173_p2)   ;;  %v2120_v12 = vld [vmem:[%s2761_s1 + $0x68] sm:$0xff] (!%p173_p2)   ;;  %v246_v16 = vunpack.c.l.s4 (!%p173_p2), %v2197_v15  ;;  %v249_v17 = vshrl.u32 (!%p173_p2), %v248_v10, 7  ;;  %vm277_vm1 = vsmask.f32 (!%p173_p2), 1280 }
   0x8   : > { %1939 = vmatpush3.bf16.msra.mxu1 (!%p173_p2), %v2111_v2  ;;  %1920 = vmatprep.subr.bf16.mxu0 (!%p173_p2), %v2195_v1  ;;  %v2117_v8 = vld [vmem:[%s2761_s1 + $0x18] sm:$0xff] (!%p173_p2)   ;;  %v2119_v11 = vld [vmem:[%s2761_s1 + $0x20] sm:$0xff] (!%p173_p2)   ;;  %v2121_v13 = vld [vmem:[%s2761_s1 + $0x28] sm:$0xff] (!%p173_p2)   ;;  %vm278_vm2 = vsmask.f32 (!%p173_p2), 3336  ;;  %vm571_vm8 = vcmask (!%p173_p2), 1040384  }
   0x9   : > { %1940 = vmatprep.subr.bf16.mxu1 (!%p173_p2), %v2195_v1  ;;  %1954 = vmatprep.mubr.msk.bf16.mxu1 (!%p173_p2), %vm2196_vm0, %v2195_v1  ;;  %v247_v21 = vunpack.c.0.s8 (!%p173_p2), %v246_v16  ;;  %v2122_v22 = vld [vmem:[%s2761_s1 + $0x70] sm:$0xff] (!%p173_p2)   ;;  %vm280_vm3 = vsmask.f32 (!%p173_p2), 5392  ;;  %v2124_v27 = vld [vmem:[%s2761_s1 + $0x78] sm:$0xff] (!%p173_p2)   ;;  %vm282_vm4 = vsmask.f32 (!%p173_p2), 7448  ;;  %vm279_vm5 = vmor (!%p173_p2), %vm277_vm1, %vm278_vm2 }
   0xa   : > { %v2123_v23 = vld [vmem:[%s2761_s1 + $0x30] sm:$0xff] (!%p173_p2)   ;;  %v2125_v33 = vld [vmem:[%s2761_s1 + $0x38] sm:$0xff] (!%p173_p2)   ;;  %vm2377_vm6 = vmor (!%p173_p2), %vm279_vm5, %vm280_vm3  ;;  %vm572_vm9 = vcmask (!%p173_p2), 1042434   ;;  %vm574_vm11 = vcmask (!%p173_p2), 1044484   ;;  %vm576_vm12 = vcmask (!%p173_p2), 1046534  }
   0xb   : > { %1921 = vmatpush3.bf16.msra.mxu0 (!%p173_p2), %v2112_v3  ;;  %v2310_v26 = vsub.s32 (!%p173_p2), %v247_v21, %v249_v17  ;;  %vm2387_vm7 = vmor (!%p173_p2), %vm2377_vm6, %vm282_vm4  ;;  %v2157_v62 = vld [vmem:[%s2761_s1 + $0x168] sm:$0xff] (!%p173_p2)  }
   0xc   : > { %1941 = vmatpush3.bf16.msra.mxu1 (!%p173_p2), %v2113_v4  ;;  %1922 = vmatprep.subr.bf16.mxu0 (!%p173_p2), %v2195_v1  ;;  %vm573_vm10 = vmor (!%p173_p2), %vm571_vm8, %vm572_vm9 }
   0xd   : > { %s2772_s16 = smov (!%p203_p3, %s1616_s16), 1  ;;  %1942 = vmatprep.subr.bf16.mxu1 %v2195_v1  ;;  %vm575_vm13 = vmor %vm573_vm10, %vm574_vm11 }
   0xe   : > { %s2098_s7 = smul.u32 24, %s2772_s16  ;;  %vm2488_vm14 = vmor %vm575_vm13, %vm576_vm12 }
   0xf   : > { %1923 = vmatpush3.bf16.msra.mxu0 %v2114_v5 }
  0x10   : > { %1943 = vmatpush3.bf16.msra.mxu1 %v2115_v6  ;;  %1924 = vmatprep.subr.bf16.mxu0 %v2195_v1  ;;  %s2280_s14 = scalar_lea.vmem %s2760_s0, %s2098_s7 }
  0x11   : > { %1944 = vmatprep.subr.bf16.mxu1 %v2195_v1  ;;  %v219_v14 = vld [vmem:[%s2280_s14] sm:$0x7]  ;;  %v2292_v18 = vld [vmem:[%s2280_s14 + $0x4] sm:$0x7]  ;;  %v2296_v19 = vld [vmem:[%s2280_s14 + $0x8] sm:$0x7] }
  0x12   : > { %v2299_v20 = vld [vmem:[%s2280_s14 + $0xc] sm:$0x7]  ;;  %v464_v24 = vcombine.low %v219_v14, %v2292_v18  ;;  %v2318_v28 = vld [vmem:[%s2280_s14 + $0x10] sm:$0x7]  ;;  %v2321_v29 = vrot.slane %v219_v14, %v2310_v26  ;;  %v2325_v30 = vrot.slane %v2292_v18, %v2310_v26  ;;  %v2329_v31 = vrot.slane %v2296_v19, %v2310_v26 }
  0x13   : > { %1925 = vmatpush3.bf16.msra.mxu0 %v2116_v7  ;;  %v465_v25 = vcombine.low %v2296_v19, %v2299_v20  ;;  %v2333_v32 = vrot.slane %v2299_v20, %v2310_v26  ;;  %v2340_v34 = vrot.slane %v2318_v28, %v2310_v26 }
  0x14   : > { %1945 = vmatpush3.bf16.msra.mxu1 %v2117_v8  ;;  %1926 = vmatprep.subr.bf16.mxu0 %v2195_v1  ;;  %v2343_v35 = vrot.slane %v464_v24, %v2310_v26  ;;  %v2350_v37 = vcombine.high %v2321_v29, %v2321_v29  ;;  %v2354_v38 = vcombine.high %v2325_v30, %v2325_v30  ;;  %v285_v41 = vshrl.u32 %v2321_v29, 16 }
  0x15   : > { %1946 = vmatprep.subr.bf16.mxu1 %v2195_v1  ;;  %v2346_v36 = vrot.slane %v465_v25, %v2310_v26  ;;  %v2358_v39 = vcombine.high %v2329_v31, %v2329_v31  ;;  %v2362_v40 = vcombine.high %v2333_v32, %v2333_v32  ;;  %v288_v42 = vshll.u32 %v2321_v29, 16 }
  0x16   : > { %v299_v43 = vshrl.u32 %v2325_v30, 16  ;;  %v302_v44 = vshll.u32 %v2325_v30, 16  ;;  %v294_v45 = vshll.u32 %v2350_v37, 16  ;;  %v308_v46 = vshll.u32 %v2354_v38, 16 }
  0x17   : > { %1927 = vmatpush3.bf16.msra.mxu0 %v2118_v9  ;;  %v313_v47 = vshrl.u32 %v2329_v31, 16  ;;  %v316_v48 = vshll.u32 %v2329_v31, 16  ;;  %v287_v50 = vrot.slane %v285_v41, 6  ;;  %v290_v51 = vrot.slane %v288_v42, 7 }
  0x18   : > { %1947 = vmatpush3.bf16.msra.mxu1 %v2119_v11  ;;  %1928 = vmatprep.subr.bf16.mxu0 %v2195_v1  ;;  %v301_v52 = vrot.slane %v299_v43, 6  ;;  %v304_v53 = vrot.slane %v302_v44, 7  ;;  %v296_v54 = vrot.slane %v294_v45, 7  ;;  %v310_v55 = vrot.slane %v308_v46, 7  ;;  %v2129_v11 = vld [vmem:[%s2761_s1 + $0xc0] sm:$0xff]   ;;  %v2131_v45 = vld [vmem:[%s2761_s1 + $0xc8] sm:$0xff]  }
  0x19   : > { %1948 = vmatprep.subr.bf16.mxu1 %v2195_v1  ;;  %v315_v56 = vrot.slane %v313_v47, 6  ;;  %v318_v57 = vrot.slane %v316_v48, 7  ;;  %v291_v58 = vor.u32 %v290_v51, %v287_v50  ;;  %v322_v60 = vshll.u32 %v2358_v39, 16  ;;  %v2128_v48 = vld [vmem:[%s2761_s1 + $0x80] sm:$0xff]  }
  0x1a   : > { %v305_v59 = vor.u32 %v304_v53, %v301_v52  ;;  %v327_v61 = vshrl.u32 %v2333_v32, 16  ;;  %v330_v0 = vshll.u32 %v2333_v32, 16  ;;  %v336_v2 = vshll.u32 %v2362_v40, 16  ;;  %v2133_v52 = vld [vmem:[%s2761_s1 + $0xd0] sm:$0xff]  }
  0x1b   : > { %1929 = vmatpush3.bf16.msra.mxu0 %v2120_v12  ;;  %v319_v63 = vor.u32 %v318_v57, %v315_v56  ;;  %v2395_v3 = vcombine.high %v2340_v34, %v2340_v34  ;;  %v292_v4 = vrot.slane %v291_v58, 2  ;;  %v324_v6 = vrot.slane %v322_v60, 7  ;;  %v2135_v56 = vld [vmem:[%s2761_s1 + $0xd8] sm:$0xff]   ;;  %v2132_v58 = vld [vmem:[%s2761_s1 + $0x90] sm:$0xff]  }
  0x1c   : > { %1949 = vmatpush3.bf16.msra.mxu1 %v2121_v13  ;;  %1930 = vmatprep.subr.bf16.mxu0 %v2195_v1  ;;  %v306_v5 = vrot.slane %v305_v59, 2  ;;  %v329_v7 = vrot.slane %v327_v61, 6  ;;  %v332_v9 = vrot.slane %v330_v0, 7  ;;  %v856_v10 = vshrl.u32 %v2340_v34, 16  ;;  %v2137_v59 = vld [vmem:[%s2761_s1 + $0xe0] sm:$0xff]   ;;  %v2134_v60 = vld [vmem:[%s2761_s1 + $0x98] sm:$0xff]  }
  0x1d   : > { %1950 = vmatprep.subr.bf16.mxu1 %v2195_v1  ;;  %v320_v8 = vrot.slane %v319_v63, 2  ;;  %v297_v12 = vsel %vm2387_vm7, %v292_v4, %v296_v54  ;;  %v859_v14 = vshll.u32 %v2340_v34, 16  ;;  %v865_v15 = vshll.u32 %v2395_v3, 16  ;;  %v2139_v61 = vld [vmem:[%s2761_s1 + $0xe8] sm:$0xff]   ;;  %v2141_v4 = vld [vmem:[%s2761_s1 + $0xf0] sm:$0xff]  }
  0x1e   : > { %v311_v13 = vsel %vm2387_vm7, %v306_v5, %v310_v55  ;;  %v333_v17 = vor.u32 %v332_v9, %v329_v7  ;;  %v338_v21 = vrot.slane %v336_v2, 7  ;;  %v2130_v55 = vld [vmem:[%s2761_s1 + $0x88] sm:$0xff]   ;;  %v1658_v63 = vrot.slane %v2321_v29, 9  ;;  %v2136_v2 = vld [vmem:[%s2761_s1 + $0xa0] sm:$0xff]  }
  0x1f   : > { %1931 = vmatpush3.bf16.msra.mxu0 %v2122_v22  ;;  %v325_v16 = vsel %vm2387_vm7, %v320_v8, %v324_v6  ;;  %v858_v22 = vrot.slane %v856_v10, 6  ;;  %v861_v24 = vrot.slane %v859_v14, 7  ;;  %v867_v41 = vrot.slane %v865_v15, 7  ;;  %v2147_v15 = vld [vmem:[%s2761_s1 + $0x140] sm:$0xff]  }
  0x20   : > { %1951 = vmatpush3.bf16.msra.mxu1 %v2123_v23  ;;  %1932 = vmatprep.subr.bf16.mxu0 %v2195_v1  ;;  %v357_v23 = vcombine.low %v297_v12, %v311_v13  ;;  %v886_v25 = vcombine.low %v311_v13, %v325_v16  ;;  %v580_v0 = vrot.slane %v2350_v37, 7  ;;  %v1659_v5 = vrot.slane %v2325_v30, 9 }
  0x21   : > { %1952 = vmatprep.subr.bf16.mxu1 %v2195_v1  ;;  %v862_v42 = vor.u32 %v861_v24, %v858_v22  ;;  %v584_v6 = vrot.slane %v2354_v38, 7  ;;  %v1660_v7 = vrot.slane %v2329_v31, 9  ;;  %v588_v8 = vrot.slane %v2358_v39, 7  ;;  %v2149_v22 = vld [vmem:[%s2761_s1 + $0x148] sm:$0xff]  }
  0x22   : > { %v2413_v43 = vrot.slane %v886_v25, %v2310_v26  ;;  %v738_v29 = vcombine.low %v2292_v18, %v2296_v19  ;;  %v739_v37 = vcombine.low %v2299_v20, %v2318_v28  ;;  %v1661_v30 = vrot.slane %v2333_v32, 9  ;;  %v2138_v18 = vld [vmem:[%s2761_s1 + $0xa8] sm:$0xff]   ;;  %v2143_v32 = vld [vmem:[%s2761_s1 + $0xf8] sm:$0xff]  }
  0x23   : > { %1933 = vmatpush3.bf16.msra.mxu0 %v2124_v27  ;;  %v480_v27 = vcombine.low %v2343_v35, %v2346_v36  ;;  %v365_v35 = vrot.slane %v357_v23, %v2310_v26  ;;  %v863_v47 = vrot.slane %v862_v42, 2  ;;  %v592_v38 = vrot.slane %v2362_v40, 7  ;;  %v224_v23 = vld [vmem:[%s2280_s14 + $0x14] sm:$0x7]  ;;  %s1835_s14 = sshll.u32 %s2772_s16, 3 }
  0x24   : > { %1953 = vmatpush3.bf16.msra.mxu1 %v2125_v33  ;;  %1958 = vmatprep.subr.bf16.mxu0 %v2195_v1  ;;  %v334_v33 = vrot.slane %v333_v17, 2  ;;  %v581_v19 = vsel %vm2488_vm14, %v1658_v63, %v580_v0  ;;  %v746_v20 = vrot.slane %v738_v29, %v2310_v26  ;;  %v753_v31 = vrot.slane %v739_v37, %v2310_v26  ;;  %v2151_v42 = vld [vmem:[%s2761_s1 + $0x150] sm:$0xff]   ;;  %v2155_v0 = vld [vmem:[%s2761_s1 + $0x160] sm:$0xff]   ;;  %s212_s25 = scalar_lea.vmem %s2763_s3, %s1835_s14  ;;  %s217_s29 = scalar_lea.vmem %s2764_s4, %s1835_s14 }
  0x25   : > { %1978 = vmatprep.subr.bf16.mxu1 %v2195_v1  ;;  %v2432_v50 = vsel %vm2387_vm7, %v863_v47, %v867_v41  ;;  %v2508_v39 = vsel %vm2488_vm14, %v1659_v5, %v584_v6  ;;  %v2512_v40 = vsel %vm2488_vm14, %v1660_v7, %v588_v8  ;;  %v2516_v10 = vsel %vm2488_vm14, %v1661_v30, %v592_v38  ;;  %v2144_v41 = vld [vmem:[%s2761_s1 + $0x100] sm:$0xff]   ;;  %v2150_v63 = vld [vmem:[%s2761_s1 + $0x110] sm:$0xff]   ;;  %v2152_v8 = vld [vmem:[%s2761_s1 + $0x118] sm:$0xff]  }
  0x26   : > { %v339_v44 = vsel %vm2387_vm7, %v334_v33, %v338_v21  ;;  %v611_v12 = vcombine.low %v581_v19, %v2508_v39  ;;  %v612_v13 = vcombine.low %v2512_v40, %v2516_v10  ;;  %v754_v14 = vcombine.low %v746_v20, %v753_v31  ;;  %v2154_v30 = vld [vmem:[%s2761_s1 + $0x120] sm:$0xff]   ;;  %v2159_v38 = vld [vmem:[%s2761_s1 + $0x170] sm:$0xff]   ;;  %v2156_v19 = vld [vmem:[%s2761_s1 + $0x128] sm:$0xff]  }
  0x27   : > { %1955 = vmatmul.mubr.bf16.vlgmr.msra.gmra.mrb[0].mxu1 %v480_v27  ;;  %v358_v46 = vcombine.low %v325_v16, %v339_v44  ;;  %v887_v51 = vcombine.low %v339_v44, %v2432_v50  ;;  %v2142_v16 = vld [vmem:[%s2761_s1 + $0xb8] sm:$0xff]   ;;  %v1143_v24 = vcombine.low %v2318_v28, %v224_v23  ;;  %v1250_v25 = vrot.slane %v224_v23, %v2310_v26  ;;  %v2174_v23 = vld [vmem:[%s2761_s1 + $0x1b0] sm:$0xff]  }
  0x28   : > { %1979 = vmatpush3.bf16.msra.mxu1 %v2129_v11  ;;  %1994 = vmatprep.mubr.msk.bf16.mxu1 %vm2196_vm0, %v2195_v1  ;;  %v2140_v11 = vld [vmem:[%s2761_s1 + $0xb0] sm:$0xff]   ;;  %v619_v17 = vrot.slane %v611_v12, %v2310_v26  ;;  %v2536_v21 = vrot.slane %v612_v13, %v2310_v26  ;;  %v1734_v33 = vrot.slane %v2340_v34, 9  ;;  %v2148_v34 = vld [vmem:[%s2761_s1 + $0x108] sm:$0xff]   ;;  %v1016_v37 = vcombine.low %v2508_v39, %v2512_v40  ;;  %v2161_v20 = vld [vmem:[%s2761_s1 + $0x178] sm:$0xff]  }
  0x29   : > { %1980 = vmatprep.subr.bf16.mxu1 %v2195_v1  ;;  %v2428_v49 = vrot.slane %v358_v46, %v2310_v26  ;;  %v2441_v54 = vrot.slane %v887_v51, %v2310_v26  ;;  %v2557_v44 = vrot.slane %v1143_v24, %v2310_v26  ;;  %v1251_v28 = vcombine.high %v1250_v25, %v1250_v25  ;;  %v2160_v39 = vld [vmem:[%s2761_s1 + $0x138] sm:$0xff]   ;;  %v2165_v40 = vld [vmem:[%s2761_s1 + $0x1c8] sm:$0xff]  }
  0x2a   : > { %v627_v27 = vcombine.low %v619_v17, %v2536_v21  ;;  %v1256_v46 = vshll.u32 %v1250_v25, 16  ;;  %v2164_v12 = vld [vmem:[%s2761_s1 + $0x188] sm:$0xff]   ;;  %v2169_v13 = vld [vmem:[%s2761_s1 + $0x1d8] sm:$0xff]  }
  0x2b   : > { %v373_v53 = vcombine.low %v365_v35, %v2428_v49  ;;  %v902_v57 = vcombine.low %v2413_v43, %v2441_v54  ;;  %v1151_v35 = vcombine.low %v2346_v36, %v2557_v44  ;;  %v1262_v51 = vshll.u32 %v1251_v28, 16  ;;  %v2166_v43 = vld [vmem:[%s2761_s1 + $0x190] sm:$0xff]   ;;  %v2171_v54 = vld [vmem:[%s2761_s1 + $0x1e0] sm:$0xff]   ;;  %v2172_v17 = vld [vmem:[%s2761_s1 + $0x1a8] sm:$0xff]  }
  0x2c   : > { %1981 = vmatpush3.bf16.msra.mxu1 %v2131_v45  ;;  %v1253_v45 = vshrl.u32 %v1250_v25, 16  ;;  %v2176_v24 = vld [vmem:[%s2761_s1 + $0x1b8] sm:$0xff]   ;;  %v2185_v44 = vld [vmem:[%s2761_s1 + $0x230] sm:$0xff]  }
  0x2d   : > { %1982 = vmatprep.subr.bf16.mxu1 %v2195_v1  ;;  %1935 = vmatmul.mubr.bf16.vlgmr.msra.gmra.mrb[0].mxu0 %v373_v53  ;;  %v1807_v53 = vrot.slane %v1250_v25, 9  ;;  %v2179_v25 = vld [vmem:[%s2761_s1 + $0x200] sm:$0xff]   ;;  %v2182_v36 = vld [vmem:[%s2761_s1 + $0x218] sm:$0xff]  }
  0x2e   : > { %1959 = vmatpush3.bf16.msra.mxu0 %v2128_v48  ;;  %1974 = vmatprep.mubr.msk.bf16.mxu0 %vm2196_vm0, %v2195_v1  ;;  %v1255_v47 = vrot.slane %v1253_v45, 6  ;;  %v1258_v48 = vrot.slane %v1256_v46, 7 }
  0x2f   : > { %1960 = vmatprep.subr.bf16.mxu0 %v2195_v1 }
  0x30   : > { %1983 = vmatpush3.bf16.msra.mxu1 %v2133_v52  ;;  %v997_v52 = vrot.slane %v2395_v3, 7 }
  0x31   : > { %1984 = vmatprep.subr.bf16.mxu1 %v2195_v1 }
  0x32   : > { %1961 = vmatpush3.bf16.msra.mxu0 %v2130_v55  ;;  %v2153_v55 = vld [vmem:[%s2761_s1 + $0x158] sm:$0xff]   ;;  %v998_v3 = vsel %vm2488_vm14, %v1734_v33, %v997_v52  ;;  %v2181_v33 = vld [vmem:[%s2761_s1 + $0x210] sm:$0xff]  }
  0x33   : > { %1962 = vmatprep.subr.bf16.mxu0 %v2195_v1  ;;  %v1017_v9 = vcombine.low %v2516_v10, %v998_v3  ;;  %v2162_v10 = vld [vmem:[%s2761_s1 + $0x180] sm:$0xff]  }
  0x34   : > { %1985 = vmatpush3.bf16.msra.mxu1 %v2135_v56  ;;  %v1259_v56 = vor.u32 %v1258_v48, %v1255_v47 }
  0x35   : > { %1986 = vmatprep.subr.bf16.mxu1 %v2195_v1 }
  0x36   : > { %1963 = vmatpush3.bf16.msra.mxu0 %v2132_v58  ;;  %v1264_v58 = vrot.slane %v1262_v51, 7 }
  0x37   : > { %1964 = vmatprep.subr.bf16.mxu0 %v2195_v1 }
  0x38   : > { %1987 = vmatpush3.bf16.msra.mxu1 %v2137_v59  ;;  %v1386_v59 = vrot.slane %v1251_v28, 7  ;;  %v2186_v28 = vld [vmem:[%s2761_s1 + $0x238] sm:$0xff]  }
  0x39   : > { %1988 = vmatprep.subr.bf16.mxu1 %v2195_v1 }
  0x3a   : > { %1965 = vmatpush3.bf16.msra.mxu0 %v2134_v60  ;;  %v1260_v60 = vrot.slane %v1259_v56, 2 }
  0x3b   : > { %1966 = vmatprep.subr.bf16.mxu0 %v2195_v1 }
  0x3c   : > { %1989 = vmatpush3.bf16.msra.mxu1 %v2139_v61  ;;  %v1387_v61 = vsel %vm2488_vm14, %v1807_v53, %v1386_v59 }
  0x3d   : > { %1990 = vmatprep.subr.bf16.mxu1 %v2195_v1 }
  0x3e   : > { %1967 = vmatpush3.bf16.msra.mxu0 %v2136_v2  ;;  %v1265_v2 = vsel %vm2387_vm7, %v1260_v60, %v1264_v58 }
  0x3f   : > { %1968 = vmatprep.subr.bf16.mxu0 %v2195_v1  ;;  %v1283_v5 = vcombine.low %v2432_v50, %v1265_v2 }
  0x40   : > { %1991 = vmatpush3.bf16.msra.mxu1 %v2141_v4  ;;  %v1405_v4 = vcombine.low %v998_v3, %v1387_v61 }
  0x41   : > { %1992 = vmatprep.subr.bf16.mxu1 %v2195_v1  ;;  %v1290_v7 = vrot.slane %v1283_v5, %v2310_v26 }
  0x42   : > { %1969 = vmatpush3.bf16.msra.mxu0 %v2138_v18  ;;  %v2590_v6 = vrot.slane %v1405_v4, %v2310_v26  ;;  %v1031_v18 = vrot.slane %v1017_v9, %v2310_v26 }
  0x43   : > { %1970 = vmatprep.subr.bf16.mxu0 %v2195_v1  ;;  %v2604_v50 = vcombine.low %v2428_v49, %v1290_v7  ;;  %v1024_v49 = vrot.slane %v1016_v37, %v2310_v26  ;;  %v2158_v26 = vld [vmem:[%s2761_s1 + $0x130] sm:$0xff]  }
  0x44   : > { %1993 = vmatpush3.bf16.msra.mxu1 %v2143_v32  ;;  %v1413_v29 = vcombine.low %v2536_v21, %v2590_v6  ;;  %v2163_v32 = vld [vmem:[%s2761_s1 + $0x1c0] sm:$0xff]  }
  0x45   : > { %2018 = vmatprep.subr.bf16.mxu1 %v2195_v1  ;;  %v1032_v31 = vcombine.low %v1024_v49, %v1031_v18 }
  0x46   : > { %1971 = vmatpush3.bf16.msra.mxu0 %v2140_v11  ;;  %v2167_v11 = vld [vmem:[%s2761_s1 + $0x1d0] sm:$0xff]  }
  0x47   : > { %1995 = vmatmul.mubr.bf16.vlgmr.msra.gmra.mrb[4].mxu1 %v754_v14  ;;  %1972 = vmatprep.subr.bf16.mxu0 %v2195_v1  ;;  %v2173_v14 = vld [vmem:[%s2761_s1 + $0x1e8] sm:$0xff]  }
  0x48   : > { %2019 = vmatpush3.bf16.msra.mxu1 %v2147_v15  ;;  %2034 = vmatprep.mubr.msk.bf16.mxu1 %vm2196_vm0, %v2195_v1  ;;  %v2170_v15 = vld [vmem:[%s2761_s1 + $0x1a0] sm:$0xff]  }
  0x49   : > { %2020 = vmatprep.subr.bf16.mxu1 %v2195_v1 }
  0x4a   : > { %1973 = vmatpush3.bf16.msra.mxu0 %v2142_v16  ;;  %v2175_v16 = vld [vmem:[%s2761_s1 + $0x1f0] sm:$0xff]  }
  0x4b   : > { %1998 = vmatprep.subr.bf16.mxu0 %v2195_v1 }
  0x4c   : > { %2021 = vmatpush3.bf16.msra.mxu1 %v2149_v22  ;;  %v2177_v22 = vld [vmem:[%s2761_s1 + $0x1f8] sm:$0xff]  }
  0x4d   : > { %2022 = vmatprep.subr.bf16.mxu1 %v2195_v1  ;;  %1975 = vmatmul.mubr.bf16.vlgmr.msra.gmra.mrb[4].mxu0 %v627_v27  ;;  %v2180_v27 = vld [vmem:[%s2761_s1 + $0x208] sm:$0xff]  }
  0x4e   : > { %1999 = vmatpush3.bf16.msra.mxu0 %v2144_v41  ;;  %2014 = vmatprep.mubr.msk.bf16.mxu0 %vm2196_vm0, %v2195_v1  ;;  %v2183_v41 = vld [vmem:[%s2761_s1 + $0x220] sm:$0xff]  }
  0x4f   : > { %2000 = vmatprep.subr.bf16.mxu0 %v2195_v1 }
  0x50   : > { %2023 = vmatpush3.bf16.msra.mxu1 %v2151_v42  ;;  %v2184_v42 = vld [vmem:[%s2761_s1 + $0x228] sm:$0xff]  }
  0x51   : > { %2024 = vmatprep.subr.bf16.mxu1 %v2195_v1 }
  0x52   : > { %2001 = vmatpush3.bf16.msra.mxu0 %v2148_v34 }
  0x53   : > { %2002 = vmatprep.subr.bf16.mxu0 %v2195_v1 }
  0x54   : > { %2025 = vmatpush3.bf16.msra.mxu1 %v2153_v55 }
  0x55   : > { %2026 = vmatprep.subr.bf16.mxu1 %v2195_v1 }
  0x56   : > { %2003 = vmatpush3.bf16.msra.mxu0 %v2150_v63 }
  0x57   : > { %2004 = vmatprep.subr.bf16.mxu0 %v2195_v1 }
  0x58   : > { %2027 = vmatpush3.bf16.msra.mxu1 %v2155_v0 }
  0x59   : > { %2028 = vmatprep.subr.bf16.mxu1 %v2195_v1 }
  0x5a   : > { %2005 = vmatpush3.bf16.msra.mxu0 %v2152_v8 }
  0x5b   : > { %2006 = vmatprep.subr.bf16.mxu0 %v2195_v1 }
  0x5c   : > { %2029 = vmatpush3.bf16.msra.mxu1 %v2157_v62 }
  0x5d   : > { %2030 = vmatprep.subr.bf16.mxu1 %v2195_v1 }
  0x5e   : > { %2007 = vmatpush3.bf16.msra.mxu0 %v2154_v30 }
  0x5f   : > { %2008 = vmatprep.subr.bf16.mxu0 %v2195_v1 }
  0x60   : > { %2031 = vmatpush3.bf16.msra.mxu1 %v2159_v38 }
  0x61   : > { %2032 = vmatprep.subr.bf16.mxu1 %v2195_v1 }
  0x62   : > { %2009 = vmatpush3.bf16.msra.mxu0 %v2156_v19 }
  0x63   : > { %2010 = vmatprep.subr.bf16.mxu0 %v2195_v1 }
  0x64   : > { %2033 = vmatpush3.bf16.msra.mxu1 %v2161_v20 }
  0x65   : > { %2058 = vmatprep.subr.bf16.mxu1 %v2195_v1 }
  0x66   : > { %2011 = vmatpush3.bf16.msra.mxu0 %v2158_v26 }
  0x67   : > { %2035 = vmatmul.mubr.bf16.vlgmr.msra.gmra.mrb[8].mxu1 %v1032_v31  ;;  %2012 = vmatprep.subr.bf16.mxu0 %v2195_v1 }
  0x68   : > { %2059 = vmatpush3.bf16.msra.mxu1 %v2163_v32  ;;  %2074 = vmatprep.mubr.msk.bf16.mxu1 %vm2196_vm0, %v2195_v1 }
  0x69   : > { %2060 = vmatprep.subr.bf16.mxu1 %v2195_v1 }
  0x6a   : > { %2013 = vmatpush3.bf16.msra.mxu0 %v2160_v39 }
  0x6b   : > { %2038 = vmatprep.subr.bf16.mxu0 %v2195_v1 }
  0x6c   : > { %2061 = vmatpush3.bf16.msra.mxu1 %v2165_v40 }
  0x6d   : > { %2062 = vmatprep.subr.bf16.mxu1 %v2195_v1  ;;  %2015 = vmatmul.mubr.bf16.vlgmr.msra.gmra.mrb[8].mxu0 %v902_v57  ;;  %v2168_v57 = vld [vmem:[%s2761_s1 + $0x198] sm:$0xff]  }
  0x6e   : > { %2039 = vmatpush3.bf16.msra.mxu0 %v2162_v10  ;;  %2054 = vmatprep.mubr.msk.bf16.mxu0 %vm2196_vm0, %v2195_v1 }
  0x6f   : > { %2040 = vmatprep.subr.bf16.mxu0 %v2195_v1 }
  0x70   : > { %2063 = vmatpush3.bf16.msra.mxu1 %v2167_v11 }
  0x71   : > { %2064 = vmatprep.subr.bf16.mxu1 %v2195_v1 }
  0x72   : > { %2041 = vmatpush3.bf16.msra.mxu0 %v2164_v12 }
  0x73   : > { %2042 = vmatprep.subr.bf16.mxu0 %v2195_v1 }
  0x74   : > { %2065 = vmatpush3.bf16.msra.mxu1 %v2169_v13 }
  0x75   : > { %2066 = vmatprep.subr.bf16.mxu1 %v2195_v1 }
  0x76   : > { %2043 = vmatpush3.bf16.msra.mxu0 %v2166_v43  ;;  %v1515_v43 = vld [vmem:[%s212_s25] sm:$0x3] }
  0x77   : > { %2044 = vmatprep.subr.bf16.mxu0 %v2195_v1 }
  0x78   : > { %2067 = vmatpush3.bf16.msra.mxu1 %v2171_v54  ;;  %v1516_v54 = vld [vmem:[%s212_s25 + $0x2] sm:$0x3] }
  0x79   : > { %2068 = vmatprep.subr.bf16.mxu1 %v2195_v1 }
  0x7a   : > { %2045 = vmatpush3.bf16.msra.mxu0 %v2168_v57  ;;  %v1517_v57 = vld [vmem:[%s212_s25 + $0x4] sm:$0x3] }
  0x7b   : > { %2046 = vmatprep.subr.bf16.mxu0 %v2195_v1 }
  0x7c   : > { %2069 = vmatpush3.bf16.msra.mxu1 %v2173_v14  ;;  %v1518_v14 = vld [vmem:[%s212_s25 + $0x6] sm:$0x3] }
  0x7d   : > { %2070 = vmatprep.subr.bf16.mxu1 %v2195_v1 }
  0x7e   : > { %2047 = vmatpush3.bf16.msra.mxu0 %v2170_v15  ;;  %v1519_v15 = vunpack.c.l.bf16 %v1515_v43 }
  0x7f   : > { %2048 = vmatprep.subr.bf16.mxu0 %v2195_v1 }
  0x80   : > { %2071 = vmatpush3.bf16.msra.mxu1 %v2175_v16  ;;  %v1520_v16 = vunpack.c.l.bf16 %v1516_v54 }
  0x81   : > { %2072 = vmatprep.subr.bf16.mxu1 %v2195_v1 }
  0x82   : > { %2049 = vmatpush3.bf16.msra.mxu0 %v2172_v17  ;;  %v1521_v17 = vunpack.c.l.bf16 %v1517_v57 }
  0x83   : > { %2050 = vmatprep.subr.bf16.mxu0 %v2195_v1 }
  0x84   : > { %2073 = vmatpush3.bf16.msra.mxu1 %v2177_v22  ;;  %v1522_v22 = vunpack.c.l.bf16 %v1518_v14 }
  0x86   : > { %2051 = vmatpush3.bf16.msra.mxu0 %v2174_v23 }
  0x87   : > { %2075 = vmatmul.mubr.bf16.vlgmr.msra.gmra.mrb[12].mxu1 %v2604_v50  ;;  %2052 = vmatprep.subr.bf16.mxu0 %v2195_v1 }
  0x8a   : > { %2053 = vmatpush3.bf16.msra.mxu0 %v2176_v24  ;;  %v1832_v24 = vld [vmem:[%s2762_s2] ss:$0 sm:$0xff] }
  0x8b   : > { %2078 = vmatprep.subr.bf16.mxu0 %v2195_v1 }
  0x8d   : > { %2055 = vmatmul.mubr.bf16.vlgmr.msra.gmra.mrb[12].mxu0 %v1151_v35 }
  0x8e   : > { %2079 = vmatpush3.bf16.msra.mxu0 %v2179_v25  ;;  %2094 = vmatprep.mubr.msk.bf16.mxu0 %vm2196_vm0, %v2195_v1 }
  0x8f   : > { %2080 = vmatprep.subr.bf16.mxu0 %v2195_v1 }
  0x92   : > { %2081 = vmatpush3.bf16.msra.mxu0 %v2180_v27  ;;  %v1527_v27 = vcombine.low %v1519_v15, %v1520_v16 }
  0x93   : > { %2082 = vmatprep.subr.bf16.mxu0 %v2195_v1 }
  0x96   : > { %2083 = vmatpush3.bf16.msra.mxu0 %v2181_v33 }
  0x97   : > { %2084 = vmatprep.subr.bf16.mxu0 %v2195_v1 }
  0x9a   : > { %2085 = vmatpush3.bf16.msra.mxu0 %v2182_v36 }
  0x9b   : > { %2086 = vmatprep.subr.bf16.mxu0 %v2195_v1 }
  0x9e   : > { %2087 = vmatpush3.bf16.msra.mxu0 %v2183_v41 }
  0x9f   : > { %2088 = vmatprep.subr.bf16.mxu0 %v2195_v1 }
  0xa2   : > { %2089 = vmatpush3.bf16.msra.mxu0 %v2184_v42 }
  0xa3   : > { %2090 = vmatprep.subr.bf16.mxu0 %v2195_v1 }
  0xa6   : > { %2091 = vmatpush3.bf16.msra.mxu0 %v2185_v44  ;;  %v1528_v44 = vcombine.low %v1521_v17, %v1522_v22 }
  0xa7   : > { %2092 = vmatprep.subr.bf16.mxu0 %v2195_v1 }
  0xaa   : > { %2093 = vmatpush3.bf16.msra.mxu0 %v2186_v28 }
  0xad   : > { %2095 = vmatmul.mubr.bf16.vlgmr.msra.gmra.mrb[16].mxu0 %v1413_v29 }
  0xfa   : > { %v564_v45 = vpop.f32.mrb[0].mxu1 }
  0xfb   : > { %v1956_v46 = vpop.f32.mrb[1].mxu1 }
  0xfc   : > { %v567_v34 = vpop.f32.mrb[2].mxu1 }
  0xfd   : > { %v1957_v35 = vpop.f32.mrb[3].mxu1 }
 0x100   : > { %v457_v47 = vpop.f32.mrb[0].mxu0 }
 0x101   : > { %v565_v48 = vadd.f32 %v564_v45, %v457_v47  ;;  %v1936_v51 = vpop.f32.mrb[1].mxu0 }
 0x102   : > { %v460_v52 = vpop.f32.mrb[2].mxu0 }
 0x103   : > { %v568_v53 = vadd.f32 %v567_v34, %v460_v52  ;;  %v1937_v55 = vpop.f32.mrb[3].mxu0 }
 0x11a   : > { %v838_v56 = vpop.f32.mrb[4].mxu1 }
 0x11b   : > { %v1996_v58 = vpop.f32.mrb[5].mxu1 }
 0x11c   : > { %v841_v59 = vpop.f32.mrb[6].mxu1 }
 0x11d   : > { %v1997_v60 = vpop.f32.mrb[7].mxu1 }
 0x120   : > { %v711_v1 = vpop.f32.mrb[4].mxu0 }
 0x121   : > { %v718_v3 = vadd.f32 %v711_v1, %v565_v48  ;;  %v1976_v61 = vpop.f32.mrb[5].mxu0 }
 0x122   : > { %v714_v63 = vpop.f32.mrb[6].mxu0 }
 0x123   : > { %v719_v21 = vadd.f32 %v714_v63, %v568_v53  ;;  %v845_v0 = vadd.f32 %v838_v56, %v718_v3  ;;  %v1977_v2 = vpop.f32.mrb[7].mxu0 }
 0x125   : > { %v846_v4 = vadd.f32 %v841_v59, %v719_v21 }
 0x13a   : > { %v1116_v5 = vpop.f32.mrb[8].mxu1 }
 0x13b   : > { %v2036_v6 = vpop.f32.mrb[9].mxu1 }
 0x13c   : > { %v1119_v7 = vpop.f32.mrb[10].mxu1 }
 0x13d   : > { %v2037_v8 = vpop.f32.mrb[11].mxu1 }
 0x140   : > { %v986_v62 = vpop.f32.mrb[8].mxu0 }
 0x141   : > { %v993_v29 = vadd.f32 %v986_v62, %v845_v0  ;;  %v2016_v50 = vpop.f32.mrb[9].mxu0 }
 0x142   : > { %v989_v37 = vpop.f32.mrb[10].mxu0 }
 0x143   : > { %v994_v9 = vadd.f32 %v989_v37, %v846_v4  ;;  %v1123_v30 = vadd.f32 %v1116_v5, %v993_v29  ;;  %v2017_v38 = vpop.f32.mrb[11].mxu0 }
 0x145   : > { %v1124_v49 = vadd.f32 %v1119_v7, %v994_v9 }
 0x15a   : > { %v1375_v18 = vpop.f32.mrb[12].mxu1 }
 0x15b   : > { %v2076_v19 = vpop.f32.mrb[13].mxu1 }
 0x15c   : > { %v1378_v20 = vpop.f32.mrb[14].mxu1 }
 0x15d   : > { %v2077_v31 = vpop.f32.mrb[15].mxu1 }
 0x160   : > { %v1235_v26 = vpop.f32.mrb[12].mxu0 }
 0x161   : > { %v1242_v32 = vadd.f32 %v1235_v26, %v1123_v30  ;;  %v2056_v39 = vpop.f32.mrb[13].mxu0 }
 0x162   : > { %v1238_v40 = vpop.f32.mrb[14].mxu0 }
 0x163   : > { %v1243_v10 = vadd.f32 %v1238_v40, %v1124_v49  ;;  %v1382_v11 = vadd.f32 %v1375_v18, %v1242_v32  ;;  %v2057_v12 = vpop.f32.mrb[15].mxu0 }
 0x165   : > { %v1383_v13 = vadd.f32 %v1378_v20, %v1243_v10 }
 0x180   : > { %v1497_v23 = vpop.f32.mrb[16].mxu0 }
 0x181   : > { %v1504_v25 = vadd.f32 %v1497_v23, %v1382_v11  ;;  %v2096_v33 = vpop.f32.mrb[17].mxu0 }
 0x182   : > { %v1500_v36 = vpop.f32.mrb[18].mxu0 }
 0x183   : > { %v1513_v41 = vadd.f32 %v1832_v24, %v1504_v25  ;;  %v1505_v42 = vadd.f32 %v1500_v36, %v1383_v13  ;;  %v2097_v28 = vpop.f32.mrb[19].mxu0 }
 0x185   : > { %v1531_v45 = vadd.f32 %v1527_v27, %v1513_v41  ;;  %v1514_v46 = vadd.f32 %v1832_v24, %v1505_v42 }
 0x187   : > { %v1533_v34 = vmax.f32 %v1531_v45, 0.0  ;;  %v1532_v35 = vadd.f32 %v1528_v44, %v1514_v46 }
 0x189   : > { %v1537_v47 = vcombine.high %v1533_v34, %v1533_v34  ;;  %v1541_v48 = vpack.c.bf16 %v1533_v34, %v1533_v34  ;;  %v1534_v51 = vmax.f32 %v1532_v35, 0.0 }
 0x18b   : > { %v1542_v52 = vpack.c.bf16 %v1537_v47, %v1537_v47  ;;  %1545 = vst [vmem:[%s217_s29] sm:$0x3] %v1541_v48  ;;  %v1538_v53 = vcombine.high %v1534_v51, %v1534_v51  ;;  %v1543_v55 = vpack.c.bf16 %v1534_v51, %v1534_v51 }
 0x18d   : > { %1546 = vst [vmem:[%s217_s29 + $0x2] sm:$0x3] %v1542_v52  ;;  %v1544_v56 = vpack.c.bf16 %v1538_v53, %v1538_v53  ;;  %1547 = vst [vmem:[%s217_s29 + $0x4] sm:$0x3] %v1543_v55 }
 0x18f   : > { %1548 = vst [vmem:[%s217_s29 + $0x6] sm:$0x3] %v1544_v56 }
 0x190 PF: > { %s14_s15 = sadd.s32 1, %s2193_s15  }
 0x191   : > { %p11_p4 = scmp.ge.s32.totalorder %s14_s15, 4  }
 0x193   :  { %13 = sbr.rel (!%p11_p4) target bundleno = 1 (0x1), region = 77 }

// kernel: resnet_forward.24
= control target key start
LH: loop header
LB: loop body
LE: loop exit
PB: predicated region body
PF: predicated region fallthrough
CT: control target
= control target key end

     0   :  { %s2138_s12 = smov 0   ;;  %s2672_s0 = inlined_call_operand.vmem [shape: bf16[2,6,6,128], index: 0, kind: input, shape index: {}]   ;;  %s2673_s1 = inlined_call_operand.vmem [shape: bf16[9,128,128], index: 1, kind: input, shape index: {}]   ;;  %s2674_s2 = inlined_call_operand.vmem [shape: f32[1,128], index: 2, kind: input, shape index: {}]   ;;  %s2675_s3 = inlined_call_operand.vmem [shape: bf16[2,4,4,128], index: 3, kind: output, shape index: {}]  }
   0x1 LB: > { %s1539_s13 = sadd.s32 4294967295, %s2113_s12   ;;  %p1543_p0 = scmp.ge.s32.totalorder %s2113_s12, 1  ;;  %s2113_s12 = sphi %s2138_s12, %s13_s12  }
   0x2   : > { %p137_p1 = scmp.lt.s32.totalorder %s2113_s12, 3 }
   0x4   : > { %p138_p2 = pnand %p1543_p0, %p137_p1 }
   0x5   : > { %v2030_v0 = vld [vmem:[%s2673_s1 + $0x40] sm:$0xff] (!%p138_p2)   ;;  %v2115_v1 = vmov (!%p138_p2), 0.0   ;;  %v2032_v3 = vld [vmem:[%s2673_s1 + $0x48] sm:$0xff] (!%p138_p2)   ;;  %vm2116_vm0 = vmmov (!%p138_p2), 0   ;;  %p161_p3 = scmp.lt.s32.totalorder (!%p138_p2), %s1539_s13, 1  ;;  %v2034_v5 = vld [vmem:[%s2673_s1 + $0x50] sm:$0xff] (!%p138_p2)   ;;  %v201_v10 = vlaneseq (!%p138_p2) }
   0x6   : > { %141 = sbr.rel (%p138_p2) target bundleno = 398 (0x18e), region = 32  ;;  %1838 = vmatprep.subr.bf16.mxu0 (!%p138_p2), %v2115_v1  ;;  %1858 = vmatprep.subr.bf16.mxu1 (!%p138_p2), %v2115_v1  ;;  %v2031_v2 = vld [vmem:[%s2673_s1] sm:$0xff] (!%p138_p2)   ;;  %v2033_v4 = vld [vmem:[%s2673_s1 + $0x8] sm:$0xff] (!%p138_p2)   ;;  %v2035_v6 = vld [vmem:[%s2673_s1 + $0x10] sm:$0xff] (!%p138_p2)   ;;  %v2117_v15 = vmov (!%p138_p2), 1983009808  }
   0x7   : > { %1839 = vmatpush3.bf16.msra.mxu0 (!%p138_p2), %v2030_v0  ;;  %1854 = vmatprep.mubr.msk.bf16.mxu0 (!%p138_p2), %vm2116_vm0, %v2115_v1  ;;  %v2036_v7 = vld [vmem:[%s2673_s1 + $0x58] sm:$0xff] (!%p138_p2)   ;;  %v2038_v9 = vld [vmem:[%s2673_s1 + $0x60] sm:$0xff] (!%p138_p2)   ;;  %v2040_v12 = vld [vmem:[%s2673_s1 + $0x68] sm:$0xff] (!%p138_p2)   ;;  %v199_v16 = vunpack.c.l.s4 (!%p138_p2), %v2117_v15  ;;  %v202_v17 = vshrl.u32 (!%p138_p2), %v201_v10, 7  ;;  %vm230_vm1 = vsmask.f32 (!%p138_p2), 1280 }
   0x8   : > { %1859 = vmatpush3.bf16.msra.mxu1 (!%p138_p2), %v2031_v2  ;;  %1840 = vmatprep.subr.bf16.mxu0 (!%p138_p2), %v2115_v1  ;;  %v2037_v8 = vld [vmem:[%s2673_s1 + $0x18] sm:$0xff] (!%p138_p2)   ;;  %v2039_v11 = vld [vmem:[%s2673_s1 + $0x20] sm:$0xff] (!%p138_p2)   ;;  %v2041_v13 = vld [vmem:[%s2673_s1 + $0x28] sm:$0xff] (!%p138_p2)   ;;  %vm231_vm2 = vsmask.f32 (!%p138_p2), 3336  ;;  %vm524_vm8 = vcmask (!%p138_p2), 1040384  }
   0x9   : > { %1860 = vmatprep.subr.bf16.mxu1 (!%p138_p2), %v2115_v1  ;;  %1874 = vmatprep.mubr.msk.bf16.mxu1 (!%p138_p2), %vm2116_vm0, %v2115_v1  ;;  %v200_v21 = vunpack.c.0.s8 (!%p138_p2), %v199_v16  ;;  %v2042_v22 = vld [vmem:[%s2673_s1 + $0x70] sm:$0xff] (!%p138_p2)   ;;  %vm233_vm3 = vsmask.f32 (!%p138_p2), 5392  ;;  %v2044_v27 = vld [vmem:[%s2673_s1 + $0x78] sm:$0xff] (!%p138_p2)   ;;  %vm235_vm4 = vsmask.f32 (!%p138_p2), 7448  ;;  %vm232_vm5 = vmor (!%p138_p2), %vm230_vm1, %vm231_vm2 }
   0xa   : > { %v2043_v23 = vld [vmem:[%s2673_s1 + $0x30] sm:$0xff] (!%p138_p2)   ;;  %v2045_v33 = vld [vmem:[%s2673_s1 + $0x38] sm:$0xff] (!%p138_p2)   ;;  %vm2292_vm6 = vmor (!%p138_p2), %vm232_vm5, %vm233_vm3  ;;  %vm525_vm9 = vcmask (!%p138_p2), 1042434   ;;  %vm527_vm11 = vcmask (!%p138_p2), 1044484   ;;  %vm529_vm12 = vcmask (!%p138_p2), 1046534  }
   0xb   : > { %1841 = vmatpush3.bf16.msra.mxu0 (!%p138_p2), %v2032_v3  ;;  %v2225_v26 = vsub.s32 (!%p138_p2), %v200_v21, %v202_v17  ;;  %vm2302_vm7 = vmor (!%p138_p2), %vm2292_vm6, %vm235_vm4  ;;  %v2077_v62 = vld [vmem:[%s2673_s1 + $0x168] sm:$0xff] (!%p138_p2)  }
   0xc   : > { %1861 = vmatpush3.bf16.msra.mxu1 (!%p138_p2), %v2033_v4  ;;  %1842 = vmatprep.subr.bf16.mxu0 (!%p138_p2), %v2115_v1  ;;  %vm526_vm10 = vmor (!%p138_p2), %vm524_vm8, %vm525_vm9 }
   0xd   : > { %s2683_s13 = smov (!%p161_p3, %s1539_s13), 1  ;;  %1862 = vmatprep.subr.bf16.mxu1 %v2115_v1  ;;  %vm528_vm13 = vmor %vm526_vm10, %vm527_vm11 }
   0xe   : > { %s2018_s30 = smul.u32 24, %s2683_s13  ;;  %vm2403_vm14 = vmor %vm528_vm13, %vm529_vm12  ;;  %s1756_s16 = sshll.u32 %s2683_s13, 3 }
   0xf   : > { %1843 = vmatpush3.bf16.msra.mxu0 %v2034_v5  ;;  %s170_s18 = scalar_lea.vmem %s2675_s3, %s1756_s16 }
  0x10   : > { %1863 = vmatpush3.bf16.msra.mxu1 %v2035_v6  ;;  %1844 = vmatprep.subr.bf16.mxu0 %v2115_v1  ;;  %s2195_s10 = scalar_lea.vmem %s2672_s0, %s2018_s30 }
  0x11   : > { %1864 = vmatprep.subr.bf16.mxu1 %v2115_v1  ;;  %v172_v14 = vld [vmem:[%s2195_s10] sm:$0x7]  ;;  %v2207_v18 = vld [vmem:[%s2195_s10 + $0x4] sm:$0x7]  ;;  %v2211_v19 = vld [vmem:[%s2195_s10 + $0x8] sm:$0x7] }
  0x12   : > { %v2214_v20 = vld [vmem:[%s2195_s10 + $0xc] sm:$0x7]  ;;  %v417_v24 = vcombine.low %v172_v14, %v2207_v18  ;;  %v2233_v28 = vld [vmem:[%s2195_s10 + $0x10] sm:$0x7]  ;;  %v2236_v29 = vrot.slane %v172_v14, %v2225_v26  ;;  %v2240_v30 = vrot.slane %v2207_v18, %v2225_v26  ;;  %v2244_v31 = vrot.slane %v2211_v19, %v2225_v26 }
  0x13   : > { %1845 = vmatpush3.bf16.msra.mxu0 %v2036_v7  ;;  %v418_v25 = vcombine.low %v2211_v19, %v2214_v20  ;;  %v2248_v32 = vrot.slane %v2214_v20, %v2225_v26  ;;  %v2255_v34 = vrot.slane %v2233_v28, %v2225_v26 }
  0x14   : > { %1865 = vmatpush3.bf16.msra.mxu1 %v2037_v8  ;;  %1846 = vmatprep.subr.bf16.mxu0 %v2115_v1  ;;  %v2258_v35 = vrot.slane %v417_v24, %v2225_v26  ;;  %v2265_v37 = vcombine.high %v2236_v29, %v2236_v29  ;;  %v2269_v38 = vcombine.high %v2240_v30, %v2240_v30  ;;  %v238_v41 = vshrl.u32 %v2236_v29, 16 }
  0x15   : > { %1866 = vmatprep.subr.bf16.mxu1 %v2115_v1  ;;  %v2261_v36 = vrot.slane %v418_v25, %v2225_v26  ;;  %v2273_v39 = vcombine.high %v2244_v31, %v2244_v31  ;;  %v2277_v40 = vcombine.high %v2248_v32, %v2248_v32  ;;  %v241_v42 = vshll.u32 %v2236_v29, 16 }
  0x16   : > { %v252_v43 = vshrl.u32 %v2240_v30, 16  ;;  %v255_v44 = vshll.u32 %v2240_v30, 16  ;;  %v247_v45 = vshll.u32 %v2265_v37, 16  ;;  %v261_v46 = vshll.u32 %v2269_v38, 16 }
  0x17   : > { %1847 = vmatpush3.bf16.msra.mxu0 %v2038_v9  ;;  %v266_v47 = vshrl.u32 %v2244_v31, 16  ;;  %v269_v48 = vshll.u32 %v2244_v31, 16  ;;  %v240_v50 = vrot.slane %v238_v41, 6  ;;  %v243_v51 = vrot.slane %v241_v42, 7 }
  0x18   : > { %1867 = vmatpush3.bf16.msra.mxu1 %v2039_v11  ;;  %1848 = vmatprep.subr.bf16.mxu0 %v2115_v1  ;;  %v254_v52 = vrot.slane %v252_v43, 6  ;;  %v257_v53 = vrot.slane %v255_v44, 7  ;;  %v249_v54 = vrot.slane %v247_v45, 7  ;;  %v263_v55 = vrot.slane %v261_v46, 7  ;;  %v2049_v11 = vld [vmem:[%s2673_s1 + $0xc0] sm:$0xff]   ;;  %v2051_v45 = vld [vmem:[%s2673_s1 + $0xc8] sm:$0xff]  }
  0x19   : > { %1868 = vmatprep.subr.bf16.mxu1 %v2115_v1  ;;  %v268_v56 = vrot.slane %v266_v47, 6  ;;  %v271_v57 = vrot.slane %v269_v48, 7  ;;  %v244_v58 = vor.u32 %v243_v51, %v240_v50  ;;  %v275_v60 = vshll.u32 %v2273_v39, 16  ;;  %v2048_v48 = vld [vmem:[%s2673_s1 + $0x80] sm:$0xff]  }
  0x1a   : > { %v258_v59 = vor.u32 %v257_v53, %v254_v52  ;;  %v280_v61 = vshrl.u32 %v2248_v32, 16  ;;  %v283_v0 = vshll.u32 %v2248_v32, 16  ;;  %v289_v2 = vshll.u32 %v2277_v40, 16  ;;  %v2053_v52 = vld [vmem:[%s2673_s1 + $0xd0] sm:$0xff]  }
  0x1b   : > { %1849 = vmatpush3.bf16.msra.mxu0 %v2040_v12  ;;  %v272_v63 = vor.u32 %v271_v57, %v268_v56  ;;  %v2310_v3 = vcombine.high %v2255_v34, %v2255_v34  ;;  %v245_v4 = vrot.slane %v244_v58, 2  ;;  %v277_v6 = vrot.slane %v275_v60, 7  ;;  %v2055_v56 = vld [vmem:[%s2673_s1 + $0xd8] sm:$0xff]   ;;  %v2052_v58 = vld [vmem:[%s2673_s1 + $0x90] sm:$0xff]  }
  0x1c   : > { %1869 = vmatpush3.bf16.msra.mxu1 %v2041_v13  ;;  %1850 = vmatprep.subr.bf16.mxu0 %v2115_v1  ;;  %v259_v5 = vrot.slane %v258_v59, 2  ;;  %v282_v7 = vrot.slane %v280_v61, 6  ;;  %v285_v9 = vrot.slane %v283_v0, 7  ;;  %v809_v10 = vshrl.u32 %v2255_v34, 16  ;;  %v2057_v59 = vld [vmem:[%s2673_s1 + $0xe0] sm:$0xff]   ;;  %v2054_v60 = vld [vmem:[%s2673_s1 + $0x98] sm:$0xff]  }
  0x1d   : > { %1870 = vmatprep.subr.bf16.mxu1 %v2115_v1  ;;  %v273_v8 = vrot.slane %v272_v63, 2  ;;  %v250_v12 = vsel %vm2302_vm7, %v245_v4, %v249_v54  ;;  %v812_v14 = vshll.u32 %v2255_v34, 16  ;;  %v818_v15 = vshll.u32 %v2310_v3, 16  ;;  %v2059_v61 = vld [vmem:[%s2673_s1 + $0xe8] sm:$0xff]   ;;  %v2061_v4 = vld [vmem:[%s2673_s1 + $0xf0] sm:$0xff]  }
  0x1e   : > { %v264_v13 = vsel %vm2302_vm7, %v259_v5, %v263_v55  ;;  %v286_v17 = vor.u32 %v285_v9, %v282_v7  ;;  %v291_v21 = vrot.slane %v289_v2, 7  ;;  %v2050_v55 = vld [vmem:[%s2673_s1 + $0x88] sm:$0xff]   ;;  %v1579_v63 = vrot.slane %v2236_v29, 9  ;;  %v2056_v2 = vld [vmem:[%s2673_s1 + $0xa0] sm:$0xff]  }
  0x1f   : > { %1851 = vmatpush3.bf16.msra.mxu0 %v2042_v22  ;;  %v278_v16 = vsel %vm2302_vm7, %v273_v8, %v277_v6  ;;  %v811_v22 = vrot.slane %v809_v10, 6  ;;  %v814_v24 = vrot.slane %v812_v14, 7  ;;  %v820_v41 = vrot.slane %v818_v15, 7  ;;  %v2067_v15 = vld [vmem:[%s2673_s1 + $0x140] sm:$0xff]  }
  0x20   : > { %1871 = vmatpush3.bf16.msra.mxu1 %v2043_v23  ;;  %1852 = vmatprep.subr.bf16.mxu0 %v2115_v1  ;;  %v310_v23 = vcombine.low %v250_v12, %v264_v13  ;;  %v839_v25 = vcombine.low %v264_v13, %v278_v16  ;;  %v533_v0 = vrot.slane %v2265_v37, 7  ;;  %v1580_v5 = vrot.slane %v2240_v30, 9 }
  0x21   : > { %1872 = vmatprep.subr.bf16.mxu1 %v2115_v1  ;;  %v815_v42 = vor.u32 %v814_v24, %v811_v22  ;;  %v537_v6 = vrot.slane %v2269_v38, 7  ;;  %v1581_v7 = vrot.slane %v2244_v31, 9  ;;  %v541_v8 = vrot.slane %v2273_v39, 7  ;;  %v2069_v22 = vld [vmem:[%s2673_s1 + $0x148] sm:$0xff]  }
  0x22   : > { %v2328_v43 = vrot.slane %v839_v25, %v2225_v26  ;;  %v691_v29 = vcombine.low %v2207_v18, %v2211_v19  ;;  %v692_v37 = vcombine.low %v2214_v20, %v2233_v28  ;;  %v1582_v30 = vrot.slane %v2248_v32, 9  ;;  %v2058_v18 = vld [vmem:[%s2673_s1 + $0xa8] sm:$0xff]   ;;  %v2063_v32 = vld [vmem:[%s2673_s1 + $0xf8] sm:$0xff]  }
  0x23   : > { %1853 = vmatpush3.bf16.msra.mxu0 %v2044_v27  ;;  %v433_v27 = vcombine.low %v2258_v35, %v2261_v36  ;;  %v318_v35 = vrot.slane %v310_v23, %v2225_v26  ;;  %v816_v47 = vrot.slane %v815_v42, 2  ;;  %v545_v38 = vrot.slane %v2277_v40, 7  ;;  %v177_v23 = vld [vmem:[%s2195_s10 + $0x14] sm:$0x7] }
  0x24   : > { %1873 = vmatpush3.bf16.msra.mxu1 %v2045_v33  ;;  %1878 = vmatprep.subr.bf16.mxu0 %v2115_v1  ;;  %v287_v33 = vrot.slane %v286_v17, 2  ;;  %v534_v19 = vsel %vm2403_vm14, %v1579_v63, %v533_v0  ;;  %v699_v20 = vrot.slane %v691_v29, %v2225_v26  ;;  %v706_v31 = vrot.slane %v692_v37, %v2225_v26  ;;  %v2071_v42 = vld [vmem:[%s2673_s1 + $0x150] sm:$0xff]   ;;  %v2075_v0 = vld [vmem:[%s2673_s1 + $0x160] sm:$0xff]  }
  0x25   : > { %1898 = vmatprep.subr.bf16.mxu1 %v2115_v1  ;;  %v2347_v50 = vsel %vm2302_vm7, %v816_v47, %v820_v41  ;;  %v2423_v39 = vsel %vm2403_vm14, %v1580_v5, %v537_v6  ;;  %v2427_v40 = vsel %vm2403_vm14, %v1581_v7, %v541_v8  ;;  %v2431_v10 = vsel %vm2403_vm14, %v1582_v30, %v545_v38  ;;  %v2064_v41 = vld [vmem:[%s2673_s1 + $0x100] sm:$0xff]   ;;  %v2070_v63 = vld [vmem:[%s2673_s1 + $0x110] sm:$0xff]   ;;  %v2072_v8 = vld [vmem:[%s2673_s1 + $0x118] sm:$0xff]  }
  0x26   : > { %v292_v44 = vsel %vm2302_vm7, %v287_v33, %v291_v21  ;;  %v564_v12 = vcombine.low %v534_v19, %v2423_v39  ;;  %v565_v13 = vcombine.low %v2427_v40, %v2431_v10  ;;  %v707_v14 = vcombine.low %v699_v20, %v706_v31  ;;  %v2074_v30 = vld [vmem:[%s2673_s1 + $0x120] sm:$0xff]   ;;  %v2079_v38 = vld [vmem:[%s2673_s1 + $0x170] sm:$0xff]   ;;  %v2076_v19 = vld [vmem:[%s2673_s1 + $0x128] sm:$0xff]  }
  0x27   : > { %1875 = vmatmul.mubr.bf16.vlgmr.msra.gmra.mrb[0].mxu1 %v433_v27  ;;  %v311_v46 = vcombine.low %v278_v16, %v292_v44  ;;  %v840_v51 = vcombine.low %v292_v44, %v2347_v50  ;;  %v2062_v16 = vld [vmem:[%s2673_s1 + $0xb8] sm:$0xff]   ;;  %v1096_v24 = vcombine.low %v2233_v28, %v177_v23  ;;  %v1203_v25 = vrot.slane %v177_v23, %v2225_v26  ;;  %v2094_v23 = vld [vmem:[%s2673_s1 + $0x1b0] sm:$0xff]  }
  0x28   : > { %1899 = vmatpush3.bf16.msra.mxu1 %v2049_v11  ;;  %1914 = vmatprep.mubr.msk.bf16.mxu1 %vm2116_vm0, %v2115_v1  ;;  %v2060_v11 = vld [vmem:[%s2673_s1 + $0xb0] sm:$0xff]   ;;  %v572_v17 = vrot.slane %v564_v12, %v2225_v26  ;;  %v2451_v21 = vrot.slane %v565_v13, %v2225_v26  ;;  %v1655_v33 = vrot.slane %v2255_v34, 9  ;;  %v2068_v34 = vld [vmem:[%s2673_s1 + $0x108] sm:$0xff]   ;;  %v969_v37 = vcombine.low %v2423_v39, %v2427_v40  ;;  %v2081_v20 = vld [vmem:[%s2673_s1 + $0x178] sm:$0xff]  }
  0x29   : > { %1900 = vmatprep.subr.bf16.mxu1 %v2115_v1  ;;  %v2343_v49 = vrot.slane %v311_v46, %v2225_v26  ;;  %v2356_v54 = vrot.slane %v840_v51, %v2225_v26  ;;  %v2472_v44 = vrot.slane %v1096_v24, %v2225_v26  ;;  %v1204_v28 = vcombine.high %v1203_v25, %v1203_v25  ;;  %v2080_v39 = vld [vmem:[%s2673_s1 + $0x138] sm:$0xff]   ;;  %v2085_v40 = vld [vmem:[%s2673_s1 + $0x1c8] sm:$0xff]  }
  0x2a   : > { %v580_v27 = vcombine.low %v572_v17, %v2451_v21  ;;  %v1209_v46 = vshll.u32 %v1203_v25, 16  ;;  %v2084_v12 = vld [vmem:[%s2673_s1 + $0x188] sm:$0xff]   ;;  %v2089_v13 = vld [vmem:[%s2673_s1 + $0x1d8] sm:$0xff]  }
  0x2b   : > { %v326_v53 = vcombine.low %v318_v35, %v2343_v49  ;;  %v855_v57 = vcombine.low %v2328_v43, %v2356_v54  ;;  %v1104_v35 = vcombine.low %v2261_v36, %v2472_v44  ;;  %v1215_v51 = vshll.u32 %v1204_v28, 16  ;;  %v2086_v43 = vld [vmem:[%s2673_s1 + $0x190] sm:$0xff]   ;;  %v2091_v54 = vld [vmem:[%s2673_s1 + $0x1e0] sm:$0xff]   ;;  %v2092_v17 = vld [vmem:[%s2673_s1 + $0x1a8] sm:$0xff]  }
  0x2c   : > { %1901 = vmatpush3.bf16.msra.mxu1 %v2051_v45  ;;  %v1206_v45 = vshrl.u32 %v1203_v25, 16  ;;  %v2096_v24 = vld [vmem:[%s2673_s1 + $0x1b8] sm:$0xff]   ;;  %v2105_v44 = vld [vmem:[%s2673_s1 + $0x230] sm:$0xff]  }
  0x2d   : > { %1902 = vmatprep.subr.bf16.mxu1 %v2115_v1  ;;  %1855 = vmatmul.mubr.bf16.vlgmr.msra.gmra.mrb[0].mxu0 %v326_v53  ;;  %v1728_v53 = vrot.slane %v1203_v25, 9  ;;  %v2099_v25 = vld [vmem:[%s2673_s1 + $0x200] sm:$0xff]   ;;  %v2102_v36 = vld [vmem:[%s2673_s1 + $0x218] sm:$0xff]  }
  0x2e   : > { %1879 = vmatpush3.bf16.msra.mxu0 %v2048_v48  ;;  %1894 = vmatprep.mubr.msk.bf16.mxu0 %vm2116_vm0, %v2115_v1  ;;  %v1208_v47 = vrot.slane %v1206_v45, 6  ;;  %v1211_v48 = vrot.slane %v1209_v46, 7 }
  0x2f   : > { %1880 = vmatprep.subr.bf16.mxu0 %v2115_v1 }
  0x30   : > { %1903 = vmatpush3.bf16.msra.mxu1 %v2053_v52  ;;  %v950_v52 = vrot.slane %v2310_v3, 7 }
  0x31   : > { %1904 = vmatprep.subr.bf16.mxu1 %v2115_v1 }
  0x32   : > { %1881 = vmatpush3.bf16.msra.mxu0 %v2050_v55  ;;  %v2073_v55 = vld [vmem:[%s2673_s1 + $0x158] sm:$0xff]   ;;  %v951_v3 = vsel %vm2403_vm14, %v1655_v33, %v950_v52  ;;  %v2101_v33 = vld [vmem:[%s2673_s1 + $0x210] sm:$0xff]  }
  0x33   : > { %1882 = vmatprep.subr.bf16.mxu0 %v2115_v1  ;;  %v970_v9 = vcombine.low %v2431_v10, %v951_v3  ;;  %v2082_v10 = vld [vmem:[%s2673_s1 + $0x180] sm:$0xff]  }
  0x34   : > { %1905 = vmatpush3.bf16.msra.mxu1 %v2055_v56  ;;  %v1212_v56 = vor.u32 %v1211_v48, %v1208_v47 }
  0x35   : > { %1906 = vmatprep.subr.bf16.mxu1 %v2115_v1 }
  0x36   : > { %1883 = vmatpush3.bf16.msra.mxu0 %v2052_v58  ;;  %v1217_v58 = vrot.slane %v1215_v51, 7 }
  0x37   : > { %1884 = vmatprep.subr.bf16.mxu0 %v2115_v1 }
  0x38   : > { %1907 = vmatpush3.bf16.msra.mxu1 %v2057_v59  ;;  %v1339_v59 = vrot.slane %v1204_v28, 7  ;;  %v2106_v28 = vld [vmem:[%s2673_s1 + $0x238] sm:$0xff]  }
  0x39   : > { %1908 = vmatprep.subr.bf16.mxu1 %v2115_v1 }
  0x3a   : > { %1885 = vmatpush3.bf16.msra.mxu0 %v2054_v60  ;;  %v1213_v60 = vrot.slane %v1212_v56, 2 }
  0x3b   : > { %1886 = vmatprep.subr.bf16.mxu0 %v2115_v1 }
  0x3c   : > { %1909 = vmatpush3.bf16.msra.mxu1 %v2059_v61  ;;  %v1340_v61 = vsel %vm2403_vm14, %v1728_v53, %v1339_v59 }
  0x3d   : > { %1910 = vmatprep.subr.bf16.mxu1 %v2115_v1 }
  0x3e   : > { %1887 = vmatpush3.bf16.msra.mxu0 %v2056_v2  ;;  %v1218_v2 = vsel %vm2302_vm7, %v1213_v60, %v1217_v58 }
  0x3f   : > { %1888 = vmatprep.subr.bf16.mxu0 %v2115_v1  ;;  %v1236_v5 = vcombine.low %v2347_v50, %v1218_v2 }
  0x40   : > { %1911 = vmatpush3.bf16.msra.mxu1 %v2061_v4  ;;  %v1358_v4 = vcombine.low %v951_v3, %v1340_v61 }
  0x41   : > { %1912 = vmatprep.subr.bf16.mxu1 %v2115_v1  ;;  %v1243_v7 = vrot.slane %v1236_v5, %v2225_v26 }
  0x42   : > { %1889 = vmatpush3.bf16.msra.mxu0 %v2058_v18  ;;  %v2505_v6 = vrot.slane %v1358_v4, %v2225_v26  ;;  %v984_v18 = vrot.slane %v970_v9, %v2225_v26 }
  0x43   : > { %1890 = vmatprep.subr.bf16.mxu0 %v2115_v1  ;;  %v2519_v50 = vcombine.low %v2343_v49, %v1243_v7  ;;  %v977_v49 = vrot.slane %v969_v37, %v2225_v26  ;;  %v2078_v26 = vld [vmem:[%s2673_s1 + $0x130] sm:$0xff]  }
  0x44   : > { %1913 = vmatpush3.bf16.msra.mxu1 %v2063_v32  ;;  %v1366_v29 = vcombine.low %v2451_v21, %v2505_v6  ;;  %v2083_v32 = vld [vmem:[%s2673_s1 + $0x1c0] sm:$0xff]  }
  0x45   : > { %1938 = vmatprep.subr.bf16.mxu1 %v2115_v1  ;;  %v985_v31 = vcombine.low %v977_v49, %v984_v18 }
  0x46   : > { %1891 = vmatpush3.bf16.msra.mxu0 %v2060_v11  ;;  %v2087_v11 = vld [vmem:[%s2673_s1 + $0x1d0] sm:$0xff]  }
  0x47   : > { %1915 = vmatmul.mubr.bf16.vlgmr.msra.gmra.mrb[4].mxu1 %v707_v14  ;;  %1892 = vmatprep.subr.bf16.mxu0 %v2115_v1  ;;  %v2093_v14 = vld [vmem:[%s2673_s1 + $0x1e8] sm:$0xff]  }
  0x48   : > { %1939 = vmatpush3.bf16.msra.mxu1 %v2067_v15  ;;  %1954 = vmatprep.mubr.msk.bf16.mxu1 %vm2116_vm0, %v2115_v1  ;;  %v2090_v15 = vld [vmem:[%s2673_s1 + $0x1a0] sm:$0xff]  }
  0x49   : > { %1940 = vmatprep.subr.bf16.mxu1 %v2115_v1 }
  0x4a   : > { %1893 = vmatpush3.bf16.msra.mxu0 %v2062_v16  ;;  %v2095_v16 = vld [vmem:[%s2673_s1 + $0x1f0] sm:$0xff]  }
  0x4b   : > { %1918 = vmatprep.subr.bf16.mxu0 %v2115_v1 }
  0x4c   : > { %1941 = vmatpush3.bf16.msra.mxu1 %v2069_v22  ;;  %v2097_v22 = vld [vmem:[%s2673_s1 + $0x1f8] sm:$0xff]  }
  0x4d   : > { %1942 = vmatprep.subr.bf16.mxu1 %v2115_v1  ;;  %1895 = vmatmul.mubr.bf16.vlgmr.msra.gmra.mrb[4].mxu0 %v580_v27  ;;  %v2100_v27 = vld [vmem:[%s2673_s1 + $0x208] sm:$0xff]  }
  0x4e   : > { %1919 = vmatpush3.bf16.msra.mxu0 %v2064_v41  ;;  %1934 = vmatprep.mubr.msk.bf16.mxu0 %vm2116_vm0, %v2115_v1  ;;  %v2103_v41 = vld [vmem:[%s2673_s1 + $0x220] sm:$0xff]  }
  0x4f   : > { %1920 = vmatprep.subr.bf16.mxu0 %v2115_v1 }
  0x50   : > { %1943 = vmatpush3.bf16.msra.mxu1 %v2071_v42  ;;  %v2104_v42 = vld [vmem:[%s2673_s1 + $0x228] sm:$0xff]  }
  0x51   : > { %1944 = vmatprep.subr.bf16.mxu1 %v2115_v1 }
  0x52   : > { %1921 = vmatpush3.bf16.msra.mxu0 %v2068_v34 }
  0x53   : > { %1922 = vmatprep.subr.bf16.mxu0 %v2115_v1 }
  0x54   : > { %1945 = vmatpush3.bf16.msra.mxu1 %v2073_v55 }
  0x55   : > { %1946 = vmatprep.subr.bf16.mxu1 %v2115_v1 }
  0x56   : > { %1923 = vmatpush3.bf16.msra.mxu0 %v2070_v63 }
  0x57   : > { %1924 = vmatprep.subr.bf16.mxu0 %v2115_v1 }
  0x58   : > { %1947 = vmatpush3.bf16.msra.mxu1 %v2075_v0 }
  0x59   : > { %1948 = vmatprep.subr.bf16.mxu1 %v2115_v1 }
  0x5a   : > { %1925 = vmatpush3.bf16.msra.mxu0 %v2072_v8 }
  0x5b   : > { %1926 = vmatprep.subr.bf16.mxu0 %v2115_v1 }
  0x5c   : > { %1949 = vmatpush3.bf16.msra.mxu1 %v2077_v62 }
  0x5d   : > { %1950 = vmatprep.subr.bf16.mxu1 %v2115_v1 }
  0x5e   : > { %1927 = vmatpush3.bf16.msra.mxu0 %v2074_v30 }
  0x5f   : > { %1928 = vmatprep.subr.bf16.mxu0 %v2115_v1 }
  0x60   : > { %1951 = vmatpush3.bf16.msra.mxu1 %v2079_v38 }
  0x61   : > { %1952 = vmatprep.subr.bf16.mxu1 %v2115_v1 }
  0x62   : > { %1929 = vmatpush3.bf16.msra.mxu0 %v2076_v19 }
  0x63   : > { %1930 = vmatprep.subr.bf16.mxu0 %v2115_v1 }
  0x64   : > { %1953 = vmatpush3.bf16.msra.mxu1 %v2081_v20 }
  0x65   : > { %1978 = vmatprep.subr.bf16.mxu1 %v2115_v1 }
  0x66   : > { %1931 = vmatpush3.bf16.msra.mxu0 %v2078_v26 }
  0x67   : > { %1955 = vmatmul.mubr.bf16.vlgmr.msra.gmra.mrb[8].mxu1 %v985_v31  ;;  %1932 = vmatprep.subr.bf16.mxu0 %v2115_v1 }
  0x68   : > { %1979 = vmatpush3.bf16.msra.mxu1 %v2083_v32  ;;  %1994 = vmatprep.mubr.msk.bf16.mxu1 %vm2116_vm0, %v2115_v1 }
  0x69   : > { %1980 = vmatprep.subr.bf16.mxu1 %v2115_v1 }
  0x6a   : > { %1933 = vmatpush3.bf16.msra.mxu0 %v2080_v39 }
  0x6b   : > { %1958 = vmatprep.subr.bf16.mxu0 %v2115_v1 }
  0x6c   : > { %1981 = vmatpush3.bf16.msra.mxu1 %v2085_v40 }
  0x6d   : > { %1982 = vmatprep.subr.bf16.mxu1 %v2115_v1  ;;  %1935 = vmatmul.mubr.bf16.vlgmr.msra.gmra.mrb[8].mxu0 %v855_v57  ;;  %v2088_v57 = vld [vmem:[%s2673_s1 + $0x198] sm:$0xff]  }
  0x6e   : > { %1959 = vmatpush3.bf16.msra.mxu0 %v2082_v10  ;;  %1974 = vmatprep.mubr.msk.bf16.mxu0 %vm2116_vm0, %v2115_v1 }
  0x6f   : > { %1960 = vmatprep.subr.bf16.mxu0 %v2115_v1 }
  0x70   : > { %1983 = vmatpush3.bf16.msra.mxu1 %v2087_v11 }
  0x71   : > { %1984 = vmatprep.subr.bf16.mxu1 %v2115_v1 }
  0x72   : > { %1961 = vmatpush3.bf16.msra.mxu0 %v2084_v12 }
  0x73   : > { %1962 = vmatprep.subr.bf16.mxu0 %v2115_v1 }
  0x74   : > { %1985 = vmatpush3.bf16.msra.mxu1 %v2089_v13 }
  0x75   : > { %1986 = vmatprep.subr.bf16.mxu1 %v2115_v1 }
  0x76   : > { %1963 = vmatpush3.bf16.msra.mxu0 %v2086_v43 }
  0x77   : > { %1964 = vmatprep.subr.bf16.mxu0 %v2115_v1 }
  0x78   : > { %1987 = vmatpush3.bf16.msra.mxu1 %v2091_v54  ;;  %v1753_v54 = vld [vmem:[%s2674_s2] ss:$0 sm:$0xff] }
  0x79   : > { %1988 = vmatprep.subr.bf16.mxu1 %v2115_v1 }
  0x7a   : > { %1965 = vmatpush3.bf16.msra.mxu0 %v2088_v57 }
  0x7b   : > { %1966 = vmatprep.subr.bf16.mxu0 %v2115_v1 }
  0x7c   : > { %1989 = vmatpush3.bf16.msra.mxu1 %v2093_v14 }
  0x7d   : > { %1990 = vmatprep.subr.bf16.mxu1 %v2115_v1 }
  0x7e   : > { %1967 = vmatpush3.bf16.msra.mxu0 %v2090_v15 }
  0x7f   : > { %1968 = vmatprep.subr.bf16.mxu0 %v2115_v1 }
  0x80   : > { %1991 = vmatpush3.bf16.msra.mxu1 %v2095_v16 }
  0x81   : > { %1992 = vmatprep.subr.bf16.mxu1 %v2115_v1 }
  0x82   : > { %1969 = vmatpush3.bf16.msra.mxu0 %v2092_v17 }
  0x83   : > { %1970 = vmatprep.subr.bf16.mxu0 %v2115_v1 }
  0x84   : > { %1993 = vmatpush3.bf16.msra.mxu1 %v2097_v22 }
  0x86   : > { %1971 = vmatpush3.bf16.msra.mxu0 %v2094_v23 }
  0x87   : > { %1995 = vmatmul.mubr.bf16.vlgmr.msra.gmra.mrb[12].mxu1 %v2519_v50  ;;  %1972 = vmatprep.subr.bf16.mxu0 %v2115_v1 }
  0x8a   : > { %1973 = vmatpush3.bf16.msra.mxu0 %v2096_v24 }
  0x8b   : > { %1998 = vmatprep.subr.bf16.mxu0 %v2115_v1 }
  0x8d   : > { %1975 = vmatmul.mubr.bf16.vlgmr.msra.gmra.mrb[12].mxu0 %v1104_v35 }
  0x8e   : > { %1999 = vmatpush3.bf16.msra.mxu0 %v2099_v25  ;;  %2014 = vmatprep.mubr.msk.bf16.mxu0 %vm2116_vm0, %v2115_v1 }
  0x8f   : > { %2000 = vmatprep.subr.bf16.mxu0 %v2115_v1 }
  0x92   : > { %2001 = vmatpush3.bf16.msra.mxu0 %v2100_v27 }
  0x93   : > { %2002 = vmatprep.subr.bf16.mxu0 %v2115_v1 }
  0x96   : > { %2003 = vmatpush3.bf16.msra.mxu0 %v2101_v33 }
  0x97   : > { %2004 = vmatprep.subr.bf16.mxu0 %v2115_v1 }
  0x9a   : > { %2005 = vmatpush3.bf16.msra.mxu0 %v2102_v36 }
  0x9b   : > { %2006 = vmatprep.subr.bf16.mxu0 %v2115_v1 }
  0x9e   : > { %2007 = vmatpush3.bf16.msra.mxu0 %v2103_v41 }
  0x9f   : > { %2008 = vmatprep.subr.bf16.mxu0 %v2115_v1 }
  0xa2   : > { %2009 = vmatpush3.bf16.msra.mxu0 %v2104_v42 }
  0xa3   : > { %2010 = vmatprep.subr.bf16.mxu0 %v2115_v1 }
  0xa6   : > { %2011 = vmatpush3.bf16.msra.mxu0 %v2105_v44 }
  0xa7   : > { %2012 = vmatprep.subr.bf16.mxu0 %v2115_v1 }
  0xaa   : > { %2013 = vmatpush3.bf16.msra.mxu0 %v2106_v28 }
  0xad   : > { %2015 = vmatmul.mubr.bf16.vlgmr.msra.gmra.mrb[16].mxu0 %v1366_v29 }
  0xfa   : > { %v517_v45 = vpop.f32.mrb[0].mxu1 }
  0xfb   : > { %v1876_v46 = vpop.f32.mrb[1].mxu1 }
  0xfc   : > { %v520_v34 = vpop.f32.mrb[2].mxu1 }
  0xfd   : > { %v1877_v35 = vpop.f32.mrb[3].mxu1 }
 0x100   : > { %v410_v47 = vpop.f32.mrb[0].mxu0 }
 0x101   : > { %v518_v48 = vadd.f32 %v517_v45, %v410_v47  ;;  %v1856_v51 = vpop.f32.mrb[1].mxu0 }
 0x102   : > { %v413_v52 = vpop.f32.mrb[2].mxu0 }
 0x103   : > { %v521_v53 = vadd.f32 %v520_v34, %v413_v52  ;;  %v1857_v55 = vpop.f32.mrb[3].mxu0 }
 0x11a   : > { %v791_v56 = vpop.f32.mrb[4].mxu1 }
 0x11b   : > { %v1916_v58 = vpop.f32.mrb[5].mxu1 }
 0x11c   : > { %v794_v59 = vpop.f32.mrb[6].mxu1 }
 0x11d   : > { %v1917_v60 = vpop.f32.mrb[7].mxu1 }
 0x120   : > { %v664_v1 = vpop.f32.mrb[4].mxu0 }
 0x121   : > { %v671_v3 = vadd.f32 %v664_v1, %v518_v48  ;;  %v1896_v61 = vpop.f32.mrb[5].mxu0 }
 0x122   : > { %v667_v63 = vpop.f32.mrb[6].mxu0 }
 0x123   : > { %v672_v21 = vadd.f32 %v667_v63, %v521_v53  ;;  %v798_v0 = vadd.f32 %v791_v56, %v671_v3  ;;  %v1897_v2 = vpop.f32.mrb[7].mxu0 }
 0x125   : > { %v799_v4 = vadd.f32 %v794_v59, %v672_v21 }
 0x13a   : > { %v1069_v5 = vpop.f32.mrb[8].mxu1 }
 0x13b   : > { %v1956_v6 = vpop.f32.mrb[9].mxu1 }
 0x13c   : > { %v1072_v7 = vpop.f32.mrb[10].mxu1 }
 0x13d   : > { %v1957_v8 = vpop.f32.mrb[11].mxu1 }
 0x140   : > { %v939_v62 = vpop.f32.mrb[8].mxu0 }
 0x141   : > { %v946_v29 = vadd.f32 %v939_v62, %v798_v0  ;;  %v1936_v50 = vpop.f32.mrb[9].mxu0 }
 0x142   : > { %v942_v37 = vpop.f32.mrb[10].mxu0 }
 0x143   : > { %v947_v9 = vadd.f32 %v942_v37, %v799_v4  ;;  %v1076_v30 = vadd.f32 %v1069_v5, %v946_v29  ;;  %v1937_v38 = vpop.f32.mrb[11].mxu0 }
 0x145   : > { %v1077_v49 = vadd.f32 %v1072_v7, %v947_v9 }
 0x15a   : > { %v1328_v18 = vpop.f32.mrb[12].mxu1 }
 0x15b   : > { %v1996_v19 = vpop.f32.mrb[13].mxu1 }
 0x15c   : > { %v1331_v20 = vpop.f32.mrb[14].mxu1 }
 0x15d   : > { %v1997_v31 = vpop.f32.mrb[15].mxu1 }
 0x160   : > { %v1188_v26 = vpop.f32.mrb[12].mxu0 }
 0x161   : > { %v1195_v32 = vadd.f32 %v1188_v26, %v1076_v30  ;;  %v1976_v39 = vpop.f32.mrb[13].mxu0 }
 0x162   : > { %v1191_v40 = vpop.f32.mrb[14].mxu0 }
 0x163   : > { %v1196_v10 = vadd.f32 %v1191_v40, %v1077_v49  ;;  %v1335_v11 = vadd.f32 %v1328_v18, %v1195_v32  ;;  %v1977_v12 = vpop.f32.mrb[15].mxu0 }
 0x165   : > { %v1336_v13 = vadd.f32 %v1331_v20, %v1196_v10 }
 0x180   : > { %v1450_v43 = vpop.f32.mrb[16].mxu0 }
 0x181   : > { %v1457_v57 = vadd.f32 %v1450_v43, %v1335_v11  ;;  %v2016_v14 = vpop.f32.mrb[17].mxu0 }
 0x182   : > { %v1453_v15 = vpop.f32.mrb[18].mxu0 }
 0x183   : > { %v1466_v16 = vadd.f32 %v1753_v54, %v1457_v57  ;;  %v1458_v17 = vadd.f32 %v1453_v15, %v1336_v13  ;;  %v2017_v22 = vpop.f32.mrb[19].mxu0 }
 0x185   : > { %v1468_v23 = vmax.f32 %v1466_v16, 0.0  ;;  %v1467_v24 = vadd.f32 %v1753_v54, %v1458_v17 }
 0x187   : > { %v1472_v25 = vcombine.high %v1468_v23, %v1468_v23  ;;  %v1476_v27 = vpack.c.bf16 %v1468_v23, %v1468_v23  ;;  %v1469_v33 = vmax.f32 %v1467_v24, 0.0 }
 0x189   : > { %v1477_v36 = vpack.c.bf16 %v1472_v25, %v1472_v25  ;;  %1480 = vst [vmem:[%s170_s18] sm:$0x3] %v1476_v27  ;;  %v1473_v41 = vcombine.high %v1469_v33, %v1469_v33  ;;  %v1478_v42 = vpack.c.bf16 %v1469_v33, %v1469_v33 }
 0x18b   : > { %1481 = vst [vmem:[%s170_s18 + $0x2] sm:$0x3] %v1477_v36  ;;  %v1479_v44 = vpack.c.bf16 %v1473_v41, %v1473_v41  ;;  %1482 = vst [vmem:[%s170_s18 + $0x4] sm:$0x3] %v1478_v42 }
 0x18d   : > { %1483 = vst [vmem:[%s170_s18 + $0x6] sm:$0x3] %v1479_v44 }
 0x18e PF: > { %s13_s12 = sadd.s32 1, %s2113_s12  }
 0x18f   : > { %p10_p4 = scmp.ge.s32.totalorder %s13_s12, 4  }
 0x191   :  { %12 = sbr.rel (!%p10_p4) target bundleno = 1 (0x1), region = 70 }

// kernel: resnet_forward.26
= control target key start
LH: loop header
LB: loop body
LE: loop exit
PB: predicated region body
PF: predicated region fallthrough
CT: control target
= control target key end

     0   :  { %s3957_s1 = inlined_call_operand.vmem [shape: bf16[1152,512], index: 1, kind: input, shape index: {}]   ;;  %s3958_s0 = inlined_call_operand.vmem [shape: bf16[8,1152], index: 0, kind: input, shape index: {}]   ;;  %s3959_s2 = inlined_call_operand.vmem [shape: f32[1,512], index: 2, kind: input, shape index: {}]   ;;  %s3960_s3 = inlined_call_operand.vmem [shape: bf16[8,512], index: 3, kind: output, shape index: {}]  }
   0x1   :  { %v2589_v0 = vld [vmem:[%s3957_s1 + $0x4] ss:$16 sps:$4 sm:$0xff]   ;;  %v2591_v1 = vld [vmem:[%s3957_s1 + $0xc] ss:$16 sps:$4 sm:$0xff]   ;;  %v2593_v2 = vld [vmem:[%s3957_s1] ss:$16 sps:$4 sm:$0xff]  }
   0x2   :  { %1802 = vmatprep.subr.bf16.mxu0 %v2589_v0  ;;  %v2594_v3 = vld [vmem:[%s3957_s1 + $0x8] ss:$16 sps:$4 sm:$0xff]   ;;  %2007 = vmatprep.subr.bf16.mxu1 %v2591_v1  ;;  %v2595_v4 = vld [vmem:[%s3957_s1 + $0x24] ss:$16 sps:$4 sm:$0xff]   ;;  %v2597_v5 = vld [vmem:[%s3957_s1 + $0x2c] ss:$16 sps:$4 sm:$0xff]  }
   0x3   :  { %1803 = vmatpush1.bf16.msra.mxu0 %v2593_v2  ;;  %2008 = vmatpush1.bf16.msra.mxu1 %v2594_v3  ;;  %v2599_v6 = vld [vmem:[%s3957_s1 + $0x20] ss:$16 sps:$4 sm:$0xff]   ;;  %v2600_v7 = vld [vmem:[%s3957_s1 + $0x28] ss:$16 sps:$4 sm:$0xff]   ;;  %v2601_v8 = vld [vmem:[%s3957_s1 + $0x44] ss:$16 sps:$4 sm:$0xff]  }
   0x4   :  { %1804 = vmatprep.subr.bf16.mxu0 %v2595_v4  ;;  %2009 = vmatprep.subr.bf16.mxu1 %v2597_v5  ;;  %v2603_v9 = vld [vmem:[%s3957_s1 + $0x4c] ss:$16 sps:$4 sm:$0xff]   ;;  %v2605_v10 = vld [vmem:[%s3957_s1 + $0x40] ss:$16 sps:$4 sm:$0xff]   ;;  %v2606_v11 = vld [vmem:[%s3957_s1 + $0x48] ss:$16 sps:$4 sm:$0xff]  }
   0x5   :  { %v2607_v12 = vld [vmem:[%s3957_s1 + $0x64] ss:$16 sps:$4 sm:$0xff]   ;;  %v2609_v13 = vld [vmem:[%s3957_s1 + $0x6c] ss:$16 sps:$4 sm:$0xff]   ;;  %v2611_v14 = vld [vmem:[%s3957_s1 + $0x60] ss:$16 sps:$4 sm:$0xff]  }
   0x6   :  { %v2612_v15 = vld [vmem:[%s3957_s1 + $0x68] ss:$16 sps:$4 sm:$0xff]   ;;  %v2613_v16 = vld [vmem:[%s3957_s1 + $0x84] ss:$16 sps:$4 sm:$0xff]   ;;  %v2615_v17 = vld [vmem:[%s3957_s1 + $0x8c] ss:$16 sps:$4 sm:$0xff]  }
   0x7   :  { %1805 = vmatpush1.bf16.msra.mxu0 %v2599_v6  ;;  %2010 = vmatpush1.bf16.msra.mxu1 %v2600_v7  ;;  %v2617_v18 = vld [vmem:[%s3957_s1 + $0x80] ss:$16 sps:$4 sm:$0xff]   ;;  %v2618_v19 = vld [vmem:[%s3957_s1 + $0x88] ss:$16 sps:$4 sm:$0xff]   ;;  %v2619_v20 = vld [vmem:[%s3957_s1 + $0xa4] ss:$16 sps:$4 sm:$0xff]  }
   0x8   :  { %1806 = vmatprep.subr.bf16.mxu0 %v2601_v8  ;;  %2011 = vmatprep.subr.bf16.mxu1 %v2603_v9  ;;  %v2621_v21 = vld [vmem:[%s3957_s1 + $0xac] ss:$16 sps:$4 sm:$0xff]   ;;  %v2623_v22 = vld [vmem:[%s3957_s1 + $0xa0] ss:$16 sps:$4 sm:$0xff]   ;;  %v2624_v23 = vld [vmem:[%s3957_s1 + $0xa8] ss:$16 sps:$4 sm:$0xff]  }
   0x9   :  { %v2625_v24 = vld [vmem:[%s3957_s1 + $0xc4] ss:$16 sps:$4 sm:$0xff]   ;;  %v2627_v25 = vld [vmem:[%s3957_s1 + $0xcc] ss:$16 sps:$4 sm:$0xff]   ;;  %v2629_v26 = vld [vmem:[%s3957_s1 + $0xc0] ss:$16 sps:$4 sm:$0xff]  }
   0xa   :  { %v2630_v27 = vld [vmem:[%s3957_s1 + $0xc8] ss:$16 sps:$4 sm:$0xff]   ;;  %v2631_v28 = vld [vmem:[%s3957_s1 + $0xe4] ss:$16 sps:$4 sm:$0xff]   ;;  %v2633_v29 = vld [vmem:[%s3957_s1 + $0xec] ss:$16 sps:$4 sm:$0xff]  }
   0xb   :  { %1807 = vmatpush1.bf16.msra.mxu0 %v2605_v10  ;;  %2012 = vmatpush1.bf16.msra.mxu1 %v2606_v11  ;;  %v2635_v30 = vld [vmem:[%s3957_s1 + $0xe0] ss:$16 sps:$4 sm:$0xff]   ;;  %v2636_v31 = vld [vmem:[%s3957_s1 + $0xe8] ss:$16 sps:$4 sm:$0xff]   ;;  %v2637_v32 = vld [vmem:[%s3957_s1 + $0x104] ss:$16 sps:$4 sm:$0xff]  }
   0xc   :  { %1808 = vmatprep.subr.bf16.mxu0 %v2607_v12  ;;  %2013 = vmatprep.subr.bf16.mxu1 %v2609_v13  ;;  %v2639_v33 = vld [vmem:[%s3957_s1 + $0x10c] ss:$16 sps:$4 sm:$0xff]   ;;  %v2641_v34 = vld [vmem:[%s3957_s1 + $0x100] ss:$16 sps:$4 sm:$0xff]   ;;  %v2642_v35 = vld [vmem:[%s3957_s1 + $0x108] ss:$16 sps:$4 sm:$0xff]  }
   0xd   :  { %v2643_v36 = vld [vmem:[%s3957_s1 + $0x124] ss:$16 sps:$4 sm:$0xff]   ;;  %v2645_v37 = vld [vmem:[%s3957_s1 + $0x12c] ss:$16 sps:$4 sm:$0xff]   ;;  %v2647_v38 = vld [vmem:[%s3957_s1 + $0x120] ss:$16 sps:$4 sm:$0xff]  }
   0xe   :  { %v2648_v39 = vld [vmem:[%s3957_s1 + $0x128] ss:$16 sps:$4 sm:$0xff]   ;;  %v2649_v40 = vld [vmem:[%s3957_s1 + $0x144] ss:$16 sps:$4 sm:$0xff]   ;;  %v2651_v41 = vld [vmem:[%s3957_s1 + $0x14c] ss:$16 sps:$4 sm:$0xff]  }
   0xf   :  { %1809 = vmatpush1.bf16.msra.mxu0 %v2611_v14  ;;  %2014 = vmatpush1.bf16.msra.mxu1 %v2612_v15  ;;  %v2653_v42 = vld [vmem:[%s3957_s1 + $0x140] ss:$16 sps:$4 sm:$0xff]   ;;  %v2654_v43 = vld [vmem:[%s3957_s1 + $0x148] ss:$16 sps:$4 sm:$0xff]   ;;  %v2655_v44 = vld [vmem:[%s3957_s1 + $0x164] ss:$16 sps:$4 sm:$0xff]  }
  0x10   :  { %1810 = vmatprep.subr.bf16.mxu0 %v2613_v16  ;;  %2015 = vmatprep.subr.bf16.mxu1 %v2615_v17  ;;  %v2657_v45 = vld [vmem:[%s3957_s1 + $0x16c] ss:$16 sps:$4 sm:$0xff]   ;;  %v15_v46 = vld [vmem:[%s3958_s0] sm:$0xff]  ;;  %v2660_v49 = vld [vmem:[%s3957_s1 + $0x168] ss:$16 sps:$4 sm:$0xff]  }
  0x11   :  { %v2659_v47 = vld [vmem:[%s3957_s1 + $0x160] ss:$16 sps:$4 sm:$0xff]   ;;  %v2252_v48 = vcombine.high %v15_v46, %v15_v46  ;;  %v2661_v50 = vld [vmem:[%s3957_s1 + $0x184] ss:$16 sps:$4 sm:$0xff]   ;;  %v2663_v51 = vld [vmem:[%s3957_s1 + $0x18c] ss:$16 sps:$4 sm:$0xff]   ;;  %v2251_v4 = vcombine.low %v15_v46, %v15_v46 }
  0x12   :  { %v2665_v52 = vld [vmem:[%s3957_s1 + $0x180] ss:$16 sps:$4 sm:$0xff]   ;;  %v2666_v53 = vld [vmem:[%s3957_s1 + $0x188] ss:$16 sps:$4 sm:$0xff]   ;;  %v2667_v54 = vld [vmem:[%s3957_s1 + $0x1a4] ss:$16 sps:$4 sm:$0xff]  }
  0x13   :  { %1811 = vmatpush1.bf16.msra.mxu0 %v2617_v18  ;;  %2016 = vmatpush1.bf16.msra.mxu1 %v2618_v19  ;;  %v2669_v55 = vld [vmem:[%s3957_s1 + $0x1ac] ss:$16 sps:$4 sm:$0xff]   ;;  %v2671_v56 = vld [vmem:[%s3957_s1 + $0x1a0] ss:$16 sps:$4 sm:$0xff]   ;;  %v2672_v57 = vld [vmem:[%s3957_s1 + $0x1a8] ss:$16 sps:$4 sm:$0xff]  }
  0x14   :  { %1812 = vmatprep.subr.bf16.mxu0 %v2619_v20  ;;  %2017 = vmatprep.subr.bf16.mxu1 %v2621_v21  ;;  %v2673_v58 = vld [vmem:[%s3957_s1 + $0x1c4] ss:$16 sps:$4 sm:$0xff]   ;;  %v2675_v59 = vld [vmem:[%s3957_s1 + $0x1cc] ss:$16 sps:$4 sm:$0xff]   ;;  %v2677_v60 = vld [vmem:[%s3957_s1 + $0x1c0] ss:$16 sps:$4 sm:$0xff]  }
  0x15   :  { %1834 = vmatprep.mubr.bf16.mxu0 %v2252_v48  ;;  %2039 = vmatprep.mubr.bf16.mxu1 %v2252_v48  ;;  %v2678_v61 = vld [vmem:[%s3957_s1 + $0x1c8] ss:$16 sps:$4 sm:$0xff]   ;;  %v2679_v62 = vld [vmem:[%s3957_s1 + $0x1e4] ss:$16 sps:$4 sm:$0xff]   ;;  %v2681_v63 = vld [vmem:[%s3957_s1 + $0x1ec] ss:$16 sps:$4 sm:$0xff]  }
  0x16   :  { %v2683_v0 = vld [vmem:[%s3957_s1 + $0x1e0] ss:$16 sps:$4 sm:$0xff]   ;;  %v2684_v1 = vld [vmem:[%s3957_s1 + $0x1e8] ss:$16 sps:$4 sm:$0xff]   ;;  %v2689_v2 = vld [vmem:[%s3957_s1 + $0x204] ss:$16 sps:$4 sm:$0xff]  }
  0x17   :  { %1813 = vmatpush1.bf16.msra.mxu0 %v2623_v22  ;;  %2018 = vmatpush1.bf16.msra.mxu1 %v2624_v23  ;;  %v2692_v3 = vld [vmem:[%s3957_s1 + $0x20c] ss:$16 sps:$4 sm:$0xff]   ;;  %v2687_v5 = vld [vmem:[%s3957_s1 + $0x200] ss:$16 sps:$4 sm:$0xff]   ;;  %v2690_v6 = vld [vmem:[%s3957_s1 + $0x208] ss:$16 sps:$4 sm:$0xff]  }
  0x18   :  { %1814 = vmatprep.subr.bf16.mxu0 %v2625_v24  ;;  %2019 = vmatprep.subr.bf16.mxu1 %v2627_v25  ;;  %v2695_v7 = vld [vmem:[%s3957_s1 + $0x224] ss:$16 sps:$4 sm:$0xff]   ;;  %v2698_v8 = vld [vmem:[%s3957_s1 + $0x22c] ss:$16 sps:$4 sm:$0xff]   ;;  %v2693_v9 = vld [vmem:[%s3957_s1 + $0x220] ss:$16 sps:$4 sm:$0xff]  }
  0x19   :  { %v2696_v10 = vld [vmem:[%s3957_s1 + $0x228] ss:$16 sps:$4 sm:$0xff]   ;;  %v2701_v11 = vld [vmem:[%s3957_s1 + $0x244] ss:$16 sps:$4 sm:$0xff]   ;;  %v2704_v12 = vld [vmem:[%s3957_s1 + $0x24c] ss:$16 sps:$4 sm:$0xff]  }
  0x1a   :  { %v2699_v13 = vld [vmem:[%s3957_s1 + $0x240] ss:$16 sps:$4 sm:$0xff]   ;;  %v2702_v14 = vld [vmem:[%s3957_s1 + $0x248] ss:$16 sps:$4 sm:$0xff]   ;;  %v2707_v15 = vld [vmem:[%s3957_s1 + $0x264] ss:$16 sps:$4 sm:$0xff]  }
  0x1b   :  { %1815 = vmatpush1.bf16.msra.mxu0 %v2629_v26  ;;  %2020 = vmatpush1.bf16.msra.mxu1 %v2630_v27  ;;  %v2710_v16 = vld [vmem:[%s3957_s1 + $0x26c] ss:$16 sps:$4 sm:$0xff]   ;;  %v2705_v17 = vld [vmem:[%s3957_s1 + $0x260] ss:$16 sps:$4 sm:$0xff]   ;;  %v2708_v18 = vld [vmem:[%s3957_s1 + $0x268] ss:$16 sps:$4 sm:$0xff]  }
  0x1c   :  { %1816 = vmatprep.subr.bf16.mxu0 %v2631_v28  ;;  %2021 = vmatprep.subr.bf16.mxu1 %v2633_v29  ;;  %v2713_v19 = vld [vmem:[%s3957_s1 + $0x284] ss:$16 sps:$4 sm:$0xff]   ;;  %v2716_v20 = vld [vmem:[%s3957_s1 + $0x28c] ss:$16 sps:$4 sm:$0xff]   ;;  %v2711_v21 = vld [vmem:[%s3957_s1 + $0x280] ss:$16 sps:$4 sm:$0xff]  }
  0x1d   :  { %v2714_v22 = vld [vmem:[%s3957_s1 + $0x288] ss:$16 sps:$4 sm:$0xff]   ;;  %v2719_v23 = vld [vmem:[%s3957_s1 + $0x2a4] ss:$16 sps:$4 sm:$0xff]   ;;  %v2722_v24 = vld [vmem:[%s3957_s1 + $0x2ac] ss:$16 sps:$4 sm:$0xff]  }
  0x1e   :  { %v2717_v25 = vld [vmem:[%s3957_s1 + $0x2a0] ss:$16 sps:$4 sm:$0xff]   ;;  %v2720_v26 = vld [vmem:[%s3957_s1 + $0x2a8] ss:$16 sps:$4 sm:$0xff]   ;;  %v2725_v27 = vld [vmem:[%s3957_s1 + $0x2c4] ss:$16 sps:$4 sm:$0xff]  }
  0x1f   :  { %1817 = vmatpush1.bf16.msra.mxu0 %v2635_v30  ;;  %2022 = vmatpush1.bf16.msra.mxu1 %v2636_v31  ;;  %v2728_v28 = vld [vmem:[%s3957_s1 + $0x2cc] ss:$16 sps:$4 sm:$0xff]   ;;  %v2723_v31 = vld [vmem:[%s3957_s1 + $0x2c0] ss:$16 sps:$4 sm:$0xff]   ;;  %v2750_v48 = vld [vmem:[%s3957_s1 + $0x348] ss:$16 sps:$4 sm:$0xff]  }
  0x20   :  { %1818 = vmatprep.subr.bf16.mxu0 %v2637_v32  ;;  %2023 = vmatprep.subr.bf16.mxu1 %v2639_v33  ;;  %v3327_v29 = vld [vmem:[%s3958_s0 + $0x8] sm:$0xff]  ;;  %v2731_v33 = vld [vmem:[%s3957_s1 + $0x2e4] ss:$16 sps:$4 sm:$0xff]  }
  0x21   :  { %v2254_v30 = vcombine.high %v3327_v29, %v3327_v29  ;;  %v2726_v32 = vld [vmem:[%s3957_s1 + $0x2c8] ss:$16 sps:$4 sm:$0xff]   ;;  %v2752_v46 = vld [vmem:[%s3957_s1 + $0x34c] ss:$16 sps:$4 sm:$0xff]  }
  0x23   :  { %1819 = vmatpush1.bf16.msra.mxu0 %v2641_v34  ;;  %2024 = vmatpush1.bf16.msra.mxu1 %v2642_v35  ;;  %v2734_v34 = vld [vmem:[%s3957_s1 + $0x2ec] ss:$16 sps:$4 sm:$0xff]   ;;  %v2729_v35 = vld [vmem:[%s3957_s1 + $0x2e0] ss:$16 sps:$4 sm:$0xff]  }
  0x24   :  { %1820 = vmatprep.subr.bf16.mxu0 %v2643_v36  ;;  %2025 = vmatprep.subr.bf16.mxu1 %v2645_v37  ;;  %v2732_v36 = vld [vmem:[%s3957_s1 + $0x2e8] ss:$16 sps:$4 sm:$0xff]   ;;  %v2737_v37 = vld [vmem:[%s3957_s1 + $0x304] ss:$16 sps:$4 sm:$0xff]  }
  0x27   :  { %1821 = vmatpush1.bf16.msra.mxu0 %v2647_v38  ;;  %2026 = vmatpush1.bf16.msra.mxu1 %v2648_v39  ;;  %v2740_v38 = vld [vmem:[%s3957_s1 + $0x30c] ss:$16 sps:$4 sm:$0xff]   ;;  %v2735_v39 = vld [vmem:[%s3957_s1 + $0x300] ss:$16 sps:$4 sm:$0xff]  }
  0x28   :  { %1822 = vmatprep.subr.bf16.mxu0 %v2649_v40  ;;  %2027 = vmatprep.subr.bf16.mxu1 %v2651_v41  ;;  %v2738_v40 = vld [vmem:[%s3957_s1 + $0x308] ss:$16 sps:$4 sm:$0xff]   ;;  %v2743_v41 = vld [vmem:[%s3957_s1 + $0x324] ss:$16 sps:$4 sm:$0xff]  }
  0x2b   :  { %1823 = vmatpush1.bf16.msra.mxu0 %v2653_v42  ;;  %2028 = vmatpush1.bf16.msra.mxu1 %v2654_v43  ;;  %v2746_v42 = vld [vmem:[%s3957_s1 + $0x32c] ss:$16 sps:$4 sm:$0xff]   ;;  %v2741_v43 = vld [vmem:[%s3957_s1 + $0x320] ss:$16 sps:$4 sm:$0xff]  }
  0x2c   :  { %1824 = vmatprep.subr.bf16.mxu0 %v2655_v44  ;;  %2029 = vmatprep.subr.bf16.mxu1 %v2657_v45  ;;  %v2744_v44 = vld [vmem:[%s3957_s1 + $0x328] ss:$16 sps:$4 sm:$0xff]   ;;  %v2749_v45 = vld [vmem:[%s3957_s1 + $0x344] ss:$16 sps:$4 sm:$0xff]  }
  0x2f   :  { %1825 = vmatpush1.bf16.msra.mxu0 %v2659_v47  ;;  %2030 = vmatpush1.bf16.msra.mxu1 %v2660_v49  ;;  %v2747_v47 = vld [vmem:[%s3957_s1 + $0x340] ss:$16 sps:$4 sm:$0xff]   ;;  %v2755_v49 = vld [vmem:[%s3957_s1 + $0x364] ss:$16 sps:$4 sm:$0xff]  }
  0x30   :  { %1826 = vmatprep.subr.bf16.mxu0 %v2661_v50  ;;  %2031 = vmatprep.subr.bf16.mxu1 %v2663_v51  ;;  %v2758_v50 = vld [vmem:[%s3957_s1 + $0x36c] ss:$16 sps:$4 sm:$0xff]   ;;  %v2753_v51 = vld [vmem:[%s3957_s1 + $0x360] ss:$16 sps:$4 sm:$0xff]  }
  0x33   :  { %1827 = vmatpush1.bf16.msra.mxu0 %v2665_v52  ;;  %2032 = vmatpush1.bf16.msra.mxu1 %v2666_v53  ;;  %v2756_v52 = vld [vmem:[%s3957_s1 + $0x368] ss:$16 sps:$4 sm:$0xff]   ;;  %v2761_v53 = vld [vmem:[%s3957_s1 + $0x384] ss:$16 sps:$4 sm:$0xff]  }
  0x34   :  { %1828 = vmatprep.subr.bf16.mxu0 %v2667_v54  ;;  %2033 = vmatprep.subr.bf16.mxu1 %v2669_v55  ;;  %v2764_v54 = vld [vmem:[%s3957_s1 + $0x38c] ss:$16 sps:$4 sm:$0xff]   ;;  %v2759_v55 = vld [vmem:[%s3957_s1 + $0x380] ss:$16 sps:$4 sm:$0xff]  }
  0x37   :  { %1829 = vmatpush1.bf16.msra.mxu0 %v2671_v56  ;;  %2034 = vmatpush1.bf16.msra.mxu1 %v2672_v57  ;;  %v2762_v56 = vld [vmem:[%s3957_s1 + $0x388] ss:$16 sps:$4 sm:$0xff]   ;;  %v2767_v57 = vld [vmem:[%s3957_s1 + $0x3a4] ss:$16 sps:$4 sm:$0xff]  }
  0x38   :  { %1830 = vmatprep.subr.bf16.mxu0 %v2673_v58  ;;  %2035 = vmatprep.subr.bf16.mxu1 %v2675_v59  ;;  %v2770_v58 = vld [vmem:[%s3957_s1 + $0x3ac] ss:$16 sps:$4 sm:$0xff]   ;;  %v2765_v59 = vld [vmem:[%s3957_s1 + $0x3a0] ss:$16 sps:$4 sm:$0xff]  }
  0x3b   :  { %1831 = vmatpush1.bf16.msra.mxu0 %v2677_v60  ;;  %2036 = vmatpush1.bf16.msra.mxu1 %v2678_v61  ;;  %v2768_v60 = vld [vmem:[%s3957_s1 + $0x3a8] ss:$16 sps:$4 sm:$0xff]   ;;  %v2773_v61 = vld [vmem:[%s3957_s1 + $0x3c4] ss:$16 sps:$4 sm:$0xff]  }
  0x3c   :  { %1832 = vmatprep.subr.bf16.mxu0 %v2679_v62  ;;  %2037 = vmatprep.subr.bf16.mxu1 %v2681_v63  ;;  %v2776_v62 = vld [vmem:[%s3957_s1 + $0x3cc] ss:$16 sps:$4 sm:$0xff]   ;;  %v2771_v63 = vld [vmem:[%s3957_s1 + $0x3c0] ss:$16 sps:$4 sm:$0xff]  }
  0x3f   :  { %1833 = vmatpush1.bf16.msra.mxu0 %v2683_v0  ;;  %2038 = vmatpush1.bf16.msra.mxu1 %v2684_v1  ;;  %v2774_v0 = vld [vmem:[%s3957_s1 + $0x3c8] ss:$16 sps:$4 sm:$0xff]   ;;  %v2779_v1 = vld [vmem:[%s3957_s1 + $0x3e4] ss:$16 sps:$4 sm:$0xff]  }
  0x40   :  { %1843 = vmatprep.subr.bf16.mxu0 %v2689_v2  ;;  %2048 = vmatprep.subr.bf16.mxu1 %v2692_v3  ;;  %v2782_v2 = vld [vmem:[%s3957_s1 + $0x3ec] ss:$16 sps:$4 sm:$0xff]   ;;  %v2777_v3 = vld [vmem:[%s3957_s1 + $0x3e0] ss:$16 sps:$4 sm:$0xff]  }
  0x42   :  { %1835 = vmatmul.mubr.bf16.vlgmr.msra.gmra.mrb[0].mxu0 %v2251_v4  ;;  %2040 = vmatmul.mubr.bf16.vlgmr.msra.gmra.mrb[0].mxu1 %v2251_v4  ;;  %v2780_v4 = vld [vmem:[%s3957_s1 + $0x3e8] ss:$16 sps:$4 sm:$0xff]  }
  0x43   :  { %1844 = vmatpush1.bf16.msra.mxu0 %v2687_v5  ;;  %2049 = vmatpush1.bf16.msra.mxu1 %v2690_v6  ;;  %v2787_v5 = vld [vmem:[%s3957_s1 + $0x404] ss:$16 sps:$4 sm:$0xff]   ;;  %v2790_v6 = vld [vmem:[%s3957_s1 + $0x40c] ss:$16 sps:$4 sm:$0xff]  }
  0x44   :  { %1845 = vmatprep.subr.bf16.mxu0 %v2695_v7  ;;  %2050 = vmatprep.subr.bf16.mxu1 %v2698_v8  ;;  %v2253_v7 = vcombine.low %v3327_v29, %v3327_v29  ;;  %v2785_v8 = vld [vmem:[%s3957_s1 + $0x400] ss:$16 sps:$4 sm:$0xff]   ;;  %v2820_v29 = vld [vmem:[%s3957_s1 + $0x4ac] ss:$16 sps:$4 sm:$0xff]  }
  0x45   :  { %1875 = vmatprep.mubr.bf16.mxu0 %v2254_v30  ;;  %2080 = vmatprep.mubr.bf16.mxu1 %v2254_v30  ;;  %v2815_v30 = vld [vmem:[%s3957_s1 + $0x4a0] ss:$16 sps:$4 sm:$0xff]  }
  0x47   :  { %1846 = vmatpush1.bf16.msra.mxu0 %v2693_v9  ;;  %2051 = vmatpush1.bf16.msra.mxu1 %v2696_v10  ;;  %v2788_v9 = vld [vmem:[%s3957_s1 + $0x408] ss:$16 sps:$4 sm:$0xff]   ;;  %v2793_v10 = vld [vmem:[%s3957_s1 + $0x424] ss:$16 sps:$4 sm:$0xff]  }
  0x48   :  { %1847 = vmatprep.subr.bf16.mxu0 %v2701_v11  ;;  %2052 = vmatprep.subr.bf16.mxu1 %v2704_v12  ;;  %v3465_v11 = vld [vmem:[%s3958_s0 + $0x10] sm:$0xff]  ;;  %v2796_v12 = vld [vmem:[%s3957_s1 + $0x42c] ss:$16 sps:$4 sm:$0xff]  }
  0x4b   :  { %1848 = vmatpush1.bf16.msra.mxu0 %v2699_v13  ;;  %2053 = vmatpush1.bf16.msra.mxu1 %v2702_v14  ;;  %v2256_v13 = vcombine.high %v3465_v11, %v3465_v11  ;;  %v2791_v14 = vld [vmem:[%s3957_s1 + $0x420] ss:$16 sps:$4 sm:$0xff]  }
  0x4c   :  { %1849 = vmatprep.subr.bf16.mxu0 %v2707_v15  ;;  %2054 = vmatprep.subr.bf16.mxu1 %v2710_v16  ;;  %v2794_v15 = vld [vmem:[%s3957_s1 + $0x428] ss:$16 sps:$4 sm:$0xff]   ;;  %v2799_v16 = vld [vmem:[%s3957_s1 + $0x444] ss:$16 sps:$4 sm:$0xff]  }
  0x4f   :  { %1850 = vmatpush1.bf16.msra.mxu0 %v2705_v17  ;;  %2055 = vmatpush1.bf16.msra.mxu1 %v2708_v18  ;;  %v2802_v17 = vld [vmem:[%s3957_s1 + $0x44c] ss:$16 sps:$4 sm:$0xff]   ;;  %v2797_v18 = vld [vmem:[%s3957_s1 + $0x440] ss:$16 sps:$4 sm:$0xff]  }
  0x50   :  { %1851 = vmatprep.subr.bf16.mxu0 %v2713_v19  ;;  %2056 = vmatprep.subr.bf16.mxu1 %v2716_v20  ;;  %v2800_v19 = vld [vmem:[%s3957_s1 + $0x448] ss:$16 sps:$4 sm:$0xff]   ;;  %v2805_v20 = vld [vmem:[%s3957_s1 + $0x464] ss:$16 sps:$4 sm:$0xff]  }
  0x53   :  { %1852 = vmatpush1.bf16.msra.mxu0 %v2711_v21  ;;  %2057 = vmatpush1.bf16.msra.mxu1 %v2714_v22  ;;  %v2808_v21 = vld [vmem:[%s3957_s1 + $0x46c] ss:$16 sps:$4 sm:$0xff]   ;;  %v2803_v22 = vld [vmem:[%s3957_s1 + $0x460] ss:$16 sps:$4 sm:$0xff]  }
  0x54   :  { %1853 = vmatprep.subr.bf16.mxu0 %v2719_v23  ;;  %2058 = vmatprep.subr.bf16.mxu1 %v2722_v24  ;;  %v2806_v23 = vld [vmem:[%s3957_s1 + $0x468] ss:$16 sps:$4 sm:$0xff]   ;;  %v2811_v24 = vld [vmem:[%s3957_s1 + $0x484] ss:$16 sps:$4 sm:$0xff]  }
  0x57   :  { %1854 = vmatpush1.bf16.msra.mxu0 %v2717_v25  ;;  %2059 = vmatpush1.bf16.msra.mxu1 %v2720_v26  ;;  %v2814_v25 = vld [vmem:[%s3957_s1 + $0x48c] ss:$16 sps:$4 sm:$0xff]   ;;  %v2809_v26 = vld [vmem:[%s3957_s1 + $0x480] ss:$16 sps:$4 sm:$0xff]  }
  0x58   :  { %1855 = vmatprep.subr.bf16.mxu0 %v2725_v27  ;;  %2060 = vmatprep.subr.bf16.mxu1 %v2728_v28  ;;  %v2812_v27 = vld [vmem:[%s3957_s1 + $0x488] ss:$16 sps:$4 sm:$0xff]   ;;  %v2817_v28 = vld [vmem:[%s3957_s1 + $0x4a4] ss:$16 sps:$4 sm:$0xff]  }
  0x5b   :  { %1856 = vmatpush1.bf16.msra.mxu0 %v2723_v31  ;;  %2061 = vmatpush1.bf16.msra.mxu1 %v2726_v32  ;;  %v2818_v31 = vld [vmem:[%s3957_s1 + $0x4a8] ss:$16 sps:$4 sm:$0xff]   ;;  %v2823_v32 = vld [vmem:[%s3957_s1 + $0x4c4] ss:$16 sps:$4 sm:$0xff]  }
  0x5c   :  { %1857 = vmatprep.subr.bf16.mxu0 %v2731_v33  ;;  %2062 = vmatprep.subr.bf16.mxu1 %v2734_v34  ;;  %v2826_v33 = vld [vmem:[%s3957_s1 + $0x4cc] ss:$16 sps:$4 sm:$0xff]   ;;  %v2821_v34 = vld [vmem:[%s3957_s1 + $0x4c0] ss:$16 sps:$4 sm:$0xff]  }
  0x5f   :  { %1858 = vmatpush1.bf16.msra.mxu0 %v2729_v35  ;;  %2063 = vmatpush1.bf16.msra.mxu1 %v2732_v36  ;;  %v2824_v35 = vld [vmem:[%s3957_s1 + $0x4c8] ss:$16 sps:$4 sm:$0xff]   ;;  %v2829_v36 = vld [vmem:[%s3957_s1 + $0x4e4] ss:$16 sps:$4 sm:$0xff]  }
  0x60   :  { %1859 = vmatprep.subr.bf16.mxu0 %v2737_v37  ;;  %2064 = vmatprep.subr.bf16.mxu1 %v2740_v38  ;;  %v2832_v37 = vld [vmem:[%s3957_s1 + $0x4ec] ss:$16 sps:$4 sm:$0xff]   ;;  %v2827_v38 = vld [vmem:[%s3957_s1 + $0x4e0] ss:$16 sps:$4 sm:$0xff]  }
  0x63   :  { %1860 = vmatpush1.bf16.msra.mxu0 %v2735_v39  ;;  %2065 = vmatpush1.bf16.msra.mxu1 %v2738_v40  ;;  %v2830_v39 = vld [vmem:[%s3957_s1 + $0x4e8] ss:$16 sps:$4 sm:$0xff]   ;;  %v2835_v40 = vld [vmem:[%s3957_s1 + $0x504] ss:$16 sps:$4 sm:$0xff]  }
  0x64   :  { %1861 = vmatprep.subr.bf16.mxu0 %v2743_v41  ;;  %2066 = vmatprep.subr.bf16.mxu1 %v2746_v42  ;;  %v2838_v41 = vld [vmem:[%s3957_s1 + $0x50c] ss:$16 sps:$4 sm:$0xff]   ;;  %v2833_v42 = vld [vmem:[%s3957_s1 + $0x500] ss:$16 sps:$4 sm:$0xff]  }
  0x67   :  { %1862 = vmatpush1.bf16.msra.mxu0 %v2741_v43  ;;  %2067 = vmatpush1.bf16.msra.mxu1 %v2744_v44  ;;  %v2836_v43 = vld [vmem:[%s3957_s1 + $0x508] ss:$16 sps:$4 sm:$0xff]   ;;  %v2841_v44 = vld [vmem:[%s3957_s1 + $0x524] ss:$16 sps:$4 sm:$0xff]  }
  0x68   :  { %1863 = vmatprep.subr.bf16.mxu0 %v2749_v45  ;;  %2068 = vmatprep.subr.bf16.mxu1 %v2752_v46  ;;  %v2844_v45 = vld [vmem:[%s3957_s1 + $0x52c] ss:$16 sps:$4 sm:$0xff]   ;;  %v2839_v46 = vld [vmem:[%s3957_s1 + $0x520] ss:$16 sps:$4 sm:$0xff]  }
  0x6b   :  { %1864 = vmatpush1.bf16.msra.mxu0 %v2747_v47  ;;  %2069 = vmatpush1.bf16.msra.mxu1 %v2750_v48  ;;  %v2842_v47 = vld [vmem:[%s3957_s1 + $0x528] ss:$16 sps:$4 sm:$0xff]   ;;  %v2847_v48 = vld [vmem:[%s3957_s1 + $0x544] ss:$16 sps:$4 sm:$0xff]  }
  0x6c   :  { %1865 = vmatprep.subr.bf16.mxu0 %v2755_v49  ;;  %2070 = vmatprep.subr.bf16.mxu1 %v2758_v50  ;;  %v2850_v49 = vld [vmem:[%s3957_s1 + $0x54c] ss:$16 sps:$4 sm:$0xff]   ;;  %v2845_v50 = vld [vmem:[%s3957_s1 + $0x540] ss:$16 sps:$4 sm:$0xff]  }
  0x6f   :  { %1866 = vmatpush1.bf16.msra.mxu0 %v2753_v51  ;;  %2071 = vmatpush1.bf16.msra.mxu1 %v2756_v52  ;;  %v2848_v51 = vld [vmem:[%s3957_s1 + $0x548] ss:$16 sps:$4 sm:$0xff]   ;;  %v2853_v52 = vld [vmem:[%s3957_s1 + $0x564] ss:$16 sps:$4 sm:$0xff]  }
  0x70   :  { %1867 = vmatprep.subr.bf16.mxu0 %v2761_v53  ;;  %2072 = vmatprep.subr.bf16.mxu1 %v2764_v54  ;;  %v2856_v53 = vld [vmem:[%s3957_s1 + $0x56c] ss:$16 sps:$4 sm:$0xff]   ;;  %v2851_v54 = vld [vmem:[%s3957_s1 + $0x560] ss:$16 sps:$4 sm:$0xff]  }
  0x73   :  { %1868 = vmatpush1.bf16.msra.mxu0 %v2759_v55  ;;  %2073 = vmatpush1.bf16.msra.mxu1 %v2762_v56  ;;  %v2854_v55 = vld [vmem:[%s3957_s1 + $0x568] ss:$16 sps:$4 sm:$0xff]   ;;  %v2859_v56 = vld [vmem:[%s3957_s1 + $0x584] ss:$16 sps:$4 sm:$0xff]  }
  0x74   :  { %1869 = vmatprep.subr.bf16.mxu0 %v2767_v57  ;;  %2074 = vmatprep.subr.bf16.mxu1 %v2770_v58  ;;  %v2862_v57 = vld [vmem:[%s3957_s1 + $0x58c] ss:$16 sps:$4 sm:$0xff]   ;;  %v2857_v58 = vld [vmem:[%s3957_s1 + $0x580] ss:$16 sps:$4 sm:$0xff]  }
  0x77   :  { %1870 = vmatpush1.bf16.msra.mxu0 %v2765_v59  ;;  %2075 = vmatpush1.bf16.msra.mxu1 %v2768_v60  ;;  %v2860_v59 = vld [vmem:[%s3957_s1 + $0x588] ss:$16 sps:$4 sm:$0xff]   ;;  %v2865_v60 = vld [vmem:[%s3957_s1 + $0x5a4] ss:$16 sps:$4 sm:$0xff]  }
  0x78   :  { %1871 = vmatprep.subr.bf16.mxu0 %v2773_v61  ;;  %2076 = vmatprep.subr.bf16.mxu1 %v2776_v62  ;;  %v2868_v61 = vld [vmem:[%s3957_s1 + $0x5ac] ss:$16 sps:$4 sm:$0xff]   ;;  %v2863_v62 = vld [vmem:[%s3957_s1 + $0x5a0] ss:$16 sps:$4 sm:$0xff]  }
  0x7b   :  { %1872 = vmatpush1.bf16.msra.mxu0 %v2771_v63  ;;  %2077 = vmatpush1.bf16.msra.mxu1 %v2774_v0  ;;  %v2866_v63 = vld [vmem:[%s3957_s1 + $0x5a8] ss:$16 sps:$4 sm:$0xff]   ;;  %v2871_v0 = vld [vmem:[%s3957_s1 + $0x5c4] ss:$16 sps:$4 sm:$0xff]  }
  0x7c   :  { %1873 = vmatprep.subr.bf16.mxu0 %v2779_v1  ;;  %2078 = vmatprep.subr.bf16.mxu1 %v2782_v2  ;;  %v2874_v1 = vld [vmem:[%s3957_s1 + $0x5cc] ss:$16 sps:$4 sm:$0xff]   ;;  %v2869_v2 = vld [vmem:[%s3957_s1 + $0x5c0] ss:$16 sps:$4 sm:$0xff]  }
  0x7f   :  { %1874 = vmatpush1.bf16.msra.mxu0 %v2777_v3  ;;  %2079 = vmatpush1.bf16.msra.mxu1 %v2780_v4  ;;  %v2872_v3 = vld [vmem:[%s3957_s1 + $0x5c8] ss:$16 sps:$4 sm:$0xff]   ;;  %v2877_v4 = vld [vmem:[%s3957_s1 + $0x5e4] ss:$16 sps:$4 sm:$0xff]  }
  0x80   :  { %1884 = vmatprep.subr.bf16.mxu0 %v2787_v5  ;;  %2089 = vmatprep.subr.bf16.mxu1 %v2790_v6  ;;  %v2880_v5 = vld [vmem:[%s3957_s1 + $0x5ec] ss:$16 sps:$4 sm:$0xff]   ;;  %v2875_v6 = vld [vmem:[%s3957_s1 + $0x5e0] ss:$16 sps:$4 sm:$0xff]  }
  0x82   :  { %1876 = vmatmul.mubr.bf16.vlgmr.msra.gmra.mrb[0].mxu0 %v2253_v7  ;;  %2081 = vmatmul.mubr.bf16.vlgmr.msra.gmra.mrb[0].mxu1 %v2253_v7  ;;  %v2878_v7 = vld [vmem:[%s3957_s1 + $0x5e8] ss:$16 sps:$4 sm:$0xff]  }
  0x83   :  { %1885 = vmatpush1.bf16.msra.mxu0 %v2785_v8  ;;  %2090 = vmatpush1.bf16.msra.mxu1 %v2788_v9  ;;  %v2885_v8 = vld [vmem:[%s3957_s1 + $0x604] ss:$16 sps:$4 sm:$0xff]   ;;  %v2888_v9 = vld [vmem:[%s3957_s1 + $0x60c] ss:$16 sps:$4 sm:$0xff]  }
  0x84   :  { %1886 = vmatprep.subr.bf16.mxu0 %v2793_v10  ;;  %2091 = vmatprep.subr.bf16.mxu1 %v2796_v12  ;;  %v2255_v10 = vcombine.low %v3465_v11, %v3465_v11  ;;  %v2883_v12 = vld [vmem:[%s3957_s1 + $0x600] ss:$16 sps:$4 sm:$0xff]   ;;  %v2891_v11 = vld [vmem:[%s3957_s1 + $0x624] ss:$16 sps:$4 sm:$0xff]  }
  0x85   :  { %1916 = vmatprep.mubr.bf16.mxu0 %v2256_v13  ;;  %2121 = vmatprep.mubr.bf16.mxu1 %v2256_v13  ;;  %v3660_v13 = vld [vmem:[%s3958_s0 + $0x18] sm:$0xff] }
  0x87   :  { %1887 = vmatpush1.bf16.msra.mxu0 %v2791_v14  ;;  %2092 = vmatpush1.bf16.msra.mxu1 %v2794_v15  ;;  %v2886_v14 = vld [vmem:[%s3957_s1 + $0x608] ss:$16 sps:$4 sm:$0xff]   ;;  %v2894_v15 = vld [vmem:[%s3957_s1 + $0x62c] ss:$16 sps:$4 sm:$0xff]  }
  0x88   :  { %1888 = vmatprep.subr.bf16.mxu0 %v2799_v16  ;;  %2093 = vmatprep.subr.bf16.mxu1 %v2802_v17  ;;  %v2258_v16 = vcombine.high %v3660_v13, %v3660_v13  ;;  %v2889_v17 = vld [vmem:[%s3957_s1 + $0x620] ss:$16 sps:$4 sm:$0xff]  }
  0x8b   :  { %1889 = vmatpush1.bf16.msra.mxu0 %v2797_v18  ;;  %2094 = vmatpush1.bf16.msra.mxu1 %v2800_v19  ;;  %v2892_v18 = vld [vmem:[%s3957_s1 + $0x628] ss:$16 sps:$4 sm:$0xff]   ;;  %v2897_v19 = vld [vmem:[%s3957_s1 + $0x644] ss:$16 sps:$4 sm:$0xff]  }
  0x8c   :  { %1890 = vmatprep.subr.bf16.mxu0 %v2805_v20  ;;  %2095 = vmatprep.subr.bf16.mxu1 %v2808_v21  ;;  %v2900_v20 = vld [vmem:[%s3957_s1 + $0x64c] ss:$16 sps:$4 sm:$0xff]   ;;  %v2895_v21 = vld [vmem:[%s3957_s1 + $0x640] ss:$16 sps:$4 sm:$0xff]  }
  0x8f   :  { %1891 = vmatpush1.bf16.msra.mxu0 %v2803_v22  ;;  %2096 = vmatpush1.bf16.msra.mxu1 %v2806_v23  ;;  %v2898_v22 = vld [vmem:[%s3957_s1 + $0x648] ss:$16 sps:$4 sm:$0xff]   ;;  %v2903_v23 = vld [vmem:[%s3957_s1 + $0x664] ss:$16 sps:$4 sm:$0xff]  }
  0x90   :  { %1892 = vmatprep.subr.bf16.mxu0 %v2811_v24  ;;  %2097 = vmatprep.subr.bf16.mxu1 %v2814_v25  ;;  %v2906_v24 = vld [vmem:[%s3957_s1 + $0x66c] ss:$16 sps:$4 sm:$0xff]   ;;  %v2901_v25 = vld [vmem:[%s3957_s1 + $0x660] ss:$16 sps:$4 sm:$0xff]  }
  0x93   :  { %1893 = vmatpush1.bf16.msra.mxu0 %v2809_v26  ;;  %2098 = vmatpush1.bf16.msra.mxu1 %v2812_v27  ;;  %v2904_v26 = vld [vmem:[%s3957_s1 + $0x668] ss:$16 sps:$4 sm:$0xff]   ;;  %v2909_v27 = vld [vmem:[%s3957_s1 + $0x684] ss:$16 sps:$4 sm:$0xff]  }
  0x94   :  { %1894 = vmatprep.subr.bf16.mxu0 %v2817_v28  ;;  %2099 = vmatprep.subr.bf16.mxu1 %v2820_v29  ;;  %v2912_v28 = vld [vmem:[%s3957_s1 + $0x68c] ss:$16 sps:$4 sm:$0xff]   ;;  %v2907_v29 = vld [vmem:[%s3957_s1 + $0x680] ss:$16 sps:$4 sm:$0xff]  }
  0x97   :  { %1895 = vmatpush1.bf16.msra.mxu0 %v2815_v30  ;;  %2100 = vmatpush1.bf16.msra.mxu1 %v2818_v31  ;;  %v2910_v30 = vld [vmem:[%s3957_s1 + $0x688] ss:$16 sps:$4 sm:$0xff]   ;;  %v2915_v31 = vld [vmem:[%s3957_s1 + $0x6a4] ss:$16 sps:$4 sm:$0xff]  }
  0x98   :  { %1896 = vmatprep.subr.bf16.mxu0 %v2823_v32  ;;  %2101 = vmatprep.subr.bf16.mxu1 %v2826_v33  ;;  %v2918_v32 = vld [vmem:[%s3957_s1 + $0x6ac] ss:$16 sps:$4 sm:$0xff]   ;;  %v2913_v33 = vld [vmem:[%s3957_s1 + $0x6a0] ss:$16 sps:$4 sm:$0xff]  }
  0x9b   :  { %1897 = vmatpush1.bf16.msra.mxu0 %v2821_v34  ;;  %2102 = vmatpush1.bf16.msra.mxu1 %v2824_v35  ;;  %v2916_v34 = vld [vmem:[%s3957_s1 + $0x6a8] ss:$16 sps:$4 sm:$0xff]   ;;  %v2921_v35 = vld [vmem:[%s3957_s1 + $0x6c4] ss:$16 sps:$4 sm:$0xff]  }
  0x9c   :  { %1898 = vmatprep.subr.bf16.mxu0 %v2829_v36  ;;  %2103 = vmatprep.subr.bf16.mxu1 %v2832_v37  ;;  %v2924_v36 = vld [vmem:[%s3957_s1 + $0x6cc] ss:$16 sps:$4 sm:$0xff]   ;;  %v2919_v37 = vld [vmem:[%s3957_s1 + $0x6c0] ss:$16 sps:$4 sm:$0xff]  }
  0x9f   :  { %1899 = vmatpush1.bf16.msra.mxu0 %v2827_v38  ;;  %2104 = vmatpush1.bf16.msra.mxu1 %v2830_v39  ;;  %v2922_v38 = vld [vmem:[%s3957_s1 + $0x6c8] ss:$16 sps:$4 sm:$0xff]   ;;  %v2927_v39 = vld [vmem:[%s3957_s1 + $0x6e4] ss:$16 sps:$4 sm:$0xff]  }
  0xa0   :  { %1900 = vmatprep.subr.bf16.mxu0 %v2835_v40  ;;  %2105 = vmatprep.subr.bf16.mxu1 %v2838_v41  ;;  %v2930_v40 = vld [vmem:[%s3957_s1 + $0x6ec] ss:$16 sps:$4 sm:$0xff]   ;;  %v2925_v41 = vld [vmem:[%s3957_s1 + $0x6e0] ss:$16 sps:$4 sm:$0xff]  }
  0xa3   :  { %1901 = vmatpush1.bf16.msra.mxu0 %v2833_v42  ;;  %2106 = vmatpush1.bf16.msra.mxu1 %v2836_v43  ;;  %v2928_v42 = vld [vmem:[%s3957_s1 + $0x6e8] ss:$16 sps:$4 sm:$0xff]   ;;  %v2933_v43 = vld [vmem:[%s3957_s1 + $0x704] ss:$16 sps:$4 sm:$0xff]  }
  0xa4   :  { %1902 = vmatprep.subr.bf16.mxu0 %v2841_v44  ;;  %2107 = vmatprep.subr.bf16.mxu1 %v2844_v45  ;;  %v2936_v44 = vld [vmem:[%s3957_s1 + $0x70c] ss:$16 sps:$4 sm:$0xff]   ;;  %v2931_v45 = vld [vmem:[%s3957_s1 + $0x700] ss:$16 sps:$4 sm:$0xff]  }
  0xa7   :  { %1903 = vmatpush1.bf16.msra.mxu0 %v2839_v46  ;;  %2108 = vmatpush1.bf16.msra.mxu1 %v2842_v47  ;;  %v2934_v46 = vld [vmem:[%s3957_s1 + $0x708] ss:$16 sps:$4 sm:$0xff]   ;;  %v2939_v47 = vld [vmem:[%s3957_s1 + $0x724] ss:$16 sps:$4 sm:$0xff]  }
  0xa8   :  { %1904 = vmatprep.subr.bf16.mxu0 %v2847_v48  ;;  %2109 = vmatprep.subr.bf16.mxu1 %v2850_v49  ;;  %v2942_v48 = vld [vmem:[%s3957_s1 + $0x72c] ss:$16 sps:$4 sm:$0xff]   ;;  %v2937_v49 = vld [vmem:[%s3957_s1 + $0x720] ss:$16 sps:$4 sm:$0xff]  }
  0xab   :  { %1905 = vmatpush1.bf16.msra.mxu0 %v2845_v50  ;;  %2110 = vmatpush1.bf16.msra.mxu1 %v2848_v51  ;;  %v2940_v50 = vld [vmem:[%s3957_s1 + $0x728] ss:$16 sps:$4 sm:$0xff]   ;;  %v2945_v51 = vld [vmem:[%s3957_s1 + $0x744] ss:$16 sps:$4 sm:$0xff]  }
  0xac   :  { %1906 = vmatprep.subr.bf16.mxu0 %v2853_v52  ;;  %2111 = vmatprep.subr.bf16.mxu1 %v2856_v53  ;;  %v2948_v52 = vld [vmem:[%s3957_s1 + $0x74c] ss:$16 sps:$4 sm:$0xff]   ;;  %v2943_v53 = vld [vmem:[%s3957_s1 + $0x740] ss:$16 sps:$4 sm:$0xff]  }
  0xaf   :  { %1907 = vmatpush1.bf16.msra.mxu0 %v2851_v54  ;;  %2112 = vmatpush1.bf16.msra.mxu1 %v2854_v55  ;;  %v2946_v54 = vld [vmem:[%s3957_s1 + $0x748] ss:$16 sps:$4 sm:$0xff]   ;;  %v2951_v55 = vld [vmem:[%s3957_s1 + $0x764] ss:$16 sps:$4 sm:$0xff]  }
  0xb0   :  { %1908 = vmatprep.subr.bf16.mxu0 %v2859_v56  ;;  %2113 = vmatprep.subr.bf16.mxu1 %v2862_v57  ;;  %v2954_v56 = vld [vmem:[%s3957_s1 + $0x76c] ss:$16 sps:$4 sm:$0xff]   ;;  %v2949_v57 = vld [vmem:[%s3957_s1 + $0x760] ss:$16 sps:$4 sm:$0xff]  }
  0xb3   :  { %1909 = vmatpush1.bf16.msra.mxu0 %v2857_v58  ;;  %2114 = vmatpush1.bf16.msra.mxu1 %v2860_v59  ;;  %v2952_v58 = vld [vmem:[%s3957_s1 + $0x768] ss:$16 sps:$4 sm:$0xff]   ;;  %v2957_v59 = vld [vmem:[%s3957_s1 + $0x784] ss:$16 sps:$4 sm:$0xff]  }
  0xb4   :  { %1910 = vmatprep.subr.bf16.mxu0 %v2865_v60  ;;  %2115 = vmatprep.subr.bf16.mxu1 %v2868_v61  ;;  %v2960_v60 = vld [vmem:[%s3957_s1 + $0x78c] ss:$16 sps:$4 sm:$0xff]   ;;  %v2955_v61 = vld [vmem:[%s3957_s1 + $0x780] ss:$16 sps:$4 sm:$0xff]  }
  0xb7   :  { %1911 = vmatpush1.bf16.msra.mxu0 %v2863_v62  ;;  %2116 = vmatpush1.bf16.msra.mxu1 %v2866_v63  ;;  %v2958_v62 = vld [vmem:[%s3957_s1 + $0x788] ss:$16 sps:$4 sm:$0xff]   ;;  %v2963_v63 = vld [vmem:[%s3957_s1 + $0x7a4] ss:$16 sps:$4 sm:$0xff]  }
  0xb8   :  { %1912 = vmatprep.subr.bf16.mxu0 %v2871_v0  ;;  %2117 = vmatprep.subr.bf16.mxu1 %v2874_v1  ;;  %v2966_v0 = vld [vmem:[%s3957_s1 + $0x7ac] ss:$16 sps:$4 sm:$0xff]   ;;  %v2961_v1 = vld [vmem:[%s3957_s1 + $0x7a0] ss:$16 sps:$4 sm:$0xff]  }
  0xbb   :  { %1913 = vmatpush1.bf16.msra.mxu0 %v2869_v2  ;;  %2118 = vmatpush1.bf16.msra.mxu1 %v2872_v3  ;;  %v2964_v2 = vld [vmem:[%s3957_s1 + $0x7a8] ss:$16 sps:$4 sm:$0xff]   ;;  %v2969_v3 = vld [vmem:[%s3957_s1 + $0x7c4] ss:$16 sps:$4 sm:$0xff]  }
  0xbc   :  { %1914 = vmatprep.subr.bf16.mxu0 %v2877_v4  ;;  %2119 = vmatprep.subr.bf16.mxu1 %v2880_v5  ;;  %v2972_v4 = vld [vmem:[%s3957_s1 + $0x7cc] ss:$16 sps:$4 sm:$0xff]   ;;  %v2967_v5 = vld [vmem:[%s3957_s1 + $0x7c0] ss:$16 sps:$4 sm:$0xff]  }
  0xbf   :  { %1915 = vmatpush1.bf16.msra.mxu0 %v2875_v6  ;;  %2120 = vmatpush1.bf16.msra.mxu1 %v2878_v7  ;;  %v2970_v6 = vld [vmem:[%s3957_s1 + $0x7c8] ss:$16 sps:$4 sm:$0xff]   ;;  %v2975_v7 = vld [vmem:[%s3957_s1 + $0x7e4] ss:$16 sps:$4 sm:$0xff]  }
  0xc0   :  { %1925 = vmatprep.subr.bf16.mxu0 %v2885_v8  ;;  %2130 = vmatprep.subr.bf16.mxu1 %v2888_v9  ;;  %v2978_v8 = vld [vmem:[%s3957_s1 + $0x7ec] ss:$16 sps:$4 sm:$0xff]   ;;  %v2973_v9 = vld [vmem:[%s3957_s1 + $0x7e0] ss:$16 sps:$4 sm:$0xff]  }
  0xc2   :  { %1917 = vmatmul.mubr.bf16.vlgmr.msra.gmra.mrb[0].mxu0 %v2255_v10  ;;  %2122 = vmatmul.mubr.bf16.vlgmr.msra.gmra.mrb[0].mxu1 %v2255_v10  ;;  %v2976_v10 = vld [vmem:[%s3957_s1 + $0x7e8] ss:$16 sps:$4 sm:$0xff]  }
  0xc3   :  { %1926 = vmatpush1.bf16.msra.mxu0 %v2883_v12  ;;  %2131 = vmatpush1.bf16.msra.mxu1 %v2886_v14  ;;  %v2983_v12 = vld [vmem:[%s3957_s1 + $0x804] ss:$16 sps:$4 sm:$0xff]   ;;  %v2986_v14 = vld [vmem:[%s3957_s1 + $0x80c] ss:$16 sps:$4 sm:$0xff]  }
  0xc4   :  { %1927 = vmatprep.subr.bf16.mxu0 %v2891_v11  ;;  %2132 = vmatprep.subr.bf16.mxu1 %v2894_v15  ;;  %v2257_v11 = vcombine.low %v3660_v13, %v3660_v13  ;;  %v2981_v15 = vld [vmem:[%s3957_s1 + $0x800] ss:$16 sps:$4 sm:$0xff]   ;;  %v2992_v13 = vld [vmem:[%s3957_s1 + $0x82c] ss:$16 sps:$4 sm:$0xff]  }
  0xc5   :  { %1957 = vmatprep.mubr.bf16.mxu0 %v2258_v16  ;;  %2162 = vmatprep.mubr.bf16.mxu1 %v2258_v16  ;;  %v2984_v16 = vld [vmem:[%s3957_s1 + $0x808] ss:$16 sps:$4 sm:$0xff]  }
  0xc7   :  { %1928 = vmatpush1.bf16.msra.mxu0 %v2889_v17  ;;  %2133 = vmatpush1.bf16.msra.mxu1 %v2892_v18  ;;  %v2989_v17 = vld [vmem:[%s3957_s1 + $0x824] ss:$16 sps:$4 sm:$0xff]   ;;  %v2987_v18 = vld [vmem:[%s3957_s1 + $0x820] ss:$16 sps:$4 sm:$0xff]  }
  0xc8   :  { %1929 = vmatprep.subr.bf16.mxu0 %v2897_v19  ;;  %2134 = vmatprep.subr.bf16.mxu1 %v2900_v20  ;;  %v2990_v19 = vld [vmem:[%s3957_s1 + $0x828] ss:$16 sps:$4 sm:$0xff]   ;;  %v2995_v20 = vld [vmem:[%s3957_s1 + $0x844] ss:$16 sps:$4 sm:$0xff]  }
  0xcb   :  { %1930 = vmatpush1.bf16.msra.mxu0 %v2895_v21  ;;  %2135 = vmatpush1.bf16.msra.mxu1 %v2898_v22  ;;  %v2998_v21 = vld [vmem:[%s3957_s1 + $0x84c] ss:$16 sps:$4 sm:$0xff]   ;;  %v3030_v22 = vmov 0  }
  0xcc   :  { %1931 = vmatprep.subr.bf16.mxu0 %v2903_v23  ;;  %2136 = vmatprep.subr.bf16.mxu1 %v2906_v24  ;;  %v2993_v23 = vld [vmem:[%s3957_s1 + $0x840] ss:$16 sps:$4 sm:$0xff]   ;;  %v2996_v24 = vld [vmem:[%s3957_s1 + $0x848] ss:$16 sps:$4 sm:$0xff]  }
  0xcf   :  { %1932 = vmatpush1.bf16.msra.mxu0 %v2901_v25  ;;  %2137 = vmatpush1.bf16.msra.mxu1 %v2904_v26  ;;  %v3001_v25 = vld [vmem:[%s3957_s1 + $0x864] ss:$16 sps:$4 sm:$0xff]   ;;  %v3004_v26 = vld [vmem:[%s3957_s1 + $0x86c] ss:$16 sps:$4 sm:$0xff]  }
  0xd0   :  { %1933 = vmatprep.subr.bf16.mxu0 %v2909_v27  ;;  %2138 = vmatprep.subr.bf16.mxu1 %v2912_v28  ;;  %v2999_v27 = vld [vmem:[%s3957_s1 + $0x860] ss:$16 sps:$4 sm:$0xff]   ;;  %v3002_v28 = vld [vmem:[%s3957_s1 + $0x868] ss:$16 sps:$4 sm:$0xff]  }
  0xd3   :  { %1934 = vmatpush1.bf16.msra.mxu0 %v2907_v29  ;;  %2139 = vmatpush1.bf16.msra.mxu1 %v2910_v30  ;;  %v3007_v29 = vld [vmem:[%s3957_s1 + $0x884] ss:$16 sps:$4 sm:$0xff]   ;;  %v3010_v30 = vld [vmem:[%s3957_s1 + $0x88c] ss:$16 sps:$4 sm:$0xff]  }
  0xd4   :  { %1935 = vmatprep.subr.bf16.mxu0 %v2915_v31  ;;  %2140 = vmatprep.subr.bf16.mxu1 %v2918_v32  ;;  %v3005_v31 = vld [vmem:[%s3957_s1 + $0x880] ss:$16 sps:$4 sm:$0xff]   ;;  %v3008_v32 = vld [vmem:[%s3957_s1 + $0x888] ss:$16 sps:$4 sm:$0xff]  }
  0xd7   :  { %1936 = vmatpush1.bf16.msra.mxu0 %v2913_v33  ;;  %2141 = vmatpush1.bf16.msra.mxu1 %v2916_v34  ;;  %v3013_v33 = vld [vmem:[%s3957_s1 + $0x8a4] ss:$16 sps:$4 sm:$0xff]   ;;  %v3016_v34 = vld [vmem:[%s3957_s1 + $0x8ac] ss:$16 sps:$4 sm:$0xff]  }
  0xd8   :  { %1937 = vmatprep.subr.bf16.mxu0 %v2921_v35  ;;  %2142 = vmatprep.subr.bf16.mxu1 %v2924_v36  ;;  %v3011_v35 = vld [vmem:[%s3957_s1 + $0x8a0] ss:$16 sps:$4 sm:$0xff]   ;;  %v3014_v36 = vld [vmem:[%s3957_s1 + $0x8a8] ss:$16 sps:$4 sm:$0xff]  }
  0xdb   :  { %1938 = vmatpush1.bf16.msra.mxu0 %v2919_v37  ;;  %2143 = vmatpush1.bf16.msra.mxu1 %v2922_v38  ;;  %v3019_v37 = vld [vmem:[%s3957_s1 + $0x8c4] ss:$16 sps:$4 sm:$0xff]   ;;  %v3022_v38 = vld [vmem:[%s3957_s1 + $0x8cc] ss:$16 sps:$4 sm:$0xff]  }
  0xdc   :  { %1939 = vmatprep.subr.bf16.mxu0 %v2927_v39  ;;  %2144 = vmatprep.subr.bf16.mxu1 %v2930_v40  ;;  %v3017_v39 = vld [vmem:[%s3957_s1 + $0x8c0] ss:$16 sps:$4 sm:$0xff]   ;;  %v3020_v40 = vld [vmem:[%s3957_s1 + $0x8c8] ss:$16 sps:$4 sm:$0xff]  }
  0xdf   :  { %1940 = vmatpush1.bf16.msra.mxu0 %v2925_v41  ;;  %2145 = vmatpush1.bf16.msra.mxu1 %v2928_v42  ;;  %v3025_v41 = vld [vmem:[%s3957_s1 + $0x8e4] ss:$16 sps:$4 sm:$0xff]   ;;  %v3028_v42 = vld [vmem:[%s3957_s1 + $0x8ec] ss:$16 sps:$4 sm:$0xff]  }
  0xe0   :  { %1941 = vmatprep.subr.bf16.mxu0 %v2933_v43  ;;  %2146 = vmatprep.subr.bf16.mxu1 %v2936_v44  ;;  %v3023_v43 = vld [vmem:[%s3957_s1 + $0x8e0] ss:$16 sps:$4 sm:$0xff]   ;;  %v3026_v44 = vld [vmem:[%s3957_s1 + $0x8e8] ss:$16 sps:$4 sm:$0xff]  }
  0xe3   :  { %1942 = vmatpush1.bf16.msra.mxu0 %v2931_v45  ;;  %2147 = vmatpush1.bf16.msra.mxu1 %v2934_v46  ;;  %v3029_v45 = vld [vmem:[%s3958_s0 + $0x20] ss:$0 sps:$4 sm:$0xff]   ;;  %v310_v46 = vlaneseq }
  0xe4   :  { %1943 = vmatprep.subr.bf16.mxu0 %v2939_v47  ;;  %2148 = vmatprep.subr.bf16.mxu1 %v2942_v48 }
  0xe5   :  { %v311_v47 = vshrl.u32 %v310_v46, 7 }
  0xe7   :  { %1944 = vmatpush1.bf16.msra.mxu0 %v2937_v49  ;;  %2149 = vmatpush1.bf16.msra.mxu1 %v2940_v50  ;;  %v312_v48 = vsub.s32 0, %v311_v47  ;;  %v320_v49 = vsub.s32 2, %v311_v47  ;;  %v308_v50 = vld [vmem:[%s3959_s2] sm:$0xf] }
  0xe8   :  { %1945 = vmatprep.subr.bf16.mxu0 %v2945_v51  ;;  %2150 = vmatprep.subr.bf16.mxu1 %v2948_v52  ;;  %v316_v51 = vsub.s32 1, %v311_v47  ;;  %v324_v52 = vsub.s32 3, %v311_v47 }
  0xeb   :  { %1946 = vmatpush1.bf16.msra.mxu0 %v2943_v53  ;;  %2151 = vmatpush1.bf16.msra.mxu1 %v2946_v54  ;;  %v313_v53 = vrot.slane %v308_v50, %v312_v48  ;;  %v321_v54 = vrot.slane %v308_v50, %v320_v49 }
  0xec   :  { %1947 = vmatprep.subr.bf16.mxu0 %v2951_v55  ;;  %2152 = vmatprep.subr.bf16.mxu1 %v2954_v56  ;;  %v317_v55 = vrot.slane %v308_v50, %v316_v51  ;;  %v325_v56 = vrot.slane %v308_v50, %v324_v52 }
  0xef   :  { %1948 = vmatpush1.bf16.msra.mxu0 %v2949_v57  ;;  %2153 = vmatpush1.bf16.msra.mxu1 %v2952_v58 }
  0xf0   :  { %1949 = vmatprep.subr.bf16.mxu0 %v2957_v59  ;;  %2154 = vmatprep.subr.bf16.mxu1 %v2960_v60 }
  0xf3   :  { %1950 = vmatpush1.bf16.msra.mxu0 %v2955_v61  ;;  %2155 = vmatpush1.bf16.msra.mxu1 %v2958_v62 }
  0xf4   :  { %1951 = vmatprep.subr.bf16.mxu0 %v2963_v63  ;;  %2156 = vmatprep.subr.bf16.mxu1 %v2966_v0 }
  0xf7   :  { %1952 = vmatpush1.bf16.msra.mxu0 %v2961_v1  ;;  %2157 = vmatpush1.bf16.msra.mxu1 %v2964_v2 }
  0xf8   :  { %1953 = vmatprep.subr.bf16.mxu0 %v2969_v3  ;;  %2158 = vmatprep.subr.bf16.mxu1 %v2972_v4 }
  0xfb   :  { %1954 = vmatpush1.bf16.msra.mxu0 %v2967_v5  ;;  %2159 = vmatpush1.bf16.msra.mxu1 %v2970_v6 }
  0xfc   :  { %1955 = vmatprep.subr.bf16.mxu0 %v2975_v7  ;;  %2160 = vmatprep.subr.bf16.mxu1 %v2978_v8 }
  0xff   :  { %1956 = vmatpush1.bf16.msra.mxu0 %v2973_v9  ;;  %2161 = vmatpush1.bf16.msra.mxu1 %v2976_v10 }
 0x100   :  { %1966 = vmatprep.subr.bf16.mxu0 %v2983_v12  ;;  %2171 = vmatprep.subr.bf16.mxu1 %v2986_v14 }
 0x102   :  { %1958 = vmatmul.mubr.bf16.vlgmr.msra.gmra.mrb[0].mxu0 %v2257_v11  ;;  %2163 = vmatmul.mubr.bf16.vlgmr.msra.gmra.mrb[0].mxu1 %v2257_v11 }
 0x103   :  { %1967 = vmatpush1.bf16.msra.mxu0 %v2981_v15  ;;  %2172 = vmatpush1.bf16.msra.mxu1 %v2984_v16 }
 0x104   :  { %1968 = vmatprep.subr.bf16.mxu0 %v2989_v17  ;;  %2173 = vmatprep.subr.bf16.mxu1 %v2992_v13 }
 0x105   :  { %1998 = vmatprep.mubr.bf16.mxu0 %v3030_v22  ;;  %2203 = vmatprep.mubr.bf16.mxu1 %v3030_v22 }
 0x107   :  { %1969 = vmatpush1.bf16.msra.mxu0 %v2987_v18  ;;  %2174 = vmatpush1.bf16.msra.mxu1 %v2990_v19 }
 0x108   :  { %1970 = vmatprep.subr.bf16.mxu0 %v2995_v20  ;;  %2175 = vmatprep.subr.bf16.mxu1 %v2998_v21 }
 0x10b   :  { %1971 = vmatpush1.bf16.msra.mxu0 %v2993_v23  ;;  %2176 = vmatpush1.bf16.msra.mxu1 %v2996_v24 }
 0x10c   :  { %1972 = vmatprep.subr.bf16.mxu0 %v3001_v25  ;;  %2177 = vmatprep.subr.bf16.mxu1 %v3004_v26 }
 0x10f   :  { %1973 = vmatpush1.bf16.msra.mxu0 %v2999_v27  ;;  %2178 = vmatpush1.bf16.msra.mxu1 %v3002_v28 }
 0x110   :  { %1974 = vmatprep.subr.bf16.mxu0 %v3007_v29  ;;  %2179 = vmatprep.subr.bf16.mxu1 %v3010_v30 }
 0x113   :  { %1975 = vmatpush1.bf16.msra.mxu0 %v3005_v31  ;;  %2180 = vmatpush1.bf16.msra.mxu1 %v3008_v32 }
 0x114   :  { %1976 = vmatprep.subr.bf16.mxu0 %v3013_v33  ;;  %2181 = vmatprep.subr.bf16.mxu1 %v3016_v34 }
 0x117   :  { %1977 = vmatpush1.bf16.msra.mxu0 %v3011_v35  ;;  %2182 = vmatpush1.bf16.msra.mxu1 %v3014_v36 }
 0x118   :  { %1978 = vmatprep.subr.bf16.mxu0 %v3019_v37  ;;  %2183 = vmatprep.subr.bf16.mxu1 %v3022_v38 }
 0x11b   :  { %1979 = vmatpush1.bf16.msra.mxu0 %v3017_v39  ;;  %2184 = vmatpush1.bf16.msra.mxu1 %v3020_v40 }
 0x11c   :  { %1980 = vmatprep.subr.bf16.mxu0 %v3025_v41  ;;  %2185 = vmatprep.subr.bf16.mxu1 %v3028_v42 }
 0x11f   :  { %1981 = vmatpush1.bf16.msra.mxu0 %v3023_v43  ;;  %2186 = vmatpush1.bf16.msra.mxu1 %v3026_v44 }
 0x122   :  { %1999 = vmatmul.mubr.bf16.vlgmr.msra.gmra.mrb[0].mxu0 %v3029_v45  ;;  %2204 = vmatmul.mubr.bf16.vlgmr.msra.gmra.mrb[0].mxu1 %v3029_v45 }
 0x1f5   :  { %v2000_v57 = vpop.f32.mrb[0].mxu0  ;;  %v2205_v58 = vpop.f32.mrb[0].mxu1 }
 0x1f6   :  { %v2552_v59 = vadd.f32 %v2000_v57, %v313_v53  ;;  %v2554_v60 = vadd.f32 %v2205_v58, %v321_v54  ;;  %v2002_v61 = vpop.f32.mrb[1].mxu0  ;;  %v2207_v62 = vpop.f32.mrb[1].mxu1 }
 0x1f7   :  { %v2553_v63 = vadd.f32 %v2002_v61, %v317_v55  ;;  %v2555_v0 = vadd.f32 %v2207_v62, %v325_v56  ;;  %v2004_v1 = vpop.f32.mrb[2].mxu0  ;;  %v2209_v2 = vpop.f32.mrb[2].mxu1 }
 0x1f8   :  { %v2221_v3 = vmax.f32 %v2552_v59, 0.0  ;;  %v2005_v4 = vpop.f32.mrb[3].mxu0  ;;  %v2210_v5 = vpop.f32.mrb[3].mxu1 }
 0x1f9   :  { %v2222_v6 = vmax.f32 %v2553_v63, 0.0  ;;  %v2551_v7 = vpack.c.bf16 %v2555_v0, %v2554_v60 }
 0x1fb   :  { %v2550_v8 = vpack.c.bf16 %v2222_v6, %v2221_v3  ;;  %2246 = vst [vmem:[%s3960_s3 + $0x8] sm:$0xff] %v2551_v7 }
 0x1fd   :  { %2245 = vst [vmem:[%s3960_s3] sm:$0xff] %v2550_v8 }

// kernel: resnet_forward.27
= control target key start
LH: loop header
LB: loop body
LE: loop exit
PB: predicated region body
PF: predicated region fallthrough
CT: control target
= control target key end

     0   :  { %s3870_s15 = smov 0   ;;  %s4905_s0 = inlined_call_operand.vmem [shape: bf16[2,4,4,256], index: 0, kind: input, shape index: {}]   ;;  %s4906_s1 = inlined_call_operand.vmem [shape: bf16[9,256,256], index: 1, kind: input, shape index: {}]   ;;  %s4907_s2 = inlined_call_operand.vmem [shape: f32[1,256], index: 2, kind: input, shape index: {}]   ;;  %s4908_s3 = inlined_call_operand.vmem [shape: bf16[2,2,2,256], index: 3, kind: input, shape index: {}]   ;;  %s4909_s4 = inlined_call_operand.vmem [shape: bf16[2,2,2,256], index: 4, kind: output, shape index: {}]  }
   0x1 LB: > { %s2821_s16 = sadd.s32 4294967295, %s3841_s15   ;;  %p2825_p0 = scmp.ge.s32.totalorder %s3841_s15, 1  ;;  %s3841_s15 = sphi %s3870_s15, %s14_s15  }
   0x2   : > { %p171_p1 = scmp.lt.s32.totalorder %s3841_s15, 3 }
   0x4   : > { %p172_p2 = pnand %p2825_p0, %p171_p1 }
   0x5   : > { %v3402_v0 = vld [vmem:[%s4906_s1 + $0x104] ss:$8 sps:$4 sm:$0xff] (!%p172_p2)   ;;  %v3406_v2 = vld [vmem:[%s4906_s1 + $0x100] ss:$8 sps:$4 sm:$0xff] (!%p172_p2)   ;;  %v3408_v4 = vld [vmem:[%s4906_s1 + $0x114] ss:$8 sps:$4 sm:$0xff] (!%p172_p2)   ;;  %v337_v41 = vlaneseq (!%p172_p2) }
   0x6   : > { %175 = sbr.rel (%p172_p2) target bundleno = 562 (0x232), region = 36  ;;  %v3404_v1 = vld [vmem:[%s4906_s1 + $0x4] ss:$8 sps:$4 sm:$0xff] (!%p172_p2)   ;;  %518 = vmatprep.subr.bf16.mxu0 (!%p172_p2), %v3402_v0  ;;  %v3407_v3 = vld [vmem:[%s4906_s1] ss:$8 sps:$4 sm:$0xff] (!%p172_p2)   ;;  %p200_p3 = scmp.lt.s32.totalorder (!%p172_p2), %s2821_s16, 1 }
   0x7   : > { %744 = vmatprep.subr.bf16.mxu1 (!%p172_p2), %v3404_v1  ;;  %519 = vmatpush1.bf16.msra.mxu0 (!%p172_p2), %v3406_v2  ;;  %v3410_v5 = vld [vmem:[%s4906_s1 + $0x14] ss:$8 sps:$4 sm:$0xff] (!%p172_p2)   ;;  %v3412_v6 = vld [vmem:[%s4906_s1 + $0x110] ss:$8 sps:$4 sm:$0xff] (!%p172_p2)   ;;  %v3414_v8 = vld [vmem:[%s4906_s1 + $0x124] ss:$8 sps:$4 sm:$0xff] (!%p172_p2)  }
   0x8   : > { %745 = vmatpush1.bf16.msra.mxu1 (!%p172_p2), %v3407_v3  ;;  %520 = vmatprep.subr.bf16.mxu0 (!%p172_p2), %v3408_v4  ;;  %v3413_v7 = vld [vmem:[%s4906_s1 + $0x10] ss:$8 sps:$4 sm:$0xff] (!%p172_p2)   ;;  %v3416_v9 = vld [vmem:[%s4906_s1 + $0x24] ss:$8 sps:$4 sm:$0xff] (!%p172_p2)   ;;  %v3418_v10 = vld [vmem:[%s4906_s1 + $0x120] ss:$8 sps:$4 sm:$0xff] (!%p172_p2)  }
   0x9   : > { %746 = vmatprep.subr.bf16.mxu1 (!%p172_p2), %v3410_v5  ;;  %v3419_v11 = vld [vmem:[%s4906_s1 + $0x20] ss:$8 sps:$4 sm:$0xff] (!%p172_p2)   ;;  %v3420_v12 = vld [vmem:[%s4906_s1 + $0x134] ss:$8 sps:$4 sm:$0xff] (!%p172_p2)   ;;  %v3424_v14 = vld [vmem:[%s4906_s1 + $0x130] ss:$8 sps:$4 sm:$0xff] (!%p172_p2)  }
   0xa   : > { %v3422_v13 = vld [vmem:[%s4906_s1 + $0x34] ss:$8 sps:$4 sm:$0xff] (!%p172_p2)   ;;  %v3425_v15 = vld [vmem:[%s4906_s1 + $0x30] ss:$8 sps:$4 sm:$0xff] (!%p172_p2)   ;;  %v3426_v16 = vld [vmem:[%s4906_s1 + $0x144] ss:$8 sps:$4 sm:$0xff] (!%p172_p2)  }
   0xb   : > { %521 = vmatpush1.bf16.msra.mxu0 (!%p172_p2), %v3412_v6  ;;  %v3428_v17 = vld [vmem:[%s4906_s1 + $0x44] ss:$8 sps:$4 sm:$0xff] (!%p172_p2)   ;;  %v3430_v18 = vld [vmem:[%s4906_s1 + $0x140] ss:$8 sps:$4 sm:$0xff] (!%p172_p2)   ;;  %v3432_v20 = vld [vmem:[%s4906_s1 + $0x154] ss:$8 sps:$4 sm:$0xff] (!%p172_p2)  }
   0xc   : > { %747 = vmatpush1.bf16.msra.mxu1 (!%p172_p2), %v3413_v7  ;;  %522 = vmatprep.subr.bf16.mxu0 (!%p172_p2), %v3414_v8  ;;  %v3431_v19 = vld [vmem:[%s4906_s1 + $0x40] ss:$8 sps:$4 sm:$0xff] (!%p172_p2)   ;;  %v3434_v21 = vld [vmem:[%s4906_s1 + $0x54] ss:$8 sps:$4 sm:$0xff] (!%p172_p2)   ;;  %v3436_v22 = vld [vmem:[%s4906_s1 + $0x150] ss:$8 sps:$4 sm:$0xff] (!%p172_p2)  }
   0xd   : > { %748 = vmatprep.subr.bf16.mxu1 %v3416_v9  ;;  %v3437_v23 = vld [vmem:[%s4906_s1 + $0x50] ss:$8 sps:$4 sm:$0xff]   ;;  %v3438_v24 = vld [vmem:[%s4906_s1 + $0x164] ss:$8 sps:$4 sm:$0xff]   ;;  %v3442_v26 = vld [vmem:[%s4906_s1 + $0x160] ss:$8 sps:$4 sm:$0xff]  }
   0xe   : > { %v3440_v25 = vld [vmem:[%s4906_s1 + $0x64] ss:$8 sps:$4 sm:$0xff]   ;;  %v3443_v27 = vld [vmem:[%s4906_s1 + $0x60] ss:$8 sps:$4 sm:$0xff]   ;;  %v3444_v28 = vld [vmem:[%s4906_s1 + $0x174] ss:$8 sps:$4 sm:$0xff]  }
   0xf   : > { %523 = vmatpush1.bf16.msra.mxu0 %v3418_v10  ;;  %v3446_v29 = vld [vmem:[%s4906_s1 + $0x74] ss:$8 sps:$4 sm:$0xff]   ;;  %v3448_v30 = vld [vmem:[%s4906_s1 + $0x170] ss:$8 sps:$4 sm:$0xff]   ;;  %v3450_v32 = vld [vmem:[%s4906_s1 + $0x184] ss:$8 sps:$4 sm:$0xff]  }
  0x10   : > { %749 = vmatpush1.bf16.msra.mxu1 %v3419_v11  ;;  %524 = vmatprep.subr.bf16.mxu0 %v3420_v12  ;;  %v3449_v31 = vld [vmem:[%s4906_s1 + $0x70] ss:$8 sps:$4 sm:$0xff]   ;;  %v3452_v33 = vld [vmem:[%s4906_s1 + $0x84] ss:$8 sps:$4 sm:$0xff]   ;;  %v3454_v34 = vld [vmem:[%s4906_s1 + $0x180] ss:$8 sps:$4 sm:$0xff]  }
  0x11   : > { %750 = vmatprep.subr.bf16.mxu1 %v3422_v13  ;;  %v3455_v35 = vld [vmem:[%s4906_s1 + $0x80] ss:$8 sps:$4 sm:$0xff]   ;;  %s4913_s16 = smov (!%p200_p3, %s2821_s16), 1  ;;  %v3456_v36 = vld [vmem:[%s4906_s1 + $0x194] ss:$8 sps:$4 sm:$0xff]   ;;  %v4017_v48 = vshrl.u32 %v337_v41, 7 }
  0x12   : > { %v3458_v37 = vld [vmem:[%s4906_s1 + $0x94] ss:$8 sps:$4 sm:$0xff]   ;;  %vm267_vm0 = vsmask.f32 256  ;;  %v3460_v38 = vld [vmem:[%s4906_s1 + $0x190] ss:$8 sps:$4 sm:$0xff]  }
  0x13   : > { %525 = vmatpush1.bf16.msra.mxu0 %v3424_v14  ;;  %vm268_vm1 = vsmask.f32 1284  ;;  %v3843_v39 = vmov 1966171168   ;;  %v3461_v42 = vld [vmem:[%s4906_s1 + $0x90] ss:$8 sps:$4 sm:$0xff]  }
  0x14   : > { %751 = vmatpush1.bf16.msra.mxu1 %v3425_v15  ;;  %526 = vmatprep.subr.bf16.mxu0 %v3426_v16  ;;  %v335_v40 = vunpack.c.l.s4 %v3843_v39  ;;  %v3462_v43 = vld [vmem:[%s4906_s1 + $0x1a4] ss:$8 sps:$4 sm:$0xff]   ;;  %s3391_s27 = sshll.u32 %s4913_s16, 4  ;;  %vm270_vm2 = vsmask.f32 2312  ;;  %vm269_vm7 = vmor %vm267_vm0, %vm268_vm1  ;;  %s2828_s11 = sshll.u32 %s4913_s16, 2 }
  0x15   : > { %752 = vmatprep.subr.bf16.mxu1 %v3428_v17  ;;  %v3464_v44 = vld [vmem:[%s4906_s1 + $0xa4] ss:$8 sps:$4 sm:$0xff]   ;;  %vm272_vm3 = vsmask.f32 3340  ;;  %vm274_vm4 = vsmask.f32 4368  ;;  %s4025_s12 = scalar_lea.vmem %s4905_s0, %s3391_s27  ;;  %vm271_vm9 = vmor %vm269_vm7, %vm270_vm2  ;;  %s208_s17 = scalar_lea.vmem %s4908_s3, %s2828_s11 }
  0x16   : > { %v3466_v45 = vld [vmem:[%s4906_s1 + $0x1a0] ss:$8 sps:$4 sm:$0xff]   ;;  %v336_v47 = vunpack.c.0.s8 %v335_v40  ;;  %v3468_v49 = vld [vmem:[%s4906_s1 + $0x1b4] ss:$8 sps:$4 sm:$0xff]   ;;  %vm276_vm5 = vsmask.f32 5396  ;;  %vm273_vm10 = vmor %vm271_vm9, %vm272_vm3  ;;  %s212_s22 = scalar_lea.vmem %s4909_s4, %s2828_s11 }
  0x17   : > { %527 = vmatpush1.bf16.msra.mxu0 %v3430_v18  ;;  %v3467_v46 = vld [vmem:[%s4906_s1 + $0xa0] ss:$8 sps:$4 sm:$0xff]   ;;  %v3470_v50 = vld [vmem:[%s4906_s1 + $0xb4] ss:$8 sps:$4 sm:$0xff]   ;;  %vm278_vm6 = vsmask.f32 6424  ;;  %vm275_vm11 = vmor %vm273_vm10, %vm274_vm4 }
  0x18   : > { %753 = vmatpush1.bf16.msra.mxu1 %v3431_v19  ;;  %528 = vmatprep.subr.bf16.mxu0 %v3432_v20  ;;  %v3472_v51 = vld [vmem:[%s4906_s1 + $0x1b0] ss:$8 sps:$4 sm:$0xff]   ;;  %vm280_vm8 = vsmask.f32 7452  ;;  %v3474_v53 = vld [vmem:[%s4906_s1 + $0x1c4] ss:$8 sps:$4 sm:$0xff]   ;;  %v4044_v55 = vsub.s32 %v336_v47, %v4017_v48  ;;  %vm277_vm12 = vmor %vm275_vm11, %vm276_vm5 }
  0x19   : > { %754 = vmatprep.subr.bf16.mxu1 %v3434_v21  ;;  %v3473_v52 = vld [vmem:[%s4906_s1 + $0xb0] ss:$8 sps:$4 sm:$0xff]   ;;  %v2830_v54 = vld.sshfl [vmem:[%s4025_s12] sm:$0x33 pattern:$0x75316420]  ;;  %vm279_vm13 = vmor %vm277_vm12, %vm278_vm6 }
  0x1a   : > { %v4047_v56 = vld.sshfl [vmem:[%s4025_s12 + $0x4] sm:$0x33 pattern:$0x75316420]  ;;  %v265_v57 = vcombine.high %v2830_v54, %v2830_v54  ;;  %v283_v60 = vshrl.u32 %v2830_v54, 16  ;;  %vm4070_vm14 = vmor %vm279_vm13, %vm280_vm8 }
  0x1b   : > { %529 = vmatpush1.bf16.msra.mxu0 %v3436_v22  ;;  %v3476_v58 = vld [vmem:[%s4906_s1 + $0xc4] ss:$8 sps:$4 sm:$0xff]   ;;  %v266_v59 = vcombine.high %v4047_v56, %v4047_v56  ;;  %v292_v61 = vshrl.u32 %v4047_v56, 16  ;;  %v559_v62 = vcombine.low %v2830_v54, %v4047_v56  ;;  %v3478_v0 = vld [vmem:[%s4906_s1 + $0x1c0] ss:$8 sps:$4 sm:$0xff]   ;;  %v2962_v19 = vcombine.high %v2830_v54, %v4047_v56 }
  0x1c   : > { %755 = vmatpush1.bf16.msra.mxu1 %v3437_v23  ;;  %530 = vmatprep.subr.bf16.mxu0 %v3438_v24  ;;  %v288_v63 = vshll.u32 %v265_v57, 16  ;;  %v3479_v3 = vld [vmem:[%s4906_s1 + $0xc0] ss:$8 sps:$4 sm:$0xff]   ;;  %v3480_v5 = vld [vmem:[%s4906_s1 + $0x1d4] ss:$8 sps:$4 sm:$0xff]  }
  0x1d   : > { %756 = vmatprep.subr.bf16.mxu1 %v3440_v25  ;;  %v297_v1 = vshll.u32 %v266_v59, 16  ;;  %v4064_v2 = vrot.slane %v559_v62, %v4044_v55  ;;  %v3482_v6 = vld [vmem:[%s4906_s1 + $0xd4] ss:$8 sps:$4 sm:$0xff]   ;;  %v3484_v13 = vld [vmem:[%s4906_s1 + $0x1d0] ss:$8 sps:$4 sm:$0xff]  }
  0x1e   : > { %v290_v7 = vsel %vm4070_vm14, %v283_v60, %v288_v63  ;;  %v4090_v11 = vld.sshfl [vmem:[%s4025_s12 + $0x8] sm:$0x33 pattern:$0x75316420]  ;;  %v3485_v14 = vld [vmem:[%s4906_s1 + $0xd0] ss:$8 sps:$4 sm:$0xff]  }
  0x1f   : > { %531 = vmatpush1.bf16.msra.mxu0 %v3442_v26  ;;  %v4084_v8 = vsel %vm4070_vm14, %v292_v61, %v297_v1  ;;  %v567_v9 = vcombine.high %v4064_v2, %v4064_v2  ;;  %v3486_v16 = vld [vmem:[%s4906_s1 + $0x1e4] ss:$8 sps:$4 sm:$0xff]   ;;  %v1087_v20 = vcombine.low %v4047_v56, %v4090_v11  ;;  %v3490_v21 = vld [vmem:[%s4906_s1 + $0x1e0] ss:$8 sps:$4 sm:$0xff]   ;;  %v3492_v24 = vld [vmem:[%s4906_s1 + $0x1f4] ss:$8 sps:$4 sm:$0xff]   ;;  %v4123_v26 = vrot.slane %v2962_v19, %v4044_v55 }
  0x20   : > { %757 = vmatpush1.bf16.msra.mxu1 %v3443_v27  ;;  %532 = vmatprep.subr.bf16.mxu0 %v3444_v28  ;;  %v333_v10 = vcombine.low %v290_v7, %v4084_v8  ;;  %v3488_v17 = vld [vmem:[%s4906_s1 + $0xe4] ss:$8 sps:$4 sm:$0xff]   ;;  %v3491_v22 = vld [vmem:[%s4906_s1 + $0xe0] ss:$8 sps:$4 sm:$0xff]   ;;  %v3494_v25 = vld [vmem:[%s4906_s1 + $0xf4] ss:$8 sps:$4 sm:$0xff]  }
  0x21   : > { %758 = vmatprep.subr.bf16.mxu1 %v3446_v29  ;;  %v581_v12 = vrot.slane %v567_v9, %v4044_v55  ;;  %v4126_v27 = vrot.slane %v1087_v20, %v4044_v55  ;;  %v3496_v28 = vld [vmem:[%s4906_s1 + $0x1f0] ss:$8 sps:$4 sm:$0xff]   ;;  %v3509_v39 = vld [vmem:[%s4906_s1 + $0x314] ss:$8 sps:$4 sm:$0xff]   ;;  %v3513_v47 = vld [vmem:[%s4906_s1 + $0x320] ss:$8 sps:$4 sm:$0xff]  }
  0x22   : > { %v340_v15 = vrot.slane %v333_v10, %v4044_v55  ;;  %v3497_v29 = vld [vmem:[%s4906_s1 + $0xf0] ss:$8 sps:$4 sm:$0xff]   ;;  %v3527_v54 = vld [vmem:[%s4906_s1 + $0x344] ss:$8 sps:$4 sm:$0xff]   ;;  %v3522_v57 = vld [vmem:[%s4906_s1 + $0x240] ss:$8 sps:$4 sm:$0xff]  }
  0x23   : > { %533 = vmatpush1.bf16.msra.mxu0 %v3448_v30  ;;  %776 = vmatprep.mubr.bf16.mxu1 %v581_v12  ;;  %v3500_v30 = vld [vmem:[%s4906_s1 + $0x204] ss:$8 sps:$4 sm:$0xff]   ;;  %v3530_v59 = vld [vmem:[%s4906_s1 + $0x254] ss:$8 sps:$4 sm:$0xff]   ;;  %v3528_v61 = vld [vmem:[%s4906_s1 + $0x250] ss:$8 sps:$4 sm:$0xff]  }
  0x24   : > { %759 = vmatpush1.bf16.msra.mxu1 %v3449_v31  ;;  %534 = vmatprep.subr.bf16.mxu0 %v3450_v32  ;;  %v341_v18 = vcombine.high %v340_v15, %v340_v15  ;;  %v3503_v31 = vld [vmem:[%s4906_s1 + $0x304] ss:$8 sps:$4 sm:$0xff]   ;;  %v826_v32 = vcombine.high %v4123_v26, %v4123_v26  ;;  %v3533_v60 = vld [vmem:[%s4906_s1 + $0x354] ss:$8 sps:$4 sm:$0xff]   ;;  %v3531_v62 = vld [vmem:[%s4906_s1 + $0x350] ss:$8 sps:$4 sm:$0xff]  }
  0x25   : > { %760 = vmatprep.subr.bf16.mxu1 %v3452_v33  ;;  %v1095_v33 = vcombine.high %v4126_v27, %v4126_v27  ;;  %v3536_v63 = vld [vmem:[%s4906_s1 + $0x264] ss:$8 sps:$4 sm:$0xff]   ;;  %v3534_v1 = vld [vmem:[%s4906_s1 + $0x260] ss:$8 sps:$4 sm:$0xff]   ;;  %v3543_v7 = vld [vmem:[%s4906_s1 + $0x370] ss:$8 sps:$4 sm:$0xff]  }
  0x26   : > { %v355_v23 = vrot.slane %v341_v18, %v4044_v55  ;;  %v840_v40 = vrot.slane %v826_v32, %v4044_v55  ;;  %v3548_v9 = vld [vmem:[%s4906_s1 + $0x284] ss:$8 sps:$4 sm:$0xff]   ;;  %v3546_v12 = vld [vmem:[%s4906_s1 + $0x280] ss:$8 sps:$4 sm:$0xff]  }
  0x27   : > { %535 = vmatpush1.bf16.msra.mxu0 %v3454_v34  ;;  %v348_v34 = vrot.slane %v340_v15, %v4044_v55  ;;  %v1109_v41 = vrot.slane %v1095_v33, %v4044_v55  ;;  %v3551_v10 = vld [vmem:[%s4906_s1 + $0x384] ss:$8 sps:$4 sm:$0xff]   ;;  %v3557_v15 = vld [vmem:[%s4906_s1 + $0x394] ss:$8 sps:$4 sm:$0xff]   ;;  %v3558_v20 = vld [vmem:[%s4906_s1 + $0x2a0] ss:$8 sps:$4 sm:$0xff]  }
  0x28   : > { %761 = vmatpush1.bf16.msra.mxu1 %v3455_v35  ;;  %536 = vmatprep.subr.bf16.mxu0 %v3456_v36  ;;  %v574_v35 = vrot.slane %v4064_v2, %v4044_v55  ;;  %v3498_v36 = vld [vmem:[%s4906_s1 + $0x200] ss:$8 sps:$4 sm:$0xff]   ;;  %v3560_v18 = vld [vmem:[%s4906_s1 + $0x2a4] ss:$8 sps:$4 sm:$0xff]  }
  0x29   : > { %762 = vmatprep.subr.bf16.mxu1 %v3458_v37  ;;  %550 = vmatprep.mubr.bf16.mxu0 %v355_v23  ;;  %v3501_v37 = vld [vmem:[%s4906_s1 + $0x300] ss:$8 sps:$4 sm:$0xff]   ;;  %v3563_v19 = vld [vmem:[%s4906_s1 + $0x3a4] ss:$8 sps:$4 sm:$0xff]   ;;  %v3569_v23 = vld [vmem:[%s4906_s1 + $0x3b4] ss:$8 sps:$4 sm:$0xff]  }
  0x2a   : > { %v3537_v2 = vld [vmem:[%s4906_s1 + $0x360] ss:$8 sps:$4 sm:$0xff]  }
  0x2b   : > { %537 = vmatpush1.bf16.msra.mxu0 %v3460_v38  ;;  %v3506_v38 = vld [vmem:[%s4906_s1 + $0x214] ss:$8 sps:$4 sm:$0xff]   ;;  %v3570_v33 = vld [vmem:[%s4906_s1 + $0x2c0] ss:$8 sps:$4 sm:$0xff]  }
  0x2c   : > { %763 = vmatpush1.bf16.msra.mxu1 %v3461_v42  ;;  %538 = vmatprep.subr.bf16.mxu0 %v3462_v43  ;;  %v3504_v42 = vld [vmem:[%s4906_s1 + $0x210] ss:$8 sps:$4 sm:$0xff]  }
  0x2d   : > { %764 = vmatprep.subr.bf16.mxu1 %v3464_v44  ;;  %v3507_v43 = vld [vmem:[%s4906_s1 + $0x310] ss:$8 sps:$4 sm:$0xff]   ;;  %v3512_v44 = vld [vmem:[%s4906_s1 + $0x224] ss:$8 sps:$4 sm:$0xff]  }
  0x2f   : > { %539 = vmatpush1.bf16.msra.mxu0 %v3466_v45  ;;  %v3515_v45 = vld [vmem:[%s4906_s1 + $0x324] ss:$8 sps:$4 sm:$0xff]  }
  0x30   : > { %765 = vmatpush1.bf16.msra.mxu1 %v3467_v46  ;;  %540 = vmatprep.subr.bf16.mxu0 %v3468_v49  ;;  %v3510_v46 = vld [vmem:[%s4906_s1 + $0x220] ss:$8 sps:$4 sm:$0xff]   ;;  %v3518_v49 = vld [vmem:[%s4906_s1 + $0x234] ss:$8 sps:$4 sm:$0xff]  }
  0x31   : > { %766 = vmatprep.subr.bf16.mxu1 %v3470_v50  ;;  %v3521_v50 = vld [vmem:[%s4906_s1 + $0x334] ss:$8 sps:$4 sm:$0xff]  }
  0x33   : > { %541 = vmatpush1.bf16.msra.mxu0 %v3472_v51  ;;  %v3516_v51 = vld [vmem:[%s4906_s1 + $0x230] ss:$8 sps:$4 sm:$0xff]  }
  0x34   : > { %767 = vmatpush1.bf16.msra.mxu1 %v3473_v52  ;;  %542 = vmatprep.subr.bf16.mxu0 %v3474_v53  ;;  %v3519_v52 = vld [vmem:[%s4906_s1 + $0x330] ss:$8 sps:$4 sm:$0xff]   ;;  %v3524_v53 = vld [vmem:[%s4906_s1 + $0x244] ss:$8 sps:$4 sm:$0xff]  }
  0x35   : > { %768 = vmatprep.subr.bf16.mxu1 %v3476_v58  ;;  %v3525_v58 = vld [vmem:[%s4906_s1 + $0x340] ss:$8 sps:$4 sm:$0xff]  }
  0x37   : > { %543 = vmatpush1.bf16.msra.mxu0 %v3478_v0  ;;  %v3539_v0 = vld [vmem:[%s4906_s1 + $0x364] ss:$8 sps:$4 sm:$0xff]  }
  0x38   : > { %769 = vmatpush1.bf16.msra.mxu1 %v3479_v3  ;;  %544 = vmatprep.subr.bf16.mxu0 %v3480_v5  ;;  %v3542_v3 = vld [vmem:[%s4906_s1 + $0x274] ss:$8 sps:$4 sm:$0xff]  }
  0x39   : > { %770 = vmatprep.subr.bf16.mxu1 %v3482_v6  ;;  %v3545_v5 = vld [vmem:[%s4906_s1 + $0x374] ss:$8 sps:$4 sm:$0xff]   ;;  %v3540_v6 = vld [vmem:[%s4906_s1 + $0x270] ss:$8 sps:$4 sm:$0xff]  }
  0x3b   : > { %545 = vmatpush1.bf16.msra.mxu0 %v3484_v13  ;;  %v3549_v13 = vld [vmem:[%s4906_s1 + $0x380] ss:$8 sps:$4 sm:$0xff]  }
  0x3c   : > { %771 = vmatpush1.bf16.msra.mxu1 %v3485_v14  ;;  %546 = vmatprep.subr.bf16.mxu0 %v3486_v16  ;;  %v3554_v14 = vld [vmem:[%s4906_s1 + $0x294] ss:$8 sps:$4 sm:$0xff]   ;;  %v3552_v16 = vld [vmem:[%s4906_s1 + $0x290] ss:$8 sps:$4 sm:$0xff]  }
  0x3d   : > { %772 = vmatprep.subr.bf16.mxu1 %v3488_v17  ;;  %v3555_v17 = vld [vmem:[%s4906_s1 + $0x390] ss:$8 sps:$4 sm:$0xff]  }
  0x3f   : > { %547 = vmatpush1.bf16.msra.mxu0 %v3490_v21  ;;  %v3561_v21 = vld [vmem:[%s4906_s1 + $0x3a0] ss:$8 sps:$4 sm:$0xff]  }
  0x40   : > { %773 = vmatpush1.bf16.msra.mxu1 %v3491_v22  ;;  %548 = vmatprep.subr.bf16.mxu0 %v3492_v24  ;;  %v3566_v22 = vld [vmem:[%s4906_s1 + $0x2b4] ss:$8 sps:$4 sm:$0xff]   ;;  %v1315_v24 = vcombine.high %v4090_v11, %v4090_v11 }
  0x41   : > { %774 = vmatprep.subr.bf16.mxu1 %v3494_v25  ;;  %v3564_v25 = vld [vmem:[%s4906_s1 + $0x2b0] ss:$8 sps:$4 sm:$0xff]  }
  0x42   : > { %v1322_v32 = vshll.u32 %v1315_v24, 16  ;;  %v3638_v24 = vld [vmem:[%s4906_s1 + $0x474] ss:$8 sps:$4 sm:$0xff]  }
  0x43   : > { %549 = vmatpush1.bf16.msra.mxu0 %v3496_v28  ;;  %v3567_v28 = vld [vmem:[%s4906_s1 + $0x3b0] ss:$8 sps:$4 sm:$0xff]  }
  0x44   : > { %775 = vmatpush1.bf16.msra.mxu1 %v3497_v29  ;;  %1003 = vmatprep.subr.bf16.mxu0 %v3500_v30  ;;  %v3572_v29 = vld [vmem:[%s4906_s1 + $0x2c4] ss:$8 sps:$4 sm:$0xff]  }
  0x45   : > { %1272 = vmatprep.subr.bf16.mxu1 %v3503_v31  ;;  %v3575_v30 = vld [vmem:[%s4906_s1 + $0x3c4] ss:$8 sps:$4 sm:$0xff]   ;;  %v1317_v31 = vshrl.u32 %v4090_v11, 16 }
  0x46   : > { %551 = vmatmul.mubr.bf16.vlgmr.msra.gmra.mrb[0].mxu0 %v348_v34  ;;  %v3573_v34 = vld [vmem:[%s4906_s1 + $0x3c0] ss:$8 sps:$4 sm:$0xff]  }
  0x47   : > { %777 = vmatmul.mubr.bf16.vlgmr.msra.gmra.mrb[0].mxu1 %v574_v35  ;;  %1004 = vmatpush1.bf16.msra.mxu0 %v3498_v36  ;;  %v3578_v35 = vld [vmem:[%s4906_s1 + $0x2d4] ss:$8 sps:$4 sm:$0xff]  }
  0x48   : > { %1273 = vmatpush1.bf16.msra.mxu1 %v3501_v37  ;;  %1005 = vmatprep.subr.bf16.mxu0 %v3506_v38  ;;  %v3581_v36 = vld [vmem:[%s4906_s1 + $0x3d4] ss:$8 sps:$4 sm:$0xff]   ;;  %v4310_v37 = vsel %vm4070_vm14, %v1317_v31, %v1322_v32  ;;  %v3576_v38 = vld [vmem:[%s4906_s1 + $0x2d0] ss:$8 sps:$4 sm:$0xff]   ;;  %v3647_v31 = vld [vmem:[%s4906_s1 + $0x584] ss:$8 sps:$4 sm:$0xff]  }
  0x49   : > { %1274 = vmatprep.subr.bf16.mxu1 %v3509_v39  ;;  %1035 = vmatprep.mubr.bf16.mxu0 %v840_v40  ;;  %v3579_v39 = vld [vmem:[%s4906_s1 + $0x3d0] ss:$8 sps:$4 sm:$0xff]   ;;  %v3584_v40 = vld [vmem:[%s4906_s1 + $0x2e4] ss:$8 sps:$4 sm:$0xff]   ;;  %v3642_v32 = vld [vmem:[%s4906_s1 + $0x480] ss:$8 sps:$4 sm:$0xff]  }
  0x4a   : > { %1304 = vmatprep.mubr.bf16.mxu1 %v1109_v41  ;;  %v3587_v41 = vld [vmem:[%s4906_s1 + $0x3e4] ss:$8 sps:$4 sm:$0xff]  }
  0x4b   : > { %1006 = vmatpush1.bf16.msra.mxu0 %v3504_v42  ;;  %v1358_v42 = vcombine.low %v4084_v8, %v4310_v37 }
  0x4c   : > { %1275 = vmatpush1.bf16.msra.mxu1 %v3507_v43  ;;  %1007 = vmatprep.subr.bf16.mxu0 %v3512_v44  ;;  %v3157_v43 = vcombine.high %v4047_v56, %v4090_v11  ;;  %v3582_v44 = vld [vmem:[%s4906_s1 + $0x2e0] ss:$8 sps:$4 sm:$0xff]   ;;  %v3593_v56 = vld [vmem:[%s4906_s1 + $0x3f4] ss:$8 sps:$4 sm:$0xff]  }
  0x4d   : > { %1276 = vmatprep.subr.bf16.mxu1 %v3515_v45  ;;  %v3585_v45 = vld [vmem:[%s4906_s1 + $0x3e0] ss:$8 sps:$4 sm:$0xff]   ;;  %v4341_v8 = vrot.slane %v1358_v42, %v4044_v55 }
  0x4e   : > { %v3657_v42 = vld [vmem:[%s4906_s1 + $0x5a0] ss:$8 sps:$4 sm:$0xff]  }
  0x4f   : > { %1008 = vmatpush1.bf16.msra.mxu0 %v3510_v46  ;;  %v3590_v46 = vld [vmem:[%s4906_s1 + $0x2f4] ss:$8 sps:$4 sm:$0xff]  }
  0x50   : > { %1277 = vmatpush1.bf16.msra.mxu1 %v3513_v47  ;;  %1009 = vmatprep.subr.bf16.mxu0 %v3518_v49  ;;  %v4344_v47 = vrot.slane %v3157_v43, %v4044_v55  ;;  %v3588_v49 = vld [vmem:[%s4906_s1 + $0x2f0] ss:$8 sps:$4 sm:$0xff]   ;;  %v3662_v43 = vld [vmem:[%s4906_s1 + $0x4b4] ss:$8 sps:$4 sm:$0xff]  }
  0x51   : > { %1278 = vmatprep.subr.bf16.mxu1 %v3521_v50  ;;  %v3591_v50 = vld [vmem:[%s4906_s1 + $0x3f0] ss:$8 sps:$4 sm:$0xff]  }
  0x53   : > { %1010 = vmatpush1.bf16.msra.mxu0 %v3516_v51  ;;  %v3596_v51 = vld [vmem:[%s4906_s1 + $0x404] ss:$8 sps:$4 sm:$0xff]  }
  0x54   : > { %1279 = vmatpush1.bf16.msra.mxu1 %v3519_v52  ;;  %1011 = vmatprep.subr.bf16.mxu0 %v3524_v53  ;;  %v3599_v52 = vld [vmem:[%s4906_s1 + $0x504] ss:$8 sps:$4 sm:$0xff]   ;;  %v1366_v53 = vcombine.high %v4341_v8, %v4341_v8 }
  0x55   : > { %1280 = vmatprep.subr.bf16.mxu1 %v3527_v54  ;;  %v1627_v54 = vcombine.high %v4344_v47, %v4344_v47 }
  0x57   : > { %1012 = vmatpush1.bf16.msra.mxu0 %v3522_v57  ;;  %v833_v57 = vrot.slane %v4123_v26, %v4044_v55  ;;  %v3605_v26 = vld [vmem:[%s4906_s1 + $0x514] ss:$8 sps:$4 sm:$0xff]  }
  0x58   : > { %1281 = vmatpush1.bf16.msra.mxu1 %v3525_v58  ;;  %1013 = vmatprep.subr.bf16.mxu0 %v3530_v59  ;;  %v1102_v58 = vrot.slane %v4126_v27, %v4044_v55  ;;  %v3594_v59 = vld [vmem:[%s4906_s1 + $0x400] ss:$8 sps:$4 sm:$0xff]   ;;  %v1380_v27 = vrot.slane %v1366_v53, %v4044_v55 }
  0x59   : > { %1282 = vmatprep.subr.bf16.mxu1 %v3533_v60  ;;  %v3597_v60 = vld [vmem:[%s4906_s1 + $0x500] ss:$8 sps:$4 sm:$0xff]  }
  0x5b   : > { %1014 = vmatpush1.bf16.msra.mxu0 %v3528_v61  ;;  %v3602_v61 = vld [vmem:[%s4906_s1 + $0x414] ss:$8 sps:$4 sm:$0xff]  }
  0x5c   : > { %1283 = vmatpush1.bf16.msra.mxu1 %v3531_v62  ;;  %1015 = vmatprep.subr.bf16.mxu0 %v3536_v63  ;;  %v1641_v62 = vrot.slane %v1627_v54, %v4044_v55  ;;  %v3600_v63 = vld [vmem:[%s4906_s1 + $0x410] ss:$8 sps:$4 sm:$0xff]   ;;  %v3669_v54 = vld [vmem:[%s4906_s1 + $0x5c0] ss:$8 sps:$4 sm:$0xff]  }
  0x5d   : > { %1284 = vmatprep.subr.bf16.mxu1 %v3539_v0  ;;  %v3603_v0 = vld [vmem:[%s4906_s1 + $0x510] ss:$8 sps:$4 sm:$0xff]  }
  0x5f   : > { %1016 = vmatpush1.bf16.msra.mxu0 %v3534_v1  ;;  %v3608_v1 = vld [vmem:[%s4906_s1 + $0x424] ss:$8 sps:$4 sm:$0xff]  }
  0x60   : > { %1285 = vmatpush1.bf16.msra.mxu1 %v3537_v2  ;;  %1017 = vmatprep.subr.bf16.mxu0 %v3542_v3  ;;  %v3611_v2 = vld [vmem:[%s4906_s1 + $0x524] ss:$8 sps:$4 sm:$0xff]   ;;  %v3606_v3 = vld [vmem:[%s4906_s1 + $0x420] ss:$8 sps:$4 sm:$0xff]  }
  0x61   : > { %1286 = vmatprep.subr.bf16.mxu1 %v3545_v5  ;;  %v3609_v5 = vld [vmem:[%s4906_s1 + $0x520] ss:$8 sps:$4 sm:$0xff]  }
  0x63   : > { %1018 = vmatpush1.bf16.msra.mxu0 %v3540_v6  ;;  %v3614_v6 = vld [vmem:[%s4906_s1 + $0x434] ss:$8 sps:$4 sm:$0xff]  }
  0x64   : > { %1287 = vmatpush1.bf16.msra.mxu1 %v3543_v7  ;;  %1019 = vmatprep.subr.bf16.mxu0 %v3548_v9  ;;  %v3617_v7 = vld [vmem:[%s4906_s1 + $0x534] ss:$8 sps:$4 sm:$0xff]   ;;  %v3612_v9 = vld [vmem:[%s4906_s1 + $0x430] ss:$8 sps:$4 sm:$0xff]  }
  0x65   : > { %1288 = vmatprep.subr.bf16.mxu1 %v3551_v10  ;;  %v3615_v10 = vld [vmem:[%s4906_s1 + $0x530] ss:$8 sps:$4 sm:$0xff]  }
  0x67   : > { %1020 = vmatpush1.bf16.msra.mxu0 %v3546_v12  ;;  %v3620_v12 = vld [vmem:[%s4906_s1 + $0x444] ss:$8 sps:$4 sm:$0xff]  }
  0x68   : > { %1289 = vmatpush1.bf16.msra.mxu1 %v3549_v13  ;;  %1021 = vmatprep.subr.bf16.mxu0 %v3554_v14  ;;  %v3623_v13 = vld [vmem:[%s4906_s1 + $0x544] ss:$8 sps:$4 sm:$0xff]   ;;  %v3618_v14 = vld [vmem:[%s4906_s1 + $0x440] ss:$8 sps:$4 sm:$0xff]  }
  0x69   : > { %1290 = vmatprep.subr.bf16.mxu1 %v3557_v15  ;;  %v3621_v15 = vld [vmem:[%s4906_s1 + $0x540] ss:$8 sps:$4 sm:$0xff]  }
  0x6b   : > { %1022 = vmatpush1.bf16.msra.mxu0 %v3552_v16  ;;  %v3626_v16 = vld [vmem:[%s4906_s1 + $0x454] ss:$8 sps:$4 sm:$0xff]  }
  0x6c   : > { %1291 = vmatpush1.bf16.msra.mxu1 %v3555_v17  ;;  %1023 = vmatprep.subr.bf16.mxu0 %v3560_v18  ;;  %v3629_v17 = vld [vmem:[%s4906_s1 + $0x554] ss:$8 sps:$4 sm:$0xff]   ;;  %v3624_v18 = vld [vmem:[%s4906_s1 + $0x450] ss:$8 sps:$4 sm:$0xff]  }
  0x6d   : > { %1292 = vmatprep.subr.bf16.mxu1 %v3563_v19  ;;  %v3627_v19 = vld [vmem:[%s4906_s1 + $0x550] ss:$8 sps:$4 sm:$0xff]  }
  0x6f   : > { %1024 = vmatpush1.bf16.msra.mxu0 %v3558_v20  ;;  %v3632_v20 = vld [vmem:[%s4906_s1 + $0x464] ss:$8 sps:$4 sm:$0xff]  }
  0x70   : > { %1293 = vmatpush1.bf16.msra.mxu1 %v3561_v21  ;;  %1025 = vmatprep.subr.bf16.mxu0 %v3566_v22  ;;  %v3635_v21 = vld [vmem:[%s4906_s1 + $0x564] ss:$8 sps:$4 sm:$0xff]   ;;  %v3630_v22 = vld [vmem:[%s4906_s1 + $0x460] ss:$8 sps:$4 sm:$0xff]  }
  0x71   : > { %1294 = vmatprep.subr.bf16.mxu1 %v3569_v23  ;;  %v3633_v23 = vld [vmem:[%s4906_s1 + $0x560] ss:$8 sps:$4 sm:$0xff]  }
  0x73   : > { %1026 = vmatpush1.bf16.msra.mxu0 %v3564_v25  ;;  %v3641_v25 = vld [vmem:[%s4906_s1 + $0x574] ss:$8 sps:$4 sm:$0xff]  }
  0x74   : > { %1295 = vmatpush1.bf16.msra.mxu1 %v3567_v28  ;;  %1027 = vmatprep.subr.bf16.mxu0 %v3572_v29  ;;  %v3636_v28 = vld [vmem:[%s4906_s1 + $0x470] ss:$8 sps:$4 sm:$0xff]  }
  0x75   : > { %1296 = vmatprep.subr.bf16.mxu1 %v3575_v30  ;;  %v3639_v29 = vld [vmem:[%s4906_s1 + $0x570] ss:$8 sps:$4 sm:$0xff]   ;;  %v3644_v30 = vld [vmem:[%s4906_s1 + $0x484] ss:$8 sps:$4 sm:$0xff]  }
  0x77   : > { %1028 = vmatpush1.bf16.msra.mxu0 %v3570_v33  ;;  %v3645_v33 = vld [vmem:[%s4906_s1 + $0x580] ss:$8 sps:$4 sm:$0xff]  }
  0x78   : > { %1297 = vmatpush1.bf16.msra.mxu1 %v3573_v34  ;;  %1029 = vmatprep.subr.bf16.mxu0 %v3578_v35  ;;  %v3650_v34 = vld [vmem:[%s4906_s1 + $0x494] ss:$8 sps:$4 sm:$0xff]  }
  0x79   : > { %1298 = vmatprep.subr.bf16.mxu1 %v3581_v36  ;;  %v3653_v35 = vld [vmem:[%s4906_s1 + $0x594] ss:$8 sps:$4 sm:$0xff]   ;;  %v3648_v36 = vld [vmem:[%s4906_s1 + $0x490] ss:$8 sps:$4 sm:$0xff]  }
  0x7b   : > { %1030 = vmatpush1.bf16.msra.mxu0 %v3576_v38  ;;  %v3651_v38 = vld [vmem:[%s4906_s1 + $0x590] ss:$8 sps:$4 sm:$0xff]  }
  0x7c   : > { %1299 = vmatpush1.bf16.msra.mxu1 %v3579_v39  ;;  %1031 = vmatprep.subr.bf16.mxu0 %v3584_v40  ;;  %v3656_v39 = vld [vmem:[%s4906_s1 + $0x4a4] ss:$8 sps:$4 sm:$0xff]  }
  0x7d   : > { %1300 = vmatprep.subr.bf16.mxu1 %v3587_v41  ;;  %v3659_v40 = vld [vmem:[%s4906_s1 + $0x5a4] ss:$8 sps:$4 sm:$0xff]   ;;  %v3654_v41 = vld [vmem:[%s4906_s1 + $0x4a0] ss:$8 sps:$4 sm:$0xff]  }
  0x7f   : > { %1032 = vmatpush1.bf16.msra.mxu0 %v3582_v44  ;;  %v3665_v44 = vld [vmem:[%s4906_s1 + $0x5b4] ss:$8 sps:$4 sm:$0xff]  }
  0x80   : > { %1301 = vmatpush1.bf16.msra.mxu1 %v3585_v45  ;;  %1033 = vmatprep.subr.bf16.mxu0 %v3590_v46  ;;  %v3660_v45 = vld [vmem:[%s4906_s1 + $0x4b0] ss:$8 sps:$4 sm:$0xff]  }
  0x81   : > { %1302 = vmatprep.subr.bf16.mxu1 %v3593_v56  ;;  %v3663_v46 = vld [vmem:[%s4906_s1 + $0x5b0] ss:$8 sps:$4 sm:$0xff]   ;;  %v3668_v56 = vld [vmem:[%s4906_s1 + $0x4c4] ss:$8 sps:$4 sm:$0xff]  }
  0x83   : > { %1034 = vmatpush1.bf16.msra.mxu0 %v3588_v49  ;;  %v3671_v49 = vld [vmem:[%s4906_s1 + $0x5c4] ss:$8 sps:$4 sm:$0xff]  }
  0x84   : > { %1303 = vmatpush1.bf16.msra.mxu1 %v3591_v50  ;;  %1543 = vmatprep.subr.bf16.mxu0 %v3596_v51  ;;  %v4513_v50 = vld.sshfl [vmem:[%s4025_s12 + $0xc] sm:$0x33 pattern:$0x75316420]  ;;  %v3666_v51 = vld [vmem:[%s4906_s1 + $0x4c0] ss:$8 sps:$4 sm:$0xff]  }
  0x85   : > { %1804 = vmatprep.subr.bf16.mxu1 %v3599_v52  ;;  %v2116_v52 = vcombine.high %v4513_v50, %v4513_v50  ;;  %v2118_v53 = vshrl.u32 %v4513_v50, 16  ;;  %v1888_v4 = vcombine.low %v4090_v11, %v4513_v50  ;;  %v3689_v11 = vld [vmem:[%s4906_s1 + $0x5f4] ss:$8 sps:$4 sm:$0xff]  }
  0x86   : > { %1036 = vmatmul.mubr.bf16.vlgmr.msra.gmra.mrb[4].mxu0 %v833_v57  ;;  %v3674_v57 = vld [vmem:[%s4906_s1 + $0x4d4] ss:$8 sps:$4 sm:$0xff]  }
  0x87   : > { %1305 = vmatmul.mubr.bf16.vlgmr.msra.gmra.mrb[4].mxu1 %v1102_v58  ;;  %1544 = vmatpush1.bf16.msra.mxu0 %v3594_v59  ;;  %v3677_v58 = vld [vmem:[%s4906_s1 + $0x5d4] ss:$8 sps:$4 sm:$0xff]   ;;  %v2123_v59 = vshll.u32 %v2116_v52, 16  ;;  %v3738_v52 = vld [vmem:[%s4906_s1 + $0x680] ss:$8 sps:$4 sm:$0xff]  }
  0x88   : > { %1805 = vmatpush1.bf16.msra.mxu1 %v3597_v60  ;;  %1545 = vmatprep.subr.bf16.mxu0 %v3602_v61  ;;  %v3672_v60 = vld [vmem:[%s4906_s1 + $0x4d0] ss:$8 sps:$4 sm:$0xff]  }
  0x89   : > { %1806 = vmatprep.subr.bf16.mxu1 %v3605_v26  ;;  %1575 = vmatprep.mubr.bf16.mxu0 %v1380_v27  ;;  %v2125_v61 = vsel %vm4070_vm14, %v2118_v53, %v2123_v59  ;;  %v3675_v26 = vld [vmem:[%s4906_s1 + $0x5d0] ss:$8 sps:$4 sm:$0xff]   ;;  %v3680_v27 = vld [vmem:[%s4906_s1 + $0x4e4] ss:$8 sps:$4 sm:$0xff]   ;;  %v3741_v53 = vld [vmem:[%s4906_s1 + $0x780] ss:$8 sps:$4 sm:$0xff]  }
  0x8a   : > { %1836 = vmatprep.mubr.bf16.mxu1 %v1641_v62  ;;  %v3683_v62 = vld [vmem:[%s4906_s1 + $0x5e4] ss:$8 sps:$4 sm:$0xff]   ;;  %v3747_v59 = vld [vmem:[%s4906_s1 + $0x790] ss:$8 sps:$4 sm:$0xff]  }
  0x8b   : > { %1546 = vmatpush1.bf16.msra.mxu0 %v3600_v63  ;;  %v2159_v63 = vcombine.low %v4310_v37, %v2125_v61  ;;  %v4560_v37 = vrot.slane %v1888_v4, %v4044_v55  ;;  %v3755_v61 = vld [vmem:[%s4906_s1 + $0x7a4] ss:$8 sps:$4 sm:$0xff]   ;;  %v3761_v4 = vld [vmem:[%s4906_s1 + $0x7b4] ss:$8 sps:$4 sm:$0xff]  }
  0x8c   : > { %1807 = vmatpush1.bf16.msra.mxu1 %v3603_v0  ;;  %1547 = vmatprep.subr.bf16.mxu0 %v3608_v1  ;;  %v3678_v0 = vld [vmem:[%s4906_s1 + $0x4e0] ss:$8 sps:$4 sm:$0xff]  }
  0x8d   : > { %1808 = vmatprep.subr.bf16.mxu1 %v3611_v2  ;;  %v3681_v1 = vld [vmem:[%s4906_s1 + $0x5e0] ss:$8 sps:$4 sm:$0xff]   ;;  %v3686_v2 = vld [vmem:[%s4906_s1 + $0x4f4] ss:$8 sps:$4 sm:$0xff]  }
  0x8f   : > { %1548 = vmatpush1.bf16.msra.mxu0 %v3606_v3  ;;  %v4563_v3 = vrot.slane %v2159_v63, %v4044_v55  ;;  %v3756_v63 = vld [vmem:[%s4906_s1 + $0x6b0] ss:$8 sps:$4 sm:$0xff]  }
  0x90   : > { %1809 = vmatpush1.bf16.msra.mxu1 %v3609_v5  ;;  %1549 = vmatprep.subr.bf16.mxu0 %v3614_v6  ;;  %v3684_v5 = vld [vmem:[%s4906_s1 + $0x4f0] ss:$8 sps:$4 sm:$0xff]  }
  0x91   : > { %1810 = vmatprep.subr.bf16.mxu1 %v3617_v7  ;;  %v3687_v6 = vld [vmem:[%s4906_s1 + $0x5f0] ss:$8 sps:$4 sm:$0xff]   ;;  %v3692_v7 = vld [vmem:[%s4906_s1 + $0x604] ss:$8 sps:$4 sm:$0xff]  }
  0x93   : > { %1550 = vmatpush1.bf16.msra.mxu0 %v3612_v9  ;;  %v3695_v9 = vld [vmem:[%s4906_s1 + $0x704] ss:$8 sps:$4 sm:$0xff]  }
  0x94   : > { %1811 = vmatpush1.bf16.msra.mxu1 %v3615_v10  ;;  %1551 = vmatprep.subr.bf16.mxu0 %v3620_v12  ;;  %v1896_v10 = vcombine.high %v4560_v37, %v4560_v37  ;;  %v2167_v12 = vcombine.high %v4563_v3, %v4563_v3 }
  0x95   : > { %1812 = vmatprep.subr.bf16.mxu1 %v3623_v13  ;;  %v1373_v13 = vrot.slane %v4341_v8, %v4044_v55  ;;  %v3701_v8 = vld [vmem:[%s4906_s1 + $0x714] ss:$8 sps:$4 sm:$0xff]  }
  0x97   : > { %1552 = vmatpush1.bf16.msra.mxu0 %v3618_v14  ;;  %v3690_v14 = vld [vmem:[%s4906_s1 + $0x600] ss:$8 sps:$4 sm:$0xff]  }
  0x98   : > { %1813 = vmatpush1.bf16.msra.mxu1 %v3621_v15  ;;  %1553 = vmatprep.subr.bf16.mxu0 %v3626_v16  ;;  %v1634_v15 = vrot.slane %v4344_v47, %v4044_v55  ;;  %v3693_v16 = vld [vmem:[%s4906_s1 + $0x700] ss:$8 sps:$4 sm:$0xff]   ;;  %v2181_v47 = vrot.slane %v2167_v12, %v4044_v55 }
  0x99   : > { %1814 = vmatprep.subr.bf16.mxu1 %v3629_v17  ;;  %v3698_v17 = vld [vmem:[%s4906_s1 + $0x614] ss:$8 sps:$4 sm:$0xff]   ;;  %v3834_v12 = vld.sshfl [vmem:[%s4025_s12 + $0x8] sm:$0x33 pattern:$0x75316420] }
  0x9b   : > { %1554 = vmatpush1.bf16.msra.mxu0 %v3624_v18  ;;  %v1910_v18 = vrot.slane %v1896_v10, %v4044_v55  ;;  %v3771_v10 = vld [vmem:[%s4906_s1 + $0x7d0] ss:$8 sps:$4 sm:$0xff]  }
  0x9c   : > { %1815 = vmatpush1.bf16.msra.mxu1 %v3627_v19  ;;  %1555 = vmatprep.subr.bf16.mxu0 %v3632_v20  ;;  %v3696_v19 = vld [vmem:[%s4906_s1 + $0x610] ss:$8 sps:$4 sm:$0xff]  }
  0x9d   : > { %1816 = vmatprep.subr.bf16.mxu1 %v3635_v21  ;;  %v3699_v20 = vld [vmem:[%s4906_s1 + $0x710] ss:$8 sps:$4 sm:$0xff]   ;;  %v3704_v21 = vld [vmem:[%s4906_s1 + $0x624] ss:$8 sps:$4 sm:$0xff]  }
  0x9f   : > { %1556 = vmatpush1.bf16.msra.mxu0 %v3630_v22  ;;  %v3707_v22 = vld [vmem:[%s4906_s1 + $0x724] ss:$8 sps:$4 sm:$0xff]  }
  0xa0   : > { %1817 = vmatpush1.bf16.msra.mxu1 %v3633_v23  ;;  %1557 = vmatprep.subr.bf16.mxu0 %v3638_v24  ;;  %v3702_v23 = vld [vmem:[%s4906_s1 + $0x620] ss:$8 sps:$4 sm:$0xff]  }
  0xa1   : > { %1818 = vmatprep.subr.bf16.mxu1 %v3641_v25  ;;  %v3705_v24 = vld [vmem:[%s4906_s1 + $0x720] ss:$8 sps:$4 sm:$0xff]   ;;  %v3710_v25 = vld [vmem:[%s4906_s1 + $0x634] ss:$8 sps:$4 sm:$0xff]  }
  0xa3   : > { %1558 = vmatpush1.bf16.msra.mxu0 %v3636_v28  ;;  %v3713_v28 = vld [vmem:[%s4906_s1 + $0x734] ss:$8 sps:$4 sm:$0xff]  }
  0xa4   : > { %1819 = vmatpush1.bf16.msra.mxu1 %v3639_v29  ;;  %1559 = vmatprep.subr.bf16.mxu0 %v3644_v30  ;;  %v3708_v29 = vld [vmem:[%s4906_s1 + $0x630] ss:$8 sps:$4 sm:$0xff]  }
  0xa5   : > { %1820 = vmatprep.subr.bf16.mxu1 %v3647_v31  ;;  %v3711_v30 = vld [vmem:[%s4906_s1 + $0x730] ss:$8 sps:$4 sm:$0xff]   ;;  %v3716_v31 = vld [vmem:[%s4906_s1 + $0x644] ss:$8 sps:$4 sm:$0xff]  }
  0xa7   : > { %1560 = vmatpush1.bf16.msra.mxu0 %v3642_v32  ;;  %v3719_v32 = vld [vmem:[%s4906_s1 + $0x744] ss:$8 sps:$4 sm:$0xff]  }
  0xa8   : > { %1821 = vmatpush1.bf16.msra.mxu1 %v3645_v33  ;;  %1561 = vmatprep.subr.bf16.mxu0 %v3650_v34  ;;  %v3714_v33 = vld [vmem:[%s4906_s1 + $0x640] ss:$8 sps:$4 sm:$0xff]  }
  0xa9   : > { %1822 = vmatprep.subr.bf16.mxu1 %v3653_v35  ;;  %v3717_v34 = vld [vmem:[%s4906_s1 + $0x740] ss:$8 sps:$4 sm:$0xff]   ;;  %v3722_v35 = vld [vmem:[%s4906_s1 + $0x654] ss:$8 sps:$4 sm:$0xff]  }
  0xab   : > { %1562 = vmatpush1.bf16.msra.mxu0 %v3648_v36  ;;  %v3725_v36 = vld [vmem:[%s4906_s1 + $0x754] ss:$8 sps:$4 sm:$0xff]  }
  0xac   : > { %1823 = vmatpush1.bf16.msra.mxu1 %v3651_v38  ;;  %1563 = vmatprep.subr.bf16.mxu0 %v3656_v39  ;;  %v3720_v38 = vld [vmem:[%s4906_s1 + $0x650] ss:$8 sps:$4 sm:$0xff]  }
  0xad   : > { %1824 = vmatprep.subr.bf16.mxu1 %v3659_v40  ;;  %v3723_v39 = vld [vmem:[%s4906_s1 + $0x750] ss:$8 sps:$4 sm:$0xff]   ;;  %v3728_v40 = vld [vmem:[%s4906_s1 + $0x664] ss:$8 sps:$4 sm:$0xff]  }
  0xaf   : > { %1564 = vmatpush1.bf16.msra.mxu0 %v3654_v41  ;;  %v3731_v41 = vld [vmem:[%s4906_s1 + $0x764] ss:$8 sps:$4 sm:$0xff]  }
  0xb0   : > { %1825 = vmatpush1.bf16.msra.mxu1 %v3657_v42  ;;  %1565 = vmatprep.subr.bf16.mxu0 %v3662_v43  ;;  %v3726_v42 = vld [vmem:[%s4906_s1 + $0x660] ss:$8 sps:$4 sm:$0xff]  }
  0xb1   : > { %1826 = vmatprep.subr.bf16.mxu1 %v3665_v44  ;;  %v3729_v43 = vld [vmem:[%s4906_s1 + $0x760] ss:$8 sps:$4 sm:$0xff]   ;;  %v3734_v44 = vld [vmem:[%s4906_s1 + $0x674] ss:$8 sps:$4 sm:$0xff]  }
  0xb3   : > { %1566 = vmatpush1.bf16.msra.mxu0 %v3660_v45  ;;  %v3737_v45 = vld [vmem:[%s4906_s1 + $0x774] ss:$8 sps:$4 sm:$0xff]  }
  0xb4   : > { %1827 = vmatpush1.bf16.msra.mxu1 %v3663_v46  ;;  %1567 = vmatprep.subr.bf16.mxu0 %v3668_v56  ;;  %v3732_v46 = vld [vmem:[%s4906_s1 + $0x670] ss:$8 sps:$4 sm:$0xff]  }
  0xb5   : > { %1828 = vmatprep.subr.bf16.mxu1 %v3671_v49  ;;  %v3735_v56 = vld [vmem:[%s4906_s1 + $0x770] ss:$8 sps:$4 sm:$0xff]   ;;  %v3740_v49 = vld [vmem:[%s4906_s1 + $0x684] ss:$8 sps:$4 sm:$0xff]  }
  0xb7   : > { %1568 = vmatpush1.bf16.msra.mxu0 %v3666_v51  ;;  %v3743_v51 = vld [vmem:[%s4906_s1 + $0x784] ss:$8 sps:$4 sm:$0xff]  }
  0xb8   : > { %1829 = vmatpush1.bf16.msra.mxu1 %v3669_v54  ;;  %1569 = vmatprep.subr.bf16.mxu0 %v3674_v57  ;;  %v3746_v54 = vld [vmem:[%s4906_s1 + $0x694] ss:$8 sps:$4 sm:$0xff]  }
  0xb9   : > { %1830 = vmatprep.subr.bf16.mxu1 %v3677_v58  ;;  %v3749_v57 = vld [vmem:[%s4906_s1 + $0x794] ss:$8 sps:$4 sm:$0xff]   ;;  %v3744_v58 = vld [vmem:[%s4906_s1 + $0x690] ss:$8 sps:$4 sm:$0xff]  }
  0xbb   : > { %1570 = vmatpush1.bf16.msra.mxu0 %v3672_v60  ;;  %v3752_v60 = vld [vmem:[%s4906_s1 + $0x6a4] ss:$8 sps:$4 sm:$0xff]  }
  0xbc   : > { %1831 = vmatpush1.bf16.msra.mxu1 %v3675_v26  ;;  %1571 = vmatprep.subr.bf16.mxu0 %v3680_v27  ;;  %v3750_v26 = vld [vmem:[%s4906_s1 + $0x6a0] ss:$8 sps:$4 sm:$0xff]  }
  0xbd   : > { %1832 = vmatprep.subr.bf16.mxu1 %v3683_v62  ;;  %v3753_v27 = vld [vmem:[%s4906_s1 + $0x7a0] ss:$8 sps:$4 sm:$0xff]   ;;  %v3758_v62 = vld [vmem:[%s4906_s1 + $0x6b4] ss:$8 sps:$4 sm:$0xff]  }
  0xbf   : > { %1572 = vmatpush1.bf16.msra.mxu0 %v3678_v0  ;;  %v3759_v0 = vld [vmem:[%s4906_s1 + $0x7b0] ss:$8 sps:$4 sm:$0xff]  }
  0xc0   : > { %1833 = vmatpush1.bf16.msra.mxu1 %v3681_v1  ;;  %1573 = vmatprep.subr.bf16.mxu0 %v3686_v2  ;;  %v3764_v1 = vld [vmem:[%s4906_s1 + $0x6c4] ss:$8 sps:$4 sm:$0xff]  }
  0xc1   : > { %1834 = vmatprep.subr.bf16.mxu1 %v3689_v11  ;;  %v3767_v2 = vld [vmem:[%s4906_s1 + $0x7c4] ss:$8 sps:$4 sm:$0xff]   ;;  %v3762_v11 = vld [vmem:[%s4906_s1 + $0x6c0] ss:$8 sps:$4 sm:$0xff]  }
  0xc3   : > { %1574 = vmatpush1.bf16.msra.mxu0 %v3684_v5  ;;  %v3765_v5 = vld [vmem:[%s4906_s1 + $0x7c0] ss:$8 sps:$4 sm:$0xff]  }
  0xc4   : > { %1835 = vmatpush1.bf16.msra.mxu1 %v3687_v6  ;;  %2073 = vmatprep.subr.bf16.mxu0 %v3692_v7  ;;  %v3770_v6 = vld [vmem:[%s4906_s1 + $0x6d4] ss:$8 sps:$4 sm:$0xff]  }
  0xc5   : > { %2344 = vmatprep.subr.bf16.mxu1 %v3695_v9  ;;  %v3773_v7 = vld [vmem:[%s4906_s1 + $0x7d4] ss:$8 sps:$4 sm:$0xff]   ;;  %v3768_v9 = vld [vmem:[%s4906_s1 + $0x6d0] ss:$8 sps:$4 sm:$0xff]  }
  0xc6   : > { %1576 = vmatmul.mubr.bf16.vlgmr.msra.gmra.mrb[8].mxu0 %v1373_v13  ;;  %v3352_v13 = vcombine.high %v3834_v12, %v4513_v50  ;;  %v3777_v50 = vld [vmem:[%s4906_s1 + $0x7e0] ss:$8 sps:$4 sm:$0xff]  }
  0xc7   : > { %1837 = vmatmul.mubr.bf16.vlgmr.msra.gmra.mrb[8].mxu1 %v1634_v15  ;;  %2074 = vmatpush1.bf16.msra.mxu0 %v3690_v14  ;;  %v3776_v14 = vld [vmem:[%s4906_s1 + $0x6e4] ss:$8 sps:$4 sm:$0xff]  }
  0xc8   : > { %2345 = vmatpush1.bf16.msra.mxu1 %v3693_v16  ;;  %2075 = vmatprep.subr.bf16.mxu0 %v3698_v17  ;;  %v3779_v15 = vld [vmem:[%s4906_s1 + $0x7e4] ss:$8 sps:$4 sm:$0xff]   ;;  %v3774_v16 = vld [vmem:[%s4906_s1 + $0x6e0] ss:$8 sps:$4 sm:$0xff]   ;;  %v4764_v17 = vrot.slane %v3352_v13, %v4044_v55 }
  0xc9   : > { %2346 = vmatprep.subr.bf16.mxu1 %v3701_v8  ;;  %2105 = vmatprep.mubr.bf16.mxu0 %v1910_v18  ;;  %v3782_v8 = vld [vmem:[%s4906_s1 + $0x6f4] ss:$8 sps:$4 sm:$0xff]  }
  0xca   : > { %2376 = vmatprep.mubr.bf16.mxu1 %v2181_v47  ;;  %v3785_v18 = vld [vmem:[%s4906_s1 + $0x7f4] ss:$8 sps:$4 sm:$0xff]   ;;  %v3780_v47 = vld [vmem:[%s4906_s1 + $0x6f0] ss:$8 sps:$4 sm:$0xff]  }
  0xcb   : > { %2076 = vmatpush1.bf16.msra.mxu0 %v3696_v19  ;;  %v3783_v19 = vld [vmem:[%s4906_s1 + $0x7f0] ss:$8 sps:$4 sm:$0xff]  }
  0xcc   : > { %2347 = vmatpush1.bf16.msra.mxu1 %v3699_v20  ;;  %2077 = vmatprep.subr.bf16.mxu0 %v3704_v21  ;;  %v2428_v20 = vcombine.high %v4764_v17, %v4764_v17  ;;  %v3788_v21 = vld [vmem:[%s4906_s1 + $0x804] ss:$8 sps:$4 sm:$0xff]  }
  0xcd   : > { %2348 = vmatprep.subr.bf16.mxu1 %v3707_v22  ;;  %v1903_v22 = vrot.slane %v4560_v37, %v4044_v55  ;;  %v3789_v37 = vld [vmem:[%s4906_s1 + $0x810] ss:$8 sps:$4 sm:$0xff]  }
  0xcf   : > { %2078 = vmatpush1.bf16.msra.mxu0 %v3702_v23  ;;  %v2174_v23 = vrot.slane %v4563_v3, %v4044_v55  ;;  %v3794_v3 = vld [vmem:[%s4906_s1 + $0x824] ss:$8 sps:$4 sm:$0xff]  }
  0xd0   : > { %2349 = vmatpush1.bf16.msra.mxu1 %v3705_v24  ;;  %2079 = vmatprep.subr.bf16.mxu0 %v3710_v25  ;;  %v3786_v24 = vld [vmem:[%s4906_s1 + $0x800] ss:$8 sps:$4 sm:$0xff]   ;;  %v2442_v25 = vrot.slane %v2428_v20, %v4044_v55 }
  0xd1   : > { %2350 = vmatprep.subr.bf16.mxu1 %v3713_v28  ;;  %v3791_v28 = vld [vmem:[%s4906_s1 + $0x814] ss:$8 sps:$4 sm:$0xff]  }
  0xd3   : > { %2080 = vmatpush1.bf16.msra.mxu0 %v3708_v29  ;;  %v3792_v29 = vld [vmem:[%s4906_s1 + $0x820] ss:$8 sps:$4 sm:$0xff]  }
  0xd4   : > { %2351 = vmatpush1.bf16.msra.mxu1 %v3711_v30  ;;  %2081 = vmatprep.subr.bf16.mxu0 %v3716_v31  ;;  %v3797_v30 = vld [vmem:[%s4906_s1 + $0x834] ss:$8 sps:$4 sm:$0xff]   ;;  %v3795_v31 = vld [vmem:[%s4906_s1 + $0x830] ss:$8 sps:$4 sm:$0xff]  }
  0xd5   : > { %2352 = vmatprep.subr.bf16.mxu1 %v3719_v32  ;;  %v3800_v32 = vld [vmem:[%s4906_s1 + $0x844] ss:$8 sps:$4 sm:$0xff]  }
  0xd7   : > { %2082 = vmatpush1.bf16.msra.mxu0 %v3714_v33  ;;  %v3798_v33 = vld [vmem:[%s4906_s1 + $0x840] ss:$8 sps:$4 sm:$0xff]  }
  0xd8   : > { %2353 = vmatpush1.bf16.msra.mxu1 %v3717_v34  ;;  %2083 = vmatprep.subr.bf16.mxu0 %v3722_v35  ;;  %v3803_v34 = vld [vmem:[%s4906_s1 + $0x854] ss:$8 sps:$4 sm:$0xff]   ;;  %v3801_v35 = vld [vmem:[%s4906_s1 + $0x850] ss:$8 sps:$4 sm:$0xff]  }
  0xd9   : > { %2354 = vmatprep.subr.bf16.mxu1 %v3725_v36  ;;  %v3806_v36 = vld [vmem:[%s4906_s1 + $0x864] ss:$8 sps:$4 sm:$0xff]  }
  0xdb   : > { %2084 = vmatpush1.bf16.msra.mxu0 %v3720_v38 }
  0xdc   : > { %2355 = vmatpush1.bf16.msra.mxu1 %v3723_v39  ;;  %2085 = vmatprep.subr.bf16.mxu0 %v3728_v40 }
  0xdd   : > { %2356 = vmatprep.subr.bf16.mxu1 %v3731_v41 }
  0xdf   : > { %2086 = vmatpush1.bf16.msra.mxu0 %v3726_v42 }
  0xe0   : > { %2357 = vmatpush1.bf16.msra.mxu1 %v3729_v43  ;;  %2087 = vmatprep.subr.bf16.mxu0 %v3734_v44 }
  0xe1   : > { %2358 = vmatprep.subr.bf16.mxu1 %v3737_v45  ;;  %v3804_v45 = vld [vmem:[%s4906_s1 + $0x860] ss:$8 sps:$4 sm:$0xff]  }
  0xe3   : > { %2088 = vmatpush1.bf16.msra.mxu0 %v3732_v46 }
  0xe4   : > { %2359 = vmatpush1.bf16.msra.mxu1 %v3735_v56  ;;  %2089 = vmatprep.subr.bf16.mxu0 %v3740_v49  ;;  %v3809_v49 = vld [vmem:[%s4906_s1 + $0x874] ss:$8 sps:$4 sm:$0xff]  }
  0xe5   : > { %2360 = vmatprep.subr.bf16.mxu1 %v3743_v51 }
  0xe7   : > { %2090 = vmatpush1.bf16.msra.mxu0 %v3738_v52  ;;  %v3807_v52 = vld [vmem:[%s4906_s1 + $0x870] ss:$8 sps:$4 sm:$0xff]  }
  0xe8   : > { %2361 = vmatpush1.bf16.msra.mxu1 %v3741_v53  ;;  %2091 = vmatprep.subr.bf16.mxu0 %v3746_v54  ;;  %v3812_v53 = vld [vmem:[%s4906_s1 + $0x884] ss:$8 sps:$4 sm:$0xff]   ;;  %v3810_v54 = vld [vmem:[%s4906_s1 + $0x880] ss:$8 sps:$4 sm:$0xff]  }
  0xe9   : > { %2362 = vmatprep.subr.bf16.mxu1 %v3749_v57  ;;  %v3815_v57 = vld [vmem:[%s4906_s1 + $0x894] ss:$8 sps:$4 sm:$0xff]  }
  0xeb   : > { %2092 = vmatpush1.bf16.msra.mxu0 %v3744_v58  ;;  %v3813_v58 = vld [vmem:[%s4906_s1 + $0x890] ss:$8 sps:$4 sm:$0xff]  }
  0xec   : > { %2363 = vmatpush1.bf16.msra.mxu1 %v3747_v59  ;;  %2093 = vmatprep.subr.bf16.mxu0 %v3752_v60  ;;  %v3818_v59 = vld [vmem:[%s4906_s1 + $0x8a4] ss:$8 sps:$4 sm:$0xff]   ;;  %v3816_v60 = vld [vmem:[%s4906_s1 + $0x8a0] ss:$8 sps:$4 sm:$0xff]  }
  0xed   : > { %2364 = vmatprep.subr.bf16.mxu1 %v3755_v61  ;;  %v3821_v61 = vld [vmem:[%s4906_s1 + $0x8b4] ss:$8 sps:$4 sm:$0xff]  }
  0xef   : > { %2094 = vmatpush1.bf16.msra.mxu0 %v3750_v26  ;;  %v3819_v26 = vld [vmem:[%s4906_s1 + $0x8b0] ss:$8 sps:$4 sm:$0xff]  }
  0xf0   : > { %2365 = vmatpush1.bf16.msra.mxu1 %v3753_v27  ;;  %2095 = vmatprep.subr.bf16.mxu0 %v3758_v62  ;;  %v3824_v27 = vld [vmem:[%s4906_s1 + $0x8c4] ss:$8 sps:$4 sm:$0xff]   ;;  %v3822_v62 = vld [vmem:[%s4906_s1 + $0x8c0] ss:$8 sps:$4 sm:$0xff]  }
  0xf1   : > { %2366 = vmatprep.subr.bf16.mxu1 %v3761_v4  ;;  %v3827_v4 = vld [vmem:[%s4906_s1 + $0x8d4] ss:$8 sps:$4 sm:$0xff]  }
  0xf3   : > { %2096 = vmatpush1.bf16.msra.mxu0 %v3756_v63  ;;  %v3825_v63 = vld [vmem:[%s4906_s1 + $0x8d0] ss:$8 sps:$4 sm:$0xff]  }
  0xf4   : > { %2367 = vmatpush1.bf16.msra.mxu1 %v3759_v0  ;;  %2097 = vmatprep.subr.bf16.mxu0 %v3764_v1  ;;  %v3830_v0 = vld [vmem:[%s4906_s1 + $0x8e4] ss:$8 sps:$4 sm:$0xff]   ;;  %v3828_v1 = vld [vmem:[%s4906_s1 + $0x8e0] ss:$8 sps:$4 sm:$0xff]  }
  0xf5   : > { %2368 = vmatprep.subr.bf16.mxu1 %v3767_v2  ;;  %v3833_v2 = vld [vmem:[%s4906_s1 + $0x8f4] ss:$8 sps:$4 sm:$0xff]  }
  0xf7   : > { %2098 = vmatpush1.bf16.msra.mxu0 %v3762_v11  ;;  %v3831_v11 = vld [vmem:[%s4906_s1 + $0x8f0] ss:$8 sps:$4 sm:$0xff]  }
  0xf8   : > { %2369 = vmatpush1.bf16.msra.mxu1 %v3765_v5  ;;  %2099 = vmatprep.subr.bf16.mxu0 %v3770_v6  ;;  %v2435_v5 = vrot.slane %v4764_v17, %v4044_v55 }
  0xf9   : > { %2370 = vmatprep.subr.bf16.mxu1 %v3773_v7 }
  0xfb   : > { %2100 = vmatpush1.bf16.msra.mxu0 %v3768_v9 }
  0xfc   : > { %2371 = vmatpush1.bf16.msra.mxu1 %v3771_v10  ;;  %2101 = vmatprep.subr.bf16.mxu0 %v3776_v14 }
  0xfd   : > { %2372 = vmatprep.subr.bf16.mxu1 %v3779_v15 }
  0xff   : > { %2102 = vmatpush1.bf16.msra.mxu0 %v3774_v16 }
 0x100   : > { %2373 = vmatpush1.bf16.msra.mxu1 %v3777_v50  ;;  %2103 = vmatprep.subr.bf16.mxu0 %v3782_v8 }
 0x101   : > { %2374 = vmatprep.subr.bf16.mxu1 %v3785_v18 }
 0x103   : > { %2104 = vmatpush1.bf16.msra.mxu0 %v3780_v47 }
 0x104   : > { %2375 = vmatpush1.bf16.msra.mxu1 %v3783_v19  ;;  %2605 = vmatprep.subr.bf16.mxu0 %v3788_v21 }
 0x106   : > { %2106 = vmatmul.mubr.bf16.vlgmr.msra.gmra.mrb[12].mxu0 %v1903_v22 }
 0x107   : > { %2377 = vmatmul.mubr.bf16.vlgmr.msra.gmra.mrb[12].mxu1 %v2174_v23  ;;  %2606 = vmatpush1.bf16.msra.mxu0 %v3786_v24 }
 0x108   : > { %2637 = vmatprep.mubr.bf16.mxu0 %v2442_v25  ;;  %2607 = vmatprep.subr.bf16.mxu0 %v3791_v28 }
 0x10b   : > { %2608 = vmatpush1.bf16.msra.mxu0 %v3789_v37 }
 0x10c   : > { %2609 = vmatprep.subr.bf16.mxu0 %v3794_v3 }
 0x10f   : > { %2610 = vmatpush1.bf16.msra.mxu0 %v3792_v29 }
 0x110   : > { %2611 = vmatprep.subr.bf16.mxu0 %v3797_v30 }
 0x113   : > { %2612 = vmatpush1.bf16.msra.mxu0 %v3795_v31 }
 0x114   : > { %2613 = vmatprep.subr.bf16.mxu0 %v3800_v32 }
 0x117   : > { %2614 = vmatpush1.bf16.msra.mxu0 %v3798_v33 }
 0x118   : > { %2615 = vmatprep.subr.bf16.mxu0 %v3803_v34 }
 0x119   : > { %v552_v38 = vpop.f32.mrb[0].mxu0 }
 0x11a   : > { %v778_v39 = vpop.f32.mrb[0].mxu1  ;;  %v554_v41 = vpop.f32.mrb[1].mxu0 }
 0x11b   : > { %v779_v40 = vadd.f32 %v778_v39, %v552_v38  ;;  %v780_v42 = vpop.f32.mrb[1].mxu1  ;;  %v556_v44 = vpop.f32.mrb[2].mxu0  ;;  %2616 = vmatpush1.bf16.msra.mxu0 %v3801_v35 }
 0x11c   : > { %v781_v43 = vadd.f32 %v780_v42, %v554_v41  ;;  %v782_v46 = vpop.f32.mrb[2].mxu1  ;;  %v557_v56 = vpop.f32.mrb[3].mxu0  ;;  %2617 = vmatprep.subr.bf16.mxu0 %v3806_v36  ;;  %v3844_v42 = vmov 1983009808   ;;  %v2662_v44 = vld [vmem:[%s208_s17] sm:$0x3] }
 0x11d   : > { %v783_v51 = vpop.f32.mrb[3].mxu1  ;;  %v2664_v46 = vunpack.c.l.bf16 %v2662_v44 }
 0x11f   : > { %2618 = vmatpush1.bf16.msra.mxu0 %v3804_v45  ;;  %v2663_v45 = vld [vmem:[%s208_s17 + $0x2] sm:$0x3] }
 0x120   : > { %2619 = vmatprep.subr.bf16.mxu0 %v3809_v49  ;;  %v2665_v56 = vunpack.c.l.bf16 %v2663_v45 }
 0x122   : > { %v2668_v51 = vcombine.low %v2664_v46, %v2665_v56 }
 0x123   : > { %2620 = vmatpush1.bf16.msra.mxu0 %v3807_v52 }
 0x124   : > { %2621 = vmatprep.subr.bf16.mxu0 %v3812_v53  ;;  %v2652_v53 = vsub.s32 0, %v4017_v48 }
 0x127   : > { %2622 = vmatpush1.bf16.msra.mxu0 %v3810_v54  ;;  %v2648_v54 = vld [vmem:[%s4907_s2] sm:$0x3] }
 0x128   : > { %2623 = vmatprep.subr.bf16.mxu0 %v3815_v57  ;;  %v2656_v57 = vsub.s32 1, %v4017_v48 }
 0x12b   : > { %2624 = vmatpush1.bf16.msra.mxu0 %v3813_v58 }
 0x12c   : > { %2625 = vmatprep.subr.bf16.mxu0 %v3818_v59  ;;  %v2653_v59 = vrot.slane %v2648_v54, %v2652_v53 }
 0x12f   : > { %2626 = vmatpush1.bf16.msra.mxu0 %v3816_v60 }
 0x130   : > { %2627 = vmatprep.subr.bf16.mxu0 %v3821_v61  ;;  %v2657_v61 = vrot.slane %v2648_v54, %v2656_v57 }
 0x133   : > { %2628 = vmatpush1.bf16.msra.mxu0 %v3819_v26 }
 0x134   : > { %2629 = vmatprep.subr.bf16.mxu0 %v3824_v27 }
 0x137   : > { %2630 = vmatpush1.bf16.msra.mxu0 %v3822_v62 }
 0x138   : > { %2631 = vmatprep.subr.bf16.mxu0 %v3827_v4 }
 0x13b   : > { %2632 = vmatpush1.bf16.msra.mxu0 %v3825_v63 }
 0x13c   : > { %2633 = vmatprep.subr.bf16.mxu0 %v3830_v0 }
 0x13f   : > { %2634 = vmatpush1.bf16.msra.mxu0 %v3828_v1 }
 0x140   : > { %2635 = vmatprep.subr.bf16.mxu0 %v3833_v2 }
 0x143   : > { %2636 = vmatpush1.bf16.msra.mxu0 %v3831_v11 }
 0x146   : > { %2638 = vmatmul.mubr.bf16.vlgmr.msra.gmra.mrb[16].mxu0 %v2435_v5 }
 0x159   : > { %v1037_v6 = vpop.f32.mrb[4].mxu0 }
 0x15a   : > { %v1306_v7 = vpop.f32.mrb[4].mxu1  ;;  %v1044_v9 = vadd.f32 %v1037_v6, %v779_v40  ;;  %v1039_v10 = vpop.f32.mrb[5].mxu0 }
 0x15b   : > { %v1308_v12 = vpop.f32.mrb[5].mxu1  ;;  %v1045_v13 = vadd.f32 %v1039_v10, %v781_v43  ;;  %v1041_v14 = vpop.f32.mrb[6].mxu0  ;;  %v2670_v43 = vunpack.c.l.s4 %v3844_v42 }
 0x15c   : > { %v1310_v15 = vpop.f32.mrb[6].mxu1  ;;  %v1313_v16 = vadd.f32 %v1306_v7, %v1044_v9  ;;  %v1042_v50 = vpop.f32.mrb[7].mxu0 }
 0x15d   : > { %v1311_v8 = vpop.f32.mrb[7].mxu1  ;;  %v1314_v18 = vadd.f32 %v1308_v12, %v1045_v13  ;;  %v2671_v49 = vunpack.c.0.s8 %v2670_v43 }
 0x15f   : > { %v2674_v52 = vsub.s32 %v2671_v49, %v4017_v48 }
 0x161   : > { %v2675_v58 = vrot.slane %v2668_v51, %v2674_v52 }
 0x163   : > { %v2676_v4 = vcombine.high %v2675_v58, %v2675_v58 }
 0x199   : > { %v1577_v47 = vpop.f32.mrb[8].mxu0 }
 0x19a   : > { %v1838_v19 = vpop.f32.mrb[8].mxu1  ;;  %v1584_v20 = vadd.f32 %v1577_v47, %v1313_v16  ;;  %v1579_v21 = vpop.f32.mrb[9].mxu0 }
 0x19b   : > { %v1840_v22 = vpop.f32.mrb[9].mxu1  ;;  %v1585_v17 = vadd.f32 %v1579_v21, %v1314_v18  ;;  %v1581_v23 = vpop.f32.mrb[10].mxu0 }
 0x19c   : > { %v1842_v24 = vpop.f32.mrb[10].mxu1  ;;  %v1845_v25 = vadd.f32 %v1838_v19, %v1584_v20  ;;  %v1582_v28 = vpop.f32.mrb[11].mxu0 }
 0x19d   : > { %v1843_v37 = vpop.f32.mrb[11].mxu1  ;;  %v1846_v3 = vadd.f32 %v1840_v22, %v1585_v17 }
 0x1d9   : > { %v2107_v29 = vpop.f32.mrb[12].mxu0 }
 0x1da   : > { %v2378_v30 = vpop.f32.mrb[12].mxu1  ;;  %v2114_v31 = vadd.f32 %v2107_v29, %v1845_v25  ;;  %v2109_v32 = vpop.f32.mrb[13].mxu0 }
 0x1db   : > { %v2380_v33 = vpop.f32.mrb[13].mxu1  ;;  %v2115_v34 = vadd.f32 %v2109_v32, %v1846_v3  ;;  %v2111_v35 = vpop.f32.mrb[14].mxu0 }
 0x1dc   : > { %v2382_v36 = vpop.f32.mrb[14].mxu1  ;;  %v2385_v38 = vadd.f32 %v2378_v30, %v2114_v31  ;;  %v2112_v39 = vpop.f32.mrb[15].mxu0 }
 0x1dd   : > { %v2383_v40 = vpop.f32.mrb[15].mxu1  ;;  %v2386_v41 = vadd.f32 %v2380_v33, %v2115_v34 }
 0x219   : > { %v2639_v60 = vpop.f32.mrb[16].mxu0 }
 0x21a   : > { %v2646_v26 = vadd.f32 %v2639_v60, %v2385_v38  ;;  %v2641_v27 = vpop.f32.mrb[17].mxu0 }
 0x21b   : > { %v2647_v62 = vadd.f32 %v2641_v27, %v2386_v41  ;;  %v2643_v63 = vpop.f32.mrb[18].mxu0 }
 0x21c   : > { %v2660_v0 = vadd.f32 %v2653_v59, %v2646_v26  ;;  %v2644_v1 = vpop.f32.mrb[19].mxu0 }
 0x21d   : > { %v2661_v2 = vadd.f32 %v2657_v61, %v2647_v62 }
 0x21e   : > { %v2679_v11 = vadd.f32 %v2675_v58, %v2660_v0 }
 0x21f   : > { %v2680_v5 = vadd.f32 %v2676_v4, %v2661_v2 }
 0x220   : > { %v2681_v6 = vmax.f32 %v2679_v11, 0.0 }
 0x221   : > { %v2682_v7 = vmax.f32 %v2680_v5, 0.0 }
 0x223   : > { %v2685_v9 = vcombine.low %v2681_v6, %v2682_v7 }
 0x225   : > { %v2692_v10 = vrot.slane %v2685_v9, %v2674_v52 }
 0x227   : > { %v2693_v48 = vcombine.high %v2692_v10, %v2692_v10  ;;  %v2700_v12 = vrot.slane %v2692_v10, %v2674_v52 }
 0x229   : > { %v2701_v13 = vcombine.high %v2700_v12, %v2700_v12  ;;  %v2708_v14 = vrot.slane %v2693_v48, %v2674_v52 }
 0x22b   : > { %v2709_v15 = vcombine.high %v2708_v14, %v2708_v14  ;;  %v3385_v16 = vpack.c.bf16 %v2701_v13, %v2700_v12 }
 0x22d   : > { %v2729_v50 = vrot.slane %v3385_v16, %v4044_v55  ;;  %v3386_v8 = vpack.c.bf16 %v2709_v15, %v2708_v14 }
 0x22f   : > { %v2744_v18 = vrot.slane %v3386_v8, %v4044_v55  ;;  %3387 = vst.sshfl [vmem:[%s212_s22] sm:$0x5 pattern:$0x73625140] %v2729_v50 }
 0x231   : > { %3388 = vst.sshfl [vmem:[%s212_s22 + $0x2] sm:$0x5 pattern:$0x73625140] %v2744_v18 }
 0x232 PF: > { %s14_s15 = sadd.s32 1, %s3841_s15  }
 0x233   : > { %p11_p4 = scmp.ge.s32.totalorder %s14_s15, 4  }
 0x235   :  { %13 = sbr.rel (!%p11_p4) target bundleno = 1 (0x1), region = 77 }

// kernel: resnet_forward.28
= control target key start
LH: loop header
LB: loop body
LE: loop exit
PB: predicated region body
PF: predicated region fallthrough
CT: control target
= control target key end

     0   :  { %s3789_s12 = smov 0   ;;  %s4817_s0 = inlined_call_operand.vmem [shape: bf16[2,4,4,256], index: 0, kind: input, shape index: {}]   ;;  %s4818_s1 = inlined_call_operand.vmem [shape: bf16[9,256,256], index: 1, kind: input, shape index: {}]   ;;  %s4819_s2 = inlined_call_operand.vmem [shape: f32[1,256], index: 2, kind: input, shape index: {}]   ;;  %s4820_s3 = inlined_call_operand.vmem [shape: bf16[2,2,2,256], index: 3, kind: output, shape index: {}]  }
   0x1 LB: > { %s2746_s13 = sadd.s32 4294967295, %s3765_s12   ;;  %p2750_p0 = scmp.ge.s32.totalorder %s3765_s12, 1  ;;  %s3765_s12 = sphi %s3789_s12, %s13_s12  }
   0x2   : > { %p137_p1 = scmp.lt.s32.totalorder %s3765_s12, 3 }
   0x4   : > { %p138_p2 = pnand %p2750_p0, %p137_p1 }
   0x5   : > { %v3326_v0 = vld [vmem:[%s4818_s1 + $0x104] ss:$8 sps:$4 sm:$0xff] (!%p138_p2)   ;;  %v3330_v2 = vld [vmem:[%s4818_s1 + $0x100] ss:$8 sps:$4 sm:$0xff] (!%p138_p2)   ;;  %v3332_v4 = vld [vmem:[%s4818_s1 + $0x114] ss:$8 sps:$4 sm:$0xff] (!%p138_p2)   ;;  %v293_v41 = vlaneseq (!%p138_p2) }
   0x6   : > { %141 = sbr.rel (%p138_p2) target bundleno = 560 (0x230), region = 32  ;;  %v3328_v1 = vld [vmem:[%s4818_s1 + $0x4] ss:$8 sps:$4 sm:$0xff] (!%p138_p2)   ;;  %474 = vmatprep.subr.bf16.mxu0 (!%p138_p2), %v3326_v0  ;;  %v3331_v3 = vld [vmem:[%s4818_s1] ss:$8 sps:$4 sm:$0xff] (!%p138_p2)   ;;  %p160_p3 = scmp.lt.s32.totalorder (!%p138_p2), %s2746_s13, 1 }
   0x7   : > { %700 = vmatprep.subr.bf16.mxu1 (!%p138_p2), %v3328_v1  ;;  %475 = vmatpush1.bf16.msra.mxu0 (!%p138_p2), %v3330_v2  ;;  %v3334_v5 = vld [vmem:[%s4818_s1 + $0x14] ss:$8 sps:$4 sm:$0xff] (!%p138_p2)   ;;  %v3336_v6 = vld [vmem:[%s4818_s1 + $0x110] ss:$8 sps:$4 sm:$0xff] (!%p138_p2)   ;;  %v3338_v8 = vld [vmem:[%s4818_s1 + $0x124] ss:$8 sps:$4 sm:$0xff] (!%p138_p2)  }
   0x8   : > { %701 = vmatpush1.bf16.msra.mxu1 (!%p138_p2), %v3331_v3  ;;  %476 = vmatprep.subr.bf16.mxu0 (!%p138_p2), %v3332_v4  ;;  %v3337_v7 = vld [vmem:[%s4818_s1 + $0x10] ss:$8 sps:$4 sm:$0xff] (!%p138_p2)   ;;  %v3340_v9 = vld [vmem:[%s4818_s1 + $0x24] ss:$8 sps:$4 sm:$0xff] (!%p138_p2)   ;;  %v3342_v10 = vld [vmem:[%s4818_s1 + $0x120] ss:$8 sps:$4 sm:$0xff] (!%p138_p2)  }
   0x9   : > { %702 = vmatprep.subr.bf16.mxu1 (!%p138_p2), %v3334_v5  ;;  %v3343_v11 = vld [vmem:[%s4818_s1 + $0x20] ss:$8 sps:$4 sm:$0xff] (!%p138_p2)   ;;  %v3344_v12 = vld [vmem:[%s4818_s1 + $0x134] ss:$8 sps:$4 sm:$0xff] (!%p138_p2)   ;;  %v3348_v14 = vld [vmem:[%s4818_s1 + $0x130] ss:$8 sps:$4 sm:$0xff] (!%p138_p2)  }
   0xa   : > { %v3346_v13 = vld [vmem:[%s4818_s1 + $0x34] ss:$8 sps:$4 sm:$0xff] (!%p138_p2)   ;;  %v3349_v15 = vld [vmem:[%s4818_s1 + $0x30] ss:$8 sps:$4 sm:$0xff] (!%p138_p2)   ;;  %v3350_v16 = vld [vmem:[%s4818_s1 + $0x144] ss:$8 sps:$4 sm:$0xff] (!%p138_p2)  }
   0xb   : > { %477 = vmatpush1.bf16.msra.mxu0 (!%p138_p2), %v3336_v6  ;;  %v3352_v17 = vld [vmem:[%s4818_s1 + $0x44] ss:$8 sps:$4 sm:$0xff] (!%p138_p2)   ;;  %v3354_v18 = vld [vmem:[%s4818_s1 + $0x140] ss:$8 sps:$4 sm:$0xff] (!%p138_p2)   ;;  %v3356_v20 = vld [vmem:[%s4818_s1 + $0x154] ss:$8 sps:$4 sm:$0xff] (!%p138_p2)  }
   0xc   : > { %703 = vmatpush1.bf16.msra.mxu1 (!%p138_p2), %v3337_v7  ;;  %478 = vmatprep.subr.bf16.mxu0 (!%p138_p2), %v3338_v8  ;;  %v3355_v19 = vld [vmem:[%s4818_s1 + $0x40] ss:$8 sps:$4 sm:$0xff] (!%p138_p2)   ;;  %v3358_v21 = vld [vmem:[%s4818_s1 + $0x54] ss:$8 sps:$4 sm:$0xff] (!%p138_p2)   ;;  %v3360_v22 = vld [vmem:[%s4818_s1 + $0x150] ss:$8 sps:$4 sm:$0xff] (!%p138_p2)  }
   0xd   : > { %704 = vmatprep.subr.bf16.mxu1 %v3340_v9  ;;  %v3361_v23 = vld [vmem:[%s4818_s1 + $0x50] ss:$8 sps:$4 sm:$0xff]   ;;  %v3362_v24 = vld [vmem:[%s4818_s1 + $0x164] ss:$8 sps:$4 sm:$0xff]   ;;  %v3366_v26 = vld [vmem:[%s4818_s1 + $0x160] ss:$8 sps:$4 sm:$0xff]  }
   0xe   : > { %v3364_v25 = vld [vmem:[%s4818_s1 + $0x64] ss:$8 sps:$4 sm:$0xff]   ;;  %v3367_v27 = vld [vmem:[%s4818_s1 + $0x60] ss:$8 sps:$4 sm:$0xff]   ;;  %v3368_v28 = vld [vmem:[%s4818_s1 + $0x174] ss:$8 sps:$4 sm:$0xff]  }
   0xf   : > { %479 = vmatpush1.bf16.msra.mxu0 %v3342_v10  ;;  %v3370_v29 = vld [vmem:[%s4818_s1 + $0x74] ss:$8 sps:$4 sm:$0xff]   ;;  %v3372_v30 = vld [vmem:[%s4818_s1 + $0x170] ss:$8 sps:$4 sm:$0xff]   ;;  %v3374_v32 = vld [vmem:[%s4818_s1 + $0x184] ss:$8 sps:$4 sm:$0xff]  }
  0x10   : > { %705 = vmatpush1.bf16.msra.mxu1 %v3343_v11  ;;  %480 = vmatprep.subr.bf16.mxu0 %v3344_v12  ;;  %v3373_v31 = vld [vmem:[%s4818_s1 + $0x70] ss:$8 sps:$4 sm:$0xff]   ;;  %v3376_v33 = vld [vmem:[%s4818_s1 + $0x84] ss:$8 sps:$4 sm:$0xff]   ;;  %v3378_v34 = vld [vmem:[%s4818_s1 + $0x180] ss:$8 sps:$4 sm:$0xff]  }
  0x11   : > { %706 = vmatprep.subr.bf16.mxu1 %v3346_v13  ;;  %v3379_v35 = vld [vmem:[%s4818_s1 + $0x80] ss:$8 sps:$4 sm:$0xff]   ;;  %s4824_s13 = smov (!%p160_p3, %s2746_s13), 1  ;;  %v3380_v36 = vld [vmem:[%s4818_s1 + $0x194] ss:$8 sps:$4 sm:$0xff]   ;;  %v3936_v48 = vshrl.u32 %v293_v41, 7 }
  0x12   : > { %v3382_v37 = vld [vmem:[%s4818_s1 + $0x94] ss:$8 sps:$4 sm:$0xff]   ;;  %vm223_vm0 = vsmask.f32 256  ;;  %v3384_v38 = vld [vmem:[%s4818_s1 + $0x190] ss:$8 sps:$4 sm:$0xff]  }
  0x13   : > { %481 = vmatpush1.bf16.msra.mxu0 %v3348_v14  ;;  %vm224_vm1 = vsmask.f32 1284  ;;  %v3767_v39 = vmov 1966171168   ;;  %v3385_v42 = vld [vmem:[%s4818_s1 + $0x90] ss:$8 sps:$4 sm:$0xff]  }
  0x14   : > { %707 = vmatpush1.bf16.msra.mxu1 %v3349_v15  ;;  %482 = vmatprep.subr.bf16.mxu0 %v3350_v16  ;;  %v291_v40 = vunpack.c.l.s4 %v3767_v39  ;;  %v3386_v43 = vld [vmem:[%s4818_s1 + $0x1a4] ss:$8 sps:$4 sm:$0xff]   ;;  %s3315_s21 = sshll.u32 %s4824_s13, 4  ;;  %vm226_vm2 = vsmask.f32 2312  ;;  %vm225_vm7 = vmor %vm223_vm0, %vm224_vm1 }
  0x15   : > { %708 = vmatprep.subr.bf16.mxu1 %v3352_v17  ;;  %v3388_v44 = vld [vmem:[%s4818_s1 + $0xa4] ss:$8 sps:$4 sm:$0xff]   ;;  %vm228_vm3 = vsmask.f32 3340  ;;  %vm230_vm4 = vsmask.f32 4368  ;;  %s3944_s5 = scalar_lea.vmem %s4817_s0, %s3315_s21  ;;  %vm227_vm9 = vmor %vm225_vm7, %vm226_vm2 }
  0x16   : > { %v3390_v45 = vld [vmem:[%s4818_s1 + $0x1a0] ss:$8 sps:$4 sm:$0xff]   ;;  %v292_v47 = vunpack.c.0.s8 %v291_v40  ;;  %v3392_v49 = vld [vmem:[%s4818_s1 + $0x1b4] ss:$8 sps:$4 sm:$0xff]   ;;  %vm232_vm5 = vsmask.f32 5396  ;;  %vm229_vm10 = vmor %vm227_vm9, %vm228_vm3 }
  0x17   : > { %483 = vmatpush1.bf16.msra.mxu0 %v3354_v18  ;;  %v3391_v46 = vld [vmem:[%s4818_s1 + $0xa0] ss:$8 sps:$4 sm:$0xff]   ;;  %v3394_v50 = vld [vmem:[%s4818_s1 + $0xb4] ss:$8 sps:$4 sm:$0xff]   ;;  %vm234_vm6 = vsmask.f32 6424  ;;  %vm231_vm11 = vmor %vm229_vm10, %vm230_vm4 }
  0x18   : > { %709 = vmatpush1.bf16.msra.mxu1 %v3355_v19  ;;  %484 = vmatprep.subr.bf16.mxu0 %v3356_v20  ;;  %v3396_v51 = vld [vmem:[%s4818_s1 + $0x1b0] ss:$8 sps:$4 sm:$0xff]   ;;  %vm236_vm8 = vsmask.f32 7452  ;;  %v3398_v53 = vld [vmem:[%s4818_s1 + $0x1c4] ss:$8 sps:$4 sm:$0xff]   ;;  %v3963_v55 = vsub.s32 %v292_v47, %v3936_v48  ;;  %vm233_vm12 = vmor %vm231_vm11, %vm232_vm5 }
  0x19   : > { %710 = vmatprep.subr.bf16.mxu1 %v3358_v21  ;;  %v3397_v52 = vld [vmem:[%s4818_s1 + $0xb0] ss:$8 sps:$4 sm:$0xff]   ;;  %v2754_v54 = vld.sshfl [vmem:[%s3944_s5] sm:$0x33 pattern:$0x75316420]  ;;  %vm235_vm13 = vmor %vm233_vm12, %vm234_vm6 }
  0x1a   : > { %v3966_v56 = vld.sshfl [vmem:[%s3944_s5 + $0x4] sm:$0x33 pattern:$0x75316420]  ;;  %v221_v57 = vcombine.high %v2754_v54, %v2754_v54  ;;  %v239_v60 = vshrl.u32 %v2754_v54, 16  ;;  %vm3989_vm14 = vmor %vm235_vm13, %vm236_vm8 }
  0x1b   : > { %485 = vmatpush1.bf16.msra.mxu0 %v3360_v22  ;;  %v3400_v58 = vld [vmem:[%s4818_s1 + $0xc4] ss:$8 sps:$4 sm:$0xff]   ;;  %v222_v59 = vcombine.high %v3966_v56, %v3966_v56  ;;  %v248_v61 = vshrl.u32 %v3966_v56, 16  ;;  %v515_v62 = vcombine.low %v2754_v54, %v3966_v56  ;;  %v3402_v0 = vld [vmem:[%s4818_s1 + $0x1c0] ss:$8 sps:$4 sm:$0xff]   ;;  %v2886_v19 = vcombine.high %v2754_v54, %v3966_v56 }
  0x1c   : > { %711 = vmatpush1.bf16.msra.mxu1 %v3361_v23  ;;  %486 = vmatprep.subr.bf16.mxu0 %v3362_v24  ;;  %v244_v63 = vshll.u32 %v221_v57, 16  ;;  %v3403_v3 = vld [vmem:[%s4818_s1 + $0xc0] ss:$8 sps:$4 sm:$0xff]   ;;  %v3404_v5 = vld [vmem:[%s4818_s1 + $0x1d4] ss:$8 sps:$4 sm:$0xff]  }
  0x1d   : > { %712 = vmatprep.subr.bf16.mxu1 %v3364_v25  ;;  %v253_v1 = vshll.u32 %v222_v59, 16  ;;  %v3983_v2 = vrot.slane %v515_v62, %v3963_v55  ;;  %v3406_v6 = vld [vmem:[%s4818_s1 + $0xd4] ss:$8 sps:$4 sm:$0xff]   ;;  %v3408_v13 = vld [vmem:[%s4818_s1 + $0x1d0] ss:$8 sps:$4 sm:$0xff]  }
  0x1e   : > { %v246_v7 = vsel %vm3989_vm14, %v239_v60, %v244_v63  ;;  %v4009_v11 = vld.sshfl [vmem:[%s3944_s5 + $0x8] sm:$0x33 pattern:$0x75316420]  ;;  %v3409_v14 = vld [vmem:[%s4818_s1 + $0xd0] ss:$8 sps:$4 sm:$0xff]  }
  0x1f   : > { %487 = vmatpush1.bf16.msra.mxu0 %v3366_v26  ;;  %v4003_v8 = vsel %vm3989_vm14, %v248_v61, %v253_v1  ;;  %v523_v9 = vcombine.high %v3983_v2, %v3983_v2  ;;  %v3410_v16 = vld [vmem:[%s4818_s1 + $0x1e4] ss:$8 sps:$4 sm:$0xff]   ;;  %v1043_v20 = vcombine.low %v3966_v56, %v4009_v11  ;;  %v3414_v21 = vld [vmem:[%s4818_s1 + $0x1e0] ss:$8 sps:$4 sm:$0xff]   ;;  %v3416_v24 = vld [vmem:[%s4818_s1 + $0x1f4] ss:$8 sps:$4 sm:$0xff]   ;;  %v4042_v26 = vrot.slane %v2886_v19, %v3963_v55 }
  0x20   : > { %713 = vmatpush1.bf16.msra.mxu1 %v3367_v27  ;;  %488 = vmatprep.subr.bf16.mxu0 %v3368_v28  ;;  %v289_v10 = vcombine.low %v246_v7, %v4003_v8  ;;  %v3412_v17 = vld [vmem:[%s4818_s1 + $0xe4] ss:$8 sps:$4 sm:$0xff]   ;;  %v3415_v22 = vld [vmem:[%s4818_s1 + $0xe0] ss:$8 sps:$4 sm:$0xff]   ;;  %v3418_v25 = vld [vmem:[%s4818_s1 + $0xf4] ss:$8 sps:$4 sm:$0xff]  }
  0x21   : > { %714 = vmatprep.subr.bf16.mxu1 %v3370_v29  ;;  %v537_v12 = vrot.slane %v523_v9, %v3963_v55  ;;  %v4045_v27 = vrot.slane %v1043_v20, %v3963_v55  ;;  %v3420_v28 = vld [vmem:[%s4818_s1 + $0x1f0] ss:$8 sps:$4 sm:$0xff]   ;;  %v3433_v39 = vld [vmem:[%s4818_s1 + $0x314] ss:$8 sps:$4 sm:$0xff]   ;;  %v3437_v47 = vld [vmem:[%s4818_s1 + $0x320] ss:$8 sps:$4 sm:$0xff]  }
  0x22   : > { %v296_v15 = vrot.slane %v289_v10, %v3963_v55  ;;  %v3421_v29 = vld [vmem:[%s4818_s1 + $0xf0] ss:$8 sps:$4 sm:$0xff]   ;;  %v3451_v54 = vld [vmem:[%s4818_s1 + $0x344] ss:$8 sps:$4 sm:$0xff]   ;;  %v3446_v57 = vld [vmem:[%s4818_s1 + $0x240] ss:$8 sps:$4 sm:$0xff]  }
  0x23   : > { %489 = vmatpush1.bf16.msra.mxu0 %v3372_v30  ;;  %732 = vmatprep.mubr.bf16.mxu1 %v537_v12  ;;  %v3424_v30 = vld [vmem:[%s4818_s1 + $0x204] ss:$8 sps:$4 sm:$0xff]   ;;  %v3454_v59 = vld [vmem:[%s4818_s1 + $0x254] ss:$8 sps:$4 sm:$0xff]   ;;  %v3452_v61 = vld [vmem:[%s4818_s1 + $0x250] ss:$8 sps:$4 sm:$0xff]  }
  0x24   : > { %715 = vmatpush1.bf16.msra.mxu1 %v3373_v31  ;;  %490 = vmatprep.subr.bf16.mxu0 %v3374_v32  ;;  %v297_v18 = vcombine.high %v296_v15, %v296_v15  ;;  %v3427_v31 = vld [vmem:[%s4818_s1 + $0x304] ss:$8 sps:$4 sm:$0xff]   ;;  %v782_v32 = vcombine.high %v4042_v26, %v4042_v26  ;;  %v3457_v60 = vld [vmem:[%s4818_s1 + $0x354] ss:$8 sps:$4 sm:$0xff]   ;;  %v3455_v62 = vld [vmem:[%s4818_s1 + $0x350] ss:$8 sps:$4 sm:$0xff]  }
  0x25   : > { %716 = vmatprep.subr.bf16.mxu1 %v3376_v33  ;;  %v1051_v33 = vcombine.high %v4045_v27, %v4045_v27  ;;  %v3460_v63 = vld [vmem:[%s4818_s1 + $0x264] ss:$8 sps:$4 sm:$0xff]   ;;  %v3458_v1 = vld [vmem:[%s4818_s1 + $0x260] ss:$8 sps:$4 sm:$0xff]   ;;  %v3467_v7 = vld [vmem:[%s4818_s1 + $0x370] ss:$8 sps:$4 sm:$0xff]  }
  0x26   : > { %v311_v23 = vrot.slane %v297_v18, %v3963_v55  ;;  %v796_v40 = vrot.slane %v782_v32, %v3963_v55  ;;  %v3472_v9 = vld [vmem:[%s4818_s1 + $0x284] ss:$8 sps:$4 sm:$0xff]   ;;  %v3470_v12 = vld [vmem:[%s4818_s1 + $0x280] ss:$8 sps:$4 sm:$0xff]  }
  0x27   : > { %491 = vmatpush1.bf16.msra.mxu0 %v3378_v34  ;;  %v304_v34 = vrot.slane %v296_v15, %v3963_v55  ;;  %v1065_v41 = vrot.slane %v1051_v33, %v3963_v55  ;;  %v3475_v10 = vld [vmem:[%s4818_s1 + $0x384] ss:$8 sps:$4 sm:$0xff]   ;;  %v3481_v15 = vld [vmem:[%s4818_s1 + $0x394] ss:$8 sps:$4 sm:$0xff]   ;;  %v3482_v20 = vld [vmem:[%s4818_s1 + $0x2a0] ss:$8 sps:$4 sm:$0xff]  }
  0x28   : > { %717 = vmatpush1.bf16.msra.mxu1 %v3379_v35  ;;  %492 = vmatprep.subr.bf16.mxu0 %v3380_v36  ;;  %v530_v35 = vrot.slane %v3983_v2, %v3963_v55  ;;  %v3422_v36 = vld [vmem:[%s4818_s1 + $0x200] ss:$8 sps:$4 sm:$0xff]   ;;  %v3484_v18 = vld [vmem:[%s4818_s1 + $0x2a4] ss:$8 sps:$4 sm:$0xff]  }
  0x29   : > { %718 = vmatprep.subr.bf16.mxu1 %v3382_v37  ;;  %506 = vmatprep.mubr.bf16.mxu0 %v311_v23  ;;  %v3425_v37 = vld [vmem:[%s4818_s1 + $0x300] ss:$8 sps:$4 sm:$0xff]   ;;  %v3487_v19 = vld [vmem:[%s4818_s1 + $0x3a4] ss:$8 sps:$4 sm:$0xff]   ;;  %v3493_v23 = vld [vmem:[%s4818_s1 + $0x3b4] ss:$8 sps:$4 sm:$0xff]  }
  0x2a   : > { %v3461_v2 = vld [vmem:[%s4818_s1 + $0x360] ss:$8 sps:$4 sm:$0xff]  }
  0x2b   : > { %493 = vmatpush1.bf16.msra.mxu0 %v3384_v38  ;;  %v3430_v38 = vld [vmem:[%s4818_s1 + $0x214] ss:$8 sps:$4 sm:$0xff]   ;;  %v3494_v33 = vld [vmem:[%s4818_s1 + $0x2c0] ss:$8 sps:$4 sm:$0xff]  }
  0x2c   : > { %719 = vmatpush1.bf16.msra.mxu1 %v3385_v42  ;;  %494 = vmatprep.subr.bf16.mxu0 %v3386_v43  ;;  %v3428_v42 = vld [vmem:[%s4818_s1 + $0x210] ss:$8 sps:$4 sm:$0xff]  }
  0x2d   : > { %720 = vmatprep.subr.bf16.mxu1 %v3388_v44  ;;  %v3431_v43 = vld [vmem:[%s4818_s1 + $0x310] ss:$8 sps:$4 sm:$0xff]   ;;  %v3436_v44 = vld [vmem:[%s4818_s1 + $0x224] ss:$8 sps:$4 sm:$0xff]  }
  0x2f   : > { %495 = vmatpush1.bf16.msra.mxu0 %v3390_v45  ;;  %v3439_v45 = vld [vmem:[%s4818_s1 + $0x324] ss:$8 sps:$4 sm:$0xff]  }
  0x30   : > { %721 = vmatpush1.bf16.msra.mxu1 %v3391_v46  ;;  %496 = vmatprep.subr.bf16.mxu0 %v3392_v49  ;;  %v3434_v46 = vld [vmem:[%s4818_s1 + $0x220] ss:$8 sps:$4 sm:$0xff]   ;;  %v3442_v49 = vld [vmem:[%s4818_s1 + $0x234] ss:$8 sps:$4 sm:$0xff]  }
  0x31   : > { %722 = vmatprep.subr.bf16.mxu1 %v3394_v50  ;;  %v3445_v50 = vld [vmem:[%s4818_s1 + $0x334] ss:$8 sps:$4 sm:$0xff]  }
  0x33   : > { %497 = vmatpush1.bf16.msra.mxu0 %v3396_v51  ;;  %v3440_v51 = vld [vmem:[%s4818_s1 + $0x230] ss:$8 sps:$4 sm:$0xff]  }
  0x34   : > { %723 = vmatpush1.bf16.msra.mxu1 %v3397_v52  ;;  %498 = vmatprep.subr.bf16.mxu0 %v3398_v53  ;;  %v3443_v52 = vld [vmem:[%s4818_s1 + $0x330] ss:$8 sps:$4 sm:$0xff]   ;;  %v3448_v53 = vld [vmem:[%s4818_s1 + $0x244] ss:$8 sps:$4 sm:$0xff]  }
  0x35   : > { %724 = vmatprep.subr.bf16.mxu1 %v3400_v58  ;;  %v3449_v58 = vld [vmem:[%s4818_s1 + $0x340] ss:$8 sps:$4 sm:$0xff]  }
  0x37   : > { %499 = vmatpush1.bf16.msra.mxu0 %v3402_v0  ;;  %v3463_v0 = vld [vmem:[%s4818_s1 + $0x364] ss:$8 sps:$4 sm:$0xff]  }
  0x38   : > { %725 = vmatpush1.bf16.msra.mxu1 %v3403_v3  ;;  %500 = vmatprep.subr.bf16.mxu0 %v3404_v5  ;;  %v3466_v3 = vld [vmem:[%s4818_s1 + $0x274] ss:$8 sps:$4 sm:$0xff]  }
  0x39   : > { %726 = vmatprep.subr.bf16.mxu1 %v3406_v6  ;;  %v3469_v5 = vld [vmem:[%s4818_s1 + $0x374] ss:$8 sps:$4 sm:$0xff]   ;;  %v3464_v6 = vld [vmem:[%s4818_s1 + $0x270] ss:$8 sps:$4 sm:$0xff]  }
  0x3b   : > { %501 = vmatpush1.bf16.msra.mxu0 %v3408_v13  ;;  %v3473_v13 = vld [vmem:[%s4818_s1 + $0x380] ss:$8 sps:$4 sm:$0xff]  }
  0x3c   : > { %727 = vmatpush1.bf16.msra.mxu1 %v3409_v14  ;;  %502 = vmatprep.subr.bf16.mxu0 %v3410_v16  ;;  %v3478_v14 = vld [vmem:[%s4818_s1 + $0x294] ss:$8 sps:$4 sm:$0xff]   ;;  %v3476_v16 = vld [vmem:[%s4818_s1 + $0x290] ss:$8 sps:$4 sm:$0xff]  }
  0x3d   : > { %728 = vmatprep.subr.bf16.mxu1 %v3412_v17  ;;  %v3479_v17 = vld [vmem:[%s4818_s1 + $0x390] ss:$8 sps:$4 sm:$0xff]  }
  0x3f   : > { %503 = vmatpush1.bf16.msra.mxu0 %v3414_v21  ;;  %v3485_v21 = vld [vmem:[%s4818_s1 + $0x3a0] ss:$8 sps:$4 sm:$0xff]  }
  0x40   : > { %729 = vmatpush1.bf16.msra.mxu1 %v3415_v22  ;;  %504 = vmatprep.subr.bf16.mxu0 %v3416_v24  ;;  %v3490_v22 = vld [vmem:[%s4818_s1 + $0x2b4] ss:$8 sps:$4 sm:$0xff]   ;;  %v1271_v24 = vcombine.high %v4009_v11, %v4009_v11 }
  0x41   : > { %730 = vmatprep.subr.bf16.mxu1 %v3418_v25  ;;  %v3488_v25 = vld [vmem:[%s4818_s1 + $0x2b0] ss:$8 sps:$4 sm:$0xff]  }
  0x42   : > { %v1278_v32 = vshll.u32 %v1271_v24, 16  ;;  %v3562_v24 = vld [vmem:[%s4818_s1 + $0x474] ss:$8 sps:$4 sm:$0xff]  }
  0x43   : > { %505 = vmatpush1.bf16.msra.mxu0 %v3420_v28  ;;  %v3491_v28 = vld [vmem:[%s4818_s1 + $0x3b0] ss:$8 sps:$4 sm:$0xff]  }
  0x44   : > { %731 = vmatpush1.bf16.msra.mxu1 %v3421_v29  ;;  %959 = vmatprep.subr.bf16.mxu0 %v3424_v30  ;;  %v3496_v29 = vld [vmem:[%s4818_s1 + $0x2c4] ss:$8 sps:$4 sm:$0xff]  }
  0x45   : > { %1228 = vmatprep.subr.bf16.mxu1 %v3427_v31  ;;  %v3499_v30 = vld [vmem:[%s4818_s1 + $0x3c4] ss:$8 sps:$4 sm:$0xff]   ;;  %v1273_v31 = vshrl.u32 %v4009_v11, 16 }
  0x46   : > { %507 = vmatmul.mubr.bf16.vlgmr.msra.gmra.mrb[0].mxu0 %v304_v34  ;;  %v3497_v34 = vld [vmem:[%s4818_s1 + $0x3c0] ss:$8 sps:$4 sm:$0xff]  }
  0x47   : > { %733 = vmatmul.mubr.bf16.vlgmr.msra.gmra.mrb[0].mxu1 %v530_v35  ;;  %960 = vmatpush1.bf16.msra.mxu0 %v3422_v36  ;;  %v3502_v35 = vld [vmem:[%s4818_s1 + $0x2d4] ss:$8 sps:$4 sm:$0xff]  }
  0x48   : > { %1229 = vmatpush1.bf16.msra.mxu1 %v3425_v37  ;;  %961 = vmatprep.subr.bf16.mxu0 %v3430_v38  ;;  %v3505_v36 = vld [vmem:[%s4818_s1 + $0x3d4] ss:$8 sps:$4 sm:$0xff]   ;;  %v4229_v37 = vsel %vm3989_vm14, %v1273_v31, %v1278_v32  ;;  %v3500_v38 = vld [vmem:[%s4818_s1 + $0x2d0] ss:$8 sps:$4 sm:$0xff]   ;;  %v3571_v31 = vld [vmem:[%s4818_s1 + $0x584] ss:$8 sps:$4 sm:$0xff]  }
  0x49   : > { %1230 = vmatprep.subr.bf16.mxu1 %v3433_v39  ;;  %991 = vmatprep.mubr.bf16.mxu0 %v796_v40  ;;  %v3503_v39 = vld [vmem:[%s4818_s1 + $0x3d0] ss:$8 sps:$4 sm:$0xff]   ;;  %v3508_v40 = vld [vmem:[%s4818_s1 + $0x2e4] ss:$8 sps:$4 sm:$0xff]   ;;  %v3566_v32 = vld [vmem:[%s4818_s1 + $0x480] ss:$8 sps:$4 sm:$0xff]  }
  0x4a   : > { %1260 = vmatprep.mubr.bf16.mxu1 %v1065_v41  ;;  %v3511_v41 = vld [vmem:[%s4818_s1 + $0x3e4] ss:$8 sps:$4 sm:$0xff]  }
  0x4b   : > { %962 = vmatpush1.bf16.msra.mxu0 %v3428_v42  ;;  %v1314_v42 = vcombine.low %v4003_v8, %v4229_v37 }
  0x4c   : > { %1231 = vmatpush1.bf16.msra.mxu1 %v3431_v43  ;;  %963 = vmatprep.subr.bf16.mxu0 %v3436_v44  ;;  %v3081_v43 = vcombine.high %v3966_v56, %v4009_v11  ;;  %v3506_v44 = vld [vmem:[%s4818_s1 + $0x2e0] ss:$8 sps:$4 sm:$0xff]   ;;  %v3517_v56 = vld [vmem:[%s4818_s1 + $0x3f4] ss:$8 sps:$4 sm:$0xff]  }
  0x4d   : > { %1232 = vmatprep.subr.bf16.mxu1 %v3439_v45  ;;  %v3509_v45 = vld [vmem:[%s4818_s1 + $0x3e0] ss:$8 sps:$4 sm:$0xff]   ;;  %v4260_v8 = vrot.slane %v1314_v42, %v3963_v55 }
  0x4e   : > { %v3581_v42 = vld [vmem:[%s4818_s1 + $0x5a0] ss:$8 sps:$4 sm:$0xff]  }
  0x4f   : > { %964 = vmatpush1.bf16.msra.mxu0 %v3434_v46  ;;  %v3514_v46 = vld [vmem:[%s4818_s1 + $0x2f4] ss:$8 sps:$4 sm:$0xff]  }
  0x50   : > { %1233 = vmatpush1.bf16.msra.mxu1 %v3437_v47  ;;  %965 = vmatprep.subr.bf16.mxu0 %v3442_v49  ;;  %v4263_v47 = vrot.slane %v3081_v43, %v3963_v55  ;;  %v3512_v49 = vld [vmem:[%s4818_s1 + $0x2f0] ss:$8 sps:$4 sm:$0xff]   ;;  %v3586_v43 = vld [vmem:[%s4818_s1 + $0x4b4] ss:$8 sps:$4 sm:$0xff]  }
  0x51   : > { %1234 = vmatprep.subr.bf16.mxu1 %v3445_v50  ;;  %v3515_v50 = vld [vmem:[%s4818_s1 + $0x3f0] ss:$8 sps:$4 sm:$0xff]  }
  0x53   : > { %966 = vmatpush1.bf16.msra.mxu0 %v3440_v51  ;;  %v3520_v51 = vld [vmem:[%s4818_s1 + $0x404] ss:$8 sps:$4 sm:$0xff]  }
  0x54   : > { %1235 = vmatpush1.bf16.msra.mxu1 %v3443_v52  ;;  %967 = vmatprep.subr.bf16.mxu0 %v3448_v53  ;;  %v3523_v52 = vld [vmem:[%s4818_s1 + $0x504] ss:$8 sps:$4 sm:$0xff]   ;;  %v1322_v53 = vcombine.high %v4260_v8, %v4260_v8 }
  0x55   : > { %1236 = vmatprep.subr.bf16.mxu1 %v3451_v54  ;;  %v1583_v54 = vcombine.high %v4263_v47, %v4263_v47 }
  0x57   : > { %968 = vmatpush1.bf16.msra.mxu0 %v3446_v57  ;;  %v789_v57 = vrot.slane %v4042_v26, %v3963_v55  ;;  %v3529_v26 = vld [vmem:[%s4818_s1 + $0x514] ss:$8 sps:$4 sm:$0xff]  }
  0x58   : > { %1237 = vmatpush1.bf16.msra.mxu1 %v3449_v58  ;;  %969 = vmatprep.subr.bf16.mxu0 %v3454_v59  ;;  %v1058_v58 = vrot.slane %v4045_v27, %v3963_v55  ;;  %v3518_v59 = vld [vmem:[%s4818_s1 + $0x400] ss:$8 sps:$4 sm:$0xff]   ;;  %v1336_v27 = vrot.slane %v1322_v53, %v3963_v55 }
  0x59   : > { %1238 = vmatprep.subr.bf16.mxu1 %v3457_v60  ;;  %v3521_v60 = vld [vmem:[%s4818_s1 + $0x500] ss:$8 sps:$4 sm:$0xff]  }
  0x5b   : > { %970 = vmatpush1.bf16.msra.mxu0 %v3452_v61  ;;  %v3526_v61 = vld [vmem:[%s4818_s1 + $0x414] ss:$8 sps:$4 sm:$0xff]  }
  0x5c   : > { %1239 = vmatpush1.bf16.msra.mxu1 %v3455_v62  ;;  %971 = vmatprep.subr.bf16.mxu0 %v3460_v63  ;;  %v1597_v62 = vrot.slane %v1583_v54, %v3963_v55  ;;  %v3524_v63 = vld [vmem:[%s4818_s1 + $0x410] ss:$8 sps:$4 sm:$0xff]   ;;  %v3593_v54 = vld [vmem:[%s4818_s1 + $0x5c0] ss:$8 sps:$4 sm:$0xff]  }
  0x5d   : > { %1240 = vmatprep.subr.bf16.mxu1 %v3463_v0  ;;  %v3527_v0 = vld [vmem:[%s4818_s1 + $0x510] ss:$8 sps:$4 sm:$0xff]  }
  0x5f   : > { %972 = vmatpush1.bf16.msra.mxu0 %v3458_v1  ;;  %v3532_v1 = vld [vmem:[%s4818_s1 + $0x424] ss:$8 sps:$4 sm:$0xff]  }
  0x60   : > { %1241 = vmatpush1.bf16.msra.mxu1 %v3461_v2  ;;  %973 = vmatprep.subr.bf16.mxu0 %v3466_v3  ;;  %v3535_v2 = vld [vmem:[%s4818_s1 + $0x524] ss:$8 sps:$4 sm:$0xff]   ;;  %v3530_v3 = vld [vmem:[%s4818_s1 + $0x420] ss:$8 sps:$4 sm:$0xff]  }
  0x61   : > { %1242 = vmatprep.subr.bf16.mxu1 %v3469_v5  ;;  %v3533_v5 = vld [vmem:[%s4818_s1 + $0x520] ss:$8 sps:$4 sm:$0xff]  }
  0x63   : > { %974 = vmatpush1.bf16.msra.mxu0 %v3464_v6  ;;  %v3538_v6 = vld [vmem:[%s4818_s1 + $0x434] ss:$8 sps:$4 sm:$0xff]  }
  0x64   : > { %1243 = vmatpush1.bf16.msra.mxu1 %v3467_v7  ;;  %975 = vmatprep.subr.bf16.mxu0 %v3472_v9  ;;  %v3541_v7 = vld [vmem:[%s4818_s1 + $0x534] ss:$8 sps:$4 sm:$0xff]   ;;  %v3536_v9 = vld [vmem:[%s4818_s1 + $0x430] ss:$8 sps:$4 sm:$0xff]  }
  0x65   : > { %1244 = vmatprep.subr.bf16.mxu1 %v3475_v10  ;;  %v3539_v10 = vld [vmem:[%s4818_s1 + $0x530] ss:$8 sps:$4 sm:$0xff]  }
  0x67   : > { %976 = vmatpush1.bf16.msra.mxu0 %v3470_v12  ;;  %v3544_v12 = vld [vmem:[%s4818_s1 + $0x444] ss:$8 sps:$4 sm:$0xff]  }
  0x68   : > { %1245 = vmatpush1.bf16.msra.mxu1 %v3473_v13  ;;  %977 = vmatprep.subr.bf16.mxu0 %v3478_v14  ;;  %v3547_v13 = vld [vmem:[%s4818_s1 + $0x544] ss:$8 sps:$4 sm:$0xff]   ;;  %v3542_v14 = vld [vmem:[%s4818_s1 + $0x440] ss:$8 sps:$4 sm:$0xff]  }
  0x69   : > { %1246 = vmatprep.subr.bf16.mxu1 %v3481_v15  ;;  %v3545_v15 = vld [vmem:[%s4818_s1 + $0x540] ss:$8 sps:$4 sm:$0xff]  }
  0x6b   : > { %978 = vmatpush1.bf16.msra.mxu0 %v3476_v16  ;;  %v3550_v16 = vld [vmem:[%s4818_s1 + $0x454] ss:$8 sps:$4 sm:$0xff]  }
  0x6c   : > { %1247 = vmatpush1.bf16.msra.mxu1 %v3479_v17  ;;  %979 = vmatprep.subr.bf16.mxu0 %v3484_v18  ;;  %v3553_v17 = vld [vmem:[%s4818_s1 + $0x554] ss:$8 sps:$4 sm:$0xff]   ;;  %v3548_v18 = vld [vmem:[%s4818_s1 + $0x450] ss:$8 sps:$4 sm:$0xff]  }
  0x6d   : > { %1248 = vmatprep.subr.bf16.mxu1 %v3487_v19  ;;  %v3551_v19 = vld [vmem:[%s4818_s1 + $0x550] ss:$8 sps:$4 sm:$0xff]  }
  0x6f   : > { %980 = vmatpush1.bf16.msra.mxu0 %v3482_v20  ;;  %v3556_v20 = vld [vmem:[%s4818_s1 + $0x464] ss:$8 sps:$4 sm:$0xff]  }
  0x70   : > { %1249 = vmatpush1.bf16.msra.mxu1 %v3485_v21  ;;  %981 = vmatprep.subr.bf16.mxu0 %v3490_v22  ;;  %v3559_v21 = vld [vmem:[%s4818_s1 + $0x564] ss:$8 sps:$4 sm:$0xff]   ;;  %v3554_v22 = vld [vmem:[%s4818_s1 + $0x460] ss:$8 sps:$4 sm:$0xff]  }
  0x71   : > { %1250 = vmatprep.subr.bf16.mxu1 %v3493_v23  ;;  %v3557_v23 = vld [vmem:[%s4818_s1 + $0x560] ss:$8 sps:$4 sm:$0xff]  }
  0x73   : > { %982 = vmatpush1.bf16.msra.mxu0 %v3488_v25  ;;  %v3565_v25 = vld [vmem:[%s4818_s1 + $0x574] ss:$8 sps:$4 sm:$0xff]  }
  0x74   : > { %1251 = vmatpush1.bf16.msra.mxu1 %v3491_v28  ;;  %983 = vmatprep.subr.bf16.mxu0 %v3496_v29  ;;  %v3560_v28 = vld [vmem:[%s4818_s1 + $0x470] ss:$8 sps:$4 sm:$0xff]  }
  0x75   : > { %1252 = vmatprep.subr.bf16.mxu1 %v3499_v30  ;;  %v3563_v29 = vld [vmem:[%s4818_s1 + $0x570] ss:$8 sps:$4 sm:$0xff]   ;;  %v3568_v30 = vld [vmem:[%s4818_s1 + $0x484] ss:$8 sps:$4 sm:$0xff]  }
  0x77   : > { %984 = vmatpush1.bf16.msra.mxu0 %v3494_v33  ;;  %v3569_v33 = vld [vmem:[%s4818_s1 + $0x580] ss:$8 sps:$4 sm:$0xff]  }
  0x78   : > { %1253 = vmatpush1.bf16.msra.mxu1 %v3497_v34  ;;  %985 = vmatprep.subr.bf16.mxu0 %v3502_v35  ;;  %v3574_v34 = vld [vmem:[%s4818_s1 + $0x494] ss:$8 sps:$4 sm:$0xff]  }
  0x79   : > { %1254 = vmatprep.subr.bf16.mxu1 %v3505_v36  ;;  %v3577_v35 = vld [vmem:[%s4818_s1 + $0x594] ss:$8 sps:$4 sm:$0xff]   ;;  %v3572_v36 = vld [vmem:[%s4818_s1 + $0x490] ss:$8 sps:$4 sm:$0xff]  }
  0x7b   : > { %986 = vmatpush1.bf16.msra.mxu0 %v3500_v38  ;;  %v3575_v38 = vld [vmem:[%s4818_s1 + $0x590] ss:$8 sps:$4 sm:$0xff]  }
  0x7c   : > { %1255 = vmatpush1.bf16.msra.mxu1 %v3503_v39  ;;  %987 = vmatprep.subr.bf16.mxu0 %v3508_v40  ;;  %v3580_v39 = vld [vmem:[%s4818_s1 + $0x4a4] ss:$8 sps:$4 sm:$0xff]  }
  0x7d   : > { %1256 = vmatprep.subr.bf16.mxu1 %v3511_v41  ;;  %v3583_v40 = vld [vmem:[%s4818_s1 + $0x5a4] ss:$8 sps:$4 sm:$0xff]   ;;  %v3578_v41 = vld [vmem:[%s4818_s1 + $0x4a0] ss:$8 sps:$4 sm:$0xff]  }
  0x7f   : > { %988 = vmatpush1.bf16.msra.mxu0 %v3506_v44  ;;  %v3589_v44 = vld [vmem:[%s4818_s1 + $0x5b4] ss:$8 sps:$4 sm:$0xff]  }
  0x80   : > { %1257 = vmatpush1.bf16.msra.mxu1 %v3509_v45  ;;  %989 = vmatprep.subr.bf16.mxu0 %v3514_v46  ;;  %v3584_v45 = vld [vmem:[%s4818_s1 + $0x4b0] ss:$8 sps:$4 sm:$0xff]  }
  0x81   : > { %1258 = vmatprep.subr.bf16.mxu1 %v3517_v56  ;;  %v3587_v46 = vld [vmem:[%s4818_s1 + $0x5b0] ss:$8 sps:$4 sm:$0xff]   ;;  %v3592_v56 = vld [vmem:[%s4818_s1 + $0x4c4] ss:$8 sps:$4 sm:$0xff]  }
  0x83   : > { %990 = vmatpush1.bf16.msra.mxu0 %v3512_v49  ;;  %v3595_v49 = vld [vmem:[%s4818_s1 + $0x5c4] ss:$8 sps:$4 sm:$0xff]  }
  0x84   : > { %1259 = vmatpush1.bf16.msra.mxu1 %v3515_v50  ;;  %1499 = vmatprep.subr.bf16.mxu0 %v3520_v51  ;;  %v4432_v50 = vld.sshfl [vmem:[%s3944_s5 + $0xc] sm:$0x33 pattern:$0x75316420]  ;;  %v3590_v51 = vld [vmem:[%s4818_s1 + $0x4c0] ss:$8 sps:$4 sm:$0xff]  }
  0x85   : > { %1760 = vmatprep.subr.bf16.mxu1 %v3523_v52  ;;  %v2072_v52 = vcombine.high %v4432_v50, %v4432_v50  ;;  %v2074_v53 = vshrl.u32 %v4432_v50, 16  ;;  %v1844_v4 = vcombine.low %v4009_v11, %v4432_v50  ;;  %v3613_v11 = vld [vmem:[%s4818_s1 + $0x5f4] ss:$8 sps:$4 sm:$0xff]  }
  0x86   : > { %992 = vmatmul.mubr.bf16.vlgmr.msra.gmra.mrb[4].mxu0 %v789_v57  ;;  %v3598_v57 = vld [vmem:[%s4818_s1 + $0x4d4] ss:$8 sps:$4 sm:$0xff]  }
  0x87   : > { %1261 = vmatmul.mubr.bf16.vlgmr.msra.gmra.mrb[4].mxu1 %v1058_v58  ;;  %1500 = vmatpush1.bf16.msra.mxu0 %v3518_v59  ;;  %v3601_v58 = vld [vmem:[%s4818_s1 + $0x5d4] ss:$8 sps:$4 sm:$0xff]   ;;  %v2079_v59 = vshll.u32 %v2072_v52, 16  ;;  %v3662_v52 = vld [vmem:[%s4818_s1 + $0x680] ss:$8 sps:$4 sm:$0xff]  }
  0x88   : > { %1761 = vmatpush1.bf16.msra.mxu1 %v3521_v60  ;;  %1501 = vmatprep.subr.bf16.mxu0 %v3526_v61  ;;  %v3596_v60 = vld [vmem:[%s4818_s1 + $0x4d0] ss:$8 sps:$4 sm:$0xff]  }
  0x89   : > { %1762 = vmatprep.subr.bf16.mxu1 %v3529_v26  ;;  %1531 = vmatprep.mubr.bf16.mxu0 %v1336_v27  ;;  %v2081_v61 = vsel %vm3989_vm14, %v2074_v53, %v2079_v59  ;;  %v3599_v26 = vld [vmem:[%s4818_s1 + $0x5d0] ss:$8 sps:$4 sm:$0xff]   ;;  %v3604_v27 = vld [vmem:[%s4818_s1 + $0x4e4] ss:$8 sps:$4 sm:$0xff]   ;;  %v3665_v53 = vld [vmem:[%s4818_s1 + $0x780] ss:$8 sps:$4 sm:$0xff]  }
  0x8a   : > { %1792 = vmatprep.mubr.bf16.mxu1 %v1597_v62  ;;  %v3607_v62 = vld [vmem:[%s4818_s1 + $0x5e4] ss:$8 sps:$4 sm:$0xff]   ;;  %v3671_v59 = vld [vmem:[%s4818_s1 + $0x790] ss:$8 sps:$4 sm:$0xff]  }
  0x8b   : > { %1502 = vmatpush1.bf16.msra.mxu0 %v3524_v63  ;;  %v2115_v63 = vcombine.low %v4229_v37, %v2081_v61  ;;  %v4479_v37 = vrot.slane %v1844_v4, %v3963_v55  ;;  %v3679_v61 = vld [vmem:[%s4818_s1 + $0x7a4] ss:$8 sps:$4 sm:$0xff]   ;;  %v3685_v4 = vld [vmem:[%s4818_s1 + $0x7b4] ss:$8 sps:$4 sm:$0xff]  }
  0x8c   : > { %1763 = vmatpush1.bf16.msra.mxu1 %v3527_v0  ;;  %1503 = vmatprep.subr.bf16.mxu0 %v3532_v1  ;;  %v3602_v0 = vld [vmem:[%s4818_s1 + $0x4e0] ss:$8 sps:$4 sm:$0xff]  }
  0x8d   : > { %1764 = vmatprep.subr.bf16.mxu1 %v3535_v2  ;;  %v3605_v1 = vld [vmem:[%s4818_s1 + $0x5e0] ss:$8 sps:$4 sm:$0xff]   ;;  %v3610_v2 = vld [vmem:[%s4818_s1 + $0x4f4] ss:$8 sps:$4 sm:$0xff]  }
  0x8f   : > { %1504 = vmatpush1.bf16.msra.mxu0 %v3530_v3  ;;  %v4482_v3 = vrot.slane %v2115_v63, %v3963_v55  ;;  %v3680_v63 = vld [vmem:[%s4818_s1 + $0x6b0] ss:$8 sps:$4 sm:$0xff]  }
  0x90   : > { %1765 = vmatpush1.bf16.msra.mxu1 %v3533_v5  ;;  %1505 = vmatprep.subr.bf16.mxu0 %v3538_v6  ;;  %v3608_v5 = vld [vmem:[%s4818_s1 + $0x4f0] ss:$8 sps:$4 sm:$0xff]  }
  0x91   : > { %1766 = vmatprep.subr.bf16.mxu1 %v3541_v7  ;;  %v3611_v6 = vld [vmem:[%s4818_s1 + $0x5f0] ss:$8 sps:$4 sm:$0xff]   ;;  %v3616_v7 = vld [vmem:[%s4818_s1 + $0x604] ss:$8 sps:$4 sm:$0xff]  }
  0x93   : > { %1506 = vmatpush1.bf16.msra.mxu0 %v3536_v9  ;;  %v3619_v9 = vld [vmem:[%s4818_s1 + $0x704] ss:$8 sps:$4 sm:$0xff]  }
  0x94   : > { %1767 = vmatpush1.bf16.msra.mxu1 %v3539_v10  ;;  %1507 = vmatprep.subr.bf16.mxu0 %v3544_v12  ;;  %v1852_v10 = vcombine.high %v4479_v37, %v4479_v37  ;;  %v2123_v12 = vcombine.high %v4482_v3, %v4482_v3 }
  0x95   : > { %1768 = vmatprep.subr.bf16.mxu1 %v3547_v13  ;;  %v1329_v13 = vrot.slane %v4260_v8, %v3963_v55  ;;  %v3625_v8 = vld [vmem:[%s4818_s1 + $0x714] ss:$8 sps:$4 sm:$0xff]  }
  0x97   : > { %1508 = vmatpush1.bf16.msra.mxu0 %v3542_v14  ;;  %v3614_v14 = vld [vmem:[%s4818_s1 + $0x600] ss:$8 sps:$4 sm:$0xff]  }
  0x98   : > { %1769 = vmatpush1.bf16.msra.mxu1 %v3545_v15  ;;  %1509 = vmatprep.subr.bf16.mxu0 %v3550_v16  ;;  %v1590_v15 = vrot.slane %v4263_v47, %v3963_v55  ;;  %v3617_v16 = vld [vmem:[%s4818_s1 + $0x700] ss:$8 sps:$4 sm:$0xff]   ;;  %v2137_v47 = vrot.slane %v2123_v12, %v3963_v55 }
  0x99   : > { %1770 = vmatprep.subr.bf16.mxu1 %v3553_v17  ;;  %v3622_v17 = vld [vmem:[%s4818_s1 + $0x614] ss:$8 sps:$4 sm:$0xff]   ;;  %v3758_v12 = vld.sshfl [vmem:[%s3944_s5 + $0x8] sm:$0x33 pattern:$0x75316420] }
  0x9a   : > { %s2753_s5 = sshll.u32 %s4824_s13, 2 }
  0x9b   : > { %1510 = vmatpush1.bf16.msra.mxu0 %v3548_v18  ;;  %v1866_v18 = vrot.slane %v1852_v10, %v3963_v55  ;;  %v3695_v10 = vld [vmem:[%s4818_s1 + $0x7d0] ss:$8 sps:$4 sm:$0xff]   ;;  %s168_s15 = scalar_lea.vmem %s4820_s3, %s2753_s5 }
  0x9c   : > { %1771 = vmatpush1.bf16.msra.mxu1 %v3551_v19  ;;  %1511 = vmatprep.subr.bf16.mxu0 %v3556_v20  ;;  %v3620_v19 = vld [vmem:[%s4818_s1 + $0x610] ss:$8 sps:$4 sm:$0xff]  }
  0x9d   : > { %1772 = vmatprep.subr.bf16.mxu1 %v3559_v21  ;;  %v3623_v20 = vld [vmem:[%s4818_s1 + $0x710] ss:$8 sps:$4 sm:$0xff]   ;;  %v3628_v21 = vld [vmem:[%s4818_s1 + $0x624] ss:$8 sps:$4 sm:$0xff]  }
  0x9f   : > { %1512 = vmatpush1.bf16.msra.mxu0 %v3554_v22  ;;  %v3631_v22 = vld [vmem:[%s4818_s1 + $0x724] ss:$8 sps:$4 sm:$0xff]  }
  0xa0   : > { %1773 = vmatpush1.bf16.msra.mxu1 %v3557_v23  ;;  %1513 = vmatprep.subr.bf16.mxu0 %v3562_v24  ;;  %v3626_v23 = vld [vmem:[%s4818_s1 + $0x620] ss:$8 sps:$4 sm:$0xff]  }
  0xa1   : > { %1774 = vmatprep.subr.bf16.mxu1 %v3565_v25  ;;  %v3629_v24 = vld [vmem:[%s4818_s1 + $0x720] ss:$8 sps:$4 sm:$0xff]   ;;  %v3634_v25 = vld [vmem:[%s4818_s1 + $0x634] ss:$8 sps:$4 sm:$0xff]  }
  0xa3   : > { %1514 = vmatpush1.bf16.msra.mxu0 %v3560_v28  ;;  %v3637_v28 = vld [vmem:[%s4818_s1 + $0x734] ss:$8 sps:$4 sm:$0xff]  }
  0xa4   : > { %1775 = vmatpush1.bf16.msra.mxu1 %v3563_v29  ;;  %1515 = vmatprep.subr.bf16.mxu0 %v3568_v30  ;;  %v3632_v29 = vld [vmem:[%s4818_s1 + $0x630] ss:$8 sps:$4 sm:$0xff]  }
  0xa5   : > { %1776 = vmatprep.subr.bf16.mxu1 %v3571_v31  ;;  %v3635_v30 = vld [vmem:[%s4818_s1 + $0x730] ss:$8 sps:$4 sm:$0xff]   ;;  %v3640_v31 = vld [vmem:[%s4818_s1 + $0x644] ss:$8 sps:$4 sm:$0xff]  }
  0xa7   : > { %1516 = vmatpush1.bf16.msra.mxu0 %v3566_v32  ;;  %v3643_v32 = vld [vmem:[%s4818_s1 + $0x744] ss:$8 sps:$4 sm:$0xff]  }
  0xa8   : > { %1777 = vmatpush1.bf16.msra.mxu1 %v3569_v33  ;;  %1517 = vmatprep.subr.bf16.mxu0 %v3574_v34  ;;  %v3638_v33 = vld [vmem:[%s4818_s1 + $0x640] ss:$8 sps:$4 sm:$0xff]  }
  0xa9   : > { %1778 = vmatprep.subr.bf16.mxu1 %v3577_v35  ;;  %v3641_v34 = vld [vmem:[%s4818_s1 + $0x740] ss:$8 sps:$4 sm:$0xff]   ;;  %v3646_v35 = vld [vmem:[%s4818_s1 + $0x654] ss:$8 sps:$4 sm:$0xff]  }
  0xab   : > { %1518 = vmatpush1.bf16.msra.mxu0 %v3572_v36  ;;  %v3649_v36 = vld [vmem:[%s4818_s1 + $0x754] ss:$8 sps:$4 sm:$0xff]  }
  0xac   : > { %1779 = vmatpush1.bf16.msra.mxu1 %v3575_v38  ;;  %1519 = vmatprep.subr.bf16.mxu0 %v3580_v39  ;;  %v3644_v38 = vld [vmem:[%s4818_s1 + $0x650] ss:$8 sps:$4 sm:$0xff]  }
  0xad   : > { %1780 = vmatprep.subr.bf16.mxu1 %v3583_v40  ;;  %v3647_v39 = vld [vmem:[%s4818_s1 + $0x750] ss:$8 sps:$4 sm:$0xff]   ;;  %v3652_v40 = vld [vmem:[%s4818_s1 + $0x664] ss:$8 sps:$4 sm:$0xff]  }
  0xaf   : > { %1520 = vmatpush1.bf16.msra.mxu0 %v3578_v41  ;;  %v3655_v41 = vld [vmem:[%s4818_s1 + $0x764] ss:$8 sps:$4 sm:$0xff]  }
  0xb0   : > { %1781 = vmatpush1.bf16.msra.mxu1 %v3581_v42  ;;  %1521 = vmatprep.subr.bf16.mxu0 %v3586_v43  ;;  %v3650_v42 = vld [vmem:[%s4818_s1 + $0x660] ss:$8 sps:$4 sm:$0xff]  }
  0xb1   : > { %1782 = vmatprep.subr.bf16.mxu1 %v3589_v44  ;;  %v3653_v43 = vld [vmem:[%s4818_s1 + $0x760] ss:$8 sps:$4 sm:$0xff]   ;;  %v3658_v44 = vld [vmem:[%s4818_s1 + $0x674] ss:$8 sps:$4 sm:$0xff]  }
  0xb3   : > { %1522 = vmatpush1.bf16.msra.mxu0 %v3584_v45  ;;  %v3661_v45 = vld [vmem:[%s4818_s1 + $0x774] ss:$8 sps:$4 sm:$0xff]  }
  0xb4   : > { %1783 = vmatpush1.bf16.msra.mxu1 %v3587_v46  ;;  %1523 = vmatprep.subr.bf16.mxu0 %v3592_v56  ;;  %v3656_v46 = vld [vmem:[%s4818_s1 + $0x670] ss:$8 sps:$4 sm:$0xff]  }
  0xb5   : > { %1784 = vmatprep.subr.bf16.mxu1 %v3595_v49  ;;  %v3659_v56 = vld [vmem:[%s4818_s1 + $0x770] ss:$8 sps:$4 sm:$0xff]   ;;  %v3664_v49 = vld [vmem:[%s4818_s1 + $0x684] ss:$8 sps:$4 sm:$0xff]  }
  0xb7   : > { %1524 = vmatpush1.bf16.msra.mxu0 %v3590_v51  ;;  %v3667_v51 = vld [vmem:[%s4818_s1 + $0x784] ss:$8 sps:$4 sm:$0xff]  }
  0xb8   : > { %1785 = vmatpush1.bf16.msra.mxu1 %v3593_v54  ;;  %1525 = vmatprep.subr.bf16.mxu0 %v3598_v57  ;;  %v3670_v54 = vld [vmem:[%s4818_s1 + $0x694] ss:$8 sps:$4 sm:$0xff]  }
  0xb9   : > { %1786 = vmatprep.subr.bf16.mxu1 %v3601_v58  ;;  %v3673_v57 = vld [vmem:[%s4818_s1 + $0x794] ss:$8 sps:$4 sm:$0xff]   ;;  %v3668_v58 = vld [vmem:[%s4818_s1 + $0x690] ss:$8 sps:$4 sm:$0xff]  }
  0xbb   : > { %1526 = vmatpush1.bf16.msra.mxu0 %v3596_v60  ;;  %v3676_v60 = vld [vmem:[%s4818_s1 + $0x6a4] ss:$8 sps:$4 sm:$0xff]  }
  0xbc   : > { %1787 = vmatpush1.bf16.msra.mxu1 %v3599_v26  ;;  %1527 = vmatprep.subr.bf16.mxu0 %v3604_v27  ;;  %v3674_v26 = vld [vmem:[%s4818_s1 + $0x6a0] ss:$8 sps:$4 sm:$0xff]  }
  0xbd   : > { %1788 = vmatprep.subr.bf16.mxu1 %v3607_v62  ;;  %v3677_v27 = vld [vmem:[%s4818_s1 + $0x7a0] ss:$8 sps:$4 sm:$0xff]   ;;  %v3682_v62 = vld [vmem:[%s4818_s1 + $0x6b4] ss:$8 sps:$4 sm:$0xff]  }
  0xbf   : > { %1528 = vmatpush1.bf16.msra.mxu0 %v3602_v0  ;;  %v3683_v0 = vld [vmem:[%s4818_s1 + $0x7b0] ss:$8 sps:$4 sm:$0xff]  }
  0xc0   : > { %1789 = vmatpush1.bf16.msra.mxu1 %v3605_v1  ;;  %1529 = vmatprep.subr.bf16.mxu0 %v3610_v2  ;;  %v3688_v1 = vld [vmem:[%s4818_s1 + $0x6c4] ss:$8 sps:$4 sm:$0xff]  }
  0xc1   : > { %1790 = vmatprep.subr.bf16.mxu1 %v3613_v11  ;;  %v3691_v2 = vld [vmem:[%s4818_s1 + $0x7c4] ss:$8 sps:$4 sm:$0xff]   ;;  %v3686_v11 = vld [vmem:[%s4818_s1 + $0x6c0] ss:$8 sps:$4 sm:$0xff]  }
  0xc3   : > { %1530 = vmatpush1.bf16.msra.mxu0 %v3608_v5  ;;  %v3689_v5 = vld [vmem:[%s4818_s1 + $0x7c0] ss:$8 sps:$4 sm:$0xff]  }
  0xc4   : > { %1791 = vmatpush1.bf16.msra.mxu1 %v3611_v6  ;;  %2029 = vmatprep.subr.bf16.mxu0 %v3616_v7  ;;  %v3694_v6 = vld [vmem:[%s4818_s1 + $0x6d4] ss:$8 sps:$4 sm:$0xff]  }
  0xc5   : > { %2300 = vmatprep.subr.bf16.mxu1 %v3619_v9  ;;  %v3697_v7 = vld [vmem:[%s4818_s1 + $0x7d4] ss:$8 sps:$4 sm:$0xff]   ;;  %v3692_v9 = vld [vmem:[%s4818_s1 + $0x6d0] ss:$8 sps:$4 sm:$0xff]  }
  0xc6   : > { %1532 = vmatmul.mubr.bf16.vlgmr.msra.gmra.mrb[8].mxu0 %v1329_v13  ;;  %v3276_v13 = vcombine.high %v3758_v12, %v4432_v50  ;;  %v3701_v50 = vld [vmem:[%s4818_s1 + $0x7e0] ss:$8 sps:$4 sm:$0xff]  }
  0xc7   : > { %1793 = vmatmul.mubr.bf16.vlgmr.msra.gmra.mrb[8].mxu1 %v1590_v15  ;;  %2030 = vmatpush1.bf16.msra.mxu0 %v3614_v14  ;;  %v3700_v14 = vld [vmem:[%s4818_s1 + $0x6e4] ss:$8 sps:$4 sm:$0xff]  }
  0xc8   : > { %2301 = vmatpush1.bf16.msra.mxu1 %v3617_v16  ;;  %2031 = vmatprep.subr.bf16.mxu0 %v3622_v17  ;;  %v3703_v15 = vld [vmem:[%s4818_s1 + $0x7e4] ss:$8 sps:$4 sm:$0xff]   ;;  %v3698_v16 = vld [vmem:[%s4818_s1 + $0x6e0] ss:$8 sps:$4 sm:$0xff]   ;;  %v4683_v17 = vrot.slane %v3276_v13, %v3963_v55 }
  0xc9   : > { %2302 = vmatprep.subr.bf16.mxu1 %v3625_v8  ;;  %2061 = vmatprep.mubr.bf16.mxu0 %v1866_v18  ;;  %v3706_v8 = vld [vmem:[%s4818_s1 + $0x6f4] ss:$8 sps:$4 sm:$0xff]  }
  0xca   : > { %2332 = vmatprep.mubr.bf16.mxu1 %v2137_v47  ;;  %v3709_v18 = vld [vmem:[%s4818_s1 + $0x7f4] ss:$8 sps:$4 sm:$0xff]   ;;  %v3704_v47 = vld [vmem:[%s4818_s1 + $0x6f0] ss:$8 sps:$4 sm:$0xff]  }
  0xcb   : > { %2032 = vmatpush1.bf16.msra.mxu0 %v3620_v19  ;;  %v3707_v19 = vld [vmem:[%s4818_s1 + $0x7f0] ss:$8 sps:$4 sm:$0xff]  }
  0xcc   : > { %2303 = vmatpush1.bf16.msra.mxu1 %v3623_v20  ;;  %2033 = vmatprep.subr.bf16.mxu0 %v3628_v21  ;;  %v2384_v20 = vcombine.high %v4683_v17, %v4683_v17  ;;  %v3712_v21 = vld [vmem:[%s4818_s1 + $0x804] ss:$8 sps:$4 sm:$0xff]  }
  0xcd   : > { %2304 = vmatprep.subr.bf16.mxu1 %v3631_v22  ;;  %v1859_v22 = vrot.slane %v4479_v37, %v3963_v55  ;;  %v3713_v37 = vld [vmem:[%s4818_s1 + $0x810] ss:$8 sps:$4 sm:$0xff]  }
  0xcf   : > { %2034 = vmatpush1.bf16.msra.mxu0 %v3626_v23  ;;  %v2130_v23 = vrot.slane %v4482_v3, %v3963_v55  ;;  %v3718_v3 = vld [vmem:[%s4818_s1 + $0x824] ss:$8 sps:$4 sm:$0xff]  }
  0xd0   : > { %2305 = vmatpush1.bf16.msra.mxu1 %v3629_v24  ;;  %2035 = vmatprep.subr.bf16.mxu0 %v3634_v25  ;;  %v3710_v24 = vld [vmem:[%s4818_s1 + $0x800] ss:$8 sps:$4 sm:$0xff]   ;;  %v2398_v25 = vrot.slane %v2384_v20, %v3963_v55 }
  0xd1   : > { %2306 = vmatprep.subr.bf16.mxu1 %v3637_v28  ;;  %v3715_v28 = vld [vmem:[%s4818_s1 + $0x814] ss:$8 sps:$4 sm:$0xff]  }
  0xd3   : > { %2036 = vmatpush1.bf16.msra.mxu0 %v3632_v29  ;;  %v3716_v29 = vld [vmem:[%s4818_s1 + $0x820] ss:$8 sps:$4 sm:$0xff]  }
  0xd4   : > { %2307 = vmatpush1.bf16.msra.mxu1 %v3635_v30  ;;  %2037 = vmatprep.subr.bf16.mxu0 %v3640_v31  ;;  %v3721_v30 = vld [vmem:[%s4818_s1 + $0x834] ss:$8 sps:$4 sm:$0xff]   ;;  %v3719_v31 = vld [vmem:[%s4818_s1 + $0x830] ss:$8 sps:$4 sm:$0xff]  }
  0xd5   : > { %2308 = vmatprep.subr.bf16.mxu1 %v3643_v32  ;;  %v3724_v32 = vld [vmem:[%s4818_s1 + $0x844] ss:$8 sps:$4 sm:$0xff]  }
  0xd7   : > { %2038 = vmatpush1.bf16.msra.mxu0 %v3638_v33  ;;  %v3722_v33 = vld [vmem:[%s4818_s1 + $0x840] ss:$8 sps:$4 sm:$0xff]  }
  0xd8   : > { %2309 = vmatpush1.bf16.msra.mxu1 %v3641_v34  ;;  %2039 = vmatprep.subr.bf16.mxu0 %v3646_v35  ;;  %v3727_v34 = vld [vmem:[%s4818_s1 + $0x854] ss:$8 sps:$4 sm:$0xff]   ;;  %v3725_v35 = vld [vmem:[%s4818_s1 + $0x850] ss:$8 sps:$4 sm:$0xff]  }
  0xd9   : > { %2310 = vmatprep.subr.bf16.mxu1 %v3649_v36  ;;  %v3730_v36 = vld [vmem:[%s4818_s1 + $0x864] ss:$8 sps:$4 sm:$0xff]  }
  0xdb   : > { %2040 = vmatpush1.bf16.msra.mxu0 %v3644_v38 }
  0xdc   : > { %2311 = vmatpush1.bf16.msra.mxu1 %v3647_v39  ;;  %2041 = vmatprep.subr.bf16.mxu0 %v3652_v40 }
  0xdd   : > { %2312 = vmatprep.subr.bf16.mxu1 %v3655_v41 }
  0xdf   : > { %2042 = vmatpush1.bf16.msra.mxu0 %v3650_v42 }
  0xe0   : > { %2313 = vmatpush1.bf16.msra.mxu1 %v3653_v43  ;;  %2043 = vmatprep.subr.bf16.mxu0 %v3658_v44 }
  0xe1   : > { %2314 = vmatprep.subr.bf16.mxu1 %v3661_v45  ;;  %v3728_v45 = vld [vmem:[%s4818_s1 + $0x860] ss:$8 sps:$4 sm:$0xff]  }
  0xe3   : > { %2044 = vmatpush1.bf16.msra.mxu0 %v3656_v46 }
  0xe4   : > { %2315 = vmatpush1.bf16.msra.mxu1 %v3659_v56  ;;  %2045 = vmatprep.subr.bf16.mxu0 %v3664_v49  ;;  %v3733_v49 = vld [vmem:[%s4818_s1 + $0x874] ss:$8 sps:$4 sm:$0xff]  }
  0xe5   : > { %2316 = vmatprep.subr.bf16.mxu1 %v3667_v51 }
  0xe7   : > { %2046 = vmatpush1.bf16.msra.mxu0 %v3662_v52  ;;  %v3731_v52 = vld [vmem:[%s4818_s1 + $0x870] ss:$8 sps:$4 sm:$0xff]  }
  0xe8   : > { %2317 = vmatpush1.bf16.msra.mxu1 %v3665_v53  ;;  %2047 = vmatprep.subr.bf16.mxu0 %v3670_v54  ;;  %v3736_v53 = vld [vmem:[%s4818_s1 + $0x884] ss:$8 sps:$4 sm:$0xff]   ;;  %v3734_v54 = vld [vmem:[%s4818_s1 + $0x880] ss:$8 sps:$4 sm:$0xff]  }
  0xe9   : > { %2318 = vmatprep.subr.bf16.mxu1 %v3673_v57  ;;  %v3739_v57 = vld [vmem:[%s4818_s1 + $0x894] ss:$8 sps:$4 sm:$0xff]  }
  0xeb   : > { %2048 = vmatpush1.bf16.msra.mxu0 %v3668_v58  ;;  %v3737_v58 = vld [vmem:[%s4818_s1 + $0x890] ss:$8 sps:$4 sm:$0xff]  }
  0xec   : > { %2319 = vmatpush1.bf16.msra.mxu1 %v3671_v59  ;;  %2049 = vmatprep.subr.bf16.mxu0 %v3676_v60  ;;  %v3742_v59 = vld [vmem:[%s4818_s1 + $0x8a4] ss:$8 sps:$4 sm:$0xff]   ;;  %v3740_v60 = vld [vmem:[%s4818_s1 + $0x8a0] ss:$8 sps:$4 sm:$0xff]  }
  0xed   : > { %2320 = vmatprep.subr.bf16.mxu1 %v3679_v61  ;;  %v3745_v61 = vld [vmem:[%s4818_s1 + $0x8b4] ss:$8 sps:$4 sm:$0xff]  }
  0xef   : > { %2050 = vmatpush1.bf16.msra.mxu0 %v3674_v26  ;;  %v3743_v26 = vld [vmem:[%s4818_s1 + $0x8b0] ss:$8 sps:$4 sm:$0xff]  }
  0xf0   : > { %2321 = vmatpush1.bf16.msra.mxu1 %v3677_v27  ;;  %2051 = vmatprep.subr.bf16.mxu0 %v3682_v62  ;;  %v3748_v27 = vld [vmem:[%s4818_s1 + $0x8c4] ss:$8 sps:$4 sm:$0xff]   ;;  %v3746_v62 = vld [vmem:[%s4818_s1 + $0x8c0] ss:$8 sps:$4 sm:$0xff]  }
  0xf1   : > { %2322 = vmatprep.subr.bf16.mxu1 %v3685_v4  ;;  %v3751_v4 = vld [vmem:[%s4818_s1 + $0x8d4] ss:$8 sps:$4 sm:$0xff]  }
  0xf3   : > { %2052 = vmatpush1.bf16.msra.mxu0 %v3680_v63  ;;  %v3749_v63 = vld [vmem:[%s4818_s1 + $0x8d0] ss:$8 sps:$4 sm:$0xff]  }
  0xf4   : > { %2323 = vmatpush1.bf16.msra.mxu1 %v3683_v0  ;;  %2053 = vmatprep.subr.bf16.mxu0 %v3688_v1  ;;  %v3754_v0 = vld [vmem:[%s4818_s1 + $0x8e4] ss:$8 sps:$4 sm:$0xff]   ;;  %v3752_v1 = vld [vmem:[%s4818_s1 + $0x8e0] ss:$8 sps:$4 sm:$0xff]  }
  0xf5   : > { %2324 = vmatprep.subr.bf16.mxu1 %v3691_v2  ;;  %v3757_v2 = vld [vmem:[%s4818_s1 + $0x8f4] ss:$8 sps:$4 sm:$0xff]  }
  0xf7   : > { %2054 = vmatpush1.bf16.msra.mxu0 %v3686_v11  ;;  %v3755_v11 = vld [vmem:[%s4818_s1 + $0x8f0] ss:$8 sps:$4 sm:$0xff]  }
  0xf8   : > { %2325 = vmatpush1.bf16.msra.mxu1 %v3689_v5  ;;  %2055 = vmatprep.subr.bf16.mxu0 %v3694_v6  ;;  %v2391_v5 = vrot.slane %v4683_v17, %v3963_v55 }
  0xf9   : > { %2326 = vmatprep.subr.bf16.mxu1 %v3697_v7 }
  0xfb   : > { %2056 = vmatpush1.bf16.msra.mxu0 %v3692_v9 }
  0xfc   : > { %2327 = vmatpush1.bf16.msra.mxu1 %v3695_v10  ;;  %2057 = vmatprep.subr.bf16.mxu0 %v3700_v14 }
  0xfd   : > { %2328 = vmatprep.subr.bf16.mxu1 %v3703_v15 }
  0xff   : > { %2058 = vmatpush1.bf16.msra.mxu0 %v3698_v16 }
 0x100   : > { %2329 = vmatpush1.bf16.msra.mxu1 %v3701_v50  ;;  %2059 = vmatprep.subr.bf16.mxu0 %v3706_v8 }
 0x101   : > { %2330 = vmatprep.subr.bf16.mxu1 %v3709_v18 }
 0x103   : > { %2060 = vmatpush1.bf16.msra.mxu0 %v3704_v47 }
 0x104   : > { %2331 = vmatpush1.bf16.msra.mxu1 %v3707_v19  ;;  %2561 = vmatprep.subr.bf16.mxu0 %v3712_v21 }
 0x106   : > { %2062 = vmatmul.mubr.bf16.vlgmr.msra.gmra.mrb[12].mxu0 %v1859_v22 }
 0x107   : > { %2333 = vmatmul.mubr.bf16.vlgmr.msra.gmra.mrb[12].mxu1 %v2130_v23  ;;  %2562 = vmatpush1.bf16.msra.mxu0 %v3710_v24 }
 0x108   : > { %2593 = vmatprep.mubr.bf16.mxu0 %v2398_v25  ;;  %2563 = vmatprep.subr.bf16.mxu0 %v3715_v28 }
 0x10b   : > { %2564 = vmatpush1.bf16.msra.mxu0 %v3713_v37 }
 0x10c   : > { %2565 = vmatprep.subr.bf16.mxu0 %v3718_v3 }
 0x10f   : > { %2566 = vmatpush1.bf16.msra.mxu0 %v3716_v29 }
 0x110   : > { %2567 = vmatprep.subr.bf16.mxu0 %v3721_v30 }
 0x113   : > { %2568 = vmatpush1.bf16.msra.mxu0 %v3719_v31 }
 0x114   : > { %2569 = vmatprep.subr.bf16.mxu0 %v3724_v32 }
 0x117   : > { %2570 = vmatpush1.bf16.msra.mxu0 %v3722_v33 }
 0x118   : > { %2571 = vmatprep.subr.bf16.mxu0 %v3727_v34 }
 0x119   : > { %v508_v38 = vpop.f32.mrb[0].mxu0 }
 0x11a   : > { %v734_v39 = vpop.f32.mrb[0].mxu1  ;;  %v510_v41 = vpop.f32.mrb[1].mxu0 }
 0x11b   : > { %v735_v40 = vadd.f32 %v734_v39, %v508_v38  ;;  %v736_v42 = vpop.f32.mrb[1].mxu1  ;;  %v512_v44 = vpop.f32.mrb[2].mxu0  ;;  %2572 = vmatpush1.bf16.msra.mxu0 %v3725_v35 }
 0x11c   : > { %v737_v43 = vadd.f32 %v736_v42, %v510_v41  ;;  %v738_v46 = vpop.f32.mrb[2].mxu1  ;;  %v513_v56 = vpop.f32.mrb[3].mxu0  ;;  %2573 = vmatprep.subr.bf16.mxu0 %v3730_v36  ;;  %v2608_v42 = vsub.s32 0, %v3936_v48  ;;  %v2612_v44 = vsub.s32 1, %v3936_v48 }
 0x11d   : > { %v739_v51 = vpop.f32.mrb[3].mxu1 }
 0x11f   : > { %2574 = vmatpush1.bf16.msra.mxu0 %v3728_v45  ;;  %v3768_v45 = vmov 1983009808  }
 0x120   : > { %2575 = vmatprep.subr.bf16.mxu0 %v3733_v49  ;;  %v2624_v46 = vunpack.c.l.s4 %v3768_v45 }
 0x123   : > { %2576 = vmatpush1.bf16.msra.mxu0 %v3731_v52 }
 0x124   : > { %2577 = vmatprep.subr.bf16.mxu0 %v3736_v53 }
 0x127   : > { %2578 = vmatpush1.bf16.msra.mxu0 %v3734_v54 }
 0x128   : > { %2579 = vmatprep.subr.bf16.mxu0 %v3739_v57  ;;  %v2625_v57 = vunpack.c.0.s8 %v2624_v46 }
 0x12b   : > { %2580 = vmatpush1.bf16.msra.mxu0 %v3737_v58 }
 0x12c   : > { %2581 = vmatprep.subr.bf16.mxu0 %v3742_v59 }
 0x12f   : > { %2582 = vmatpush1.bf16.msra.mxu0 %v3740_v60 }
 0x130   : > { %2583 = vmatprep.subr.bf16.mxu0 %v3745_v61 }
 0x133   : > { %2584 = vmatpush1.bf16.msra.mxu0 %v3743_v26 }
 0x134   : > { %2585 = vmatprep.subr.bf16.mxu0 %v3748_v27 }
 0x137   : > { %2586 = vmatpush1.bf16.msra.mxu0 %v3746_v62  ;;  %v2628_v62 = vsub.s32 %v2625_v57, %v3936_v48 }
 0x138   : > { %2587 = vmatprep.subr.bf16.mxu0 %v3751_v4 }
 0x13b   : > { %2588 = vmatpush1.bf16.msra.mxu0 %v3749_v63 }
 0x13c   : > { %2589 = vmatprep.subr.bf16.mxu0 %v3754_v0 }
 0x13f   : > { %2590 = vmatpush1.bf16.msra.mxu0 %v3752_v1 }
 0x140   : > { %2591 = vmatprep.subr.bf16.mxu0 %v3757_v2 }
 0x143   : > { %2592 = vmatpush1.bf16.msra.mxu0 %v3755_v11 }
 0x146   : > { %2594 = vmatmul.mubr.bf16.vlgmr.msra.gmra.mrb[16].mxu0 %v2391_v5 }
 0x159   : > { %v993_v6 = vpop.f32.mrb[4].mxu0 }
 0x15a   : > { %v1262_v7 = vpop.f32.mrb[4].mxu1  ;;  %v1000_v9 = vadd.f32 %v993_v6, %v735_v40  ;;  %v995_v10 = vpop.f32.mrb[5].mxu0 }
 0x15b   : > { %v1264_v12 = vpop.f32.mrb[5].mxu1  ;;  %v1001_v13 = vadd.f32 %v995_v10, %v737_v43  ;;  %v997_v14 = vpop.f32.mrb[6].mxu0  ;;  %v2604_v43 = vld [vmem:[%s4819_s2] sm:$0x3] }
 0x15c   : > { %v1266_v15 = vpop.f32.mrb[6].mxu1  ;;  %v1269_v16 = vadd.f32 %v1262_v7, %v1000_v9  ;;  %v998_v50 = vpop.f32.mrb[7].mxu0  ;;  %v2609_v56 = vrot.slane %v2604_v43, %v2608_v42  ;;  %v2613_v51 = vrot.slane %v2604_v43, %v2612_v44 }
 0x15d   : > { %v1267_v8 = vpop.f32.mrb[7].mxu1  ;;  %v1270_v18 = vadd.f32 %v1264_v12, %v1001_v13 }
 0x199   : > { %v1533_v47 = vpop.f32.mrb[8].mxu0 }
 0x19a   : > { %v1794_v19 = vpop.f32.mrb[8].mxu1  ;;  %v1540_v20 = vadd.f32 %v1533_v47, %v1269_v16  ;;  %v1535_v21 = vpop.f32.mrb[9].mxu0 }
 0x19b   : > { %v1796_v22 = vpop.f32.mrb[9].mxu1  ;;  %v1541_v17 = vadd.f32 %v1535_v21, %v1270_v18  ;;  %v1537_v23 = vpop.f32.mrb[10].mxu0 }
 0x19c   : > { %v1798_v24 = vpop.f32.mrb[10].mxu1  ;;  %v1801_v25 = vadd.f32 %v1794_v19, %v1540_v20  ;;  %v1538_v28 = vpop.f32.mrb[11].mxu0 }
 0x19d   : > { %v1799_v37 = vpop.f32.mrb[11].mxu1  ;;  %v1802_v3 = vadd.f32 %v1796_v22, %v1541_v17 }
 0x1d9   : > { %v2063_v29 = vpop.f32.mrb[12].mxu0 }
 0x1da   : > { %v2334_v30 = vpop.f32.mrb[12].mxu1  ;;  %v2070_v31 = vadd.f32 %v2063_v29, %v1801_v25  ;;  %v2065_v32 = vpop.f32.mrb[13].mxu0 }
 0x1db   : > { %v2336_v33 = vpop.f32.mrb[13].mxu1  ;;  %v2071_v34 = vadd.f32 %v2065_v32, %v1802_v3  ;;  %v2067_v35 = vpop.f32.mrb[14].mxu0 }
 0x1dc   : > { %v2338_v36 = vpop.f32.mrb[14].mxu1  ;;  %v2341_v38 = vadd.f32 %v2334_v30, %v2070_v31  ;;  %v2068_v39 = vpop.f32.mrb[15].mxu0 }
 0x1dd   : > { %v2339_v40 = vpop.f32.mrb[15].mxu1  ;;  %v2342_v41 = vadd.f32 %v2336_v33, %v2071_v34 }
 0x219   : > { %v2595_v49 = vpop.f32.mrb[16].mxu0 }
 0x21a   : > { %v2602_v52 = vadd.f32 %v2595_v49, %v2341_v38  ;;  %v2597_v53 = vpop.f32.mrb[17].mxu0 }
 0x21b   : > { %v2603_v54 = vadd.f32 %v2597_v53, %v2342_v41  ;;  %v2599_v58 = vpop.f32.mrb[18].mxu0 }
 0x21c   : > { %v2616_v59 = vadd.f32 %v2609_v56, %v2602_v52  ;;  %v2600_v60 = vpop.f32.mrb[19].mxu0 }
 0x21d   : > { %v2617_v61 = vadd.f32 %v2613_v51, %v2603_v54 }
 0x21e   : > { %v2618_v26 = vmax.f32 %v2616_v59, 0.0 }
 0x21f   : > { %v2619_v27 = vmax.f32 %v2617_v61, 0.0 }
 0x221   : > { %v2622_v4 = vcombine.low %v2618_v26, %v2619_v27 }
 0x223   : > { %v2629_v63 = vrot.slane %v2622_v4, %v2628_v62 }
 0x225   : > { %v2630_v0 = vcombine.high %v2629_v63, %v2629_v63  ;;  %v2637_v1 = vrot.slane %v2629_v63, %v2628_v62 }
 0x227   : > { %v2638_v2 = vcombine.high %v2637_v1, %v2637_v1  ;;  %v2645_v11 = vrot.slane %v2630_v0, %v2628_v62 }
 0x229   : > { %v2646_v5 = vcombine.high %v2645_v11, %v2645_v11  ;;  %v3309_v6 = vpack.c.bf16 %v2638_v2, %v2637_v1 }
 0x22b   : > { %v2666_v7 = vrot.slane %v3309_v6, %v3963_v55  ;;  %v3310_v9 = vpack.c.bf16 %v2646_v5, %v2645_v11 }
 0x22d   : > { %v2681_v10 = vrot.slane %v3310_v9, %v3963_v55  ;;  %3311 = vst.sshfl [vmem:[%s168_s15] sm:$0x5 pattern:$0x73625140] %v2666_v7 }
 0x22f   : > { %3312 = vst.sshfl [vmem:[%s168_s15 + $0x2] sm:$0x5 pattern:$0x73625140] %v2681_v10 }
 0x230 PF: > { %s13_s12 = sadd.s32 1, %s3765_s12  }
 0x231   : > { %p10_p4 = scmp.ge.s32.totalorder %s13_s12, 4  }
 0x233   :  { %12 = sbr.rel (!%p10_p4) target bundleno = 1 (0x1), region = 70 }

// kernel: resnet_forward.31
= control target key start
LH: loop header
LB: loop body
LE: loop exit
PB: predicated region body
PF: predicated region fallthrough
CT: control target
= control target key end

     0   :  { %s85_s0 = inlined_call_operand.vmem [shape: bf16[8,128], index: 0, kind: input, shape index: {}]   ;;  %s86_s1 = inlined_call_operand.hbm [shape: f32[8,128], index: 1, kind: output, shape index: {}]  }
   0x1   :  { %v9_v0 = vld [vmem:[%s85_s0] sm:$0xf] }
   0x2   :  { %6 = vsyncpa [#allocation3], 0  ;;  %v10_v1 = vunpack.c.l.bf16 %v9_v0  ;;  %s59_s8 = smov [#allocation2]  }
   0x3   :  { %s24_s9 = sshll.u32 %s59_s8, 4  ;;  %s25_s9 = int_to_ptr.vmem [resolvable:$true] %s24_s9 }
   0x4   :  { %v11_v2 = vmul.f32 %v10_v1, %v10_v1  ;;  %s35_s10 = scalar_lea.vmem %s25_s9, 128  ;;  %p40_p1 = scmp.lt.s32.totalorder %s25_s9, %s25_s9 }
   0x5   :  { %p36_p0 = scmp.ne.s32.totalorder %s25_s9, %s35_s10  ;;  %p41_p2 = scmp.lt.s32.totalorder %s35_s10, %s35_s10 }
   0x6   :  { %12 = vadd.xlane.f32.xlu0 %v11_v2 }
   0x7   :  { %p42_p3 = por %p41_p2, %p40_p1 }
   0x9   :  { %p43_p4 = pnand %p42_p3, %p36_p0 }
  0x93   :  { %v13_v3 = vpop.xlane.xlu0 %12 }
  0x94   :  { %v14_v4 = vmax.f32 %v13_v3, 1e-24 }
  0x96   :  { %33 = vrsqrt.f32 %v14_v4 }
  0xa0   :  { %v34_v5 = vpop.eup %33 }
  0xa1   :  { %v16_v6 = vmul.f32 %v34_v5, %v10_v1 }
  0xa3   :  { %17 = vst [vmem:[#allocation2] sm:$0xff] %v16_v6 }
  0xa4   :  { %46 = shalt.err (!%p43_p4)
}
  0xa5   :  { %s47_s12 = scalar_lea.hbm %s86_s1, 128 }
  0xa6   :  { %p48_p5 = scmp.ne.s32.totalorder %s86_s1, %s47_s12  ;;  %p51_p6 = scmp.lt.u32.totalorder %s47_s12, %s86_s1 }
  0xa8   :  { %p53_p7 = pnand %p51_p6, %p48_p5 }
  0xaa   :  { %56 = shalt.err (!%p53_p7)
}
  0xab   :  { %27 = dma.vmem_to_hbm [thread:$0]  %s25_s9, 128, %s86_s1, [#allocation3]  }
  0xac   :  { %57 = dma.done.wait [#allocation3], 128  }
  0xad   :  { %58 = vsyncadd [#allocation3], 4294967168 }
  0xae   :  { %31 = vsyncpa [#allocation3], 1 }

// kernel: resnet_forward.30
= control target key start
LH: loop header
LB: loop body
LE: loop exit
PB: predicated region body
PF: predicated region fallthrough
CT: control target
= control target key end

     0   :  { %s2894_s12 = smov 0   ;;  %s3451_s0 = inlined_call_operand.vmem [shape: bf16[2,4,4,256], index: 0, kind: input, shape index: {}]   ;;  %s3452_s1 = inlined_call_operand.vmem [shape: bf16[9,256,128], index: 1, kind: input, shape index: {}]   ;;  %s3453_s2 = inlined_call_operand.vmem [shape: f32[1,128], index: 2, kind: input, shape index: {}]   ;;  %s3454_s3 = inlined_call_operand.vmem [shape: bf16[2,2,2,128], index: 3, kind: output, shape index: {}]  }
   0x1 LB: > { %s2089_s13 = sadd.s32 4294967295, %s2870_s12   ;;  %p2093_p0 = scmp.ge.s32.totalorder %s2870_s12, 1  ;;  %s2870_s12 = sphi %s2894_s12, %s13_s12  }
   0x2   : > { %p137_p1 = scmp.lt.s32.totalorder %s2870_s12, 3 }
   0x4   : > { %p138_p2 = pnand %p2093_p0, %p137_p1 }
   0x5   : > { %v2720_v0 = vld [vmem:[%s3452_s1 + $0xc0] sm:$0xff] (!%p138_p2)   ;;  %v2724_v4 = vld [vmem:[%s3452_s1 + $0xc8] sm:$0xff] (!%p138_p2)   ;;  %v2728_v8 = vld [vmem:[%s3452_s1 + $0xd0] sm:$0xff] (!%p138_p2)   ;;  %p160_p3 = scmp.lt.s32.totalorder (!%p138_p2), %s2089_s13, 1  ;;  %vm224_vm0 = vsmask.f32 (!%p138_p2), 256  ;;  %v294_v36 = vlaneseq (!%p138_p2) }
   0x6   : > { %141 = sbr.rel (%p138_p2) target bundleno = 393 (0x189), region = 32  ;;  %v2721_v1 = vld [vmem:[%s3452_s1 + $0x40] sm:$0xff] (!%p138_p2)   ;;  %2512 = vmatprep.subr.bf16.mxu0 (!%p138_p2), %v2720_v0  ;;  %v2725_v5 = vld [vmem:[%s3452_s1 + $0x48] sm:$0xff] (!%p138_p2)   ;;  %v2729_v9 = vld [vmem:[%s3452_s1 + $0x50] sm:$0xff] (!%p138_p2)   ;;  %vm225_vm1 = vsmask.f32 (!%p138_p2), 1284 }
   0x7   : > { %v2722_v2 = vld [vmem:[%s3452_s1 + $0x80] sm:$0xff] (!%p138_p2)   ;;  %2534 = vmatprep.subr.bf16.mxu1 (!%p138_p2), %v2721_v1  ;;  %v2726_v6 = vld [vmem:[%s3452_s1 + $0x88] sm:$0xff] (!%p138_p2)   ;;  %v2730_v10 = vld [vmem:[%s3452_s1 + $0x90] sm:$0xff] (!%p138_p2)   ;;  %vm227_vm3 = vsmask.f32 (!%p138_p2), 2312  ;;  %v3023_v45 = vshrl.u32 (!%p138_p2), %v294_v36, 7 }
   0x8   : > { %v2723_v3 = vld [vmem:[%s3452_s1] sm:$0xff] (!%p138_p2)   ;;  %2513 = vmatpush3.bf16.msra.mxu0 (!%p138_p2), %v2722_v2  ;;  %v2727_v7 = vld [vmem:[%s3452_s1 + $0x8] sm:$0xff] (!%p138_p2)   ;;  %v2731_v11 = vld [vmem:[%s3452_s1 + $0x10] sm:$0xff] (!%p138_p2)   ;;  %vm229_vm5 = vsmask.f32 (!%p138_p2), 3340 }
   0x9   : > { %2535 = vmatpush3.bf16.msra.mxu1 (!%p138_p2), %v2723_v3  ;;  %2514 = vmatprep.subr.bf16.mxu0 (!%p138_p2), %v2724_v4  ;;  %v2732_v12 = vld [vmem:[%s3452_s1 + $0xd8] sm:$0xff] (!%p138_p2)   ;;  %v2736_v16 = vld [vmem:[%s3452_s1 + $0xe0] sm:$0xff] (!%p138_p2)   ;;  %v2740_v20 = vld [vmem:[%s3452_s1 + $0xe8] sm:$0xff] (!%p138_p2)   ;;  %vm231_vm6 = vsmask.f32 (!%p138_p2), 4368 }
   0xa   : > { %2536 = vmatprep.subr.bf16.mxu1 (!%p138_p2), %v2725_v5  ;;  %v2733_v13 = vld [vmem:[%s3452_s1 + $0x58] sm:$0xff] (!%p138_p2)   ;;  %v2737_v17 = vld [vmem:[%s3452_s1 + $0x60] sm:$0xff] (!%p138_p2)   ;;  %v2741_v21 = vld [vmem:[%s3452_s1 + $0x68] sm:$0xff] (!%p138_p2)   ;;  %vm233_vm7 = vsmask.f32 (!%p138_p2), 5396 }
   0xb   : > { %v2734_v14 = vld [vmem:[%s3452_s1 + $0x98] sm:$0xff] (!%p138_p2)   ;;  %v2738_v18 = vld [vmem:[%s3452_s1 + $0xa0] sm:$0xff] (!%p138_p2)   ;;  %v2742_v22 = vld [vmem:[%s3452_s1 + $0xa8] sm:$0xff] (!%p138_p2)   ;;  %vm235_vm9 = vsmask.f32 (!%p138_p2), 6424 }
   0xc   : > { %2515 = vmatpush3.bf16.msra.mxu0 (!%p138_p2), %v2726_v6  ;;  %v2735_v15 = vld [vmem:[%s3452_s1 + $0x18] sm:$0xff] (!%p138_p2)   ;;  %v2739_v19 = vld [vmem:[%s3452_s1 + $0x20] sm:$0xff] (!%p138_p2)   ;;  %v2743_v23 = vld [vmem:[%s3452_s1 + $0x28] sm:$0xff] (!%p138_p2)   ;;  %vm237_vm10 = vsmask.f32 (!%p138_p2), 7452 }
   0xd   : > { %2537 = vmatpush3.bf16.msra.mxu1 %v2727_v7  ;;  %2516 = vmatprep.subr.bf16.mxu0 %v2728_v8  ;;  %s3458_s13 = smov (!%p160_p3, %s2089_s13), 1  ;;  %v2744_v24 = vld [vmem:[%s3452_s1 + $0xf0] sm:$0xff]   ;;  %v2748_v28 = vld [vmem:[%s3452_s1 + $0xf8] sm:$0xff]   ;;  %vm226_vm2 = vmor %vm224_vm0, %vm225_vm1  ;;  %v2872_v43 = vmov 1966171168  }
   0xe   : > { %2538 = vmatprep.subr.bf16.mxu1 %v2729_v9  ;;  %v2745_v25 = vld [vmem:[%s3452_s1 + $0x70] sm:$0xff]   ;;  %s2511_s18 = sshll.u32 %s3458_s13, 4  ;;  %v2749_v29 = vld [vmem:[%s3452_s1 + $0x78] sm:$0xff]   ;;  %vm228_vm4 = vmor %vm226_vm2, %vm227_vm3  ;;  %v292_v44 = vunpack.c.l.s4 %v2872_v43  ;;  %s2096_s15 = sshll.u32 %s3458_s13, 1 }
   0xf   : > { %v2746_v26 = vld [vmem:[%s3452_s1 + $0xb0] sm:$0xff]   ;;  %s3002_s27 = scalar_lea.vmem %s3451_s0, %s2511_s18  ;;  %v2750_v30 = vld [vmem:[%s3452_s1 + $0xb8] sm:$0xff]   ;;  %vm230_vm8 = vmor %vm228_vm4, %vm229_vm5  ;;  %s168_s18 = scalar_lea.vmem %s3454_s3, %s2096_s15 }
  0x10   : > { %2517 = vmatpush3.bf16.msra.mxu0 %v2730_v10  ;;  %v2747_v27 = vld [vmem:[%s3452_s1 + $0x30] sm:$0xff]   ;;  %v2751_v31 = vld [vmem:[%s3452_s1 + $0x38] sm:$0xff]   ;;  %v2097_v32 = vld.sshfl [vmem:[%s3002_s27] sm:$0x33 pattern:$0x75316420]  ;;  %v293_v47 = vunpack.c.0.s8 %v292_v44 }
  0x11   : > { %2539 = vmatpush3.bf16.msra.mxu1 %v2731_v11  ;;  %2518 = vmatprep.subr.bf16.mxu0 %v2732_v12  ;;  %v3012_v33 = vld.sshfl [vmem:[%s3002_s27 + $0x4] sm:$0x33 pattern:$0x75316420]  ;;  %v222_v34 = vcombine.high %v2097_v32, %v2097_v32  ;;  %v240_v38 = vshrl.u32 %v2097_v32, 16  ;;  %vm232_vm11 = vmor %vm230_vm8, %vm231_vm6  ;;  %v2756_v6 = vld [vmem:[%s3452_s1 + $0x148] sm:$0xff]  }
  0x12   : > { %2540 = vmatprep.subr.bf16.mxu1 %v2733_v13  ;;  %v223_v35 = vcombine.high %v3012_v33, %v3012_v33  ;;  %v3017_v37 = vld.sshfl [vmem:[%s3002_s27 + $0x8] sm:$0x33 pattern:$0x75316420]  ;;  %v249_v40 = vshrl.u32 %v3012_v33, 16  ;;  %v2752_v42 = vld [vmem:[%s3452_s1 + $0x140] sm:$0xff]   ;;  %vm234_vm12 = vmor %vm232_vm11, %vm233_vm7  ;;  %v451_v48 = vcombine.low %v2097_v32, %v3012_v33  ;;  %v2197_v49 = vcombine.high %v2097_v32, %v3012_v33 }
  0x13   : > { %v245_v39 = vshll.u32 %v222_v34, 16  ;;  %vm236_vm13 = vmor %vm234_vm12, %vm235_vm9  ;;  %v848_v50 = vcombine.low %v3012_v33, %v3017_v37  ;;  %v2754_v53 = vld [vmem:[%s3452_s1 + $0x1c0] sm:$0xff]   ;;  %v3044_v55 = vsub.s32 %v293_v47, %v3023_v45  ;;  %v2758_v7 = vld [vmem:[%s3452_s1 + $0x1c8] sm:$0xff]  }
  0x14   : > { %2519 = vmatpush3.bf16.msra.mxu0 %v2734_v14  ;;  %v254_v41 = vshll.u32 %v223_v35, 16  ;;  %vm3025_vm14 = vmor %vm236_vm13, %vm237_vm10  ;;  %v2753_v62 = vld [vmem:[%s3452_s1 + $0x100] sm:$0xff]   ;;  %v2757_v8 = vld [vmem:[%s3452_s1 + $0x108] sm:$0xff]  }
  0x15   : > { %2541 = vmatpush3.bf16.msra.mxu1 %v2735_v15  ;;  %2520 = vmatprep.subr.bf16.mxu0 %v2736_v16  ;;  %v247_v51 = vsel %vm3025_vm14, %v240_v38, %v245_v39  ;;  %v458_v57 = vrot.slane %v451_v48, %v3044_v55  ;;  %v3049_v58 = vrot.slane %v2197_v49, %v3044_v55  ;;  %v2755_v1 = vld [vmem:[%s3452_s1 + $0x180] sm:$0xff]   ;;  %v2759_v11 = vld [vmem:[%s3452_s1 + $0x188] sm:$0xff]   ;;  %v2760_v12 = vld [vmem:[%s3452_s1 + $0x150] sm:$0xff]  }
  0x16   : > { %2542 = vmatprep.subr.bf16.mxu1 %v2737_v17  ;;  %v3037_v52 = vsel %vm3025_vm14, %v249_v40, %v254_v41  ;;  %v3052_v59 = vrot.slane %v848_v50, %v3044_v55  ;;  %v2762_v13 = vld [vmem:[%s3452_s1 + $0x1d0] sm:$0xff]   ;;  %v2764_v16 = vld [vmem:[%s3452_s1 + $0x158] sm:$0xff]   ;;  %v2344_v38 = vcombine.high %v3012_v33, %v3017_v37  ;;  %v2784_v47 = vld [vmem:[%s3452_s1 + $0x240] sm:$0xff]  }
  0x17   : > { %v290_v54 = vcombine.low %v247_v51, %v3037_v52  ;;  %v459_v61 = vcombine.high %v458_v57, %v458_v57  ;;  %v466_v0 = vrot.slane %v458_v57, %v3044_v55  ;;  %v653_v2 = vcombine.high %v3049_v58, %v3049_v58  ;;  %v2761_v14 = vld [vmem:[%s3452_s1 + $0x110] sm:$0xff]   ;;  %v2766_v17 = vld [vmem:[%s3452_s1 + $0x1d8] sm:$0xff]   ;;  %v2786_v48 = vld [vmem:[%s3452_s1 + $0x2c0] sm:$0xff]  }
  0x18   : > { %2521 = vmatpush3.bf16.msra.mxu0 %v2738_v18  ;;  %v856_v3 = vcombine.high %v3052_v59, %v3052_v59  ;;  %v2763_v15 = vld [vmem:[%s3452_s1 + $0x190] sm:$0xff]   ;;  %v2765_v18 = vld [vmem:[%s3452_s1 + $0x118] sm:$0xff]   ;;  %v3166_v43 = vrot.slane %v2344_v38, %v3044_v55  ;;  %v2785_v49 = vld [vmem:[%s3452_s1 + $0x200] sm:$0xff]  }
  0x19   : > { %2543 = vmatpush3.bf16.msra.mxu1 %v2739_v19  ;;  %2522 = vmatprep.subr.bf16.mxu0 %v2740_v20  ;;  %v297_v56 = vrot.slane %v290_v54, %v3044_v55  ;;  %v473_v5 = vrot.slane %v459_v61, %v3044_v55  ;;  %v667_v9 = vrot.slane %v653_v2, %v3044_v55  ;;  %v2767_v20 = vld [vmem:[%s3452_s1 + $0x198] sm:$0xff]   ;;  %v2776_v32 = vld [vmem:[%s3452_s1 + $0x170] sm:$0xff]   ;;  %v2787_v54 = vld [vmem:[%s3452_s1 + $0x280] sm:$0xff]  }
  0x1a   : > { %2544 = vmatprep.subr.bf16.mxu1 %v2741_v21  ;;  %v870_v10 = vrot.slane %v856_v3, %v3044_v55  ;;  %v1010_v19 = vcombine.high %v3017_v37, %v3017_v37  ;;  %v2768_v21 = vld [vmem:[%s3452_s1 + $0x160] sm:$0xff]   ;;  %v2778_v34 = vld [vmem:[%s3452_s1 + $0x1f0] sm:$0xff]   ;;  %v2780_v40 = vld [vmem:[%s3452_s1 + $0x178] sm:$0xff]   ;;  %v1256_v51 = vcombine.high %v3166_v43, %v3166_v43 }
  0x1b   : > { %v298_v60 = vcombine.high %v297_v56, %v297_v56  ;;  %v305_v63 = vrot.slane %v297_v56, %v3044_v55  ;;  %604 = vmatprep.mubr.bf16.mxu1 %v473_v5  ;;  %v2777_v36 = vld [vmem:[%s3452_s1 + $0x130] sm:$0xff]   ;;  %v2782_v41 = vld [vmem:[%s3452_s1 + $0x1f8] sm:$0xff]   ;;  %v2788_v56 = vld [vmem:[%s3452_s1 + $0x248] sm:$0xff]  }
  0x1c   : > { %2523 = vmatpush3.bf16.msra.mxu0 %v2742_v22  ;;  %v2770_v22 = vld [vmem:[%s3452_s1 + $0x1e0] sm:$0xff]   ;;  %v2779_v39 = vld [vmem:[%s3452_s1 + $0x1b0] sm:$0xff]   ;;  %v2781_v33 = vld [vmem:[%s3452_s1 + $0x138] sm:$0xff]  }
  0x1d   : > { %2545 = vmatpush3.bf16.msra.mxu1 %v2743_v23  ;;  %2524 = vmatprep.subr.bf16.mxu0 %v2744_v24  ;;  %v312_v4 = vrot.slane %v298_v60, %v3044_v55  ;;  %v1012_v23 = vshrl.u32 %v3017_v37, 16  ;;  %v2769_v24 = vld [vmem:[%s3452_s1 + $0x120] sm:$0xff]   ;;  %v2783_v44 = vld [vmem:[%s3452_s1 + $0x1b8] sm:$0xff]   ;;  %v2790_v57 = vld [vmem:[%s3452_s1 + $0x2c8] sm:$0xff]   ;;  %v1270_v60 = vrot.slane %v1256_v51, %v3044_v55 }
  0x1e   : > { %2546 = vmatprep.subr.bf16.mxu1 %v2745_v25  ;;  %v1017_v25 = vshll.u32 %v1010_v19, 16  ;;  %v2791_v61 = vld [vmem:[%s3452_s1 + $0x288] sm:$0xff]   ;;  %v2796_v2 = vld [vmem:[%s3452_s1 + $0x258] sm:$0xff]   ;;  %v2827_v38 = vld [vmem:[%s3452_s1 + $0x390] sm:$0xff]  }
  0x1f   : > { %443 = vmatprep.mubr.bf16.mxu0 %v312_v4  ;;  %v2798_v3 = vld [vmem:[%s3452_s1 + $0x2d8] sm:$0xff]   ;;  %v2839_v51 = vld [vmem:[%s3452_s1 + $0x3a8] sm:$0xff]  }
  0x20   : > { %2525 = vmatpush3.bf16.msra.mxu0 %v2746_v26  ;;  %v2771_v26 = vld [vmem:[%s3452_s1 + $0x1a0] sm:$0xff]   ;;  %v2797_v4 = vld [vmem:[%s3452_s1 + $0x218] sm:$0xff]  }
  0x21   : > { %2547 = vmatpush3.bf16.msra.mxu1 %v2747_v27  ;;  %2526 = vmatprep.subr.bf16.mxu0 %v2748_v28  ;;  %v2772_v27 = vld [vmem:[%s3452_s1 + $0x168] sm:$0xff]   ;;  %v2799_v5 = vld [vmem:[%s3452_s1 + $0x298] sm:$0xff]  }
  0x22   : > { %2548 = vmatprep.subr.bf16.mxu1 %v2749_v29  ;;  %v2774_v28 = vld [vmem:[%s3452_s1 + $0x1e8] sm:$0xff]   ;;  %v2814_v19 = vld [vmem:[%s3452_s1 + $0x2f8] sm:$0xff]  }
  0x23   : > { %v2773_v29 = vld [vmem:[%s3452_s1 + $0x128] sm:$0xff]  }
  0x24   : > { %2527 = vmatpush3.bf16.msra.mxu0 %v2750_v30  ;;  %v3132_v30 = vsel %vm3025_vm14, %v1012_v23, %v1017_v25  ;;  %v2818_v23 = vld [vmem:[%s3452_s1 + $0x3c0] sm:$0xff]  }
  0x25   : > { %2549 = vmatpush3.bf16.msra.mxu1 %v2751_v31  ;;  %2556 = vmatprep.subr.bf16.mxu0 %v2752_v42  ;;  %v2775_v31 = vld [vmem:[%s3452_s1 + $0x1a8] sm:$0xff]   ;;  %v1053_v35 = vcombine.low %v3037_v52, %v3132_v30  ;;  %v660_v52 = vrot.slane %v3049_v58, %v3044_v55 }
  0x26   : > { %2578 = vmatprep.subr.bf16.mxu1 %v2754_v53  ;;  %v863_v53 = vrot.slane %v3052_v59, %v3044_v55  ;;  %v2789_v58 = vld [vmem:[%s3452_s1 + $0x208] sm:$0xff]  }
  0x27   : > { %444 = vmatmul.mubr.bf16.vlgmr.msra.gmra.mrb[0].mxu0 %v305_v63  ;;  %v3163_v42 = vrot.slane %v1053_v35, %v3044_v55  ;;  %v2794_v63 = vld [vmem:[%s3452_s1 + $0x2d0] sm:$0xff]  }
  0x28   : > { %605 = vmatmul.mubr.bf16.vlgmr.msra.gmra.mrb[0].mxu1 %v466_v0  ;;  %2557 = vmatpush3.bf16.msra.mxu0 %v2753_v62  ;;  %v2792_v62 = vld [vmem:[%s3452_s1 + $0x250] sm:$0xff]  }
  0x29   : > { %2579 = vmatpush3.bf16.msra.mxu1 %v2755_v1  ;;  %2558 = vmatprep.subr.bf16.mxu0 %v2756_v6  ;;  %v1061_v50 = vcombine.high %v3163_v42, %v3163_v42  ;;  %v2793_v0 = vld [vmem:[%s3452_s1 + $0x210] sm:$0xff]   ;;  %v2800_v6 = vld [vmem:[%s3452_s1 + $0x260] sm:$0xff]   ;;  %v1068_v25 = vrot.slane %v3163_v42, %v3044_v55 }
  0x2a   : > { %2580 = vmatprep.subr.bf16.mxu1 %v2758_v7  ;;  %798 = vmatprep.mubr.bf16.mxu0 %v667_v9  ;;  %v2795_v1 = vld [vmem:[%s3452_s1 + $0x290] sm:$0xff]   ;;  %v2802_v7 = vld [vmem:[%s3452_s1 + $0x2e0] sm:$0xff]  }
  0x2b   : > { %1001 = vmatprep.mubr.bf16.mxu1 %v870_v10  ;;  %v1075_v59 = vrot.slane %v1061_v50, %v3044_v55  ;;  %v2803_v9 = vld [vmem:[%s3452_s1 + $0x2a0] sm:$0xff]   ;;  %v2804_v10 = vld [vmem:[%s3452_s1 + $0x268] sm:$0xff]   ;;  %v2826_v35 = vld [vmem:[%s3452_s1 + $0x3d0] sm:$0xff]  }
  0x2c   : > { %2559 = vmatpush3.bf16.msra.mxu0 %v2757_v8  ;;  %v2801_v8 = vld [vmem:[%s3452_s1 + $0x220] sm:$0xff]   ;;  %v2837_v50 = vld [vmem:[%s3452_s1 + $0x328] sm:$0xff]  }
  0x2d   : > { %2581 = vmatpush3.bf16.msra.mxu1 %v2759_v11  ;;  %2560 = vmatprep.subr.bf16.mxu0 %v2760_v12  ;;  %v2806_v11 = vld [vmem:[%s3452_s1 + $0x2e8] sm:$0xff]   ;;  %v2832_v42 = vld [vmem:[%s3452_s1 + $0x360] sm:$0xff]  }
  0x2e   : > { %2582 = vmatprep.subr.bf16.mxu1 %v2762_v13  ;;  %v2805_v12 = vld [vmem:[%s3452_s1 + $0x228] sm:$0xff]  }
  0x2f   : > { %v2807_v13 = vld [vmem:[%s3452_s1 + $0x2a8] sm:$0xff]  }
  0x30   : > { %2561 = vmatpush3.bf16.msra.mxu0 %v2761_v14  ;;  %v2808_v14 = vld [vmem:[%s3452_s1 + $0x270] sm:$0xff]  }
  0x31   : > { %2583 = vmatpush3.bf16.msra.mxu1 %v2763_v15  ;;  %2562 = vmatprep.subr.bf16.mxu0 %v2764_v16  ;;  %v2810_v15 = vld [vmem:[%s3452_s1 + $0x2f0] sm:$0xff]  }
  0x32   : > { %2584 = vmatprep.subr.bf16.mxu1 %v2766_v17  ;;  %v2809_v16 = vld [vmem:[%s3452_s1 + $0x230] sm:$0xff]  }
  0x33   : > { %v2811_v17 = vld [vmem:[%s3452_s1 + $0x2b0] sm:$0xff]  }
  0x34   : > { %2563 = vmatpush3.bf16.msra.mxu0 %v2765_v18  ;;  %v2812_v18 = vld [vmem:[%s3452_s1 + $0x278] sm:$0xff]  }
  0x35   : > { %2585 = vmatpush3.bf16.msra.mxu1 %v2767_v20  ;;  %2564 = vmatprep.subr.bf16.mxu0 %v2768_v21  ;;  %v2813_v20 = vld [vmem:[%s3452_s1 + $0x238] sm:$0xff]  }
  0x36   : > { %2586 = vmatprep.subr.bf16.mxu1 %v2770_v22  ;;  %v2815_v21 = vld [vmem:[%s3452_s1 + $0x2b8] sm:$0xff]   ;;  %v2816_v22 = vld [vmem:[%s3452_s1 + $0x340] sm:$0xff]  }
  0x38   : > { %2565 = vmatpush3.bf16.msra.mxu0 %v2769_v24  ;;  %v2817_v24 = vld [vmem:[%s3452_s1 + $0x300] sm:$0xff]  }
  0x39   : > { %2587 = vmatpush3.bf16.msra.mxu1 %v2771_v26  ;;  %2566 = vmatprep.subr.bf16.mxu0 %v2772_v27  ;;  %v1263_v26 = vrot.slane %v3166_v43, %v3044_v55  ;;  %v2819_v27 = vld [vmem:[%s3452_s1 + $0x380] sm:$0xff]  }
  0x3a   : > { %2588 = vmatprep.subr.bf16.mxu1 %v2774_v28  ;;  %v2820_v28 = vld [vmem:[%s3452_s1 + $0x348] sm:$0xff]   ;;  %v2834_v43 = vld [vmem:[%s3452_s1 + $0x3e0] sm:$0xff]  }
  0x3c   : > { %2567 = vmatpush3.bf16.msra.mxu0 %v2773_v29  ;;  %v2822_v29 = vld [vmem:[%s3452_s1 + $0x3c8] sm:$0xff]  }
  0x3d   : > { %2589 = vmatpush3.bf16.msra.mxu1 %v2775_v31  ;;  %2568 = vmatprep.subr.bf16.mxu0 %v2776_v32  ;;  %v2821_v31 = vld [vmem:[%s3452_s1 + $0x308] sm:$0xff]  }
  0x3e   : > { %2590 = vmatprep.subr.bf16.mxu1 %v2778_v34  ;;  %v2823_v32 = vld [vmem:[%s3452_s1 + $0x388] sm:$0xff]   ;;  %v2824_v34 = vld [vmem:[%s3452_s1 + $0x350] sm:$0xff]  }
  0x40   : > { %2569 = vmatpush3.bf16.msra.mxu0 %v2777_v36  ;;  %v2825_v36 = vld [vmem:[%s3452_s1 + $0x310] sm:$0xff]  }
  0x41   : > { %2591 = vmatpush3.bf16.msra.mxu1 %v2779_v39  ;;  %2570 = vmatprep.subr.bf16.mxu0 %v2780_v40  ;;  %v2828_v39 = vld [vmem:[%s3452_s1 + $0x358] sm:$0xff]  }
  0x42   : > { %2592 = vmatprep.subr.bf16.mxu1 %v2782_v41  ;;  %v2830_v40 = vld [vmem:[%s3452_s1 + $0x3d8] sm:$0xff]  }
  0x43   : > { %v2829_v41 = vld [vmem:[%s3452_s1 + $0x318] sm:$0xff]  }
  0x44   : > { %2571 = vmatpush3.bf16.msra.mxu0 %v2781_v33  ;;  %v2831_v33 = vld [vmem:[%s3452_s1 + $0x398] sm:$0xff]  }
  0x45   : > { %2593 = vmatpush3.bf16.msra.mxu1 %v2783_v44  ;;  %2600 = vmatprep.subr.bf16.mxu0 %v2784_v47  ;;  %v2833_v44 = vld [vmem:[%s3452_s1 + $0x320] sm:$0xff]  }
  0x46   : > { %2622 = vmatprep.subr.bf16.mxu1 %v2786_v48  ;;  %v2835_v47 = vld [vmem:[%s3452_s1 + $0x3a0] sm:$0xff]   ;;  %v2836_v48 = vld [vmem:[%s3452_s1 + $0x368] sm:$0xff]  }
  0x47   : > { %799 = vmatmul.mubr.bf16.vlgmr.msra.gmra.mrb[4].mxu0 %v660_v52  ;;  %v2840_v52 = vld [vmem:[%s3452_s1 + $0x370] sm:$0xff]  }
  0x48   : > { %1002 = vmatmul.mubr.bf16.vlgmr.msra.gmra.mrb[4].mxu1 %v863_v53  ;;  %2601 = vmatpush3.bf16.msra.mxu0 %v2785_v49  ;;  %v2838_v49 = vld [vmem:[%s3452_s1 + $0x3e8] sm:$0xff]   ;;  %v2842_v53 = vld [vmem:[%s3452_s1 + $0x3f0] sm:$0xff]  }
  0x49   : > { %2623 = vmatpush3.bf16.msra.mxu1 %v2787_v54  ;;  %2602 = vmatprep.subr.bf16.mxu0 %v2788_v56  ;;  %v2841_v54 = vld [vmem:[%s3452_s1 + $0x330] sm:$0xff]   ;;  %v2361_v56 = vld.sshfl [vmem:[%s3002_s27 + $0xc] sm:$0x33 pattern:$0x75316420] }
  0x4a   : > { %2624 = vmatprep.subr.bf16.mxu1 %v2790_v57  ;;  %1206 = vmatprep.mubr.bf16.mxu0 %v1075_v59  ;;  %v2843_v57 = vld [vmem:[%s3452_s1 + $0x3b0] sm:$0xff]   ;;  %v1613_v59 = vcombine.high %v2361_v56, %v2361_v56 }
  0x4b   : > { %1401 = vmatprep.mubr.bf16.mxu1 %v1270_v60  ;;  %v1615_v60 = vshrl.u32 %v2361_v56, 16 }
  0x4c   : > { %2603 = vmatpush3.bf16.msra.mxu0 %v2789_v58  ;;  %v1451_v58 = vcombine.low %v3017_v37, %v2361_v56 }
  0x4d   : > { %2625 = vmatpush3.bf16.msra.mxu1 %v2791_v61  ;;  %2604 = vmatprep.subr.bf16.mxu0 %v2792_v62  ;;  %v2491_v61 = vcombine.high %v3017_v37, %v2361_v56  ;;  %v2844_v62 = vld [vmem:[%s3452_s1 + $0x378] sm:$0xff]  }
  0x4e   : > { %2626 = vmatprep.subr.bf16.mxu1 %v2794_v63  ;;  %v2846_v63 = vld [vmem:[%s3452_s1 + $0x3f8] sm:$0xff]  }
  0x4f   : > { %v2845_v37 = vld [vmem:[%s3452_s1 + $0x338] sm:$0xff]  }
  0x50   : > { %2605 = vmatpush3.bf16.msra.mxu0 %v2793_v0  ;;  %v1458_v0 = vrot.slane %v1451_v58, %v3044_v55 }
  0x51   : > { %2627 = vmatpush3.bf16.msra.mxu1 %v2795_v1  ;;  %2606 = vmatprep.subr.bf16.mxu0 %v2796_v2  ;;  %v1620_v1 = vshll.u32 %v1613_v59, 16  ;;  %v1858_v2 = vrot.slane %v2491_v61, %v3044_v55 }
  0x52   : > { %2628 = vmatprep.subr.bf16.mxu1 %v2798_v3  ;;  %v1459_v3 = vcombine.high %v1458_v0, %v1458_v0 }
  0x53   : > { %v1859_v46 = vcombine.high %v1858_v2, %v1858_v2 }
  0x54   : > { %2607 = vmatpush3.bf16.msra.mxu0 %v2797_v4  ;;  %v1622_v4 = vsel %vm3025_vm14, %v1615_v60, %v1620_v1 }
  0x55   : > { %2629 = vmatpush3.bf16.msra.mxu1 %v2799_v5  ;;  %2608 = vmatprep.subr.bf16.mxu0 %v2800_v6  ;;  %v2847_v5 = vld [vmem:[%s3452_s1 + $0x3b8] sm:$0xff]   ;;  %v1656_v6 = vcombine.low %v3132_v30, %v1622_v4  ;;  %v2849_v30 = vld [vmem:[%s3452_s1 + $0x400] sm:$0xff]  }
  0x56   : > { %2630 = vmatprep.subr.bf16.mxu1 %v2802_v7  ;;  %v1473_v7 = vrot.slane %v1459_v3, %v3044_v55 }
  0x58   : > { %2609 = vmatpush3.bf16.msra.mxu0 %v2801_v8  ;;  %v2848_v8 = vld [vmem:[%s3452_s1 + $0x440] sm:$0xff]  }
  0x59   : > { %2631 = vmatpush3.bf16.msra.mxu1 %v2803_v9  ;;  %2610 = vmatprep.subr.bf16.mxu0 %v2804_v10  ;;  %v1663_v9 = vrot.slane %v1656_v6, %v3044_v55  ;;  %v1466_v10 = vrot.slane %v1458_v0, %v3044_v55 }
  0x5a   : > { %2632 = vmatprep.subr.bf16.mxu1 %v2806_v11 }
  0x5b   : > { %v1664_v11 = vcombine.high %v1663_v9, %v1663_v9 }
  0x5c   : > { %2611 = vmatpush3.bf16.msra.mxu0 %v2805_v12  ;;  %v1671_v12 = vrot.slane %v1663_v9, %v3044_v55 }
  0x5d   : > { %2633 = vmatpush3.bf16.msra.mxu1 %v2807_v13  ;;  %2612 = vmatprep.subr.bf16.mxu0 %v2808_v14  ;;  %v2850_v13 = vld [vmem:[%s3452_s1 + $0x448] sm:$0xff]   ;;  %v1678_v14 = vrot.slane %v1664_v11, %v3044_v55 }
  0x5e   : > { %2634 = vmatprep.subr.bf16.mxu1 %v2810_v15  ;;  %v1873_v15 = vrot.slane %v1859_v46, %v3044_v55 }
  0x60   : > { %2613 = vmatpush3.bf16.msra.mxu0 %v2809_v16  ;;  %v2851_v16 = vld [vmem:[%s3452_s1 + $0x408] sm:$0xff]  }
  0x61   : > { %2635 = vmatpush3.bf16.msra.mxu1 %v2811_v17  ;;  %2614 = vmatprep.subr.bf16.mxu0 %v2812_v18  ;;  %v2852_v17 = vld [vmem:[%s3452_s1 + $0x450] sm:$0xff]  }
  0x62   : > { %2636 = vmatprep.subr.bf16.mxu1 %v2814_v19  ;;  %v2853_v18 = vld [vmem:[%s3452_s1 + $0x410] sm:$0xff]   ;;  %v2854_v19 = vld [vmem:[%s3452_s1 + $0x458] sm:$0xff]  }
  0x64   : > { %2615 = vmatpush3.bf16.msra.mxu0 %v2813_v20  ;;  %v2855_v20 = vld [vmem:[%s3452_s1 + $0x418] sm:$0xff]  }
  0x65   : > { %2637 = vmatpush3.bf16.msra.mxu1 %v2815_v21  ;;  %2644 = vmatprep.subr.bf16.mxu0 %v2816_v22  ;;  %v2856_v21 = vld [vmem:[%s3452_s1 + $0x460] sm:$0xff]  }
  0x66   : > { %2666 = vmatprep.subr.bf16.mxu1 %v2818_v23  ;;  %v2857_v22 = vld [vmem:[%s3452_s1 + $0x420] sm:$0xff]   ;;  %v2858_v23 = vld [vmem:[%s3452_s1 + $0x468] sm:$0xff]  }
  0x67   : > { %1207 = vmatmul.mubr.bf16.vlgmr.msra.gmra.mrb[8].mxu0 %v1068_v25  ;;  %v2860_v25 = vld [vmem:[%s3452_s1 + $0x470] sm:$0xff]  }
  0x68   : > { %1402 = vmatmul.mubr.bf16.vlgmr.msra.gmra.mrb[8].mxu1 %v1263_v26  ;;  %2645 = vmatpush3.bf16.msra.mxu0 %v2817_v24  ;;  %v2859_v24 = vld [vmem:[%s3452_s1 + $0x428] sm:$0xff]   ;;  %v2861_v26 = vld [vmem:[%s3452_s1 + $0x430] sm:$0xff]  }
  0x69   : > { %2667 = vmatpush3.bf16.msra.mxu1 %v2819_v27  ;;  %2646 = vmatprep.subr.bf16.mxu0 %v2820_v28  ;;  %v2862_v27 = vld [vmem:[%s3452_s1 + $0x478] sm:$0xff]  }
  0x6a   : > { %2668 = vmatprep.subr.bf16.mxu1 %v2822_v29  ;;  %1604 = vmatprep.mubr.bf16.mxu0 %v1473_v7  ;;  %v2863_v28 = vld [vmem:[%s3452_s1 + $0x438] sm:$0xff]   ;;  %v1866_v29 = vrot.slane %v1858_v2, %v3044_v55 }
  0x6b   : > { %1809 = vmatprep.mubr.bf16.mxu1 %v1678_v14  ;;  %v2873_v14 = vmov 1983009808  }
  0x6c   : > { %2647 = vmatpush3.bf16.msra.mxu0 %v2821_v31 }
  0x6d   : > { %2669 = vmatpush3.bf16.msra.mxu1 %v2823_v32  ;;  %2648 = vmatprep.subr.bf16.mxu0 %v2824_v34 }
  0x6e   : > { %2670 = vmatprep.subr.bf16.mxu1 %v2826_v35 }
  0x70   : > { %2649 = vmatpush3.bf16.msra.mxu0 %v2825_v36 }
  0x71   : > { %2671 = vmatpush3.bf16.msra.mxu1 %v2827_v38  ;;  %2650 = vmatprep.subr.bf16.mxu0 %v2828_v39 }
  0x72   : > { %2672 = vmatprep.subr.bf16.mxu1 %v2830_v40 }
  0x74   : > { %2651 = vmatpush3.bf16.msra.mxu0 %v2829_v41 }
  0x75   : > { %2673 = vmatpush3.bf16.msra.mxu1 %v2831_v33  ;;  %2652 = vmatprep.subr.bf16.mxu0 %v2832_v42 }
  0x76   : > { %2674 = vmatprep.subr.bf16.mxu1 %v2834_v43 }
  0x78   : > { %2653 = vmatpush3.bf16.msra.mxu0 %v2833_v44 }
  0x79   : > { %2675 = vmatpush3.bf16.msra.mxu1 %v2835_v47  ;;  %2654 = vmatprep.subr.bf16.mxu0 %v2836_v48 }
  0x7a   : > { %2676 = vmatprep.subr.bf16.mxu1 %v2838_v49 }
  0x7c   : > { %2655 = vmatpush3.bf16.msra.mxu0 %v2837_v50 }
  0x7d   : > { %2677 = vmatpush3.bf16.msra.mxu1 %v2839_v51  ;;  %2656 = vmatprep.subr.bf16.mxu0 %v2840_v52 }
  0x7e   : > { %2678 = vmatprep.subr.bf16.mxu1 %v2842_v53 }
  0x80   : > { %2657 = vmatpush3.bf16.msra.mxu0 %v2841_v54 }
  0x81   : > { %2679 = vmatpush3.bf16.msra.mxu1 %v2843_v57  ;;  %2658 = vmatprep.subr.bf16.mxu0 %v2844_v62 }
  0x82   : > { %2680 = vmatprep.subr.bf16.mxu1 %v2846_v63 }
  0x84   : > { %2659 = vmatpush3.bf16.msra.mxu0 %v2845_v37 }
  0x85   : > { %2681 = vmatpush3.bf16.msra.mxu1 %v2847_v5  ;;  %2688 = vmatprep.subr.bf16.mxu0 %v2848_v8 }
  0x87   : > { %1605 = vmatmul.mubr.bf16.vlgmr.msra.gmra.mrb[12].mxu0 %v1466_v10 }
  0x88   : > { %2689 = vmatpush3.bf16.msra.mxu0 %v2849_v30  ;;  %1810 = vmatmul.mubr.bf16.vlgmr.msra.gmra.mrb[12].mxu1 %v1671_v12 }
  0x89   : > { %2690 = vmatprep.subr.bf16.mxu0 %v2850_v13  ;;  %2004 = vmatprep.mubr.bf16.mxu0 %v1873_v15  ;;  %v2023_v15 = vunpack.c.l.s4 %v2873_v14 }
  0x8c   : > { %2691 = vmatpush3.bf16.msra.mxu0 %v2851_v16 }
  0x8d   : > { %2692 = vmatprep.subr.bf16.mxu0 %v2852_v17  ;;  %v2024_v17 = vunpack.c.0.s8 %v2023_v15 }
  0x90   : > { %2693 = vmatpush3.bf16.msra.mxu0 %v2853_v18 }
  0x91   : > { %2694 = vmatprep.subr.bf16.mxu0 %v2854_v19 }
  0x94   : > { %2695 = vmatpush3.bf16.msra.mxu0 %v2855_v20 }
  0x95   : > { %2696 = vmatprep.subr.bf16.mxu0 %v2856_v21  ;;  %v2508_v21 = vld [vmem:[%s3453_s2] ss:$0 sm:$0xff] }
  0x98   : > { %2697 = vmatpush3.bf16.msra.mxu0 %v2857_v22 }
  0x99   : > { %2698 = vmatprep.subr.bf16.mxu0 %v2858_v23 }
  0x9c   : > { %2699 = vmatpush3.bf16.msra.mxu0 %v2859_v24  ;;  %v2027_v24 = vsub.s32 %v2024_v17, %v3023_v45 }
  0x9d   : > { %2700 = vmatprep.subr.bf16.mxu0 %v2860_v25 }
  0xa0   : > { %2701 = vmatpush3.bf16.msra.mxu0 %v2861_v26 }
  0xa1   : > { %2702 = vmatprep.subr.bf16.mxu0 %v2862_v27 }
  0xa4   : > { %2703 = vmatpush3.bf16.msra.mxu0 %v2863_v28 }
  0xa7   : > { %2005 = vmatmul.mubr.bf16.vlgmr.msra.gmra.mrb[16].mxu0 %v1866_v29 }
  0xfa   : > { %v2528_v31 = vpop.f32.mrb[0].mxu0 }
  0xfb   : > { %v2550_v32 = vpop.f32.mrb[0].mxu1  ;;  %v2529_v34 = vpop.f32.mrb[1].mxu0 }
  0xfc   : > { %v2551_v35 = vpop.f32.mrb[1].mxu1  ;;  %v2530_v36 = vadd.f32 %v2529_v34, %v2528_v31  ;;  %v2531_v39 = vpop.f32.mrb[2].mxu0 }
  0xfd   : > { %v2552_v38 = vadd.f32 %v2551_v35, %v2550_v32  ;;  %v2553_v40 = vpop.f32.mrb[2].mxu1  ;;  %v2532_v41 = vpop.f32.mrb[3].mxu0 }
  0xfe   : > { %v2554_v33 = vpop.f32.mrb[3].mxu1 }
  0xff   : > { %v607_v42 = vadd.f32 %v2552_v38, %v2530_v36 }
 0x11a   : > { %v2572_v43 = vpop.f32.mrb[4].mxu0 }
 0x11b   : > { %v2594_v44 = vpop.f32.mrb[4].mxu1  ;;  %v2573_v47 = vpop.f32.mrb[5].mxu0 }
 0x11c   : > { %v2595_v48 = vpop.f32.mrb[5].mxu1  ;;  %v2574_v49 = vadd.f32 %v2573_v47, %v2572_v43  ;;  %v2575_v50 = vpop.f32.mrb[6].mxu0 }
 0x11d   : > { %v2596_v55 = vadd.f32 %v2595_v48, %v2594_v44  ;;  %v2597_v51 = vpop.f32.mrb[6].mxu1  ;;  %v2576_v52 = vpop.f32.mrb[7].mxu0 }
 0x11e   : > { %v2598_v53 = vpop.f32.mrb[7].mxu1  ;;  %v806_v54 = vadd.f32 %v2574_v49, %v607_v42 }
 0x120   : > { %v1009_v56 = vadd.f32 %v2596_v55, %v806_v54 }
 0x13a   : > { %v2616_v57 = vpop.f32.mrb[8].mxu0 }
 0x13b   : > { %v2638_v58 = vpop.f32.mrb[8].mxu1  ;;  %v2617_v59 = vpop.f32.mrb[9].mxu0 }
 0x13c   : > { %v2639_v60 = vpop.f32.mrb[9].mxu1  ;;  %v2618_v61 = vadd.f32 %v2617_v59, %v2616_v57  ;;  %v2619_v62 = vpop.f32.mrb[10].mxu0 }
 0x13d   : > { %v2640_v63 = vadd.f32 %v2639_v60, %v2638_v58  ;;  %v2641_v0 = vpop.f32.mrb[10].mxu1  ;;  %v2620_v1 = vpop.f32.mrb[11].mxu0 }
 0x13e   : > { %v2642_v2 = vpop.f32.mrb[11].mxu1  ;;  %v1214_v37 = vadd.f32 %v2618_v61, %v1009_v56 }
 0x140   : > { %v1409_v3 = vadd.f32 %v2640_v63, %v1214_v37 }
 0x15a   : > { %v2660_v4 = vpop.f32.mrb[12].mxu0 }
 0x15b   : > { %v2661_v5 = vpop.f32.mrb[13].mxu0  ;;  %v2682_v8 = vpop.f32.mrb[12].mxu1 }
 0x15c   : > { %v2662_v6 = vadd.f32 %v2661_v5, %v2660_v4  ;;  %v2663_v7 = vpop.f32.mrb[14].mxu0  ;;  %v2683_v46 = vpop.f32.mrb[13].mxu1 }
 0x15d   : > { %v2664_v9 = vpop.f32.mrb[15].mxu0  ;;  %v2684_v11 = vadd.f32 %v2683_v46, %v2682_v8  ;;  %v2685_v30 = vpop.f32.mrb[14].mxu1 }
 0x15e   : > { %v1612_v10 = vadd.f32 %v2662_v6, %v1409_v3  ;;  %v2686_v12 = vpop.f32.mrb[15].mxu1 }
 0x160   : > { %v1817_v13 = vadd.f32 %v2684_v11, %v1612_v10 }
 0x17a   : > { %v2704_v16 = vpop.f32.mrb[16].mxu0 }
 0x17b   : > { %v2705_v18 = vpop.f32.mrb[17].mxu0 }
 0x17c   : > { %v2706_v19 = vadd.f32 %v2705_v18, %v2704_v16  ;;  %v2707_v20 = vpop.f32.mrb[18].mxu0 }
 0x17d   : > { %v2708_v22 = vpop.f32.mrb[19].mxu0 }
 0x17e   : > { %v2012_v23 = vadd.f32 %v2706_v19, %v1817_v13 }
 0x180   : > { %v2020_v25 = vadd.f32 %v2508_v21, %v2012_v23 }
 0x182   : > { %v2028_v26 = vrot.slane %v2020_v25, %v2027_v24 }
 0x184   : > { %v2029_v27 = vcombine.high %v2028_v26, %v2028_v26  ;;  %v2032_v28 = vpack.c.bf16 %v2028_v26, %v2028_v26 }
 0x186   : > { %v2033_v29 = vpack.c.bf16 %v2029_v27, %v2029_v27  ;;  %2034 = vst [vmem:[%s168_s18] sm:$0x1] %v2032_v28 }
 0x188   : > { %2035 = vst [vmem:[%s168_s18 + $0x1] sm:$0x1] %v2033_v29 }
 0x189 PF: > { %s13_s12 = sadd.s32 1, %s2870_s12  }
 0x18a   : > { %p10_p4 = scmp.ge.s32.totalorder %s13_s12, 4  }
 0x18c   :  { %12 = sbr.rel (!%p10_p4) target bundleno = 1 (0x1), region = 70 }

</bundles_post_ra>
